<compile_context>
chip_gen: v7x
topology: tpu7x:2x2x1
jax: 0.10.0
libtpu: 0.0.40
codegen_flags: <defaults>
</compile_context>

<pallas_src>
import jax
import jax.numpy as jnp
from jax import lax
from jax.experimental import pallas as pl
from jax.experimental.pallas import tpu as pltpu

KSIZE = 5
PAD = 2                          # 'same' padding for 5x5, stride 1
NTAPS = KSIZE * KSIZE            # 25
CMID = 64                        # hidden width; also padded Cin/Cout of layers 1/11
NLAYERS = 8                      # conv1..conv7 + conv11
KP = NTAPS * CMID + CMID         # 1664 = 13*128: 25 taps * 64 ch + 64 pad (bias row)
BIAS_ROW = NTAPS * CMID          # 1600: im2col row that is all ones (bias lane)


def _make_kernel(H, W):
    Wp = W + 2 * PAD                       # x-padded row stride
    Hp = H + 2 * PAD
    WIDE = H * Wp                          # wide spatial extent (incl. invalid x cols)
    IN_LANES = Hp * Wp                     # fully padded input image, flattened
    ACT_LANES = IN_LANES + 2 * PAD         # + guard lanes read by bottom-right taps
    ACT_OFF = PAD * Wp + PAD               # flat offset of pixel (0,0) in the canvas

    def kernel(x_ref, w_ref, mask_ref, out_ref, actp_ref, col_ref):
        # ---- per-grid-step (per batch element) targeted init ----
        # im2col rows [0, 1600) are always fully overwritten before use and are
        # never zeroed; only the canvas and the bias/pad rows are initialised.
        actp_ref[...] = jnp.zeros((CMID, ACT_LANES), jnp.float32)
        actp_ref[0:8, 0:IN_LANES] = x_ref[0]          # 4 input ch (+4 zero), with halo
        row = lax.broadcasted_iota(jnp.int32, (KP - BIAS_ROW, WIDE), 0)
        col_ref[BIAS_ROW:, :] = (row == 0).astype(jnp.float32)   # ones (bias) + zeros

        mask = mask_ref[...]                          # (1, WIDE): 1.0 where x < W

        def layer(l, carry):
            # im2col^T: 25 CONTIGUOUS lane slices of the canvas -> 64-row bands.
            for t in range(NTAPS):
                dy, dx = divmod(t, KSIZE)
                s = dy * Wp + dx
                col_ref[t * CMID:(t + 1) * CMID, :] = actp_ref[:, s:s + WIDE]
            # One MXU matmul per layer; spatial (WIDE) on the output/lane side,
            # bias folded in through the ones row.
            pre = jnp.dot(w_ref[l], col_ref[...],
                          preferred_element_type=jnp.float32)     # (64, WIDE)
            out_ref[l, 0, :, :] = pre                             # pre-activation tap-out

            @pl.when(l < NLAYERS - 1)
            def _():
                # ReLU, zero the invalid x columns, write back into the canvas
                # interior (keeps the zero halo intact for the next layer).
                actp_ref[:, ACT_OFF:ACT_OFF + WIDE] = jnp.maximum(pre, 0.0) * mask

            return carry

        lax.fori_loop(0, NLAYERS, layer, 0)

    return kernel, WIDE, IN_LANES, ACT_LANES


def _pack_layer(weight, bias):
    """(Cout,Cin,5,5)+(Cout,) torch layout -> (64, 1664).

    Row = padded Cout, column k = (dy*5+dx)*64 + cin, bias in column 1600,
    columns 1601..1663 zero (matching the ones/zero rows of the im2col scratch).
    """
    cout, cin = weight.shape[0], weight.shape[1]
    w = jnp.transpose(weight, (0, 2, 3, 1))                       # (cout, 5, 5, cin)
    w = jnp.pad(w, ((0, CMID - cout), (0, 0), (0, 0), (0, CMID - cin)))
    w = w.reshape(CMID, NTAPS * CMID)
    b = jnp.pad(bias, (0, CMID - cout)).reshape(CMID, 1)
    tail = jnp.concatenate([b, jnp.zeros((CMID, KP - BIAS_ROW - 1), w.dtype)], axis=1)
    return jnp.concatenate([w, tail], axis=1).astype(jnp.float32)  # (64, 1664)


@jax.jit
def conv_neural_net_forward(params, x_nchw):
    """Forward pass matching ConvNeuralNet.forward.

    x_nchw: (N, 4, H, W) float32.
    Returns (output (N, 2, H, W), mid_output dict of NCHW activations).
    """
    N, Cin, H, W = x_nchw.shape
    assert Cin <= 8
    Wp = W + 2 * PAD
    kernel, WIDE, IN_LANES, ACT_LANES = _make_kernel(H, W)

    # ---- pack all 8 layers' weights+bias: (8, 64, 1664) ----
    names = [f"conv_layer{i}" for i in list(range(1, 8)) + [11]]
    w_all = jnp.stack([_pack_layer(params[n]["weight"], params[n]["bias"])
                       for n in names])

    # ---- input: zero 'same' halo, channels padded Cin->8, flattened with
    #      row stride Wp (the kernel drops it straight into the canvas) ----
    xp = jnp.pad(x_nchw.astype(jnp.float32),
                 ((0, 0), (0, 8 - Cin), (PAD, PAD), (PAD, PAD)))
    x_wide = xp.reshape(N, 8, IN_LANES)

    # valid-column mask over the wide spatial index p = y*Wp + x  (1.0 where x < W)
    mask = (jnp.arange(WIDE) % Wp < W).astype(jnp.float32).reshape(1, WIDE)

    out_wide = pl.pallas_call(
        kernel,
        out_shape=jax.ShapeDtypeStruct((NLAYERS, N, CMID, WIDE), jnp.float32),
        grid_spec=pltpu.PrefetchScalarGridSpec(
            num_scalar_prefetch=0,
            grid=(N,),
            in_specs=[
                pl.BlockSpec((1, 8, IN_LANES), lambda n: (n, 0, 0)),
                pl.BlockSpec((NLAYERS, CMID, KP), lambda n: (0, 0, 0)),
                pl.BlockSpec((1, WIDE), lambda n: (0, 0)),
            ],
            out_specs=pl.BlockSpec((NLAYERS, 1, CMID, WIDE),
                                   lambda n: (0, n, 0, 0)),
            scratch_shapes=[
                pltpu.VMEM((CMID, ACT_LANES), jnp.float32),   # padded activation canvas
                pltpu.VMEM((KP, WIDE), jnp.float32),          # im2col^T block
            ]),
        compiler_params=pltpu.CompilerParams(
            dimension_semantics=("parallel",),
            vmem_limit_bytes=32 * 1024 * 1024),
    )(x_wide, w_all, mask)

    # ---- unpack: drop invalid x columns; already in NCHW (no transpose) ----
    grid_out = out_wide.reshape(NLAYERS, N, CMID, H, Wp)[:, :, :, :, :W]
    mid = {}
    for i in range(7):
        before = grid_out[i]                                  # (N, 64, H, W)
        mid[f"out{i + 1}_before"] = before
        mid[f"out{i + 1}_after"] = jnp.maximum(before, 0.0)   # recomputed (halves writeback)
    output = grid_out[7, :, :2]                               # (N, 2, H, W)
    return output, mid


def init_params(key):
    """Deterministic synthetic parameters with the module's shapes."""
    layer_defs = {
        "conv_layer1": (4, 64),
        "conv_layer2": (64, 64),
        "conv_layer3": (64, 64),
        "conv_layer4": (64, 64),
        "conv_layer5": (64, 64),
        "conv_layer6": (64, 64),
        "conv_layer7": (64, 64),
        "conv_layer11": (64, 2),
    }
    params = {}
    for name, (cin, cout) in layer_defs.items():
        key, kw, kb = jax.random.split(key, 3)
        fan_in = cin * KSIZE * KSIZE
        bound = 1.0 / jnp.sqrt(fan_in)
        params[name] = {
            "weight": jax.random.uniform(
                kw, (cout, cin, KSIZE, KSIZE), jnp.float32, -bound, bound),
            "bias": jax.random.uniform(
                kb, (cout,), jnp.float32, -bound, bound),
        }
    return params


def _reference_forward(params, x_nchw):
    """Pure-JAX (XLA conv) reference for correctness checking."""
    h = x_nchw
    mids = {}
    for i in list(range(1, 8)) + [11]:
        name = f"conv_layer{i}"
        w = params[name]["weight"]
        b = params[name]["bias"]
        h = lax.conv_general_dilated(
            h, w, window_strides=(1, 1), padding="SAME",
            dimension_numbers=("NCHW", "OIHW", "NCHW")) + b[None, :, None, None]
        if i != 11:
            mids[f"out{i}_before"] = h
            h = jnp.maximum(h, 0.0)
            mids[f"out{i}_after"] = h
    return h, mids


if __name__ == "__main__":
    key = jax.random.PRNGKey(0)
    kp, kx = jax.random.split(key)

    params = init_params(kp)

    # Small input consistent with the module: batch=2, 4 channels, 16x16 spatial.
    x = jax.random.normal(kx, (2, 4, 16, 16), jnp.float32)

    output, mid = conv_neural_net_forward(params, x)
    output = jax.block_until_ready(output)

    assert output.shape == (2, 2, 16, 16), output.shape
    assert len(mid) == 14, sorted(mid.keys())
    assert mid["out7_after"].shape == (2, 64, 16, 16)

    ref_out, ref_mid = _reference_forward(params, x)
    err = float(jnp.max(jnp.abs(output - ref_out)))
    for k in ("out1_before", "out4_after", "out7_before"):
        err = max(err, float(jnp.max(jnp.abs(mid[k] - ref_mid[k]))))
    if err > 2e-3:
        raise AssertionError(f"mismatch vs XLA reference conv: max abs err {err}")

    print("KERNEL_OK")
</pallas_src>

<mosaic_0001>
module attributes {stable_mosaic.version = 11 : i64} {
  func.func @kernel(%arg0: i32, %arg1: memref<1x8x400xf32, #tpu.memory_space<vmem>>, %arg2: memref<8x64x1664xf32, #tpu.memory_space<vmem>>, %arg3: memref<1x320xf32, #tpu.memory_space<vmem>>, %arg4: memref<8x1x64x320xf32, #tpu.memory_space<vmem>>, %arg5: memref<64x404xf32, #tpu.memory_space<vmem>>, %arg6: memref<1664x320xf32, #tpu.memory_space<vmem>>) attributes {dimension_semantics = [#tpu.dimension_semantics<parallel>], iteration_bounds = array<i64: 2>, scalar_prefetch = 0 : i64, scratch_operands = 2 : i64, tpu.core_type = #tpu.core_type<tc>, window_params = [{transform_indices = @transform_0, window_bounds = array<i64: 1, 8, 400>}, {pipeline_mode = #tpu.pipeline_mode<synchronous>, transform_indices = @transform_1, window_bounds = array<i64: 8, 64, 1664>}, {pipeline_mode = #tpu.pipeline_mode<synchronous>, transform_indices = @transform_2, window_bounds = array<i64: 1, 320>}, {transform_indices = @transform_3, window_bounds = array<i64: 8, 1, 64, 320>}]} {
    %cst = arith.constant 0.000000e+00 : f32
    %0 = vector.broadcast %cst : f32 to vector<64x404xf32>
    %c0 = arith.constant 0 : index
    %c0_0 = arith.constant 0 : index
    %1 = vector.load %arg5[%c0, %c0_0] : memref<64x404xf32, #tpu.memory_space<vmem>>, vector<64x404xf32>
    tpu.vector_store %arg5[%c0, %c0_0], %0 {strides = array<i32>} : memref<64x404xf32, #tpu.memory_space<vmem>>, vector<64x404xf32>,
    %c0_1 = arith.constant 0 : index
    %c0_2 = arith.constant 0 : index
    %c0_3 = arith.constant 0 : index
    %2 = vector.load %arg1[%c0_1, %c0_2, %c0_3] : memref<1x8x400xf32, #tpu.memory_space<vmem>>, vector<1x8x400xf32>
    %3 = vector.shape_cast %2 : vector<1x8x400xf32> to vector<8x400xf32>
    %c0_4 = arith.constant 0 : index
    %c0_5 = arith.constant 0 : index
    %4 = vector.load %arg5[%c0_4, %c0_5] : memref<64x404xf32, #tpu.memory_space<vmem>>, vector<8x400xf32>
    tpu.vector_store %arg5[%c0_4, %c0_5], %3 {strides = array<i32>} : memref<64x404xf32, #tpu.memory_space<vmem>>, vector<8x400xf32>,
    %5 = tpu.iota {dimensions = array<i32: 0>} : vector<64x320xi32>
    %c0_i32 = arith.constant 0 : i32
    %6 = vector.broadcast %c0_i32 : i32 to vector<64x320xi32>
    %7 = arith.cmpi eq, %5, %6 : vector<64x320xi32>
    %8 = arith.extui %7 : vector<64x320xi1> to vector<64x320xi32>
    %9 = arith.sitofp %8 : vector<64x320xi32> to vector<64x320xf32>
    %c1600 = arith.constant 1600 : index
    %c0_6 = arith.constant 0 : index
    %10 = vector.load %arg6[%c1600, %c0_6] : memref<1664x320xf32, #tpu.memory_space<vmem>>, vector<64x320xf32>
    tpu.vector_store %arg6[%c1600, %c0_6], %9 {strides = array<i32>} : memref<1664x320xf32, #tpu.memory_space<vmem>>, vector<64x320xf32>,
    %c0_7 = arith.constant 0 : index
    %c0_8 = arith.constant 0 : index
    %11 = vector.load %arg3[%c0_7, %c0_8] : memref<1x320xf32, #tpu.memory_space<vmem>>, vector<1x320xf32>
    %c0_i32_9 = arith.constant 0 : i32
    %c8_i32 = arith.constant 8 : i32
    %12 = arith.addi %c0_i32_9, %c8_i32 : i32
    %c1_i32 = arith.constant 1 : i32
    scf.for %arg7 = %c0_i32_9 to %12 step %c1_i32  : i32 {
      %c0_11 = arith.constant 0 : index
      %c0_12 = arith.constant 0 : index
      %13 = vector.load %arg5[%c0_11, %c0_12] : memref<64x404xf32, #tpu.memory_space<vmem>>, vector<64x320xf32>
      %c0_13 = arith.constant 0 : index
      %c0_14 = arith.constant 0 : index
      %14 = vector.load %arg6[%c0_13, %c0_14] : memref<1664x320xf32, #tpu.memory_space<vmem>>, vector<64x320xf32>
      tpu.vector_store %arg6[%c0_13, %c0_14], %13 {strides = array<i32>} : memref<1664x320xf32, #tpu.memory_space<vmem>>, vector<64x320xf32>,
      %c0_15 = arith.constant 0 : index
      %c1 = arith.constant 1 : index
      %15 = vector.load %arg5[%c0_15, %c1] : memref<64x404xf32, #tpu.memory_space<vmem>>, vector<64x320xf32>
      %c64 = arith.constant 64 : index
      %c0_16 = arith.constant 0 : index
      %16 = vector.load %arg6[%c64, %c0_16] : memref<1664x320xf32, #tpu.memory_space<vmem>>, vector<64x320xf32>
      tpu.vector_store %arg6[%c64, %c0_16], %15 {strides = array<i32>} : memref<1664x320xf32, #tpu.memory_space<vmem>>, vector<64x320xf32>,
      %c0_17 = arith.constant 0 : index
      %c2 = arith.constant 2 : index
      %17 = vector.load %arg5[%c0_17, %c2] : memref<64x404xf32, #tpu.memory_space<vmem>>, vector<64x320xf32>
      %c128 = arith.constant 128 : index
      %c0_18 = arith.constant 0 : index
      %18 = vector.load %arg6[%c128, %c0_18] : memref<1664x320xf32, #tpu.memory_space<vmem>>, vector<64x320xf32>
      tpu.vector_store %arg6[%c128, %c0_18], %17 {strides = array<i32>} : memref<1664x320xf32, #tpu.memory_space<vmem>>, vector<64x320xf32>,
      %c0_19 = arith.constant 0 : index
      %c3 = arith.constant 3 : index
      %19 = vector.load %arg5[%c0_19, %c3] : memref<64x404xf32, #tpu.memory_space<vmem>>, vector<64x320xf32>
      %c192 = arith.constant 192 : index
      %c0_20 = arith.constant 0 : index
      %20 = vector.load %arg6[%c192, %c0_20] : memref<1664x320xf32, #tpu.memory_space<vmem>>, vector<64x320xf32>
      tpu.vector_store %arg6[%c192, %c0_20], %19 {strides = array<i32>} : memref<1664x320xf32, #tpu.memory_space<vmem>>, vector<64x320xf32>,
      %c0_21 = arith.constant 0 : index
      %c4 = arith.constant 4 : index
      %21 = vector.load %arg5[%c0_21, %c4] : memref<64x404xf32, #tpu.memory_space<vmem>>, vector<64x320xf32>
      %c256 = arith.constant 256 : index
      %c0_22 = arith.constant 0 : index
      %22 = vector.load %arg6[%c256, %c0_22] : memref<1664x320xf32, #tpu.memory_space<vmem>>, vector<64x320xf32>
      tpu.vector_store %arg6[%c256, %c0_22], %21 {strides = array<i32>} : memref<1664x320xf32, #tpu.memory_space<vmem>>, vector<64x320xf32>,
      %c0_23 = arith.constant 0 : index
      %c20 = arith.constant 20 : index
      %23 = vector.load %arg5[%c0_23, %c20] : memref<64x404xf32, #tpu.memory_space<vmem>>, vector<64x320xf32>
      %c320 = arith.constant 320 : index
      %c0_24 = arith.constant 0 : index
      %24 = vector.load %arg6[%c320, %c0_24] : memref<1664x320xf32, #tpu.memory_space<vmem>>, vector<64x320xf32>
      tpu.vector_store %arg6[%c320, %c0_24], %23 {strides = array<i32>} : memref<1664x320xf32, #tpu.memory_space<vmem>>, vector<64x320xf32>,
      %c0_25 = arith.constant 0 : index
      %c21 = arith.constant 21 : index
      %25 = vector.load %arg5[%c0_25, %c21] : memref<64x404xf32, #tpu.memory_space<vmem>>, vector<64x320xf32>
      %c384 = arith.constant 384 : index
      %c0_26 = arith.constant 0 : index
      %26 = vector.load %arg6[%c384, %c0_26] : memref<1664x320xf32, #tpu.memory_space<vmem>>, vector<64x320xf32>
      tpu.vector_store %arg6[%c384, %c0_26], %25 {strides = array<i32>} : memref<1664x320xf32, #tpu.memory_space<vmem>>, vector<64x320xf32>,
      %c0_27 = arith.constant 0 : index
      %c22 = arith.constant 22 : index
      %27 = vector.load %arg5[%c0_27, %c22] : memref<64x404xf32, #tpu.memory_space<vmem>>, vector<64x320xf32>
      %c448 = arith.constant 448 : index
      %c0_28 = arith.constant 0 : index
      %28 = vector.load %arg6[%c448, %c0_28] : memref<1664x320xf32, #tpu.memory_space<vmem>>, vector<64x320xf32>
      tpu.vector_store %arg6[%c448, %c0_28], %27 {strides = array<i32>} : memref<1664x320xf32, #tpu.memory_space<vmem>>, vector<64x320xf32>,
      %c0_29 = arith.constant 0 : index
      %c23 = arith.constant 23 : index
      %29 = vector.load %arg5[%c0_29, %c23] : memref<64x404xf32, #tpu.memory_space<vmem>>, vector<64x320xf32>
      %c512 = arith.constant 512 : index
      %c0_30 = arith.constant 0 : index
      %30 = vector.load %arg6[%c512, %c0_30] : memref<1664x320xf32, #tpu.memory_space<vmem>>, vector<64x320xf32>
      tpu.vector_store %arg6[%c512, %c0_30], %29 {strides = array<i32>} : memref<1664x320xf32, #tpu.memory_space<vmem>>, vector<64x320xf32>,
      %c0_31 = arith.constant 0 : index
      %c24 = arith.constant 24 : index
      %31 = vector.load %arg5[%c0_31, %c24] : memref<64x404xf32, #tpu.memory_space<vmem>>, vector<64x320xf32>
      %c576 = arith.constant 576 : index
      %c0_32 = arith.constant 0 : index
      %32 = vector.load %arg6[%c576, %c0_32] : memref<1664x320xf32, #tpu.memory_space<vmem>>, vector<64x320xf32>
      tpu.vector_store %arg6[%c576, %c0_32], %31 {strides = array<i32>} : memref<1664x320xf32, #tpu.memory_space<vmem>>, vector<64x320xf32>,
      %c0_33 = arith.constant 0 : index
      %c40 = arith.constant 40 : index
      %33 = vector.load %arg5[%c0_33, %c40] : memref<64x404xf32, #tpu.memory_space<vmem>>, vector<64x320xf32>
      %c640 = arith.constant 640 : index
      %c0_34 = arith.constant 0 : index
      %34 = vector.load %arg6[%c640, %c0_34] : memref<1664x320xf32, #tpu.memory_space<vmem>>, vector<64x320xf32>
      tpu.vector_store %arg6[%c640, %c0_34], %33 {strides = array<i32>} : memref<1664x320xf32, #tpu.memory_space<vmem>>, vector<64x320xf32>,
      %c0_35 = arith.constant 0 : index
      %c41 = arith.constant 41 : index
      %35 = vector.load %arg5[%c0_35, %c41] : memref<64x404xf32, #tpu.memory_space<vmem>>, vector<64x320xf32>
      %c704 = arith.constant 704 : index
      %c0_36 = arith.constant 0 : index
      %36 = vector.load %arg6[%c704, %c0_36] : memref<1664x320xf32, #tpu.memory_space<vmem>>, vector<64x320xf32>
      tpu.vector_store %arg6[%c704, %c0_36], %35 {strides = array<i32>} : memref<1664x320xf32, #tpu.memory_space<vmem>>, vector<64x320xf32>,
      %c0_37 = arith.constant 0 : index
      %c42 = arith.constant 42 : index
      %37 = vector.load %arg5[%c0_37, %c42] : memref<64x404xf32, #tpu.memory_space<vmem>>, vector<64x320xf32>
      %c768 = arith.constant 768 : index
      %c0_38 = arith.constant 0 : index
      %38 = vector.load %arg6[%c768, %c0_38] : memref<1664x320xf32, #tpu.memory_space<vmem>>, vector<64x320xf32>
      tpu.vector_store %arg6[%c768, %c0_38], %37 {strides = array<i32>} : memref<1664x320xf32, #tpu.memory_space<vmem>>, vector<64x320xf32>,
      %c0_39 = arith.constant 0 : index
      %c43 = arith.constant 43 : index
      %39 = vector.load %arg5[%c0_39, %c43] : memref<64x404xf32, #tpu.memory_space<vmem>>, vector<64x320xf32>
      %c832 = arith.constant 832 : index
      %c0_40 = arith.constant 0 : index
      %40 = vector.load %arg6[%c832, %c0_40] : memref<1664x320xf32, #tpu.memory_space<vmem>>, vector<64x320xf32>
      tpu.vector_store %arg6[%c832, %c0_40], %39 {strides = array<i32>} : memref<1664x320xf32, #tpu.memory_space<vmem>>, vector<64x320xf32>,
      %c0_41 = arith.constant 0 : index
      %c44 = arith.constant 44 : index
      %41 = vector.load %arg5[%c0_41, %c44] : memref<64x404xf32, #tpu.memory_space<vmem>>, vector<64x320xf32>
      %c896 = arith.constant 896 : index
      %c0_42 = arith.constant 0 : index
      %42 = vector.load %arg6[%c896, %c0_42] : memref<1664x320xf32, #tpu.memory_space<vmem>>, vector<64x320xf32>
      tpu.vector_store %arg6[%c896, %c0_42], %41 {strides = array<i32>} : memref<1664x320xf32, #tpu.memory_space<vmem>>, vector<64x320xf32>,
      %c0_43 = arith.constant 0 : index
      %c60 = arith.constant 60 : index
      %43 = vector.load %arg5[%c0_43, %c60] : memref<64x404xf32, #tpu.memory_space<vmem>>, vector<64x320xf32>
      %c960 = arith.constant 960 : index
      %c0_44 = arith.constant 0 : index
      %44 = vector.load %arg6[%c960, %c0_44] : memref<1664x320xf32, #tpu.memory_space<vmem>>, vector<64x320xf32>
      tpu.vector_store %arg6[%c960, %c0_44], %43 {strides = array<i32>} : memref<1664x320xf32, #tpu.memory_space<vmem>>, vector<64x320xf32>,
      %c0_45 = arith.constant 0 : index
      %c61 = arith.constant 61 : index
      %45 = vector.load %arg5[%c0_45, %c61] : memref<64x404xf32, #tpu.memory_space<vmem>>, vector<64x320xf32>
      %c1024 = arith.constant 1024 : index
      %c0_46 = arith.constant 0 : index
      %46 = vector.load %arg6[%c1024, %c0_46] : memref<1664x320xf32, #tpu.memory_space<vmem>>, vector<64x320xf32>
      tpu.vector_store %arg6[%c1024, %c0_46], %45 {strides = array<i32>} : memref<1664x320xf32, #tpu.memory_space<vmem>>, vector<64x320xf32>,
      %c0_47 = arith.constant 0 : index
      %c62 = arith.constant 62 : index
      %47 = vector.load %arg5[%c0_47, %c62] : memref<64x404xf32, #tpu.memory_space<vmem>>, vector<64x320xf32>
      %c1088 = arith.constant 1088 : index
      %c0_48 = arith.constant 0 : index
      %48 = vector.load %arg6[%c1088, %c0_48] : memref<1664x320xf32, #tpu.memory_space<vmem>>, vector<64x320xf32>
      tpu.vector_store %arg6[%c1088, %c0_48], %47 {strides = array<i32>} : memref<1664x320xf32, #tpu.memory_space<vmem>>, vector<64x320xf32>,
      %c0_49 = arith.constant 0 : index
      %c63 = arith.constant 63 : index
      %49 = vector.load %arg5[%c0_49, %c63] : memref<64x404xf32, #tpu.memory_space<vmem>>, vector<64x320xf32>
      %c1152 = arith.constant 1152 : index
      %c0_50 = arith.constant 0 : index
      %50 = vector.load %arg6[%c1152, %c0_50] : memref<1664x320xf32, #tpu.memory_space<vmem>>, vector<64x320xf32>
      tpu.vector_store %arg6[%c1152, %c0_50], %49 {strides = array<i32>} : memref<1664x320xf32, #tpu.memory_space<vmem>>, vector<64x320xf32>,
      %c0_51 = arith.constant 0 : index
      %c64_52 = arith.constant 64 : index
      %51 = vector.load %arg5[%c0_51, %c64_52] : memref<64x404xf32, #tpu.memory_space<vmem>>, vector<64x320xf32>
      %c1216 = arith.constant 1216 : index
      %c0_53 = arith.constant 0 : index
      %52 = vector.load %arg6[%c1216, %c0_53] : memref<1664x320xf32, #tpu.memory_space<vmem>>, vector<64x320xf32>
      tpu.vector_store %arg6[%c1216, %c0_53], %51 {strides = array<i32>} : memref<1664x320xf32, #tpu.memory_space<vmem>>, vector<64x320xf32>,
      %c0_54 = arith.constant 0 : index
      %c80 = arith.constant 80 : index
      %53 = vector.load %arg5[%c0_54, %c80] : memref<64x404xf32, #tpu.memory_space<vmem>>, vector<64x320xf32>
      %c1280 = arith.constant 1280 : index
      %c0_55 = arith.constant 0 : index
      %54 = vector.load %arg6[%c1280, %c0_55] : memref<1664x320xf32, #tpu.memory_space<vmem>>, vector<64x320xf32>
      tpu.vector_store %arg6[%c1280, %c0_55], %53 {strides = array<i32>} : memref<1664x320xf32, #tpu.memory_space<vmem>>, vector<64x320xf32>,
      %c0_56 = arith.constant 0 : index
      %c81 = arith.constant 81 : index
      %55 = vector.load %arg5[%c0_56, %c81] : memref<64x404xf32, #tpu.memory_space<vmem>>, vector<64x320xf32>
      %c1344 = arith.constant 1344 : index
      %c0_57 = arith.constant 0 : index
      %56 = vector.load %arg6[%c1344, %c0_57] : memref<1664x320xf32, #tpu.memory_space<vmem>>, vector<64x320xf32>
      tpu.vector_store %arg6[%c1344, %c0_57], %55 {strides = array<i32>} : memref<1664x320xf32, #tpu.memory_space<vmem>>, vector<64x320xf32>,
      %c0_58 = arith.constant 0 : index
      %c82 = arith.constant 82 : index
      %57 = vector.load %arg5[%c0_58, %c82] : memref<64x404xf32, #tpu.memory_space<vmem>>, vector<64x320xf32>
      %c1408 = arith.constant 1408 : index
      %c0_59 = arith.constant 0 : index
      %58 = vector.load %arg6[%c1408, %c0_59] : memref<1664x320xf32, #tpu.memory_space<vmem>>, vector<64x320xf32>
      tpu.vector_store %arg6[%c1408, %c0_59], %57 {strides = array<i32>} : memref<1664x320xf32, #tpu.memory_space<vmem>>, vector<64x320xf32>,
      %c0_60 = arith.constant 0 : index
      %c83 = arith.constant 83 : index
      %59 = vector.load %arg5[%c0_60, %c83] : memref<64x404xf32, #tpu.memory_space<vmem>>, vector<64x320xf32>
      %c1472 = arith.constant 1472 : index
      %c0_61 = arith.constant 0 : index
      %60 = vector.load %arg6[%c1472, %c0_61] : memref<1664x320xf32, #tpu.memory_space<vmem>>, vector<64x320xf32>
      tpu.vector_store %arg6[%c1472, %c0_61], %59 {strides = array<i32>} : memref<1664x320xf32, #tpu.memory_space<vmem>>, vector<64x320xf32>,
      %c0_62 = arith.constant 0 : index
      %c84 = arith.constant 84 : index
      %61 = vector.load %arg5[%c0_62, %c84] : memref<64x404xf32, #tpu.memory_space<vmem>>, vector<64x320xf32>
      %c1536 = arith.constant 1536 : index
      %c0_63 = arith.constant 0 : index
      %62 = vector.load %arg6[%c1536, %c0_63] : memref<1664x320xf32, #tpu.memory_space<vmem>>, vector<64x320xf32>
      tpu.vector_store %arg6[%c1536, %c0_63], %61 {strides = array<i32>} : memref<1664x320xf32, #tpu.memory_space<vmem>>, vector<64x320xf32>,
      %63 = arith.index_cast %arg7 : i32 to index
      %c0_64 = arith.constant 0 : index
      %c0_65 = arith.constant 0 : index
      %64 = vector.load %arg2[%63, %c0_64, %c0_65] : memref<8x64x1664xf32, #tpu.memory_space<vmem>>, vector<1x64x1664xf32>
      %65 = vector.shape_cast %64 : vector<1x64x1664xf32> to vector<64x1664xf32>
      %c0_66 = arith.constant 0 : index
      %c0_67 = arith.constant 0 : index
      %66 = vector.load %arg6[%c0_66, %c0_67] : memref<1664x320xf32, #tpu.memory_space<vmem>>, vector<1664x320xf32>
      %cst_68 = arith.constant dense<0.000000e+00> : vector<64x320xf32>
      %67 = tpu.matmul %65, %66, %cst_68 {dimension_numbers = #tpu.dot_dimension_numbers<[1], [0], [0], [1], [0, 0, 1, 1], [], []>} : vector<64x1664xf32>, vector<1664x320xf32>, vector<64x320xf32> -> vector<64x320xf32>
      %68 = arith.index_cast %arg7 : i32 to index
      %c0_69 = arith.constant 0 : index
      %c0_70 = arith.constant 0 : index
      %c0_71 = arith.constant 0 : index
      %69 = vector.load %arg4[%68, %c0_69, %c0_70, %c0_71] : memref<8x1x64x320xf32, #tpu.memory_space<vmem>>, vector<1x1x64x320xf32>
      %70 = vector.shape_cast %69 : vector<1x1x64x320xf32> to vector<64x320xf32>
      %71 = vector.shape_cast %67 : vector<64x320xf32> to vector<1x1x64x320xf32>
      tpu.vector_store %arg4[%68, %c0_69, %c0_70, %c0_71], %71 {strides = array<i32>} : memref<8x1x64x320xf32, #tpu.memory_space<vmem>>, vector<1x1x64x320xf32>,
      %c7_i32 = arith.constant 7 : i32
      %72 = arith.cmpi slt, %arg7, %c7_i32 : i32
      %73 = arith.extui %72 : i1 to i32
      %c0_i32_72 = arith.constant 0 : i32
      %74 = arith.cmpi ne, %73, %c0_i32_72 : i32
      scf.if %74 {
        %cst_73 = arith.constant 0.000000e+00 : f32
        %75 = vector.broadcast %cst_73 : f32 to vector<64x320xf32>
        %76 = arith.maximumf %67, %75 : vector<64x320xf32>
        %77 = vector.broadcast %11 : vector<1x320xf32> to vector<64x320xf32>
        %78 = arith.mulf %76, %77 : vector<64x320xf32>
        %c0_74 = arith.constant 0 : index
        %c42_75 = arith.constant 42 : index
        %79 = vector.load %arg5[%c0_74, %c42_75] : memref<64x404xf32, #tpu.memory_space<vmem>>, vector<64x320xf32>
        tpu.vector_store %arg5[%c0_74, %c42_75], %78 {strides = array<i32>} : memref<64x404xf32, #tpu.memory_space<vmem>>, vector<64x320xf32>,
      } else {
      }
    }
    %c8_i32_10 = arith.constant 8 : i32
    return
  }
  func.func @transform_0(%arg0: i32) -> (i32, i32, i32) {
    %c0_i32 = arith.constant 0 : i32
    %c0_i32_0 = arith.constant 0 : i32
    %c0_i32_1 = arith.constant 0 : i32
    return %arg0, %c0_i32, %c0_i32_0 : i32, i32, i32
  }
  func.func @transform_1(%arg0: i32) -> (i32, i32, i32) {
    %c0_i32 = arith.constant 0 : i32
    %c0_i32_0 = arith.constant 0 : i32
    %c0_i32_1 = arith.constant 0 : i32
    %c0_i32_2 = arith.constant 0 : i32
    return %c0_i32, %c0_i32_0, %c0_i32_1 : i32, i32, i32
  }
  func.func @transform_2(%arg0: i32) -> (i32, i32) {
    %c0_i32 = arith.constant 0 : i32
    %c0_i32_0 = arith.constant 0 : i32
    %c0_i32_1 = arith.constant 0 : i32
    return %c0_i32, %c0_i32_0 : i32, i32
  }
  func.func @transform_3(%arg0: i32) -> (i32, i32, i32, i32) {
    %c0_i32 = arith.constant 0 : i32
    %c0_i32_0 = arith.constant 0 : i32
    %c0_i32_1 = arith.constant 0 : i32
    %c0_i32_2 = arith.constant 0 : i32
    return %c0_i32, %arg0, %c0_i32_0, %c0_i32_1 : i32, i32, i32, i32
  }
}

</mosaic_0001>

<bundles_post_ra>
// kernel: conv_neural_net_forward.1
= control target key start
LH: loop header
LB: loop body
LE: loop exit
PB: predicated region body
PF: predicated region fallthrough
CT: control target
= control target key end

     0   :  { %s8696_s12 = smov 0   ;;  %s8698_s13 = smov 0   ;;  %s12283_s0 = inlined_call_operand.vmem [shape: f32[2,8,400], index: 0, kind: input, shape index: {}]   ;;  %s12284_s1 = inlined_call_operand.vmem [shape: f32[8,64,1664], index: 1, kind: input, shape index: {}]   ;;  %s12285_s2 = inlined_call_operand.vmem [shape: f32[1,320], index: 2, kind: input, shape index: {}]   ;;  %s12286_s3 = inlined_call_operand.vmem [shape: f32[8,2,64,320], index: 3, kind: output, shape index: {}]  }
   0x1   :  { %s8700_s14 = smov 0  }
   0x2 LB: > { %s8707_s15 = sadd.s32 4294967295, %s8643_s14   ;;  %s8709_s16 = sadd.s32 1, %s8643_s14   ;;  %s8643_s14 = sphi %s8700_s14, %s12333_s14   ;;  %s8639_s13 = sphi %s8698_s13, %s12332_s13   ;;  %s8635_s12 = sphi %s8696_s12, %s12331_s12  }
   0x3   : > { %s85_s17 = ssub.s32 %s8643_s14, %s8709_s16  ;;  %s88_s18 = sadd.s32 1, %s8639_s13 }
   0x4   : > { %p86_p0 = scmp.eq.s32.totalorder %s85_s17, 0  ;;  %p98_p1 = scmp.ne.s32.totalorder %s8639_s13, %s8635_s12 }
   0x5   : > { %p99_p2 = scmp.eq.s32.totalorder %s8707_s15, 1  ;;  %p7345_p3 = scmp.ge.s32.totalorder %s8643_s14, 1 }
   0x6   : > { %s8716_s19 = scalar_select %p86_p0, %s8639_s13, %s88_s18  }
   0x7   : > { %p8718_p4 = por %p99_p2, %p98_p1  ;;  %p137_p5 = scmp.lt.s32.totalorder %s8643_s14, 3 }
   0x9   : > { %p138_p6 = pnand %p7345_p3, %p137_p5 }
   0xb   : > { %141 = sbr.rel (%p138_p6) target bundleno = 1930 (0x78a), region = 32 }
  0x12   : > { %s157_s21 = sand.u32 1, %s8635_s12   ;;  %v8725_v0 = vld [vmem:[%s12285_s2] sm:$0x7]  ;;  %vm168_vm0 = vcmask 162816   ;;  %p160_p7 = scmp.lt.s32.totalorder %s8707_s15, 1  ;;  %v207_v1 = vlaneseq  ;;  %v8649_v2 = vmov 0.0  }
  0x13   : > { %12291 = vst [vmem:[#allocation5_spill] sm:$0xff] %v8725_v0  ;;  %s8728_s24 = smul.u32 1536, %s157_s21  ;;  %170 = vst [vmem:[#allocation2 + $0x20] sm:$0xff] %v8649_v2  ;;  %vm242_vm1 = vcmask 523264   ;;  %vm205_vm3 = vcmask 130048   ;;  %s8758_s4 = smov 0  }
  0x14   : > { %171 = vst [vmem:[#allocation2 + $0x28] sm:$0xff] %v8649_v2  ;;  %172 = vst [vmem:[#allocation2 + $0x30] sm:$0xff] %v8649_v2  ;;  %s161_s25 = scalar_select %p160_p7, %s8707_s15, 1  ;;  %v8741_v3 = vshrl.u32 %v207_v1, 7 }
  0x15   : > { %174 = vst [vmem:[#allocation2 + $0x40] sm:$0xff] %v8649_v2  ;;  %175 = vst [vmem:[#allocation2 + $0x48] sm:$0xff] %v8649_v2  ;;  %s8756_s30 = scalar_lea.vmem [#allocation4], %s8728_s24 }
  0x16   : > { %176 = vst [vmem:[#allocation2 + $0x50] sm:$0xff] %v8649_v2  ;;  %178 = vst [vmem:[#allocation2 + $0x60] sm:$0xff] %v8649_v2  ;;  %s7355_s26 = sshll.u32 %s161_s25, 5  ;;  %vm216_vm2 = vcmp.eq.s32.totalorder %v8741_v3, 0 }
  0x17   : > { %179 = vst [vmem:[#allocation2 + $0x68] sm:$0xff] %v8649_v2  ;;  %180 = vst [vmem:[#allocation2 + $0x70] sm:$0xff] %v8649_v2  ;;  %s164_s29 = scalar_lea.vmem %s12283_s0, %s7355_s26  ;;  %v7348_v4 = vsel %vm216_vm2, 1.0, %v8649_v2 }
  0x18   : > { %182 = vst [vmem:[#allocation2 + $0x80] sm:$0xff] %v8649_v2  ;;  %183 = vst [vmem:[#allocation2 + $0x88] sm:$0xff] %v8649_v2  ;;  %v198_v5 = vld [vmem:[%s164_s29] sm:$0xff]  ;;  %v199_v6 = vld [vmem:[%s164_s29 + $0x8] sm:$0xff] }
  0x19   : > { %184 = vst [vmem:[#allocation2 + $0x90] sm:$0xff] %v8649_v2  ;;  %186 = vst [vmem:[#allocation2 + $0xa0] sm:$0xff] %v8649_v2  ;;  %v200_v7 = vld [vmem:[%s164_s29 + $0x10] sm:$0xff]  ;;  %v201_v8 = vld [vmem:[%s164_s29 + $0x18] sm:$0xff] }
  0x1a   : > { %187 = vst [vmem:[#allocation2 + $0xa8] sm:$0xff] %v8649_v2  ;;  %188 = vst [vmem:[#allocation2 + $0xb0] sm:$0xff] %v8649_v2 }
  0x1b   : > { %190 = vst [vmem:[#allocation2 + $0xc0] sm:$0xff] %v8649_v2  ;;  %191 = vst [vmem:[#allocation2 + $0xc8] sm:$0xff] %v8649_v2 }
  0x1c   : > { %192 = vst [vmem:[#allocation2 + $0xd0] sm:$0xff] %v8649_v2  ;;  %194 = vst [vmem:[#allocation2 + $0xe0] sm:$0xff] %v8649_v2 }
  0x1d   : > { %195 = vst [vmem:[#allocation2 + $0xe8] sm:$0xff] %v8649_v2  ;;  %196 = vst [vmem:[#allocation2 + $0xf0] sm:$0xff] %v8649_v2 }
  0x1e   : > { %244 = vst [vmem:[#allocation3 + $0x12d8] sm:$0xff] %v8649_v2  ;;  %245 = vst [vmem:[#allocation3 + $0x12e0] sm:$0xff] %v8649_v2 }
  0x1f   : > { %247 = vst [vmem:[#allocation3 + $0x12f0] sm:$0xff] %v8649_v2  ;;  %248 = vst [vmem:[#allocation3 + $0x12f8] sm:$0xff] %v8649_v2 }
  0x20   : > { %250 = vst [vmem:[#allocation3 + $0x1308] sm:$0xff] %v8649_v2  ;;  %251 = vst [vmem:[#allocation3 + $0x1310] sm:$0xff] %v8649_v2 }
  0x21   : > { %253 = vst [vmem:[#allocation3 + $0x1320] sm:$0xff] %v8649_v2  ;;  %254 = vst [vmem:[#allocation3 + $0x1328] sm:$0xff] %v8649_v2 }
  0x22   : > { %256 = vst [vmem:[#allocation3 + $0x1338] sm:$0xff] %v8649_v2  ;;  %257 = vst [vmem:[#allocation3 + $0x1340] sm:$0xff] %v8649_v2 }
  0x23   : > { %259 = vst [vmem:[#allocation3 + $0x1350] sm:$0xff] %v8649_v2  ;;  %260 = vst [vmem:[#allocation3 + $0x1358] sm:$0xff] %v8649_v2 }
  0x24   : > { %262 = vst [vmem:[#allocation3 + $0x1368] sm:$0xff] %v8649_v2  ;;  %263 = vst [vmem:[#allocation3 + $0x1370] sm:$0xff] %v8649_v2 }
  0x25   : > { %169 = vst.msk [vmem:[#allocation2 + $0x18] sm:$0xff] %vm168_vm0, %v8649_v2  ;;  %173 = vst.msk [vmem:[#allocation2 + $0x38] sm:$0xff] %vm168_vm0, %v8649_v2 }
  0x26   : > { %177 = vst.msk [vmem:[#allocation2 + $0x58] sm:$0xff] %vm168_vm0, %v8649_v2  ;;  %181 = vst.msk [vmem:[#allocation2 + $0x78] sm:$0xff] %vm168_vm0, %v8649_v2 }
  0x27   : > { %185 = vst.msk [vmem:[#allocation2 + $0x98] sm:$0xff] %vm168_vm0, %v8649_v2  ;;  %189 = vst.msk [vmem:[#allocation2 + $0xb8] sm:$0xff] %vm168_vm0, %v8649_v2 }
  0x28   : > { %193 = vst.msk [vmem:[#allocation2 + $0xd8] sm:$0xff] %vm168_vm0, %v8649_v2  ;;  %197 = vst.msk [vmem:[#allocation2 + $0xf8] sm:$0xff] %vm168_vm0, %v8649_v2 }
  0x29   : > { %12292 = vst [vmem:[#allocation6_spill] sm:$0xff] %v8741_v3  ;;  %246 = vst.msk [vmem:[#allocation3 + $0x12e8] sm:$0xff] %vm242_vm1, %v8649_v2 }
  0x2a   : > { %249 = vst.msk [vmem:[#allocation3 + $0x1300] sm:$0xff] %vm242_vm1, %v8649_v2  ;;  %252 = vst.msk [vmem:[#allocation3 + $0x1318] sm:$0xff] %vm242_vm1, %v8649_v2 }
  0x2b   : > { %255 = vst.msk [vmem:[#allocation3 + $0x1330] sm:$0xff] %vm242_vm1, %v8649_v2  ;;  %258 = vst.msk [vmem:[#allocation3 + $0x1348] sm:$0xff] %vm242_vm1, %v8649_v2 }
  0x2c   : > { %261 = vst.msk [vmem:[#allocation3 + $0x1360] sm:$0xff] %vm242_vm1, %v8649_v2  ;;  %264 = vst.msk [vmem:[#allocation3 + $0x1378] sm:$0xff] %vm242_vm1, %v8649_v2 }
  0x2d   : > { %240 = vst [vmem:[#allocation3 + $0x12c0] sm:$0xff] %v7348_v4  ;;  %241 = vst [vmem:[#allocation3 + $0x12c8] sm:$0xff] %v7348_v4 }
  0x2e   : > { %243 = vst.msk [vmem:[#allocation3 + $0x12d0] sm:$0xff] %vm242_vm1, %v7348_v4  ;;  %202 = vst [vmem:[#allocation2] sm:$0xff] %v198_v5 }
  0x2f   : > { %203 = vst [vmem:[#allocation2 + $0x8] sm:$0xff] %v199_v6  ;;  %204 = vst [vmem:[#allocation2 + $0x10] sm:$0xff] %v200_v7 }
  0x30   : > { %206 = vst.msk [vmem:[#allocation2 + $0x18] sm:$0xff] %vm205_vm3, %v201_v8 }
  0x31 LB: >> { %v8767_v11 = vld [vmem:[#allocation2 + $0x20] sm:$0xff]  ;;  %s8650_s5 = smov 127   ;;  %v8775_v13 = vld [vmem:[#allocation2 + $0x28] sm:$0xff]  ;;  %v8801_v24 = vld [vmem:[#allocation2 + $0x30] sm:$0xff]  ;;  %s8651_s6 = smov 126   ;;  %vm416_vm4 = vcmask 1039360   ;;  %s8647_s4 = sphi %s8758_s4, %s271_s4  }
  0x32   : >> { %v8777_v14 = vld [vmem:[#allocation2 + $0x48] sm:$0xff]  ;;  %v8779_v15 = vld [vmem:[#allocation2 + $0x40] sm:$0xff]  ;;  %v8829_v34 = vld [vmem:[#allocation2 + $0x50] sm:$0xff]  ;;  %s8652_s7 = smov 125   ;;  %s8653_s8 = smov 124   ;;  %vm577_vm5 = vcmask 1031168  }
  0x33   : >> { %v8781_v16 = vld [vmem:[#allocation2 + $0x60] sm:$0xff]  ;;  %v8787_v19 = vld [vmem:[#allocation2 + $0x68] sm:$0xff]  ;;  %v8837_v36 = vld [vmem:[#allocation2 + $0x70] sm:$0xff]  ;;  %s8654_s9 = smov 108   ;;  %vm738_vm6 = vcmask 1022976   ;;  %s8655_s10 = smov 107  }
  0x34   : >> { %v8789_v20 = vld [vmem:[#allocation2 + $0x88] sm:$0xff]  ;;  %v8791_v21 = vld [vmem:[#allocation2 + $0x80] sm:$0xff]  ;;  %v7766_v23 = vpack.c.bf16 %v8787_v19, %v8777_v14  ;;  %v7768_v29 = vpack.c.bf16 %v8781_v16, %v8779_v15  ;;  %v8847_v37 = vld [vmem:[#allocation2 + $0x90] sm:$0xff]  ;;  %vm899_vm7 = vcmask 1014784   ;;  %s8656_s11 = smov 106   ;;  %vm1060_vm8 = vcmask 883712  }
  0x35   : >> { %v8765_v10 = vld [vmem:[#allocation2] sm:$0xff]  ;;  %v8803_v25 = vld [vmem:[#allocation2 + $0xa8] sm:$0xff]  ;;  %v8853_v38 = vld [vmem:[#allocation2 + $0xb0] sm:$0xff]  ;;  %s7356_s12 = smul.u32 832, %s8647_s4  ;;  %s8657_s21 = smov 105   ;;  %vm1221_vm9 = vcmask 875520  }
  0x36   : >> { %v8763_v9 = vld [vmem:[#allocation2 + $0x10] sm:$0xff]  ;;  %368 = vrot.lane.b32.xlu0 %v8765_v10, %s8650_s5  ;;  %v8773_v12 = vld [vmem:[#allocation2 + $0x8] sm:$0xff]  ;;  %v7764_v18 = vpack.c.bf16 %v8767_v11, %v8765_v10  ;;  %v8793_v22 = vld [vmem:[#allocation2 + $0xa0] sm:$0xff]  ;;  %v7770_v31 = vpack.c.bf16 %v8803_v25, %v8789_v20  ;;  %s8658_s22 = smov 104   ;;  %vm1382_vm10 = vcmask 867328   ;;  %s8659_s23 = smov 88  }
  0x37   : >> { %372 = vrot.lane.b32.xlu1 %v8763_v9, %s8650_s5  ;;  %v7762_v17 = vpack.c.bf16 %v8775_v13, %v8773_v12  ;;  %v8805_v26 = vld [vmem:[#allocation2 + $0xc8] sm:$0xff]  ;;  %v8807_v27 = vld [vmem:[#allocation2 + $0xc0] sm:$0xff]  ;;  %v7772_v32 = vpack.c.bf16 %v8793_v22, %v8791_v21  ;;  %v8863_v39 = vld [vmem:[#allocation2 + $0xd0] sm:$0xff]  ;;  %s9300_s18 = scalar_lea.vmem %s12284_s1, %s7356_s12  ;;  %vm1543_vm11 = vcmask 859136   ;;  %s8660_s24 = smov 87   ;;  %vm1704_vm12 = vcmask 850944  }
  0x38   : >> { %v8809_v28 = vld [vmem:[#allocation2 + $0xe0] sm:$0xff]  ;;  %v8813_v30 = vld [vmem:[#allocation2 + $0xe8] sm:$0xff]  ;;  %v8869_v40 = vld [vmem:[#allocation2 + $0xf0] sm:$0xff]  ;;  %s8661_s25 = smov 86   ;;  %vm1865_vm13 = vcmask 719872   ;;  %s8662_s26 = smov 85  }
  0x39   : >> { %7763 = vmatprep.subr.bf16.mxu1 %v7762_v17  ;;  %v7774_v33 = vpack.c.bf16 %v8813_v30, %v8805_v26  ;;  %v7776_v35 = vpack.c.bf16 %v8809_v28, %v8807_v27  ;;  %vm2026_vm14 = vcmask 711680   ;;  %s8663_s27 = smov 84   ;;  %vm2187_vm15 = vcmask 703488   ;;  %s8664_s28 = smov 68  }
  0x3a   : >> { %370 = vrot.lane.b32.xlu0 %v8773_v12, %s8650_s5  ;;  %7765 = vmatpush1.bf16.msra.mxu1 %v7764_v18  ;;  %s8665_s29 = smov 44   ;;  %vm2348_vm0 = vcmask 695296   ;;  %vm2509_vm2 = vcmask 687104   ;;  %vm2670_vm3 = vcmask 556032   ;;  %s8674_s12 = smov 45  }
  0x3b   : >> { %374 = vrot.lane.b32.xlu1 %v8767_v11, %s8650_s5  ;;  %7767 = vmatprep.subr.bf16.mxu1 %v7766_v23  ;;  %s7357_s14 = smul.u32 192, %s8647_s4  ;;  %p7351_p8 = scmp.ge.s32.totalorder %s8647_s4, 7 }
  0x3d   : >> { %s11632_s17 = scalar_lea.vmem %s8756_s30, %s7357_s14 [#allocation4] }
  0x3e   : >> { %376 = vrot.lane.b32.xlu0 %v8775_v13, %s8650_s5  ;;  %7769 = vmatpush1.bf16.msra.mxu1 %v7768_v29 }
  0x3f   : >> { %378 = vrot.lane.b32.xlu1 %v8801_v24, %s8650_s5  ;;  %7771 = vmatprep.subr.bf16.mxu1 %v7770_v31 }
  0x42   : >> { %380 = vrot.lane.b32.xlu0 %v8779_v15, %s8650_s5  ;;  %7773 = vmatpush1.bf16.msra.mxu1 %v7772_v32 }
  0x43   : >> { %382 = vrot.lane.b32.xlu1 %v8777_v14, %s8650_s5  ;;  %7775 = vmatprep.subr.bf16.mxu1 %v7774_v33 }
  0x46   : >> { %384 = vrot.lane.b32.xlu0 %v8829_v34, %s8650_s5  ;;  %7777 = vmatpush1.bf16.msra.mxu1 %v7776_v35 }
  0x47   : >> { %386 = vrot.lane.b32.xlu1 %v8781_v16, %s8650_s5 }
  0x4a   : >> { %388 = vrot.lane.b32.xlu0 %v8787_v19, %s8650_s5 }
  0x4b   : >> { %390 = vrot.lane.b32.xlu1 %v8837_v36, %s8650_s5 }
  0x4e   : >> { %392 = vrot.lane.b32.xlu0 %v8791_v21, %s8650_s5 }
  0x4f   : >> { %394 = vrot.lane.b32.xlu1 %v8789_v20, %s8650_s5 }
  0x52   : >> { %396 = vrot.lane.b32.xlu0 %v8847_v37, %s8650_s5 }
  0x53   : >> { %398 = vrot.lane.b32.xlu1 %v8793_v22, %s8650_s5 }
  0x56   : >> { %400 = vrot.lane.b32.xlu0 %v8803_v25, %s8650_s5 }
  0x57   : >> { %402 = vrot.lane.b32.xlu1 %v8853_v38, %s8650_s5 }
  0x5a   : >> { %404 = vrot.lane.b32.xlu0 %v8807_v27, %s8650_s5 }
  0x5b   : >> { %406 = vrot.lane.b32.xlu1 %v8805_v26, %s8650_s5 }
  0x5e   : >> { %408 = vrot.lane.b32.xlu0 %v8863_v39, %s8650_s5 }
  0x5f   : >> { %410 = vrot.lane.b32.xlu1 %v8809_v28, %s8650_s5 }
  0x62   : >> { %412 = vrot.lane.b32.xlu0 %v8813_v30, %s8650_s5 }
  0x63   : >> { %414 = vrot.lane.b32.xlu1 %v8869_v40, %s8650_s5  ;;  %s8667_s5 = smov 67  }
  0x66   : >> { %529 = vrot.lane.b32.xlu0 %v8765_v10, %s8651_s6 }
  0x67   : >> { %531 = vrot.lane.b32.xlu1 %v8773_v12, %s8651_s6 }
  0x6a   : >> { %533 = vrot.lane.b32.xlu0 %v8763_v9, %s8651_s6 }
  0x6b   : >> { %535 = vrot.lane.b32.xlu1 %v8767_v11, %s8651_s6 }
  0x6e   : >> { %537 = vrot.lane.b32.xlu0 %v8775_v13, %s8651_s6 }
  0x6f   : >> { %539 = vrot.lane.b32.xlu1 %v8801_v24, %s8651_s6 }
  0x72   : >> { %541 = vrot.lane.b32.xlu0 %v8779_v15, %s8651_s6 }
  0x73   : >> { %543 = vrot.lane.b32.xlu1 %v8777_v14, %s8651_s6 }
  0x76   : >> { %545 = vrot.lane.b32.xlu0 %v8829_v34, %s8651_s6 }
  0x77   : >> { %547 = vrot.lane.b32.xlu1 %v8781_v16, %s8651_s6 }
  0x7a   : >> { %549 = vrot.lane.b32.xlu0 %v8787_v19, %s8651_s6 }
  0x7b   : >> { %551 = vrot.lane.b32.xlu1 %v8837_v36, %s8651_s6 }
  0x7e   : >> { %553 = vrot.lane.b32.xlu0 %v8791_v21, %s8651_s6 }
  0x7f   : >> { %555 = vrot.lane.b32.xlu1 %v8789_v20, %s8651_s6 }
  0x82   : >> { %557 = vrot.lane.b32.xlu0 %v8847_v37, %s8651_s6 }
  0x83   : >> { %559 = vrot.lane.b32.xlu1 %v8793_v22, %s8651_s6 }
  0x86   : >> { %561 = vrot.lane.b32.xlu0 %v8803_v25, %s8651_s6 }
  0x87   : >> { %563 = vrot.lane.b32.xlu1 %v8853_v38, %s8651_s6 }
  0x8a   : >> { %565 = vrot.lane.b32.xlu0 %v8807_v27, %s8651_s6 }
  0x8b   : >> { %567 = vrot.lane.b32.xlu1 %v8805_v26, %s8651_s6 }
  0x8e   : >> { %569 = vrot.lane.b32.xlu0 %v8863_v39, %s8651_s6 }
  0x8f   : >> { %571 = vrot.lane.b32.xlu1 %v8809_v28, %s8651_s6 }
  0x92   : >> { %573 = vrot.lane.b32.xlu0 %v8813_v30, %s8651_s6 }
  0x93   : >> { %575 = vrot.lane.b32.xlu1 %v8869_v40, %s8651_s6  ;;  %s8668_s6 = smov 66  }
  0x96   : >> { %690 = vrot.lane.b32.xlu0 %v8765_v10, %s8652_s7 }
  0x97   : >> { %692 = vrot.lane.b32.xlu1 %v8773_v12, %s8652_s7 }
  0x9a   : >> { %694 = vrot.lane.b32.xlu0 %v8763_v9, %s8652_s7 }
  0x9b   : >> { %696 = vrot.lane.b32.xlu1 %v8767_v11, %s8652_s7 }
  0x9e   : >> { %698 = vrot.lane.b32.xlu0 %v8775_v13, %s8652_s7 }
  0x9f   : >> { %700 = vrot.lane.b32.xlu1 %v8801_v24, %s8652_s7 }
  0xa2   : >> { %702 = vrot.lane.b32.xlu0 %v8779_v15, %s8652_s7 }
  0xa3   : >> { %704 = vrot.lane.b32.xlu1 %v8777_v14, %s8652_s7 }
  0xa6   : >> { %706 = vrot.lane.b32.xlu0 %v8829_v34, %s8652_s7 }
  0xa7   : >> { %708 = vrot.lane.b32.xlu1 %v8781_v16, %s8652_s7 }
  0xa8   : >> { %v369_v42 = vpop.permute.xlu0 %368 }
  0xa9   : >> { %v373_v41 = vpop.permute.xlu1 %372 }
  0xaa   : >> { %459 = vst.msk [vmem:[#allocation3 + $0xd0] sm:$0xff] %vm242_vm1, %v373_v41  ;;  %710 = vrot.lane.b32.xlu0 %v8787_v19, %s8652_s7 }
  0xab   : >> { %712 = vrot.lane.b32.xlu1 %v8837_v36, %s8652_s7 }
  0xac   : >> { %v371_v44 = vpop.permute.xlu0 %370 }
  0xad   : >> { %v375_v43 = vpop.permute.xlu1 %374  ;;  %v417_v45 = vsel %vm416_vm4, %v369_v42, %v371_v44  ;;  %v418_v46 = vsel %vm416_vm4, %v371_v44, %v373_v41 }
  0xae   : >> { %714 = vrot.lane.b32.xlu0 %v8791_v21, %s8652_s7 }
  0xaf   : >> { %716 = vrot.lane.b32.xlu1 %v8789_v20, %s8652_s7 }
  0xb0   : >> { %v377_v48 = vpop.permute.xlu0 %376 }
  0xb1   : >> { %v379_v47 = vpop.permute.xlu1 %378  ;;  %v419_v49 = vsel %vm416_vm4, %v375_v43, %v377_v48 }
  0xb2   : >> { %462 = vst.msk [vmem:[#allocation3 + $0xe8] sm:$0xff] %vm242_vm1, %v379_v47  ;;  %v420_v50 = vsel %vm416_vm4, %v377_v48, %v379_v47  ;;  %718 = vrot.lane.b32.xlu0 %v8847_v37, %s8652_s7  ;;  %v7780_v52 = vpack.c.bf16 %v419_v49, %v417_v45 }
  0xb3   : >> { %720 = vrot.lane.b32.xlu1 %v8793_v22, %s8652_s7  ;;  %v7778_v51 = vpack.c.bf16 %v420_v50, %v418_v46 }
  0xb4   : >> { %v381_v54 = vpop.permute.xlu0 %380 }
  0xb5   : >> { %v383_v53 = vpop.permute.xlu1 %382  ;;  %7779 = vmatprep.subr.bf16.mxu1 %v7778_v51 }
  0xb6   : >> { %v421_v55 = vsel %vm416_vm4, %v381_v54, %v383_v53  ;;  %7781 = vmatpush1.bf16.msra.mxu1 %v7780_v52  ;;  %722 = vrot.lane.b32.xlu0 %v8803_v25, %s8652_s7 }
  0xb7   : >> { %724 = vrot.lane.b32.xlu1 %v8853_v38, %s8652_s7 }
  0xb8   : >> { %v385_v57 = vpop.permute.xlu0 %384 }
  0xb9   : >> { %v387_v56 = vpop.permute.xlu1 %386  ;;  %v422_v58 = vsel %vm416_vm4, %v383_v53, %v385_v57  ;;  %465 = vst.msk [vmem:[#allocation3 + $0x100] sm:$0xff] %vm242_vm1, %v385_v57 }
  0xba   : >> { %726 = vrot.lane.b32.xlu0 %v8807_v27, %s8652_s7 }
  0xbb   : >> { %728 = vrot.lane.b32.xlu1 %v8805_v26, %s8652_s7 }
  0xbc   : >> { %v389_v60 = vpop.permute.xlu0 %388 }
  0xbd   : >> { %v391_v59 = vpop.permute.xlu1 %390  ;;  %v423_v61 = vsel %vm416_vm4, %v387_v56, %v389_v60 }
  0xbe   : >> { %468 = vst.msk [vmem:[#allocation3 + $0x118] sm:$0xff] %vm242_vm1, %v391_v59  ;;  %v424_v62 = vsel %vm416_vm4, %v389_v60, %v391_v59  ;;  %730 = vrot.lane.b32.xlu0 %v8863_v39, %s8652_s7  ;;  %v7784_v1 = vpack.c.bf16 %v423_v61, %v421_v55 }
  0xbf   : >> { %732 = vrot.lane.b32.xlu1 %v8809_v28, %s8652_s7  ;;  %v7782_v63 = vpack.c.bf16 %v424_v62, %v422_v58 }
  0xc0   : >> { %v393_v4 = vpop.permute.xlu0 %392 }
  0xc1   : >> { %v395_v2 = vpop.permute.xlu1 %394  ;;  %7783 = vmatprep.subr.bf16.mxu1 %v7782_v63 }
  0xc2   : >> { %v425_v5 = vsel %vm416_vm4, %v393_v4, %v395_v2  ;;  %7785 = vmatpush1.bf16.msra.mxu1 %v7784_v1  ;;  %734 = vrot.lane.b32.xlu0 %v8813_v30, %s8652_s7 }
  0xc3   : >> { %736 = vrot.lane.b32.xlu1 %v8869_v40, %s8652_s7  ;;  %s8669_s7 = smov 65  }
  0xc4   : >> { %v397_v7 = vpop.permute.xlu0 %396 }
  0xc5   : >> { %v399_v6 = vpop.permute.xlu1 %398  ;;  %v426_v8 = vsel %vm416_vm4, %v395_v2, %v397_v7  ;;  %471 = vst.msk [vmem:[#allocation3 + $0x130] sm:$0xff] %vm242_vm1, %v397_v7 }
  0xc6   : >> { %851 = vrot.lane.b32.xlu0 %v8765_v10, %s8653_s8 }
  0xc7   : >> { %853 = vrot.lane.b32.xlu1 %v8773_v12, %s8653_s8 }
  0xc8   : >> { %v401_v18 = vpop.permute.xlu0 %400 }
  0xc9   : >> { %v403_v17 = vpop.permute.xlu1 %402  ;;  %v427_v23 = vsel %vm416_vm4, %v399_v6, %v401_v18 }
  0xca   : >> { %474 = vst.msk [vmem:[#allocation3 + $0x148] sm:$0xff] %vm242_vm1, %v403_v17  ;;  %v428_v29 = vsel %vm416_vm4, %v401_v18, %v403_v17  ;;  %855 = vrot.lane.b32.xlu0 %v8763_v9, %s8653_s8  ;;  %v7788_v32 = vpack.c.bf16 %v427_v23, %v425_v5 }
  0xcb   : >> { %857 = vrot.lane.b32.xlu1 %v8767_v11, %s8653_s8  ;;  %v7786_v31 = vpack.c.bf16 %v428_v29, %v426_v8 }
  0xcc   : >> { %v405_v35 = vpop.permute.xlu0 %404 }
  0xcd   : >> { %v407_v33 = vpop.permute.xlu1 %406  ;;  %7787 = vmatprep.subr.bf16.mxu1 %v7786_v31 }
  0xce   : >> { %v429_v41 = vsel %vm416_vm4, %v405_v35, %v407_v33  ;;  %7789 = vmatpush1.bf16.msra.mxu1 %v7788_v32  ;;  %859 = vrot.lane.b32.xlu0 %v8775_v13, %s8653_s8 }
  0xcf   : >> { %861 = vrot.lane.b32.xlu1 %v8801_v24, %s8653_s8 }
  0xd0   : >> { %v409_v43 = vpop.permute.xlu0 %408 }
  0xd1   : >> { %v411_v42 = vpop.permute.xlu1 %410  ;;  %v430_v44 = vsel %vm416_vm4, %v407_v33, %v409_v43  ;;  %477 = vst.msk [vmem:[#allocation3 + $0x160] sm:$0xff] %vm242_vm1, %v409_v43 }
  0xd2   : >> { %863 = vrot.lane.b32.xlu0 %v8779_v15, %s8653_s8 }
  0xd3   : >> { %865 = vrot.lane.b32.xlu1 %v8777_v14, %s8653_s8 }
  0xd4   : >> { %v413_v46 = vpop.permute.xlu0 %412 }
  0xd5   : >> { %v415_v45 = vpop.permute.xlu1 %414  ;;  %v431_v47 = vsel %vm416_vm4, %v411_v42, %v413_v46 }
  0xd6   : >> { %480 = vst.msk [vmem:[#allocation3 + $0x178] sm:$0xff] %vm242_vm1, %v415_v45  ;;  %v432_v48 = vsel %vm416_vm4, %v413_v46, %v415_v45  ;;  %867 = vrot.lane.b32.xlu0 %v8829_v34, %s8653_s8  ;;  %v7792_v50 = vpack.c.bf16 %v431_v47, %v429_v41  ;;  %vm4310_vm4 = vcmask 359424  }
  0xd7   : >> { %869 = vrot.lane.b32.xlu1 %v8781_v16, %s8653_s8  ;;  %v7790_v49 = vpack.c.bf16 %v432_v48, %v430_v44 }
  0xd8   : >> { %v530_v52 = vpop.permute.xlu0 %529 }
  0xd9   : >> { %v532_v51 = vpop.permute.xlu1 %531  ;;  %7791 = vmatprep.subr.bf16.mxu1 %v7790_v49 }
  0xda   : >> { %v578_v53 = vsel %vm577_vm5, %v530_v52, %v532_v51  ;;  %7793 = vmatpush1.bf16.msra.mxu1 %v7792_v50  ;;  %871 = vrot.lane.b32.xlu0 %v8787_v19, %s8653_s8 }
  0xdb   : >> { %873 = vrot.lane.b32.xlu1 %v8837_v36, %s8653_s8 }
  0xdc   : >> { %v534_v55 = vpop.permute.xlu0 %533 }
  0xdd   : >> { %v536_v54 = vpop.permute.xlu1 %535  ;;  %v579_v56 = vsel %vm577_vm5, %v532_v51, %v534_v55  ;;  %620 = vst.msk [vmem:[#allocation3 + $0x190] sm:$0xff] %vm242_vm1, %v534_v55 }
  0xde   : >> { %875 = vrot.lane.b32.xlu0 %v8791_v21, %s8653_s8 }
  0xdf   : >> { %877 = vrot.lane.b32.xlu1 %v8789_v20, %s8653_s8 }
  0xe0   : >> { %v538_v58 = vpop.permute.xlu0 %537 }
  0xe1   : >> { %v540_v57 = vpop.permute.xlu1 %539  ;;  %v580_v59 = vsel %vm577_vm5, %v536_v54, %v538_v58 }
  0xe2   : >> { %623 = vst.msk [vmem:[#allocation3 + $0x1a8] sm:$0xff] %vm242_vm1, %v540_v57  ;;  %v581_v60 = vsel %vm577_vm5, %v538_v58, %v540_v57  ;;  %879 = vrot.lane.b32.xlu0 %v8847_v37, %s8653_s8  ;;  %v7796_v62 = vpack.c.bf16 %v580_v59, %v578_v53 }
  0xe3   : >> { %881 = vrot.lane.b32.xlu1 %v8793_v22, %s8653_s8  ;;  %v7794_v61 = vpack.c.bf16 %v581_v60, %v579_v56 }
  0xe4   : >> { %v542_v1 = vpop.permute.xlu0 %541 }
  0xe5   : >> { %v544_v63 = vpop.permute.xlu1 %543  ;;  %7795 = vmatprep.subr.bf16.mxu1 %v7794_v61 }
  0xe6   : >> { %v582_v2 = vsel %vm577_vm5, %v542_v1, %v544_v63  ;;  %7797 = vmatpush1.bf16.msra.mxu1 %v7796_v62  ;;  %883 = vrot.lane.b32.xlu0 %v8803_v25, %s8653_s8 }
  0xe7   : >> { %885 = vrot.lane.b32.xlu1 %v8853_v38, %s8653_s8 }
  0xe8   : >> { %v546_v5 = vpop.permute.xlu0 %545 }
  0xe9   : >> { %v548_v4 = vpop.permute.xlu1 %547  ;;  %v583_v6 = vsel %vm577_vm5, %v544_v63, %v546_v5  ;;  %626 = vst.msk [vmem:[#allocation3 + $0x1c0] sm:$0xff] %vm242_vm1, %v546_v5 }
  0xea   : >> { %887 = vrot.lane.b32.xlu0 %v8807_v27, %s8653_s8 }
  0xeb   : >> { %889 = vrot.lane.b32.xlu1 %v8805_v26, %s8653_s8 }
  0xec   : >> { %v550_v8 = vpop.permute.xlu0 %549 }
  0xed   : >> { %v552_v7 = vpop.permute.xlu1 %551  ;;  %v584_v17 = vsel %vm577_vm5, %v548_v4, %v550_v8 }
  0xee   : >> { %629 = vst.msk [vmem:[#allocation3 + $0x1d8] sm:$0xff] %vm242_vm1, %v552_v7  ;;  %v585_v18 = vsel %vm577_vm5, %v550_v8, %v552_v7  ;;  %891 = vrot.lane.b32.xlu0 %v8863_v39, %s8653_s8  ;;  %v7800_v29 = vpack.c.bf16 %v584_v17, %v582_v2 }
  0xef   : >> { %893 = vrot.lane.b32.xlu1 %v8809_v28, %s8653_s8  ;;  %v7798_v23 = vpack.c.bf16 %v585_v18, %v583_v6  ;;  %v9104_v6 = vld [vmem:[#allocation2 + $0x8] sm:$0xff] }
  0xf0   : >> { %v554_v32 = vpop.permute.xlu0 %553 }
  0xf1   : >> { %v556_v31 = vpop.permute.xlu1 %555  ;;  %7799 = vmatprep.subr.bf16.mxu1 %v7798_v23 }
  0xf2   : >> { %v586_v33 = vsel %vm577_vm5, %v554_v32, %v556_v31  ;;  %7801 = vmatpush1.bf16.msra.mxu1 %v7800_v29  ;;  %895 = vrot.lane.b32.xlu0 %v8813_v30, %s8653_s8 }
  0xf3   : >> { %897 = vrot.lane.b32.xlu1 %v8869_v40, %s8653_s8  ;;  %s8670_s8 = smov 64  }
  0xf4   : >> { %v558_v41 = vpop.permute.xlu0 %557 }
  0xf5   : >> { %v560_v35 = vpop.permute.xlu1 %559  ;;  %v587_v42 = vsel %vm577_vm5, %v556_v31, %v558_v41  ;;  %632 = vst.msk [vmem:[#allocation3 + $0x1f0] sm:$0xff] %vm242_vm1, %v558_v41 }
  0xf6   : >> { %1012 = vrot.lane.b32.xlu0 %v8765_v10, %s8654_s9 }
  0xf7   : >> { %1014 = vrot.lane.b32.xlu1 %v8773_v12, %s8654_s9 }
  0xf8   : >> { %v562_v44 = vpop.permute.xlu0 %561 }
  0xf9   : >> { %v564_v43 = vpop.permute.xlu1 %563  ;;  %v588_v45 = vsel %vm577_vm5, %v560_v35, %v562_v44  ;;  %v9127_v35 = vld [vmem:[#allocation2 + $0x28] sm:$0xff] }
  0xfa   : >> { %635 = vst.msk [vmem:[#allocation3 + $0x208] sm:$0xff] %vm242_vm1, %v564_v43  ;;  %v589_v46 = vsel %vm577_vm5, %v562_v44, %v564_v43  ;;  %1016 = vrot.lane.b32.xlu0 %v8763_v9, %s8654_s9  ;;  %v7804_v48 = vpack.c.bf16 %v588_v45, %v586_v33  ;;  %v9125_v33 = vld [vmem:[#allocation2 + $0x30] sm:$0xff]  ;;  %v9134_v44 = vld [vmem:[#allocation2 + $0x48] sm:$0xff]  ;;  %v9136_v45 = vld [vmem:[#allocation2 + $0x40] sm:$0xff] }
  0xfb   : >> { %1018 = vrot.lane.b32.xlu1 %v8767_v11, %s8654_s9  ;;  %v7802_v47 = vpack.c.bf16 %v589_v46, %v587_v42 }
  0xfc   : >> { %v566_v49 = vpop.permute.xlu0 %565 }
  0xfd   : >> { %v568_v12 = vpop.permute.xlu1 %567  ;;  %7803 = vmatprep.subr.bf16.mxu1 %v7802_v47 }
  0xfe   : >> { %v590_v10 = vsel %vm577_vm5, %v566_v49, %v568_v12  ;;  %7805 = vmatpush1.bf16.msra.mxu1 %v7804_v48  ;;  %1020 = vrot.lane.b32.xlu0 %v8775_v13, %s8654_s9  ;;  %v9146_v49 = vld [vmem:[#allocation2 + $0x50] sm:$0xff] }
  0xff   : >> { %1022 = vrot.lane.b32.xlu1 %v8801_v24, %s8654_s9 }
 0x100   : >> { %v570_v51 = vpop.permute.xlu0 %569 }
 0x101   : >> { %v572_v50 = vpop.permute.xlu1 %571  ;;  %v591_v11 = vsel %vm577_vm5, %v568_v12, %v570_v51  ;;  %638 = vst.msk [vmem:[#allocation3 + $0x220] sm:$0xff] %vm242_vm1, %v570_v51  ;;  %v9144_v12 = vld [vmem:[#allocation2 + $0x60] sm:$0xff] }
 0x102   : >> { %1024 = vrot.lane.b32.xlu0 %v8779_v15, %s8654_s9 }
 0x103   : >> { %1026 = vrot.lane.b32.xlu1 %v8777_v14, %s8654_s9 }
 0x104   : >> { %v574_v52 = vpop.permute.xlu0 %573 }
 0x105   : >> { %v576_v9 = vpop.permute.xlu1 %575  ;;  %v592_v24 = vsel %vm577_vm5, %v572_v50, %v574_v52 }
 0x106   : >> { %641 = vst.msk [vmem:[#allocation3 + $0x238] sm:$0xff] %vm242_vm1, %v576_v9  ;;  %v593_v13 = vsel %vm577_vm5, %v574_v52, %v576_v9  ;;  %1028 = vrot.lane.b32.xlu0 %v8829_v34, %s8654_s9  ;;  %v7808_v14 = vpack.c.bf16 %v592_v24, %v590_v10  ;;  %v9155_v24 = vld [vmem:[#allocation2 + $0x70] sm:$0xff]  ;;  %vm2831_vm5 = vcmask 547840  }
 0x107   : >> { %1030 = vrot.lane.b32.xlu1 %v8781_v16, %s8654_s9  ;;  %v7806_v53 = vpack.c.bf16 %v593_v13, %v591_v11  ;;  %v9157_v13 = vld [vmem:[#allocation2 + $0x68] sm:$0xff] }
 0x108   : >> { %v691_v55 = vpop.permute.xlu0 %690 }
 0x109   : >> { %v693_v54 = vpop.permute.xlu1 %692  ;;  %7807 = vmatprep.subr.bf16.mxu1 %v7806_v53 }
 0x10a   : >> { %v739_v15 = vsel %vm738_vm6, %v691_v55, %v693_v54  ;;  %7809 = vmatpush1.bf16.msra.mxu1 %v7808_v14  ;;  %1032 = vrot.lane.b32.xlu0 %v8787_v19, %s8654_s9  ;;  %v9164_v55 = vld [vmem:[#allocation2 + $0x88] sm:$0xff] }
 0x10b   : >> { %1034 = vrot.lane.b32.xlu1 %v8837_v36, %s8654_s9 }
 0x10c   : >> { %v695_v16 = vpop.permute.xlu0 %694 }
 0x10d   : >> { %v697_v56 = vpop.permute.xlu1 %696  ;;  %v740_v57 = vsel %vm738_vm6, %v693_v54, %v695_v16  ;;  %781 = vst.msk [vmem:[#allocation3 + $0x250] sm:$0xff] %vm242_vm1, %v695_v16 }
 0x10e   : >> { %1036 = vrot.lane.b32.xlu0 %v8791_v21, %s8654_s9 }
 0x10f   : >> { %1038 = vrot.lane.b32.xlu1 %v8789_v20, %s8654_s9 }
 0x110   : >> { %v699_v58 = vpop.permute.xlu0 %698 }
 0x111   : >> { %v701_v34 = vpop.permute.xlu1 %700  ;;  %v741_v36 = vsel %vm738_vm6, %v697_v56, %v699_v58 }
 0x112   : >> { %784 = vst.msk [vmem:[#allocation3 + $0x268] sm:$0xff] %vm242_vm1, %v701_v34  ;;  %v742_v19 = vsel %vm738_vm6, %v699_v58, %v701_v34  ;;  %1040 = vrot.lane.b32.xlu0 %v8847_v37, %s8654_s9  ;;  %v7812_v60 = vpack.c.bf16 %v741_v36, %v739_v15  ;;  %v9166_v15 = vld [vmem:[#allocation2 + $0x80] sm:$0xff]  ;;  %v9176_v58 = vld [vmem:[#allocation2 + $0x90] sm:$0xff] }
 0x113   : >> { %1042 = vrot.lane.b32.xlu1 %v8793_v22, %s8654_s9  ;;  %v7810_v59 = vpack.c.bf16 %v742_v19, %v740_v57  ;;  %v9174_v34 = vld [vmem:[#allocation2 + $0xa0] sm:$0xff] }
 0x114   : >> { %v703_v61 = vpop.permute.xlu0 %702 }
 0x115   : >> { %v705_v20 = vpop.permute.xlu1 %704  ;;  %7811 = vmatprep.subr.bf16.mxu1 %v7810_v59 }
 0x116   : >> { %v743_v21 = vsel %vm738_vm6, %v703_v61, %v705_v20  ;;  %7813 = vmatpush1.bf16.msra.mxu1 %v7812_v60  ;;  %1044 = vrot.lane.b32.xlu0 %v8803_v25, %s8654_s9 }
 0x117   : >> { %1046 = vrot.lane.b32.xlu1 %v8853_v38, %s8654_s9 }
 0x118   : >> { %v707_v63 = vpop.permute.xlu0 %706 }
 0x119   : >> { %v709_v62 = vpop.permute.xlu1 %708  ;;  %v744_v22 = vsel %vm738_vm6, %v705_v20, %v707_v63  ;;  %787 = vst.msk [vmem:[#allocation3 + $0x280] sm:$0xff] %vm242_vm1, %v707_v63 }
 0x11a   : >> { %1048 = vrot.lane.b32.xlu0 %v8807_v27, %s8654_s9 }
 0x11b   : >> { %1050 = vrot.lane.b32.xlu1 %v8805_v26, %s8654_s9 }
 0x11c   : >> { %v711_v1 = vpop.permute.xlu0 %710 }
 0x11d   : >> { %v713_v37 = vpop.permute.xlu1 %712  ;;  %v745_v38 = vsel %vm738_vm6, %v709_v62, %v711_v1  ;;  %v9187_v62 = vld [vmem:[#allocation2 + $0xa8] sm:$0xff] }
 0x11e   : >> { %790 = vst.msk [vmem:[#allocation3 + $0x298] sm:$0xff] %vm242_vm1, %v713_v37  ;;  %v746_v25 = vsel %vm738_vm6, %v711_v1, %v713_v37  ;;  %1052 = vrot.lane.b32.xlu0 %v8863_v39, %s8654_s9  ;;  %v7816_v4 = vpack.c.bf16 %v745_v38, %v743_v21  ;;  %v9185_v21 = vld [vmem:[#allocation2 + $0xb0] sm:$0xff]  ;;  %v9194_v1 = vld [vmem:[#allocation2 + $0xc8] sm:$0xff]  ;;  %v9196_v38 = vld [vmem:[#allocation2 + $0xc0] sm:$0xff] }
 0x11f   : >> { %1054 = vrot.lane.b32.xlu1 %v8809_v28, %s8654_s9  ;;  %v7814_v2 = vpack.c.bf16 %v746_v25, %v744_v22  ;;  %v9106_v28 = vld [vmem:[#allocation2] sm:$0xff] }
 0x120   : >> { %v715_v5 = vpop.permute.xlu0 %714 }
 0x121   : >> { %v717_v26 = vpop.permute.xlu1 %716  ;;  %7815 = vmatprep.subr.bf16.mxu1 %v7814_v2 }
 0x122   : >> { %v747_v27 = vsel %vm738_vm6, %v715_v5, %v717_v26  ;;  %7817 = vmatpush1.bf16.msra.mxu1 %v7816_v4  ;;  %1056 = vrot.lane.b32.xlu0 %v8813_v30, %s8654_s9  ;;  %v9116_v30 = vld [vmem:[#allocation2 + $0x10] sm:$0xff] }
 0x123   : >> { %1058 = vrot.lane.b32.xlu1 %v8869_v40, %s8654_s9  ;;  %v9114_v40 = vld [vmem:[#allocation2 + $0x20] sm:$0xff]  ;;  %v9206_v5 = vld [vmem:[#allocation2 + $0xd0] sm:$0xff]  ;;  %s8671_s9 = smov 48  }
 0x124   : >> { %v719_v39 = vpop.permute.xlu0 %718 }
 0x125   : >> { %v721_v7 = vpop.permute.xlu1 %720  ;;  %v748_v8 = vsel %vm738_vm6, %v717_v26, %v719_v39  ;;  %793 = vst.msk [vmem:[#allocation3 + $0x2b0] sm:$0xff] %vm242_vm1, %v719_v39  ;;  %v9204_v26 = vld [vmem:[#allocation2 + $0xe0] sm:$0xff] }
 0x126   : >> { %1173 = vrot.lane.b32.xlu0 %v9106_v28, %s8655_s10 }
 0x127   : >> { %1175 = vrot.lane.b32.xlu1 %v9104_v6, %s8655_s10 }
 0x128   : >> { %v723_v18 = vpop.permute.xlu0 %722 }
 0x129   : >> { %v725_v17 = vpop.permute.xlu1 %724  ;;  %v749_v23 = vsel %vm738_vm6, %v721_v7, %v723_v18 }
 0x12a   : >> { %796 = vst.msk [vmem:[#allocation3 + $0x2c8] sm:$0xff] %vm242_vm1, %v725_v17  ;;  %v750_v29 = vsel %vm738_vm6, %v723_v18, %v725_v17  ;;  %1177 = vrot.lane.b32.xlu0 %v9116_v30, %s8655_s10  ;;  %v7820_v32 = vpack.c.bf16 %v749_v23, %v747_v27  ;;  %v9215_v23 = vld [vmem:[#allocation2 + $0xf0] sm:$0xff] }
 0x12b   : >> { %1179 = vrot.lane.b32.xlu1 %v9114_v40, %s8655_s10  ;;  %v7818_v31 = vpack.c.bf16 %v750_v29, %v748_v8  ;;  %v9217_v29 = vld [vmem:[#allocation2 + $0xe8] sm:$0xff] }
 0x12c   : >> { %v727_v42 = vpop.permute.xlu0 %726 }
 0x12d   : >> { %v729_v41 = vpop.permute.xlu1 %728  ;;  %7819 = vmatprep.subr.bf16.mxu1 %v7818_v31 }
 0x12e   : >> { %v751_v43 = vsel %vm738_vm6, %v727_v42, %v729_v41  ;;  %7821 = vmatpush1.bf16.msra.mxu1 %v7820_v32  ;;  %1181 = vrot.lane.b32.xlu0 %v9127_v35, %s8655_s10 }
 0x12f   : >> { %1183 = vrot.lane.b32.xlu1 %v9125_v33, %s8655_s10 }
 0x130   : >> { %v731_v47 = vpop.permute.xlu0 %730 }
 0x131   : >> { %v733_v46 = vpop.permute.xlu1 %732  ;;  %v752_v48 = vsel %vm738_vm6, %v729_v41, %v731_v47  ;;  %799 = vst.msk [vmem:[#allocation3 + $0x2e0] sm:$0xff] %vm242_vm1, %v731_v47 }
 0x132   : >> { %1185 = vrot.lane.b32.xlu0 %v9136_v45, %s8655_s10 }
 0x133   : >> { %1187 = vrot.lane.b32.xlu1 %v9134_v44, %s8655_s10 }
 0x134   : >> { %v735_v50 = vpop.permute.xlu0 %734 }
 0x135   : >> { %v737_v10 = vpop.permute.xlu1 %736  ;;  %v753_v51 = vsel %vm738_vm6, %v733_v46, %v735_v50 }
 0x136   : >> { %802 = vst.msk [vmem:[#allocation3 + $0x2f8] sm:$0xff] %vm242_vm1, %v737_v10  ;;  %v754_v11 = vsel %vm738_vm6, %v735_v50, %v737_v10  ;;  %1189 = vrot.lane.b32.xlu0 %v9146_v49, %s8655_s10  ;;  %v7824_v52 = vpack.c.bf16 %v753_v51, %v751_v43  ;;  %vm2992_vm6 = vcmask 539648  }
 0x137   : >> { %1191 = vrot.lane.b32.xlu1 %v9144_v12, %s8655_s10  ;;  %v7822_v9 = vpack.c.bf16 %v754_v11, %v752_v48 }
 0x138   : >> { %v852_v14 = vpop.permute.xlu0 %851 }
 0x139   : >> { %v854_v53 = vpop.permute.xlu1 %853  ;;  %7823 = vmatprep.subr.bf16.mxu1 %v7822_v9 }
 0x13a   : >> { %v900_v54 = vsel %vm899_vm7, %v852_v14, %v854_v53  ;;  %7825 = vmatpush1.bf16.msra.mxu1 %v7824_v52  ;;  %1193 = vrot.lane.b32.xlu0 %v9157_v13, %s8655_s10 }
 0x13b   : >> { %1195 = vrot.lane.b32.xlu1 %v9155_v24, %s8655_s10 }
 0x13c   : >> { %v856_v16 = vpop.permute.xlu0 %855 }
 0x13d   : >> { %v858_v56 = vpop.permute.xlu1 %857  ;;  %v901_v57 = vsel %vm899_vm7, %v854_v53, %v856_v16  ;;  %942 = vst.msk [vmem:[#allocation3 + $0x310] sm:$0xff] %vm242_vm1, %v856_v16 }
 0x13e   : >> { %1197 = vrot.lane.b32.xlu0 %v9166_v15, %s8655_s10 }
 0x13f   : >> { %1199 = vrot.lane.b32.xlu1 %v9164_v55, %s8655_s10 }
 0x140   : >> { %v860_v19 = vpop.permute.xlu0 %859 }
 0x141   : >> { %v862_v36 = vpop.permute.xlu1 %861  ;;  %v902_v59 = vsel %vm899_vm7, %v858_v56, %v860_v19 }
 0x142   : >> { %945 = vst.msk [vmem:[#allocation3 + $0x328] sm:$0xff] %vm242_vm1, %v862_v36  ;;  %v903_v60 = vsel %vm899_vm7, %v860_v19, %v862_v36  ;;  %1201 = vrot.lane.b32.xlu0 %v9176_v58, %s8655_s10  ;;  %v7828_v61 = vpack.c.bf16 %v902_v59, %v900_v54 }
 0x143   : >> { %1203 = vrot.lane.b32.xlu1 %v9174_v34, %s8655_s10  ;;  %v7826_v20 = vpack.c.bf16 %v903_v60, %v901_v57 }
 0x144   : >> { %v864_v22 = vpop.permute.xlu0 %863 }
 0x145   : >> { %v866_v63 = vpop.permute.xlu1 %865  ;;  %7827 = vmatprep.subr.bf16.mxu0 %v7826_v20 }
 0x146   : >> { %v904_v37 = vsel %vm899_vm7, %v864_v22, %v866_v63  ;;  %7829 = vmatpush1.bf16.msra.mxu0 %v7828_v61  ;;  %1205 = vrot.lane.b32.xlu0 %v9187_v62, %s8655_s10 }
 0x147   : >> { %1207 = vrot.lane.b32.xlu1 %v9185_v21, %s8655_s10 }
 0x148   : >> { %v868_v2 = vpop.permute.xlu0 %867 }
 0x149   : >> { %v870_v25 = vpop.permute.xlu1 %869  ;;  %v905_v4 = vsel %vm899_vm7, %v866_v63, %v868_v2  ;;  %948 = vst.msk [vmem:[#allocation3 + $0x340] sm:$0xff] %vm242_vm1, %v868_v2 }
 0x14a   : >> { %1209 = vrot.lane.b32.xlu0 %v9196_v38, %s8655_s10 }
 0x14b   : >> { %1211 = vrot.lane.b32.xlu1 %v9194_v1, %s8655_s10 }
 0x14c   : >> { %v872_v7 = vpop.permute.xlu0 %871 }
 0x14d   : >> { %v874_v27 = vpop.permute.xlu1 %873  ;;  %v906_v39 = vsel %vm899_vm7, %v870_v25, %v872_v7 }
 0x14e   : >> { %951 = vst.msk [vmem:[#allocation3 + $0x358] sm:$0xff] %vm242_vm1, %v874_v27  ;;  %v907_v8 = vsel %vm899_vm7, %v872_v7, %v874_v27  ;;  %1213 = vrot.lane.b32.xlu0 %v9206_v5, %s8655_s10  ;;  %v7832_v18 = vpack.c.bf16 %v906_v39, %v904_v37 }
 0x14f   : >> { %1215 = vrot.lane.b32.xlu1 %v9204_v26, %s8655_s10  ;;  %v7830_v17 = vpack.c.bf16 %v907_v8, %v905_v4 }
 0x150   : >> { %v876_v32 = vpop.permute.xlu0 %875 }
 0x151   : >> { %v878_v31 = vpop.permute.xlu1 %877  ;;  %7831 = vmatprep.subr.bf16.mxu0 %v7830_v17 }
 0x152   : >> { %v908_v41 = vsel %vm899_vm7, %v876_v32, %v878_v31  ;;  %7833 = vmatpush1.bf16.msra.mxu0 %v7832_v18  ;;  %1217 = vrot.lane.b32.xlu0 %v9217_v29, %s8655_s10 }
 0x153   : >> { %1219 = vrot.lane.b32.xlu1 %v9215_v23, %s8655_s10  ;;  %s8672_s10 = smov 47  }
 0x154   : >> { %v880_v43 = vpop.permute.xlu0 %879 }
 0x155   : >> { %v882_v42 = vpop.permute.xlu1 %881  ;;  %v909_v46 = vsel %vm899_vm7, %v878_v31, %v880_v43  ;;  %954 = vst.msk [vmem:[#allocation3 + $0x370] sm:$0xff] %vm242_vm1, %v880_v43 }
 0x156   : >> { %1334 = vrot.lane.b32.xlu0 %v9106_v28, %s8656_s11 }
 0x157   : >> { %1336 = vrot.lane.b32.xlu1 %v9104_v6, %s8656_s11 }
 0x158   : >> { %v884_v48 = vpop.permute.xlu0 %883 }
 0x159   : >> { %v886_v47 = vpop.permute.xlu1 %885  ;;  %v910_v10 = vsel %vm899_vm7, %v882_v42, %v884_v48 }
 0x15a   : >> { %957 = vst.msk [vmem:[#allocation3 + $0x388] sm:$0xff] %vm242_vm1, %v886_v47  ;;  %v911_v50 = vsel %vm899_vm7, %v884_v48, %v886_v47  ;;  %1338 = vrot.lane.b32.xlu0 %v9116_v30, %s8656_s11  ;;  %v7836_v11 = vpack.c.bf16 %v910_v10, %v908_v41 }
 0x15b   : >> { %1340 = vrot.lane.b32.xlu1 %v9114_v40, %s8656_s11  ;;  %v7834_v51 = vpack.c.bf16 %v911_v50, %v909_v46 }
 0x15c   : >> { %v888_v52 = vpop.permute.xlu0 %887 }
 0x15d   : >> { %v890_v9 = vpop.permute.xlu1 %889  ;;  %7835 = vmatprep.subr.bf16.mxu0 %v7834_v51 }
 0x15e   : >> { %v912_v53 = vsel %vm899_vm7, %v888_v52, %v890_v9  ;;  %7837 = vmatpush1.bf16.msra.mxu0 %v7836_v11  ;;  %1342 = vrot.lane.b32.xlu0 %v9127_v35, %s8656_s11  ;;  %v4389_v52 = vld [vmem:[%s9300_s18 + $0x18] sm:$0xff] }
 0x15f   : >> { %1344 = vrot.lane.b32.xlu1 %v9125_v33, %s8656_s11  ;;  %5291 = vmatprep.mubr.f32.mxu0 %v4389_v52 }
 0x160   : >> { %v892_v54 = vpop.permute.xlu0 %891 }
 0x161   : >> { %v894_v14 = vpop.permute.xlu1 %893  ;;  %v913_v56 = vsel %vm899_vm7, %v890_v9, %v892_v54  ;;  %960 = vst.msk [vmem:[#allocation3 + $0x3a0] sm:$0xff] %vm242_vm1, %v892_v54 }
 0x162   : >> { %1346 = vrot.lane.b32.xlu0 %v9136_v45, %s8656_s11 }
 0x163   : >> { %1348 = vrot.lane.b32.xlu1 %v9134_v44, %s8656_s11 }
 0x164   : >> { %v896_v57 = vpop.permute.xlu0 %895 }
 0x165   : >> { %v898_v16 = vpop.permute.xlu1 %897  ;;  %v914_v36 = vsel %vm899_vm7, %v894_v14, %v896_v57 }
 0x166   : >> { %963 = vst.msk [vmem:[#allocation3 + $0x3b8] sm:$0xff] %vm242_vm1, %v898_v16  ;;  %v915_v19 = vsel %vm899_vm7, %v896_v57, %v898_v16  ;;  %1350 = vrot.lane.b32.xlu0 %v9146_v49, %s8656_s11  ;;  %v7840_v60 = vpack.c.bf16 %v914_v36, %v912_v53  ;;  %vm3153_vm7 = vcmask 531456  }
 0x167   : >> { %1352 = vrot.lane.b32.xlu1 %v9144_v12, %s8656_s11  ;;  %v7838_v59 = vpack.c.bf16 %v915_v19, %v913_v56 }
 0x168   : >> { %v1013_v61 = vpop.permute.xlu0 %1012 }
 0x169   : >> { %v1015_v20 = vpop.permute.xlu1 %1014  ;;  %7839 = vmatprep.subr.bf16.mxu0 %v7838_v59 }
 0x16a   : >> { %v1061_v63 = vsel %vm1060_vm8, %v1013_v61, %v1015_v20  ;;  %7841 = vmatpush1.bf16.msra.mxu0 %v7840_v60  ;;  %1354 = vrot.lane.b32.xlu0 %v9157_v13, %s8656_s11 }
 0x16b   : >> { %1356 = vrot.lane.b32.xlu1 %v9155_v24, %s8656_s11 }
 0x16c   : >> { %v1017_v37 = vpop.permute.xlu0 %1016 }
 0x16d   : >> { %v1019_v22 = vpop.permute.xlu1 %1018  ;;  %v1062_v25 = vsel %vm1060_vm8, %v1015_v20, %v1017_v37  ;;  %1103 = vst.msk [vmem:[#allocation3 + $0x3d0] sm:$0xff] %vm242_vm1, %v1017_v37 }
 0x16e   : >> { %1358 = vrot.lane.b32.xlu0 %v9166_v15, %s8656_s11 }
 0x16f   : >> { %1360 = vrot.lane.b32.xlu1 %v9164_v55, %s8656_s11 }
 0x170   : >> { %v1021_v4 = vpop.permute.xlu0 %1020 }
 0x171   : >> { %v1023_v2 = vpop.permute.xlu1 %1022  ;;  %v1063_v27 = vsel %vm1060_vm8, %v1019_v22, %v1021_v4 }
 0x172   : >> { %1106 = vst.msk [vmem:[#allocation3 + $0x3e8] sm:$0xff] %vm242_vm1, %v1023_v2  ;;  %v1064_v7 = vsel %vm1060_vm8, %v1021_v4, %v1023_v2  ;;  %1362 = vrot.lane.b32.xlu0 %v9176_v58, %s8656_s11  ;;  %v7844_v8 = vpack.c.bf16 %v1063_v27, %v1061_v63 }
 0x173   : >> { %1364 = vrot.lane.b32.xlu1 %v9174_v34, %s8656_s11  ;;  %v7842_v39 = vpack.c.bf16 %v1064_v7, %v1062_v25 }
 0x174   : >> { %v1025_v18 = vpop.permute.xlu0 %1024 }
 0x175   : >> { %v1027_v17 = vpop.permute.xlu1 %1026  ;;  %7843 = vmatprep.subr.bf16.mxu0 %v7842_v39 }
 0x176   : >> { %v1065_v31 = vsel %vm1060_vm8, %v1025_v18, %v1027_v17  ;;  %7845 = vmatpush1.bf16.msra.mxu0 %v7844_v8  ;;  %1366 = vrot.lane.b32.xlu0 %v9187_v62, %s8656_s11 }
 0x177   : >> { %1368 = vrot.lane.b32.xlu1 %v9185_v21, %s8656_s11 }
 0x178   : >> { %v1029_v41 = vpop.permute.xlu0 %1028 }
 0x179   : >> { %v1031_v32 = vpop.permute.xlu1 %1030  ;;  %v1066_v42 = vsel %vm1060_vm8, %v1027_v17, %v1029_v41  ;;  %1109 = vst.msk [vmem:[#allocation3 + $0x400] sm:$0xff] %vm242_vm1, %v1029_v41 }
 0x17a   : >> { %1370 = vrot.lane.b32.xlu0 %v9196_v38, %s8656_s11 }
 0x17b   : >> { %1372 = vrot.lane.b32.xlu1 %v9194_v1, %s8656_s11 }
 0x17c   : >> { %v1033_v46 = vpop.permute.xlu0 %1032 }
 0x17d   : >> { %v1035_v43 = vpop.permute.xlu1 %1034  ;;  %v1067_v47 = vsel %vm1060_vm8, %v1031_v32, %v1033_v46 }
 0x17e   : >> { %1112 = vst.msk [vmem:[#allocation3 + $0x418] sm:$0xff] %vm242_vm1, %v1035_v43  ;;  %v1068_v48 = vsel %vm1060_vm8, %v1033_v46, %v1035_v43  ;;  %1374 = vrot.lane.b32.xlu0 %v9206_v5, %s8656_s11  ;;  %v7848_v50 = vpack.c.bf16 %v1067_v47, %v1065_v31 }
 0x17f   : >> { %1376 = vrot.lane.b32.xlu1 %v9204_v26, %s8656_s11  ;;  %v7846_v10 = vpack.c.bf16 %v1068_v48, %v1066_v42 }
 0x180   : >> { %v1037_v11 = vpop.permute.xlu0 %1036 }
 0x181   : >> { %v1039_v51 = vpop.permute.xlu1 %1038  ;;  %7847 = vmatprep.subr.bf16.mxu0 %v7846_v10 }
 0x182   : >> { %v1069_v9 = vsel %vm1060_vm8, %v1037_v11, %v1039_v51  ;;  %7849 = vmatpush1.bf16.msra.mxu0 %v7848_v50  ;;  %1378 = vrot.lane.b32.xlu0 %v9217_v29, %s8656_s11 }
 0x183   : >> { %1380 = vrot.lane.b32.xlu1 %v9215_v23, %s8656_s11  ;;  %s8673_s11 = smov 46  }
 0x184   : >> { %v1041_v14 = vpop.permute.xlu0 %1040 }
 0x185   : >> { %v1043_v53 = vpop.permute.xlu1 %1042  ;;  %v1070_v54 = vsel %vm1060_vm8, %v1039_v51, %v1041_v14  ;;  %1115 = vst.msk [vmem:[#allocation3 + $0x430] sm:$0xff] %vm242_vm1, %v1041_v14 }
 0x186   : >> { %1495 = vrot.lane.b32.xlu0 %v9106_v28, %s8657_s21 }
 0x187   : >> { %1497 = vrot.lane.b32.xlu1 %v9104_v6, %s8657_s21 }
 0x188   : >> { %v1045_v16 = vpop.permute.xlu0 %1044 }
 0x189   : >> { %v1047_v56 = vpop.permute.xlu1 %1046  ;;  %v1071_v57 = vsel %vm1060_vm8, %v1043_v53, %v1045_v16 }
 0x18a   : >> { %1118 = vst.msk [vmem:[#allocation3 + $0x448] sm:$0xff] %vm242_vm1, %v1047_v56  ;;  %v1072_v36 = vsel %vm1060_vm8, %v1045_v16, %v1047_v56  ;;  %1499 = vrot.lane.b32.xlu0 %v9116_v30, %s8657_s21  ;;  %v7852_v59 = vpack.c.bf16 %v1071_v57, %v1069_v9 }
 0x18b   : >> { %1501 = vrot.lane.b32.xlu1 %v9114_v40, %s8657_s21  ;;  %v7850_v19 = vpack.c.bf16 %v1072_v36, %v1070_v54 }
 0x18c   : >> { %v1049_v20 = vpop.permute.xlu0 %1048 }
 0x18d   : >> { %v1051_v60 = vpop.permute.xlu1 %1050  ;;  %7851 = vmatprep.subr.bf16.mxu0 %v7850_v19 }
 0x18e   : >> { %v1073_v61 = vsel %vm1060_vm8, %v1049_v20, %v1051_v60  ;;  %7853 = vmatpush1.bf16.msra.mxu0 %v7852_v59  ;;  %1503 = vrot.lane.b32.xlu0 %v9127_v35, %s8657_s21 }
 0x18f   : >> { %1505 = vrot.lane.b32.xlu1 %v9125_v33, %s8657_s21 }
 0x190   : >> { %v1053_v22 = vpop.permute.xlu0 %1052 }
 0x191   : >> { %v1055_v63 = vpop.permute.xlu1 %1054  ;;  %v1074_v37 = vsel %vm1060_vm8, %v1051_v60, %v1053_v22  ;;  %1121 = vst.msk [vmem:[#allocation3 + $0x460] sm:$0xff] %vm242_vm1, %v1053_v22 }
 0x192   : >> { %1507 = vrot.lane.b32.xlu0 %v9136_v45, %s8657_s21 }
 0x193   : >> { %1509 = vrot.lane.b32.xlu1 %v9134_v44, %s8657_s21 }
 0x194   : >> { %v1057_v2 = vpop.permute.xlu0 %1056 }
 0x195   : >> { %v1059_v25 = vpop.permute.xlu1 %1058  ;;  %v1075_v4 = vsel %vm1060_vm8, %v1055_v63, %v1057_v2 }
 0x196   : >> { %1124 = vst.msk [vmem:[#allocation3 + $0x478] sm:$0xff] %vm242_vm1, %v1059_v25  ;;  %v1076_v27 = vsel %vm1060_vm8, %v1057_v2, %v1059_v25  ;;  %1511 = vrot.lane.b32.xlu0 %v9146_v49, %s8657_s21  ;;  %v7856_v39 = vpack.c.bf16 %v1075_v4, %v1073_v61  ;;  %vm3506_vm8 = vcmask 392192  }
 0x197   : >> { %1513 = vrot.lane.b32.xlu1 %v9144_v12, %s8657_s21  ;;  %v7854_v7 = vpack.c.bf16 %v1076_v27, %v1074_v37 }
 0x198   : >> { %v1174_v17 = vpop.permute.xlu0 %1173 }
 0x199   : >> { %v1176_v8 = vpop.permute.xlu1 %1175  ;;  %7855 = vmatprep.subr.bf16.mxu0 %v7854_v7 }
 0x19a   : >> { %v1222_v18 = vsel %vm1221_vm9, %v1174_v17, %v1176_v8  ;;  %7857 = vmatpush1.bf16.msra.mxu0 %v7856_v39  ;;  %1515 = vrot.lane.b32.xlu0 %v9157_v13, %s8657_s21 }
 0x19b   : >> { %1517 = vrot.lane.b32.xlu1 %v9155_v24, %s8657_s21 }
 0x19c   : >> { %v1178_v32 = vpop.permute.xlu0 %1177 }
 0x19d   : >> { %v1180_v31 = vpop.permute.xlu1 %1179  ;;  %v1223_v41 = vsel %vm1221_vm9, %v1176_v8, %v1178_v32  ;;  %1264 = vst.msk [vmem:[#allocation3 + $0x490] sm:$0xff] %vm242_vm1, %v1178_v32 }
 0x19e   : >> { %1519 = vrot.lane.b32.xlu0 %v9166_v15, %s8657_s21 }
 0x19f   : >> { %1521 = vrot.lane.b32.xlu1 %v9164_v55, %s8657_s21 }
 0x1a0   : >> { %v1182_v43 = vpop.permute.xlu0 %1181 }
 0x1a1   : >> { %v1184_v42 = vpop.permute.xlu1 %1183  ;;  %v1224_v46 = vsel %vm1221_vm9, %v1180_v31, %v1182_v43 }
 0x1a2   : >> { %1267 = vst.msk [vmem:[#allocation3 + $0x4a8] sm:$0xff] %vm242_vm1, %v1184_v42  ;;  %v1225_v47 = vsel %vm1221_vm9, %v1182_v43, %v1184_v42  ;;  %1523 = vrot.lane.b32.xlu0 %v9176_v58, %s8657_s21  ;;  %v7860_v10 = vpack.c.bf16 %v1224_v46, %v1222_v18 }
 0x1a3   : >> { %1525 = vrot.lane.b32.xlu1 %v9174_v34, %s8657_s21  ;;  %v7858_v48 = vpack.c.bf16 %v1225_v47, %v1223_v41 }
 0x1a4   : >> { %v1186_v51 = vpop.permute.xlu0 %1185 }
 0x1a5   : >> { %v1188_v50 = vpop.permute.xlu1 %1187  ;;  %7859 = vmatprep.subr.bf16.mxu0 %v7858_v48 }
 0x1a6   : >> { %v1226_v11 = vsel %vm1221_vm9, %v1186_v51, %v1188_v50  ;;  %7861 = vmatpush1.bf16.msra.mxu0 %v7860_v10  ;;  %1527 = vrot.lane.b32.xlu0 %v9187_v62, %s8657_s21 }
 0x1a7   : >> { %1529 = vrot.lane.b32.xlu1 %v9185_v21, %s8657_s21 }
 0x1a8   : >> { %v1190_v52 = vpop.permute.xlu0 %1189 }
 0x1a9   : >> { %v1192_v9 = vpop.permute.xlu1 %1191  ;;  %v1227_v53 = vsel %vm1221_vm9, %v1188_v50, %v1190_v52  ;;  %1270 = vst.msk [vmem:[#allocation3 + $0x4c0] sm:$0xff] %vm242_vm1, %v1190_v52 }
 0x1aa   : >> { %1531 = vrot.lane.b32.xlu0 %v9196_v38, %s8657_s21 }
 0x1ab   : >> { %1533 = vrot.lane.b32.xlu1 %v9194_v1, %s8657_s21 }
 0x1ac   : >> { %v1194_v54 = vpop.permute.xlu0 %1193 }
 0x1ad   : >> { %v1196_v14 = vpop.permute.xlu1 %1195  ;;  %v1228_v56 = vsel %vm1221_vm9, %v1192_v9, %v1194_v54 }
 0x1ae   : >> { %1273 = vst.msk [vmem:[#allocation3 + $0x4d8] sm:$0xff] %vm242_vm1, %v1196_v14  ;;  %v1229_v16 = vsel %vm1221_vm9, %v1194_v54, %v1196_v14  ;;  %1535 = vrot.lane.b32.xlu0 %v9206_v5, %s8657_s21  ;;  %v7864_v36 = vpack.c.bf16 %v1228_v56, %v1226_v11 }
 0x1af   : >> { %1537 = vrot.lane.b32.xlu1 %v9204_v26, %s8657_s21  ;;  %v7862_v57 = vpack.c.bf16 %v1229_v16, %v1227_v53  ;;  %v9447_v53 = vld [vmem:[#allocation2 + $0x8] sm:$0xff] }
 0x1b0   : >> { %v1198_v59 = vpop.permute.xlu0 %1197 }
 0x1b1   : >> { %v1200_v19 = vpop.permute.xlu1 %1199  ;;  %7863 = vmatprep.subr.bf16.mxu0 %v7862_v57 }
 0x1b2   : >> { %v1230_v60 = vsel %vm1221_vm9, %v1198_v59, %v1200_v19  ;;  %7865 = vmatpush1.bf16.msra.mxu0 %v7864_v36  ;;  %1539 = vrot.lane.b32.xlu0 %v9217_v29, %s8657_s21 }
 0x1b3   : >> { %1541 = vrot.lane.b32.xlu1 %v9215_v23, %s8657_s21 }
 0x1b4   : >> { %v1202_v61 = vpop.permute.xlu0 %1201 }
 0x1b5   : >> { %v1204_v20 = vpop.permute.xlu1 %1203  ;;  %v1231_v63 = vsel %vm1221_vm9, %v1200_v19, %v1202_v61  ;;  %1276 = vst.msk [vmem:[#allocation3 + $0x4f0] sm:$0xff] %vm242_vm1, %v1202_v61 }
 0x1b6   : >> { %1656 = vrot.lane.b32.xlu0 %v9106_v28, %s8658_s22 }
 0x1b7   : >> { %1658 = vrot.lane.b32.xlu1 %v9104_v6, %s8658_s22 }
 0x1b8   : >> { %v1206_v37 = vpop.permute.xlu0 %1205 }
 0x1b9   : >> { %v1208_v22 = vpop.permute.xlu1 %1207  ;;  %v1232_v25 = vsel %vm1221_vm9, %v1204_v20, %v1206_v37  ;;  %v9470_v20 = vld [vmem:[#allocation2 + $0x28] sm:$0xff] }
 0x1ba   : >> { %1279 = vst.msk [vmem:[#allocation3 + $0x508] sm:$0xff] %vm242_vm1, %v1208_v22  ;;  %v1233_v2 = vsel %vm1221_vm9, %v1206_v37, %v1208_v22  ;;  %1660 = vrot.lane.b32.xlu0 %v9116_v30, %s8658_s22  ;;  %v7868_v27 = vpack.c.bf16 %v1232_v25, %v1230_v60  ;;  %v9468_v60 = vld [vmem:[#allocation2 + $0x30] sm:$0xff]  ;;  %v9477_v37 = vld [vmem:[#allocation2 + $0x48] sm:$0xff]  ;;  %v9479_v25 = vld [vmem:[#allocation2 + $0x40] sm:$0xff] }
 0x1bb   : >> { %1662 = vrot.lane.b32.xlu1 %v9114_v40, %s8658_s22  ;;  %v7866_v4 = vpack.c.bf16 %v1233_v2, %v1231_v63 }
 0x1bc   : >> { %v1210_v7 = vpop.permute.xlu0 %1209 }
 0x1bd   : >> { %v1212_v6 = vpop.permute.xlu1 %1211  ;;  %7867 = vmatprep.subr.bf16.mxu0 %v7866_v4 }
 0x1be   : >> { %v1234_v28 = vsel %vm1221_vm9, %v1210_v7, %v1212_v6  ;;  %7869 = vmatpush1.bf16.msra.mxu0 %v7868_v27  ;;  %1664 = vrot.lane.b32.xlu0 %v9127_v35, %s8658_s22  ;;  %v9489_v7 = vld [vmem:[#allocation2 + $0x50] sm:$0xff] }
 0x1bf   : >> { %1666 = vrot.lane.b32.xlu1 %v9125_v33, %s8658_s22 }
 0x1c0   : >> { %v1214_v8 = vpop.permute.xlu0 %1213 }
 0x1c1   : >> { %v1216_v39 = vpop.permute.xlu1 %1215  ;;  %v1235_v40 = vsel %vm1221_vm9, %v1212_v6, %v1214_v8  ;;  %1282 = vst.msk [vmem:[#allocation3 + $0x520] sm:$0xff] %vm242_vm1, %v1214_v8  ;;  %v9487_v6 = vld [vmem:[#allocation2 + $0x60] sm:$0xff] }
 0x1c2   : >> { %1668 = vrot.lane.b32.xlu0 %v9136_v45, %s8658_s22 }
 0x1c3   : >> { %1670 = vrot.lane.b32.xlu1 %v9134_v44, %s8658_s22 }
 0x1c4   : >> { %v1218_v17 = vpop.permute.xlu0 %1217 }
 0x1c5   : >> { %v1220_v30 = vpop.permute.xlu1 %1219  ;;  %v1236_v33 = vsel %vm1221_vm9, %v1216_v39, %v1218_v17 }
 0x1c6   : >> { %1285 = vst.msk [vmem:[#allocation3 + $0x538] sm:$0xff] %vm242_vm1, %v1220_v30  ;;  %v1237_v35 = vsel %vm1221_vm9, %v1218_v17, %v1220_v30  ;;  %1672 = vrot.lane.b32.xlu0 %v9146_v49, %s8658_s22  ;;  %v7872_v44 = vpack.c.bf16 %v1236_v33, %v1234_v28  ;;  %v9498_v33 = vld [vmem:[#allocation2 + $0x70] sm:$0xff]  ;;  %vm3707_vm9 = vcmask 384000  }
 0x1c7   : >> { %1674 = vrot.lane.b32.xlu1 %v9144_v12, %s8658_s22  ;;  %v7870_v18 = vpack.c.bf16 %v1237_v35, %v1235_v40  ;;  %v9500_v35 = vld [vmem:[#allocation2 + $0x68] sm:$0xff] }
 0x1c8   : >> { %v1335_v32 = vpop.permute.xlu0 %1334 }
 0x1c9   : >> { %v1337_v31 = vpop.permute.xlu1 %1336  ;;  %7871 = vmatprep.subr.bf16.mxu0 %v7870_v18 }
 0x1ca   : >> { %v1383_v45 = vsel %vm1382_vm10, %v1335_v32, %v1337_v31  ;;  %7873 = vmatpush1.bf16.msra.mxu0 %v7872_v44  ;;  %1676 = vrot.lane.b32.xlu0 %v9157_v13, %s8658_s22  ;;  %v4388_v32 = vld [vmem:[%s9300_s18 + $0x10] sm:$0xff] }
 0x1cb   : >> { %1678 = vrot.lane.b32.xlu1 %v9155_v24, %s8658_s22 }
 0x1cc   : >> { %v1339_v12 = vpop.permute.xlu0 %1338 }
 0x1cd   : >> { %v1341_v41 = vpop.permute.xlu1 %1340  ;;  %v1384_v42 = vsel %vm1382_vm10, %v1337_v31, %v1339_v12  ;;  %1425 = vst.msk [vmem:[#allocation3 + $0x550] sm:$0xff] %vm242_vm1, %v1339_v12 }
 0x1ce   : >> { %1680 = vrot.lane.b32.xlu0 %v9166_v15, %s8658_s22 }
 0x1cf   : >> { %1682 = vrot.lane.b32.xlu1 %v9164_v55, %s8658_s22 }
 0x1d0   : >> { %v1343_v43 = vpop.permute.xlu0 %1342 }
 0x1d1   : >> { %v1345_v49 = vpop.permute.xlu1 %1344  ;;  %v1385_v24 = vsel %vm1382_vm10, %v1341_v41, %v1343_v43  ;;  %v9510_v41 = vld [vmem:[#allocation2 + $0x80] sm:$0xff] }
 0x1d2   : >> { %1428 = vst.msk [vmem:[#allocation3 + $0x568] sm:$0xff] %vm242_vm1, %v1345_v49  ;;  %v1386_v13 = vsel %vm1382_vm10, %v1343_v43, %v1345_v49  ;;  %1684 = vrot.lane.b32.xlu0 %v9176_v58, %s8658_s22  ;;  %v7876_v47 = vpack.c.bf16 %v1385_v24, %v1383_v45  ;;  %v9508_v45 = vld [vmem:[#allocation2 + $0x88] sm:$0xff]  ;;  %v9518_v43 = vld [vmem:[#allocation2 + $0xa0] sm:$0xff]  ;;  %v9520_v24 = vld [vmem:[#allocation2 + $0x90] sm:$0xff] }
 0x1d3   : >> { %1686 = vrot.lane.b32.xlu1 %v9174_v34, %s8658_s22  ;;  %v7874_v46 = vpack.c.bf16 %v1386_v13, %v1384_v42 }
 0x1d4   : >> { %v1347_v48 = vpop.permute.xlu0 %1346 }
 0x1d5   : >> { %v1349_v55 = vpop.permute.xlu1 %1348  ;;  %7875 = vmatprep.subr.bf16.mxu0 %v7874_v46 }
 0x1d6   : >> { %v1387_v15 = vsel %vm1382_vm10, %v1347_v48, %v1349_v55  ;;  %7877 = vmatpush1.bf16.msra.mxu0 %v7876_v47  ;;  %1688 = vrot.lane.b32.xlu0 %v9187_v62, %s8658_s22 }
 0x1d7   : >> { %1690 = vrot.lane.b32.xlu1 %v9185_v21, %s8658_s22 }
 0x1d8   : >> { %v1351_v50 = vpop.permute.xlu0 %1350 }
 0x1d9   : >> { %v1353_v10 = vpop.permute.xlu1 %1352  ;;  %v1388_v34 = vsel %vm1382_vm10, %v1349_v55, %v1351_v50  ;;  %1431 = vst.msk [vmem:[#allocation3 + $0x580] sm:$0xff] %vm242_vm1, %v1351_v50  ;;  %v9531_v50 = vld [vmem:[#allocation2 + $0xa8] sm:$0xff] }
 0x1da   : >> { %1692 = vrot.lane.b32.xlu0 %v9196_v38, %s8658_s22 }
 0x1db   : >> { %1694 = vrot.lane.b32.xlu1 %v9194_v1, %s8658_s22 }
 0x1dc   : >> { %v1355_v51 = vpop.permute.xlu0 %1354 }
 0x1dd   : >> { %v1357_v58 = vpop.permute.xlu1 %1356  ;;  %v1389_v21 = vsel %vm1382_vm10, %v1353_v10, %v1355_v51  ;;  %v9529_v10 = vld [vmem:[#allocation2 + $0xb0] sm:$0xff] }
 0x1de   : >> { %1434 = vst.msk [vmem:[#allocation3 + $0x598] sm:$0xff] %vm242_vm1, %v1357_v58  ;;  %v1390_v62 = vsel %vm1382_vm10, %v1355_v51, %v1357_v58  ;;  %1696 = vrot.lane.b32.xlu0 %v9206_v5, %s8658_s22  ;;  %v7880_v9 = vpack.c.bf16 %v1389_v21, %v1387_v15  ;;  %v9538_v21 = vld [vmem:[#allocation2 + $0xc8] sm:$0xff] }
 0x1df   : >> { %1698 = vrot.lane.b32.xlu1 %v9204_v26, %s8658_s22  ;;  %v7878_v11 = vpack.c.bf16 %v1390_v62, %v1388_v34  ;;  %v9449_v26 = vld [vmem:[#allocation2] sm:$0xff] }
 0x1e0   : >> { %v1359_v52 = vpop.permute.xlu0 %1358  ;;  %v9540_v62 = vld [vmem:[#allocation2 + $0xc0] sm:$0xff] }
 0x1e1   : >> { %v1361_v1 = vpop.permute.xlu1 %1360  ;;  %7879 = vmatprep.subr.bf16.mxu0 %v7878_v11 }
 0x1e2   : >> { %v1391_v38 = vsel %vm1382_vm10, %v1359_v52, %v1361_v1  ;;  %7881 = vmatpush1.bf16.msra.mxu0 %v7880_v9  ;;  %1700 = vrot.lane.b32.xlu0 %v9217_v29, %s8658_s22  ;;  %v9459_v29 = vld [vmem:[#allocation2 + $0x10] sm:$0xff]  ;;  %v9548_v52 = vld [vmem:[#allocation2 + $0xe0] sm:$0xff] }
 0x1e3   : >> { %1702 = vrot.lane.b32.xlu1 %v9215_v23, %s8658_s22  ;;  %v9457_v23 = vld [vmem:[#allocation2 + $0x20] sm:$0xff] }
 0x1e4   : >> { %v1363_v5 = vpop.permute.xlu0 %1362 }
 0x1e5   : >> { %v1365_v14 = vpop.permute.xlu1 %1364  ;;  %v1392_v54 = vsel %vm1382_vm10, %v1361_v1, %v1363_v5  ;;  %1437 = vst.msk [vmem:[#allocation3 + $0x5b0] sm:$0xff] %vm242_vm1, %v1363_v5 }
 0x1e6   : >> { %1817 = vrot.lane.b32.xlu0 %v9449_v26, %s8659_s23 }
 0x1e7   : >> { %1819 = vrot.lane.b32.xlu1 %v9447_v53, %s8659_s23 }
 0x1e8   : >> { %v1367_v16 = vpop.permute.xlu0 %1366 }
 0x1e9   : >> { %v1369_v56 = vpop.permute.xlu1 %1368  ;;  %v1393_v57 = vsel %vm1382_vm10, %v1365_v14, %v1367_v16 }
 0x1ea   : >> { %1440 = vst.msk [vmem:[#allocation3 + $0x5c8] sm:$0xff] %vm242_vm1, %v1369_v56  ;;  %v1394_v36 = vsel %vm1382_vm10, %v1367_v16, %v1369_v56  ;;  %1821 = vrot.lane.b32.xlu0 %v9459_v29, %s8659_s23  ;;  %v7884_v59 = vpack.c.bf16 %v1393_v57, %v1391_v38  ;;  %v9550_v38 = vld [vmem:[#allocation2 + $0xd0] sm:$0xff] }
 0x1eb   : >> { %1823 = vrot.lane.b32.xlu1 %v9457_v23, %s8659_s23  ;;  %v7882_v19 = vpack.c.bf16 %v1394_v36, %v1392_v54  ;;  %v9559_v36 = vld [vmem:[#allocation2 + $0xf0] sm:$0xff] }
 0x1ec   : >> { %v1371_v63 = vpop.permute.xlu0 %1370 }
 0x1ed   : >> { %v1373_v61 = vpop.permute.xlu1 %1372  ;;  %7883 = vmatprep.subr.bf16.mxu0 %v7882_v19  ;;  %v9561_v19 = vld [vmem:[#allocation2 + $0xe8] sm:$0xff] }
 0x1ee   : >> { %v1395_v22 = vsel %vm1382_vm10, %v1371_v63, %v1373_v61  ;;  %7885 = vmatpush1.bf16.msra.mxu0 %v7884_v59  ;;  %1825 = vrot.lane.b32.xlu0 %v9470_v20, %s8659_s23 }
 0x1ef   : >> { %1827 = vrot.lane.b32.xlu1 %v9468_v60, %s8659_s23 }
 0x1f0   : >> { %v1375_v4 = vpop.permute.xlu0 %1374 }
 0x1f1   : >> { %v1377_v2 = vpop.permute.xlu1 %1376  ;;  %v1396_v27 = vsel %vm1382_vm10, %v1373_v61, %v1375_v4  ;;  %1443 = vst.msk [vmem:[#allocation3 + $0x5e0] sm:$0xff] %vm242_vm1, %v1375_v4 }
 0x1f2   : >> { %1829 = vrot.lane.b32.xlu0 %v9479_v25, %s8659_s23 }
 0x1f3   : >> { %1831 = vrot.lane.b32.xlu1 %v9477_v37, %s8659_s23 }
 0x1f4   : >> { %v1379_v39 = vpop.permute.xlu0 %1378 }
 0x1f5   : >> { %v1381_v28 = vpop.permute.xlu1 %1380  ;;  %v1397_v8 = vsel %vm1382_vm10, %v1377_v2, %v1379_v39 }
 0x1f6   : >> { %1446 = vst.msk [vmem:[#allocation3 + $0x5f8] sm:$0xff] %vm242_vm1, %v1381_v28  ;;  %v1398_v40 = vsel %vm1382_vm10, %v1379_v39, %v1381_v28  ;;  %1833 = vrot.lane.b32.xlu0 %v9489_v7, %s8659_s23  ;;  %v7888_v17 = vpack.c.bf16 %v1397_v8, %v1395_v22 }
 0x1f7   : >> { %1835 = vrot.lane.b32.xlu1 %v9487_v6, %s8659_s23  ;;  %v7886_v30 = vpack.c.bf16 %v1398_v40, %v1396_v27 }
 0x1f8   : >> { %v1496_v44 = vpop.permute.xlu0 %1495 }
 0x1f9   : >> { %v1498_v18 = vpop.permute.xlu1 %1497  ;;  %7887 = vmatprep.subr.bf16.mxu0 %v7886_v30 }
 0x1fa   : >> { %v1544_v31 = vsel %vm1543_vm11, %v1496_v44, %v1498_v18  ;;  %7889 = vmatpush1.bf16.msra.mxu0 %v7888_v17  ;;  %1837 = vrot.lane.b32.xlu0 %v9500_v35, %s8659_s23 }
 0x1fb   : >> { %1839 = vrot.lane.b32.xlu1 %v9498_v33, %s8659_s23 }
 0x1fc   : >> { %v1500_v42 = vpop.permute.xlu0 %1499 }
 0x1fd   : >> { %v1502_v12 = vpop.permute.xlu1 %1501  ;;  %5292 = vmatmul.mubr.f32.vlgmr.msra.gmra.mrb[0].mxu0 %v4388_v32  ;;  %v1545_v49 = vsel %vm1543_vm11, %v1498_v18, %v1500_v42  ;;  %1586 = vst.msk [vmem:[#allocation3 + $0x610] sm:$0xff] %vm242_vm1, %v1500_v42 }
 0x1fe   : >> { %1841 = vrot.lane.b32.xlu0 %v9510_v41, %s8659_s23 }
 0x1ff   : >> { %1843 = vrot.lane.b32.xlu1 %v9508_v45, %s8659_s23 }
 0x200   : >> { %v1504_v46 = vpop.permute.xlu0 %1503 }
 0x201   : >> { %v1506_v13 = vpop.permute.xlu1 %1505  ;;  %v1546_v47 = vsel %vm1543_vm11, %v1502_v12, %v1504_v46 }
 0x202   : >> { %1589 = vst.msk [vmem:[#allocation3 + $0x628] sm:$0xff] %vm242_vm1, %v1506_v13  ;;  %v1547_v55 = vsel %vm1543_vm11, %v1504_v46, %v1506_v13  ;;  %1845 = vrot.lane.b32.xlu0 %v9520_v24, %s8659_s23  ;;  %v7892_v15 = vpack.c.bf16 %v1546_v47, %v1544_v31 }
 0x203   : >> { %1847 = vrot.lane.b32.xlu1 %v9518_v43, %s8659_s23  ;;  %v7890_v48 = vpack.c.bf16 %v1547_v55, %v1545_v49 }
 0x204   : >> { %v1508_v58 = vpop.permute.xlu0 %1507 }
 0x205   : >> { %v1510_v34 = vpop.permute.xlu1 %1509  ;;  %7891 = vmatprep.subr.bf16.mxu0 %v7890_v48  ;;  %v4402_v48 = vld [vmem:[%s9300_s18 + $0x80] sm:$0xff] }
 0x206   : >> { %v1548_v51 = vsel %vm1543_vm11, %v1508_v58, %v1510_v34  ;;  %7893 = vmatpush1.bf16.msra.mxu0 %v7892_v15  ;;  %1849 = vrot.lane.b32.xlu0 %v9531_v50, %s8659_s23  ;;  %v4401_v58 = vld [vmem:[%s9300_s18 + $0x78] sm:$0xff] }
 0x207   : >> { %1851 = vrot.lane.b32.xlu1 %v9529_v10, %s8659_s23  ;;  %5297 = vmatprep.mubr.f32.mxu0 %v4402_v48 }
 0x208   : >> { %v1512_v9 = vpop.permute.xlu0 %1511  ;;  %5298 = vmatmul.mubr.f32.gmra.mrb[2].mxu0 %v4401_v58  ;;  %v4391_v58 = vld [vmem:[%s9300_s18 + $0x28] sm:$0xff] }
 0x209   : >> { %v1514_v11 = vpop.permute.xlu1 %1513  ;;  %v1549_v1 = vsel %vm1543_vm11, %v1510_v34, %v1512_v9  ;;  %1592 = vst.msk [vmem:[#allocation3 + $0x640] sm:$0xff] %vm242_vm1, %v1512_v9 }
 0x20a   : >> { %1853 = vrot.lane.b32.xlu0 %v9540_v62, %s8659_s23 }
 0x20b   : >> { %1855 = vrot.lane.b32.xlu1 %v9538_v21, %s8659_s23 }
 0x20c   : >> { %v1516_v5 = vpop.permute.xlu0 %1515 }
 0x20d   : >> { %v1518_v14 = vpop.permute.xlu1 %1517  ;;  %v1550_v54 = vsel %vm1543_vm11, %v1514_v11, %v1516_v5  ;;  %v4415_v11 = vld [vmem:[%s9300_s18 + $0xe8] sm:$0xff] }
 0x20e   : >> { %1595 = vst.msk [vmem:[#allocation3 + $0x658] sm:$0xff] %vm242_vm1, %v1518_v14  ;;  %v1551_v56 = vsel %vm1543_vm11, %v1516_v5, %v1518_v14  ;;  %1857 = vrot.lane.b32.xlu0 %v9550_v38, %s8659_s23  ;;  %v7896_v57 = vpack.c.bf16 %v1550_v54, %v1548_v51  ;;  %5303 = vmatprep.mubr.f32.mxu0 %v4415_v11  ;;  %v4414_v14 = vld [vmem:[%s9300_s18 + $0xe0] sm:$0xff]  ;;  %v4428_v54 = vld [vmem:[%s9300_s18 + $0x150] sm:$0xff] }
 0x20f   : >> { %1859 = vrot.lane.b32.xlu1 %v9548_v52, %s8659_s23  ;;  %v7894_v16 = vpack.c.bf16 %v1551_v56, %v1549_v1  ;;  %5304 = vmatmul.mubr.f32.gmra.mrb[4].mxu0 %v4414_v14 }
 0x210   : >> { %v1520_v61 = vpop.permute.xlu0 %1519  ;;  %5309 = vmatprep.mubr.f32.mxu0 %v4428_v54 }
 0x211   : >> { %v1522_v59 = vpop.permute.xlu1 %1521  ;;  %7895 = vmatprep.subr.bf16.mxu0 %v7894_v16 }
 0x212   : >> { %v1552_v63 = vsel %vm1543_vm11, %v1520_v61, %v1522_v59  ;;  %7897 = vmatpush1.bf16.msra.mxu0 %v7896_v57  ;;  %1861 = vrot.lane.b32.xlu0 %v9561_v19, %s8659_s23  ;;  %v4427_v57 = vld [vmem:[%s9300_s18 + $0x148] sm:$0xff] }
 0x213   : >> { %1863 = vrot.lane.b32.xlu1 %v9559_v36, %s8659_s23  ;;  %5310 = vmatmul.mubr.f32.gmra.mrb[6].mxu0 %v4427_v57 }
 0x214   : >> { %v1524_v2 = vpop.permute.xlu0 %1523 }
 0x215   : >> { %v1526_v22 = vpop.permute.xlu1 %1525  ;;  %v1553_v4 = vsel %vm1543_vm11, %v1522_v59, %v1524_v2  ;;  %1598 = vst.msk [vmem:[#allocation3 + $0x670] sm:$0xff] %vm242_vm1, %v1524_v2  ;;  %v4441_v2 = vld [vmem:[%s9300_s18 + $0x1b8] sm:$0xff] }
 0x216   : >> { %1978 = vrot.lane.b32.xlu0 %v9449_v26, %s8660_s24  ;;  %5315 = vmatprep.mubr.f32.mxu0 %v4441_v2 }
 0x217   : >> { %1980 = vrot.lane.b32.xlu1 %v9447_v53, %s8660_s24 }
 0x218   : >> { %v1528_v28 = vpop.permute.xlu0 %1527 }
 0x219   : >> { %v1530_v27 = vpop.permute.xlu1 %1529  ;;  %v1554_v39 = vsel %vm1543_vm11, %v1526_v22, %v1528_v28 }
 0x21a   : >> { %1601 = vst.msk [vmem:[#allocation3 + $0x688] sm:$0xff] %vm242_vm1, %v1530_v27  ;;  %v1555_v8 = vsel %vm1543_vm11, %v1528_v28, %v1530_v27  ;;  %1982 = vrot.lane.b32.xlu0 %v9459_v29, %s8660_s24  ;;  %v7900_v30 = vpack.c.bf16 %v1554_v39, %v1552_v63  ;;  %v4440_v28 = vld [vmem:[%s9300_s18 + $0x1b0] sm:$0xff] }
 0x21b   : >> { %1984 = vrot.lane.b32.xlu1 %v9457_v23, %s8660_s24  ;;  %v7898_v40 = vpack.c.bf16 %v1555_v8, %v1553_v4  ;;  %5316 = vmatmul.mubr.f32.gmra.mrb[8].mxu0 %v4440_v28  ;;  %v4454_v8 = vld [vmem:[%s9300_s18 + $0x220] sm:$0xff] }
 0x21c   : >> { %v1532_v18 = vpop.permute.xlu0 %1531  ;;  %5321 = vmatprep.mubr.f32.mxu0 %v4454_v8 }
 0x21d   : >> { %v1534_v17 = vpop.permute.xlu1 %1533  ;;  %7899 = vmatprep.subr.bf16.mxu0 %v7898_v40 }
 0x21e   : >> { %v1556_v44 = vsel %vm1543_vm11, %v1532_v18, %v1534_v17  ;;  %7901 = vmatpush1.bf16.msra.mxu0 %v7900_v30  ;;  %1986 = vrot.lane.b32.xlu0 %v9470_v20, %s8660_s24 }
 0x21f   : >> { %1988 = vrot.lane.b32.xlu1 %v9468_v60, %s8660_s24 }
 0x220   : >> { %v1536_v32 = vpop.permute.xlu0 %1535 }
 0x221   : >> { %v1538_v31 = vpop.permute.xlu1 %1537  ;;  %v1557_v12 = vsel %vm1543_vm11, %v1534_v17, %v1536_v32  ;;  %1604 = vst.msk [vmem:[#allocation3 + $0x6a0] sm:$0xff] %vm242_vm1, %v1536_v32  ;;  %v4453_v17 = vld [vmem:[%s9300_s18 + $0x218] sm:$0xff] }
 0x222   : >> { %1990 = vrot.lane.b32.xlu0 %v9479_v25, %s8660_s24  ;;  %5322 = vmatmul.mubr.f32.gmra.mrb[10].mxu0 %v4453_v17 }
 0x223   : >> { %1992 = vrot.lane.b32.xlu1 %v9477_v37, %s8660_s24 }
 0x224   : >> { %v1540_v49 = vpop.permute.xlu0 %1539 }
 0x225   : >> { %v1542_v42 = vpop.permute.xlu1 %1541  ;;  %v1558_v13 = vsel %vm1543_vm11, %v1538_v31, %v1540_v49 }
 0x226   : >> { %1607 = vst.msk [vmem:[#allocation3 + $0x6b8] sm:$0xff] %vm242_vm1, %v1542_v42  ;;  %v1559_v46 = vsel %vm1543_vm11, %v1540_v49, %v1542_v42  ;;  %1994 = vrot.lane.b32.xlu0 %v9489_v7, %s8660_s24  ;;  %v7904_v55 = vpack.c.bf16 %v1558_v13, %v1556_v44  ;;  %v4467_v44 = vld [vmem:[%s9300_s18 + $0x288] sm:$0xff]  ;;  %vm3908_vm11 = vcmask 375808  }
 0x227   : >> { %1996 = vrot.lane.b32.xlu1 %v9487_v6, %s8660_s24  ;;  %v7902_v47 = vpack.c.bf16 %v1559_v46, %v1557_v12  ;;  %5327 = vmatprep.mubr.f32.mxu0 %v4467_v44  ;;  %v4466_v12 = vld [vmem:[%s9300_s18 + $0x280] sm:$0xff] }
 0x228   : >> { %v1657_v34 = vpop.permute.xlu0 %1656  ;;  %5328 = vmatmul.mubr.f32.gmra.mrb[12].mxu0 %v4466_v12 }
 0x229   : >> { %v1659_v15 = vpop.permute.xlu1 %1658  ;;  %7903 = vmatprep.subr.bf16.mxu0 %v7902_v47  ;;  %v4480_v47 = vld [vmem:[%s9300_s18 + $0x2f0] sm:$0xff] }
 0x22a   : >> { %v1705_v51 = vsel %vm1704_vm12, %v1657_v34, %v1659_v15  ;;  %7905 = vmatpush1.bf16.msra.mxu0 %v7904_v55  ;;  %1998 = vrot.lane.b32.xlu0 %v9500_v35, %s8660_s24 }
 0x22b   : >> { %2000 = vrot.lane.b32.xlu1 %v9498_v33, %s8660_s24  ;;  %5333 = vmatprep.mubr.f32.mxu0 %v4480_v47 }
 0x22c   : >> { %v1661_v1 = vpop.permute.xlu0 %1660 }
 0x22d   : >> { %v1663_v9 = vpop.permute.xlu1 %1662  ;;  %v1706_v5 = vsel %vm1704_vm12, %v1659_v15, %v1661_v1  ;;  %1747 = vst.msk [vmem:[#allocation3 + $0x6d0] sm:$0xff] %vm242_vm1, %v1661_v1  ;;  %v4479_v15 = vld [vmem:[%s9300_s18 + $0x2e8] sm:$0xff] }
 0x22e   : >> { %2002 = vrot.lane.b32.xlu0 %v9510_v41, %s8660_s24  ;;  %5334 = vmatmul.mubr.f32.gmra.mrb[14].mxu0 %v4479_v15 }
 0x22f   : >> { %2004 = vrot.lane.b32.xlu1 %v9508_v45, %s8660_s24  ;;  %5404 = vmatprep.mubr.f32.mxu0 %v4391_v58 }
 0x230   : >> { %v1665_v16 = vpop.permute.xlu0 %1664 }
 0x231   : >> { %v1667_v56 = vpop.permute.xlu1 %1666  ;;  %v1707_v59 = vsel %vm1704_vm12, %v1663_v9, %v1665_v16 }
 0x232   : >> { %1750 = vst.msk [vmem:[#allocation3 + $0x6e8] sm:$0xff] %vm242_vm1, %v1667_v56  ;;  %v1708_v61 = vsel %vm1704_vm12, %v1665_v16, %v1667_v56  ;;  %2006 = vrot.lane.b32.xlu0 %v9520_v24, %s8660_s24  ;;  %v7908_v22 = vpack.c.bf16 %v1707_v59, %v1705_v51 }
 0x233   : >> { %2008 = vrot.lane.b32.xlu1 %v9518_v43, %s8660_s24  ;;  %v7906_v63 = vpack.c.bf16 %v1708_v61, %v1706_v5 }
 0x234   : >> { %v1669_v27 = vpop.permute.xlu0 %1668 }
 0x235   : >> { %v1671_v4 = vpop.permute.xlu1 %1670  ;;  %7907 = vmatprep.subr.bf16.mxu0 %v7906_v63 }
 0x236   : >> { %v1709_v39 = vsel %vm1704_vm12, %v1669_v27, %v1671_v4  ;;  %7909 = vmatpush1.bf16.msra.mxu0 %v7908_v22  ;;  %2010 = vrot.lane.b32.xlu0 %v9531_v50, %s8660_s24 }
 0x237   : >> { %2012 = vrot.lane.b32.xlu1 %v9529_v10, %s8660_s24 }
 0x238   : >> { %v1673_v30 = vpop.permute.xlu0 %1672 }
 0x239   : >> { %v1675_v40 = vpop.permute.xlu1 %1674  ;;  %v1710_v18 = vsel %vm1704_vm12, %v1671_v4, %v1673_v30  ;;  %1753 = vst.msk [vmem:[#allocation3 + $0x700] sm:$0xff] %vm242_vm1, %v1673_v30 }
 0x23a   : >> { %2014 = vrot.lane.b32.xlu0 %v9540_v62, %s8660_s24 }
 0x23b   : >> { %2016 = vrot.lane.b32.xlu1 %v9538_v21, %s8660_s24 }
 0x23c   : >> { %v1677_v32 = vpop.permute.xlu0 %1676 }
 0x23d   : >> { %v1679_v31 = vpop.permute.xlu1 %1678  ;;  %v1711_v42 = vsel %vm1704_vm12, %v1675_v40, %v1677_v32 }
 0x23e   : >> { %1756 = vst.msk [vmem:[#allocation3 + $0x718] sm:$0xff] %vm242_vm1, %v1679_v31  ;;  %v1712_v49 = vsel %vm1704_vm12, %v1677_v32, %v1679_v31  ;;  %2018 = vrot.lane.b32.xlu0 %v9550_v38, %s8660_s24  ;;  %v7912_v46 = vpack.c.bf16 %v1711_v42, %v1709_v39 }
 0x23f   : >> { %2020 = vrot.lane.b32.xlu1 %v9548_v52, %s8660_s24  ;;  %v7910_v13 = vpack.c.bf16 %v1712_v49, %v1710_v18 }
 0x240   : >> { %v1681_v48 = vpop.permute.xlu0 %1680 }
 0x241   : >> { %v1683_v55 = vpop.permute.xlu1 %1682  ;;  %7911 = vmatprep.subr.bf16.mxu0 %v7910_v13 }
 0x242   : >> { %v1713_v34 = vsel %vm1704_vm12, %v1681_v48, %v1683_v55  ;;  %7913 = vmatpush1.bf16.msra.mxu0 %v7912_v46  ;;  %2022 = vrot.lane.b32.xlu0 %v9561_v19, %s8660_s24 }
 0x243   : >> { %2024 = vrot.lane.b32.xlu1 %v9559_v36, %s8660_s24 }
 0x244   : >> { %v1685_v11 = vpop.permute.xlu0 %1684 }
 0x245   : >> { %v1687_v51 = vpop.permute.xlu1 %1686  ;;  %v1714_v9 = vsel %vm1704_vm12, %v1683_v55, %v1685_v11  ;;  %1759 = vst.msk [vmem:[#allocation3 + $0x730] sm:$0xff] %vm242_vm1, %v1685_v11 }
 0x246   : >> { %2139 = vrot.lane.b32.xlu0 %v9449_v26, %s8661_s25 }
 0x247   : >> { %2141 = vrot.lane.b32.xlu1 %v9447_v53, %s8661_s25 }
 0x248   : >> { %v1689_v14 = vpop.permute.xlu0 %1688 }
 0x249   : >> { %v1691_v1 = vpop.permute.xlu1 %1690  ;;  %v1715_v5 = vsel %vm1704_vm12, %v1687_v51, %v1689_v14 }
 0x24a   : >> { %1762 = vst.msk [vmem:[#allocation3 + $0x748] sm:$0xff] %vm242_vm1, %v1691_v1  ;;  %v1716_v54 = vsel %vm1704_vm12, %v1689_v14, %v1691_v1  ;;  %2143 = vrot.lane.b32.xlu0 %v9459_v29, %s8661_s25  ;;  %v7916_v16 = vpack.c.bf16 %v1715_v5, %v1713_v34 }
 0x24b   : >> { %2145 = vrot.lane.b32.xlu1 %v9457_v23, %s8661_s25  ;;  %v7914_v56 = vpack.c.bf16 %v1716_v54, %v1714_v9 }
 0x24c   : >> { %v1693_v59 = vpop.permute.xlu0 %1692 }
 0x24d   : >> { %v1695_v57 = vpop.permute.xlu1 %1694  ;;  %7915 = vmatprep.subr.bf16.mxu0 %v7914_v56 }
 0x24e   : >> { %v1717_v61 = vsel %vm1704_vm12, %v1693_v59, %v1695_v57  ;;  %7917 = vmatpush1.bf16.msra.mxu0 %v7916_v16  ;;  %2147 = vrot.lane.b32.xlu0 %v9470_v20, %s8661_s25 }
 0x24f   : >> { %2149 = vrot.lane.b32.xlu1 %v9468_v60, %s8661_s25 }
 0x250   : >> { %v1697_v22 = vpop.permute.xlu0 %1696 }
 0x251   : >> { %v1699_v63 = vpop.permute.xlu1 %1698  ;;  %v1718_v2 = vsel %vm1704_vm12, %v1695_v57, %v1697_v22  ;;  %1765 = vst.msk [vmem:[#allocation3 + $0x760] sm:$0xff] %vm242_vm1, %v1697_v22 }
 0x252   : >> { %2151 = vrot.lane.b32.xlu0 %v9479_v25, %s8661_s25 }
 0x253   : >> { %2153 = vrot.lane.b32.xlu1 %v9477_v37, %s8661_s25 }
 0x254   : >> { %v1701_v27 = vpop.permute.xlu0 %1700 }
 0x255   : >> { %v1703_v4 = vpop.permute.xlu1 %1702  ;;  %v1719_v28 = vsel %vm1704_vm12, %v1699_v63, %v1701_v27 }
 0x256   : >> { %1768 = vst.msk [vmem:[#allocation3 + $0x778] sm:$0xff] %vm242_vm1, %v1703_v4  ;;  %v1720_v39 = vsel %vm1704_vm12, %v1701_v27, %v1703_v4  ;;  %2155 = vrot.lane.b32.xlu0 %v9489_v7, %s8661_s25  ;;  %v7920_v40 = vpack.c.bf16 %v1719_v28, %v1717_v61  ;;  %vm4109_vm12 = vcmask 367616  }
 0x257   : >> { %2157 = vrot.lane.b32.xlu1 %v9487_v6, %s8661_s25  ;;  %v7918_v8 = vpack.c.bf16 %v1720_v39, %v1718_v2 }
 0x258   : >> { %v1818_v17 = vpop.permute.xlu0 %1817 }
 0x259   : >> { %v1820_v30 = vpop.permute.xlu1 %1819  ;;  %7919 = vmatprep.subr.bf16.mxu0 %v7918_v8 }
 0x25a   : >> { %v1866_v18 = vsel %vm1865_vm13, %v1818_v17, %v1820_v30  ;;  %7921 = vmatpush1.bf16.msra.mxu0 %v7920_v40  ;;  %2159 = vrot.lane.b32.xlu0 %v9500_v35, %s8661_s25 }
 0x25b   : >> { %2161 = vrot.lane.b32.xlu1 %v9498_v33, %s8661_s25 }
 0x25c   : >> { %v1822_v31 = vpop.permute.xlu0 %1821 }
 0x25d   : >> { %v1824_v44 = vpop.permute.xlu1 %1823  ;;  %v1867_v32 = vsel %vm1865_vm13, %v1820_v30, %v1822_v31  ;;  %1908 = vst.msk [vmem:[#allocation3 + $0x790] sm:$0xff] %vm242_vm1, %v1822_v31 }
 0x25e   : >> { %2163 = vrot.lane.b32.xlu0 %v9510_v41, %s8661_s25 }
 0x25f   : >> { %2165 = vrot.lane.b32.xlu1 %v9508_v45, %s8661_s25 }
 0x260   : >> { %v1826_v42 = vpop.permute.xlu0 %1825 }
 0x261   : >> { %v1828_v12 = vpop.permute.xlu1 %1827  ;;  %v1868_v49 = vsel %vm1865_vm13, %v1824_v44, %v1826_v42 }
 0x262   : >> { %1911 = vst.msk [vmem:[#allocation3 + $0x7a8] sm:$0xff] %vm242_vm1, %v1828_v12  ;;  %v1869_v13 = vsel %vm1865_vm13, %v1826_v42, %v1828_v12  ;;  %2167 = vrot.lane.b32.xlu0 %v9520_v24, %s8661_s25  ;;  %v7924_v47 = vpack.c.bf16 %v1868_v49, %v1866_v18 }
 0x263   : >> { %2169 = vrot.lane.b32.xlu1 %v9518_v43, %s8661_s25  ;;  %v7922_v46 = vpack.c.bf16 %v1869_v13, %v1867_v32 }
 0x264   : >> { %v1830_v48 = vpop.permute.xlu0 %1829 }
 0x265   : >> { %v1832_v55 = vpop.permute.xlu1 %1831  ;;  %7923 = vmatprep.subr.bf16.mxu0 %v7922_v46 }
 0x266   : >> { %v1870_v15 = vsel %vm1865_vm13, %v1830_v48, %v1832_v55  ;;  %7925 = vmatpush1.bf16.msra.mxu0 %v7924_v47  ;;  %2171 = vrot.lane.b32.xlu0 %v9531_v50, %s8661_s25 }
 0x267   : >> { %2173 = vrot.lane.b32.xlu1 %v9529_v10, %s8661_s25 }
 0x268   : >> { %v1834_v58 = vpop.permute.xlu0 %1833 }
 0x269   : >> { %v1836_v34 = vpop.permute.xlu1 %1835  ;;  %v1871_v51 = vsel %vm1865_vm13, %v1832_v55, %v1834_v58  ;;  %1914 = vst.msk [vmem:[#allocation3 + $0x7c0] sm:$0xff] %vm242_vm1, %v1834_v58 }
 0x26a   : >> { %2175 = vrot.lane.b32.xlu0 %v9540_v62, %s8661_s25 }
 0x26b   : >> { %2177 = vrot.lane.b32.xlu1 %v9538_v21, %s8661_s25 }
 0x26c   : >> { %v1838_v9 = vpop.permute.xlu0 %1837 }
 0x26d   : >> { %v1840_v11 = vpop.permute.xlu1 %1839  ;;  %v1872_v1 = vsel %vm1865_vm13, %v1836_v34, %v1838_v9 }
 0x26e   : >> { %1917 = vst.msk [vmem:[#allocation3 + $0x7d8] sm:$0xff] %vm242_vm1, %v1840_v11  ;;  %v1873_v14 = vsel %vm1865_vm13, %v1838_v9, %v1840_v11  ;;  %2179 = vrot.lane.b32.xlu0 %v9550_v38, %s8661_s25  ;;  %v7928_v54 = vpack.c.bf16 %v1872_v1, %v1870_v15 }
 0x26f   : >> { %2181 = vrot.lane.b32.xlu1 %v9548_v52, %s8661_s25  ;;  %v7926_v5 = vpack.c.bf16 %v1873_v14, %v1871_v51  ;;  %v9799_v51 = vld [vmem:[#allocation2 + $0x8] sm:$0xff] }
 0x270   : >> { %v1842_v16 = vpop.permute.xlu0 %1841 }
 0x271   : >> { %v1844_v56 = vpop.permute.xlu1 %1843  ;;  %7927 = vmatprep.subr.bf16.mxu0 %v7926_v5 }
 0x272   : >> { %v1874_v57 = vsel %vm1865_vm13, %v1842_v16, %v1844_v56  ;;  %7929 = vmatpush1.bf16.msra.mxu0 %v7928_v54  ;;  %2183 = vrot.lane.b32.xlu0 %v9561_v19, %s8661_s25 }
 0x273   : >> { %2185 = vrot.lane.b32.xlu1 %v9559_v36, %s8661_s25 }
 0x274   : >> { %v1846_v61 = vpop.permute.xlu0 %1845 }
 0x275   : >> { %v1848_v59 = vpop.permute.xlu1 %1847  ;;  %v1875_v63 = vsel %vm1865_vm13, %v1844_v56, %v1846_v61  ;;  %1920 = vst.msk [vmem:[#allocation3 + $0x7f0] sm:$0xff] %vm242_vm1, %v1846_v61 }
 0x276   : >> { %2300 = vrot.lane.b32.xlu0 %v9449_v26, %s8662_s26 }
 0x277   : >> { %2302 = vrot.lane.b32.xlu1 %v9447_v53, %s8662_s26 }
 0x278   : >> { %v1850_v2 = vpop.permute.xlu0 %1849 }
 0x279   : >> { %v1852_v22 = vpop.permute.xlu1 %1851  ;;  %v1876_v4 = vsel %vm1865_vm13, %v1848_v59, %v1850_v2  ;;  %v9822_v59 = vld [vmem:[#allocation2 + $0x28] sm:$0xff] }
 0x27a   : >> { %1923 = vst.msk [vmem:[#allocation3 + $0x808] sm:$0xff] %vm242_vm1, %v1852_v22  ;;  %v1877_v27 = vsel %vm1865_vm13, %v1850_v2, %v1852_v22  ;;  %2304 = vrot.lane.b32.xlu0 %v9459_v29, %s8662_s26  ;;  %v7932_v39 = vpack.c.bf16 %v1876_v4, %v1874_v57  ;;  %v9820_v57 = vld [vmem:[#allocation2 + $0x30] sm:$0xff]  ;;  %v9829_v2 = vld [vmem:[#allocation2 + $0x48] sm:$0xff]  ;;  %v9831_v4 = vld [vmem:[#allocation2 + $0x40] sm:$0xff] }
 0x27b   : >> { %2306 = vrot.lane.b32.xlu1 %v9457_v23, %s8662_s26  ;;  %v7930_v28 = vpack.c.bf16 %v1877_v27, %v1875_v63 }
 0x27c   : >> { %v1854_v8 = vpop.permute.xlu0 %1853 }
 0x27d   : >> { %v1856_v53 = vpop.permute.xlu1 %1855  ;;  %7931 = vmatprep.subr.bf16.mxu0 %v7930_v28 }
 0x27e   : >> { %v1878_v26 = vsel %vm1865_vm13, %v1854_v8, %v1856_v53  ;;  %7933 = vmatpush1.bf16.msra.mxu0 %v7932_v39  ;;  %2308 = vrot.lane.b32.xlu0 %v9470_v20, %s8662_s26  ;;  %v9841_v8 = vld [vmem:[#allocation2 + $0x50] sm:$0xff] }
 0x27f   : >> { %2310 = vrot.lane.b32.xlu1 %v9468_v60, %s8662_s26 }
 0x280   : >> { %v1858_v30 = vpop.permute.xlu0 %1857 }
 0x281   : >> { %v1860_v40 = vpop.permute.xlu1 %1859  ;;  %v1879_v23 = vsel %vm1865_vm13, %v1856_v53, %v1858_v30  ;;  %1926 = vst.msk [vmem:[#allocation3 + $0x820] sm:$0xff] %vm242_vm1, %v1858_v30  ;;  %v9839_v53 = vld [vmem:[#allocation2 + $0x60] sm:$0xff] }
 0x282   : >> { %2312 = vrot.lane.b32.xlu0 %v9479_v25, %s8662_s26 }
 0x283   : >> { %2314 = vrot.lane.b32.xlu1 %v9477_v37, %s8662_s26 }
 0x284   : >> { %v1862_v17 = vpop.permute.xlu0 %1861 }
 0x285   : >> { %v1864_v29 = vpop.permute.xlu1 %1863  ;;  %v1880_v60 = vsel %vm1865_vm13, %v1860_v40, %v1862_v17 }
 0x286   : >> { %1929 = vst.msk [vmem:[#allocation3 + $0x838] sm:$0xff] %vm242_vm1, %v1864_v29  ;;  %v1881_v20 = vsel %vm1865_vm13, %v1862_v17, %v1864_v29  ;;  %2316 = vrot.lane.b32.xlu0 %v9489_v7, %s8662_s26  ;;  %v7936_v37 = vpack.c.bf16 %v1880_v60, %v1878_v26  ;;  %v9850_v60 = vld [vmem:[#allocation2 + $0x70] sm:$0xff]  ;;  %vm6848_vm13 = vcmask (!%p7351_p8), 1047888  }
 0x287   : >> { %2318 = vrot.lane.b32.xlu1 %v9487_v6, %s8662_s26  ;;  %v7934_v18 = vpack.c.bf16 %v1881_v20, %v1879_v23  ;;  %v9852_v20 = vld [vmem:[#allocation2 + $0x68] sm:$0xff] }
 0x288   : >> { %v1979_v31 = vpop.permute.xlu0 %1978 }
 0x289   : >> { %v1981_v44 = vpop.permute.xlu1 %1980  ;;  %7935 = vmatprep.subr.bf16.mxu0 %v7934_v18 }
 0x28a   : >> { %v2027_v25 = vsel %vm2026_vm14, %v1979_v31, %v1981_v44  ;;  %7937 = vmatpush1.bf16.msra.mxu0 %v7936_v37  ;;  %2320 = vrot.lane.b32.xlu0 %v9500_v35, %s8662_s26  ;;  %v4390_v31 = vld [vmem:[%s9300_s18 + $0x20] sm:$0xff] }
 0x28b   : >> { %2322 = vrot.lane.b32.xlu1 %v9498_v33, %s8662_s26 }
 0x28c   : >> { %v1983_v6 = vpop.permute.xlu0 %1982 }
 0x28d   : >> { %v1985_v32 = vpop.permute.xlu1 %1984  ;;  %v2028_v12 = vsel %vm2026_vm14, %v1981_v44, %v1983_v6  ;;  %2069 = vst.msk [vmem:[#allocation3 + $0x850] sm:$0xff] %vm242_vm1, %v1983_v6 }
 0x28e   : >> { %2324 = vrot.lane.b32.xlu0 %v9510_v41, %s8662_s26 }
 0x28f   : >> { %2326 = vrot.lane.b32.xlu1 %v9508_v45, %s8662_s26 }
 0x290   : >> { %v1987_v42 = vpop.permute.xlu0 %1986 }
 0x291   : >> { %v1989_v7 = vpop.permute.xlu1 %1988  ;;  %v2029_v33 = vsel %vm2026_vm14, %v1985_v32, %v1987_v42  ;;  %v9862_v32 = vld [vmem:[#allocation2 + $0x80] sm:$0xff] }
 0x292   : >> { %2072 = vst.msk [vmem:[#allocation3 + $0x868] sm:$0xff] %vm242_vm1, %v1989_v7  ;;  %v2030_v35 = vsel %vm2026_vm14, %v1987_v42, %v1989_v7  ;;  %2328 = vrot.lane.b32.xlu0 %v9520_v24, %s8662_s26  ;;  %v7940_v13 = vpack.c.bf16 %v2029_v33, %v2027_v25  ;;  %v9860_v25 = vld [vmem:[#allocation2 + $0x88] sm:$0xff]  ;;  %v9870_v42 = vld [vmem:[#allocation2 + $0xa0] sm:$0xff]  ;;  %v9872_v33 = vld [vmem:[#allocation2 + $0x90] sm:$0xff] }
 0x293   : >> { %2330 = vrot.lane.b32.xlu1 %v9518_v43, %s8662_s26  ;;  %v7938_v49 = vpack.c.bf16 %v2030_v35, %v2028_v12 }
 0x294   : >> { %v1991_v46 = vpop.permute.xlu0 %1990 }
 0x295   : >> { %v1993_v45 = vpop.permute.xlu1 %1992  ;;  %7939 = vmatprep.subr.bf16.mxu0 %v7938_v49 }
 0x296   : >> { %v2031_v41 = vsel %vm2026_vm14, %v1991_v46, %v1993_v45  ;;  %7941 = vmatpush1.bf16.msra.mxu0 %v7940_v13  ;;  %2332 = vrot.lane.b32.xlu0 %v9531_v50, %s8662_s26 }
 0x297   : >> { %2334 = vrot.lane.b32.xlu1 %v9529_v10, %s8662_s26 }
 0x298   : >> { %v1995_v55 = vpop.permute.xlu0 %1994 }
 0x299   : >> { %v1997_v47 = vpop.permute.xlu1 %1996  ;;  %v2032_v43 = vsel %vm2026_vm14, %v1993_v45, %v1995_v55  ;;  %2075 = vst.msk [vmem:[#allocation3 + $0x880] sm:$0xff] %vm242_vm1, %v1995_v55  ;;  %v9883_v55 = vld [vmem:[#allocation2 + $0xa8] sm:$0xff] }
 0x29a   : >> { %2336 = vrot.lane.b32.xlu0 %v9540_v62, %s8662_s26 }
 0x29b   : >> { %2338 = vrot.lane.b32.xlu1 %v9538_v21, %s8662_s26 }
 0x29c   : >> { %v1999_v48 = vpop.permute.xlu0 %1998 }
 0x29d   : >> { %v2001_v24 = vpop.permute.xlu1 %2000  ;;  %v2033_v10 = vsel %vm2026_vm14, %v1997_v47, %v1999_v48  ;;  %v9881_v47 = vld [vmem:[#allocation2 + $0xb0] sm:$0xff] }
 0x29e   : >> { %2078 = vst.msk [vmem:[#allocation3 + $0x898] sm:$0xff] %vm242_vm1, %v2001_v24  ;;  %v2034_v50 = vsel %vm2026_vm14, %v1999_v48, %v2001_v24  ;;  %2340 = vrot.lane.b32.xlu0 %v9550_v38, %s8662_s26  ;;  %v7944_v34 = vpack.c.bf16 %v2033_v10, %v2031_v41  ;;  %v9890_v10 = vld [vmem:[#allocation2 + $0xc8] sm:$0xff] }
 0x29f   : >> { %2342 = vrot.lane.b32.xlu1 %v9548_v52, %s8662_s26  ;;  %v7942_v15 = vpack.c.bf16 %v2034_v50, %v2032_v43  ;;  %v9801_v52 = vld [vmem:[#allocation2] sm:$0xff] }
 0x2a0   : >> { %v2003_v58 = vpop.permute.xlu0 %2002  ;;  %v9892_v50 = vld [vmem:[#allocation2 + $0xc0] sm:$0xff] }
 0x2a1   : >> { %v2005_v21 = vpop.permute.xlu1 %2004  ;;  %7943 = vmatprep.subr.bf16.mxu0 %v7942_v15 }
 0x2a2   : >> { %v2035_v62 = vsel %vm2026_vm14, %v2003_v58, %v2005_v21  ;;  %7945 = vmatpush1.bf16.msra.mxu0 %v7944_v34  ;;  %2344 = vrot.lane.b32.xlu0 %v9561_v19, %s8662_s26  ;;  %v9811_v19 = vld [vmem:[#allocation2 + $0x10] sm:$0xff]  ;;  %v9900_v58 = vld [vmem:[#allocation2 + $0xe0] sm:$0xff] }
 0x2a3   : >> { %2346 = vrot.lane.b32.xlu1 %v9559_v36, %s8662_s26  ;;  %v9809_v36 = vld [vmem:[#allocation2 + $0x20] sm:$0xff] }
 0x2a4   : >> { %v2007_v38 = vpop.permute.xlu0 %2006 }
 0x2a5   : >> { %v2009_v11 = vpop.permute.xlu1 %2008  ;;  %v2036_v9 = vsel %vm2026_vm14, %v2005_v21, %v2007_v38  ;;  %2081 = vst.msk [vmem:[#allocation3 + $0x8b0] sm:$0xff] %vm242_vm1, %v2007_v38 }
 0x2a6   : >> { %2461 = vrot.lane.b32.xlu0 %v9801_v52, %s8663_s27 }
 0x2a7   : >> { %2463 = vrot.lane.b32.xlu1 %v9799_v51, %s8663_s27 }
 0x2a8   : >> { %v2011_v14 = vpop.permute.xlu0 %2010 }
 0x2a9   : >> { %v2013_v1 = vpop.permute.xlu1 %2012  ;;  %v2037_v5 = vsel %vm2026_vm14, %v2009_v11, %v2011_v14 }
 0x2aa   : >> { %2084 = vst.msk [vmem:[#allocation3 + $0x8c8] sm:$0xff] %vm242_vm1, %v2013_v1  ;;  %v2038_v54 = vsel %vm2026_vm14, %v2011_v14, %v2013_v1  ;;  %2465 = vrot.lane.b32.xlu0 %v9811_v19, %s8663_s27  ;;  %v7948_v16 = vpack.c.bf16 %v2037_v5, %v2035_v62  ;;  %v9902_v62 = vld [vmem:[#allocation2 + $0xd0] sm:$0xff] }
 0x2ab   : >> { %2467 = vrot.lane.b32.xlu1 %v9809_v36, %s8663_s27  ;;  %v7946_v56 = vpack.c.bf16 %v2038_v54, %v2036_v9  ;;  %v9911_v54 = vld [vmem:[#allocation2 + $0xf0] sm:$0xff] }
 0x2ac   : >> { %v2015_v63 = vpop.permute.xlu0 %2014 }
 0x2ad   : >> { %v2017_v61 = vpop.permute.xlu1 %2016  ;;  %7947 = vmatprep.subr.bf16.mxu0 %v7946_v56  ;;  %v9913_v56 = vld [vmem:[#allocation2 + $0xe8] sm:$0xff] }
 0x2ae   : >> { %v2039_v22 = vsel %vm2026_vm14, %v2015_v63, %v2017_v61  ;;  %7949 = vmatpush1.bf16.msra.mxu0 %v7948_v16  ;;  %2469 = vrot.lane.b32.xlu0 %v9822_v59, %s8663_s27 }
 0x2af   : >> { %2471 = vrot.lane.b32.xlu1 %v9820_v57, %s8663_s27 }
 0x2b0   : >> { %v2019_v28 = vpop.permute.xlu0 %2018 }
 0x2b1   : >> { %v2021_v27 = vpop.permute.xlu1 %2020  ;;  %v2040_v39 = vsel %vm2026_vm14, %v2017_v61, %v2019_v28  ;;  %2087 = vst.msk [vmem:[#allocation3 + $0x8e0] sm:$0xff] %vm242_vm1, %v2019_v28 }
 0x2b2   : >> { %2473 = vrot.lane.b32.xlu0 %v9831_v4, %s8663_s27 }
 0x2b3   : >> { %2475 = vrot.lane.b32.xlu1 %v9829_v2, %s8663_s27 }
 0x2b4   : >> { %v2023_v40 = vpop.permute.xlu0 %2022 }
 0x2b5   : >> { %v2025_v26 = vpop.permute.xlu1 %2024  ;;  %v2041_v30 = vsel %vm2026_vm14, %v2021_v27, %v2023_v40 }
 0x2b6   : >> { %2090 = vst.msk [vmem:[#allocation3 + $0x8f8] sm:$0xff] %vm242_vm1, %v2025_v26  ;;  %v2042_v23 = vsel %vm2026_vm14, %v2023_v40, %v2025_v26  ;;  %2477 = vrot.lane.b32.xlu0 %v9841_v8, %s8663_s27  ;;  %v7952_v17 = vpack.c.bf16 %v2041_v30, %v2039_v22  ;;  %vm6807_vm14 = vcmask (!%p7351_p8), 343040  }
 0x2b7   : >> { %2479 = vrot.lane.b32.xlu1 %v9839_v53, %s8663_s27  ;;  %v7950_v29 = vpack.c.bf16 %v2042_v23, %v2040_v39 }
 0x2b8   : >> { %v2140_v37 = vpop.permute.xlu0 %2139 }
 0x2b9   : >> { %v2142_v18 = vpop.permute.xlu1 %2141  ;;  %7951 = vmatprep.subr.bf16.mxu0 %v7950_v29 }
 0x2ba   : >> { %v2188_v44 = vsel %vm2187_vm15, %v2140_v37, %v2142_v18  ;;  %7953 = vmatpush1.bf16.msra.mxu0 %v7952_v17  ;;  %2481 = vrot.lane.b32.xlu0 %v9852_v20, %s8663_s27  ;;  %v4387_v17 = vld [vmem:[%s9300_s18 + $0x8] sm:$0xff] }
 0x2bb   : >> { %2483 = vrot.lane.b32.xlu1 %v9850_v60, %s8663_s27  ;;  %5178 = vmatprep.mubr.f32.mxu1 %v4387_v17  ;;  %v4413_v17 = vld [vmem:[%s9300_s18 + $0xd8] sm:$0xff] }
 0x2bc   : >> { %v2144_v12 = vpop.permute.xlu0 %2143 }
 0x2bd   : >> { %v2146_v6 = vpop.permute.xlu1 %2145  ;;  %5405 = vmatmul.mubr.f32.vlgmr.msra.gmra.mrb[0].mxu0 %v4390_v31  ;;  %v2189_v7 = vsel %vm2187_vm15, %v2142_v18, %v2144_v12  ;;  %2230 = vst.msk [vmem:[#allocation3 + $0x910] sm:$0xff] %vm242_vm1, %v2144_v12  ;;  %v4386_v18 = vld [vmem:[%s9300_s18] sm:$0xff] }
 0x2be   : >> { %2485 = vrot.lane.b32.xlu0 %v9862_v32, %s8663_s27  ;;  %5179 = vmatmul.mubr.f32.vlgmr.msra.gmra.mrb[0].mxu1 %v4386_v18  ;;  %v4412_v18 = vld [vmem:[%s9300_s18 + $0xd0] sm:$0xff] }
 0x2bf   : >> { %2487 = vrot.lane.b32.xlu1 %v9860_v25, %s8663_s27 }
 0x2c0   : >> { %v2148_v49 = vpop.permute.xlu0 %2147 }
 0x2c1   : >> { %v2150_v35 = vpop.permute.xlu1 %2149  ;;  %v2190_v13 = vsel %vm2187_vm15, %v2146_v6, %v2148_v49 }
 0x2c2   : >> { %2233 = vst.msk [vmem:[#allocation3 + $0x928] sm:$0xff] %vm242_vm1, %v2150_v35  ;;  %v2191_v45 = vsel %vm2187_vm15, %v2148_v49, %v2150_v35  ;;  %2489 = vrot.lane.b32.xlu0 %v9872_v33, %s8663_s27  ;;  %v7956_v41 = vpack.c.bf16 %v2190_v13, %v2188_v44 }
 0x2c3   : >> { %2491 = vrot.lane.b32.xlu1 %v9870_v42, %s8663_s27  ;;  %v7954_v46 = vpack.c.bf16 %v2191_v45, %v2189_v7 }
 0x2c4   : >> { %v2152_v24 = vpop.permute.xlu0 %2151 }
 0x2c5   : >> { %v2154_v43 = vpop.permute.xlu1 %2153  ;;  %7955 = vmatprep.subr.bf16.mxu0 %v7954_v46  ;;  %v9949_v46 = vld [vmem:[#allocation2 + $0x10] sm:$0xff] }
 0x2c6   : >> { %v2192_v48 = vsel %vm2187_vm15, %v2152_v24, %v2154_v43  ;;  %7957 = vmatpush1.bf16.msra.mxu0 %v7956_v41  ;;  %2493 = vrot.lane.b32.xlu0 %v9883_v55, %s8663_s27  ;;  %298 = vst.msk [vmem:[#allocation3 + $0x10] sm:$0xff] %vm242_vm1, %v9949_v46 }
 0x2c7   : >> { %2495 = vrot.lane.b32.xlu1 %v9881_v47, %s8663_s27 }
 0x2c8   : >> { %v2156_v34 = vpop.permute.xlu0 %2155 }
 0x2c9   : >> { %v2158_v15 = vpop.permute.xlu1 %2157  ;;  %v2193_v21 = vsel %vm2187_vm15, %v2154_v43, %v2156_v34  ;;  %2236 = vst.msk [vmem:[#allocation3 + $0x940] sm:$0xff] %vm242_vm1, %v2156_v34  ;;  %v9958_v34 = vld [vmem:[#allocation2 + $0x30] sm:$0xff] }
 0x2ca   : >> { %2497 = vrot.lane.b32.xlu0 %v9892_v50, %s8663_s27  ;;  %301 = vst.msk [vmem:[#allocation3 + $0x28] sm:$0xff] %vm242_vm1, %v9958_v34 }
 0x2cb   : >> { %2499 = vrot.lane.b32.xlu1 %v9890_v10, %s8663_s27 }
 0x2cc   : >> { %v2160_v38 = vpop.permute.xlu0 %2159 }
 0x2cd   : >> { %v2162_v11 = vpop.permute.xlu1 %2161  ;;  %v2194_v9 = vsel %vm2187_vm15, %v2158_v15, %v2160_v38 }
 0x2ce   : >> { %2239 = vst.msk [vmem:[#allocation3 + $0x958] sm:$0xff] %vm242_vm1, %v2162_v11  ;;  %v2195_v1 = vsel %vm2187_vm15, %v2160_v38, %v2162_v11  ;;  %2501 = vrot.lane.b32.xlu0 %v9902_v62, %s8663_s27  ;;  %v7960_v5 = vpack.c.bf16 %v2194_v9, %v2192_v48 }
 0x2cf   : >> { %2503 = vrot.lane.b32.xlu1 %v9900_v58, %s8663_s27  ;;  %v7958_v14 = vpack.c.bf16 %v2195_v1, %v2193_v21 }
 0x2d0   : >> { %v2164_v61 = vpop.permute.xlu0 %2163 }
 0x2d1   : >> { %v2166_v16 = vpop.permute.xlu1 %2165  ;;  %7959 = vmatprep.subr.bf16.mxu0 %v7958_v14 }
 0x2d2   : >> { %v2196_v63 = vsel %vm2187_vm15, %v2164_v61, %v2166_v16  ;;  %7961 = vmatpush1.bf16.msra.mxu0 %v7960_v5  ;;  %2505 = vrot.lane.b32.xlu0 %v9913_v56, %s8663_s27 }
 0x2d3   : >> { %2507 = vrot.lane.b32.xlu1 %v9911_v54, %s8663_s27 }
 0x2d4   : >> { %v2168_v27 = vpop.permute.xlu0 %2167 }
 0x2d5   : >> { %v2170_v22 = vpop.permute.xlu1 %2169  ;;  %v2197_v28 = vsel %vm2187_vm15, %v2166_v16, %v2168_v27  ;;  %2242 = vst.msk [vmem:[#allocation3 + $0x970] sm:$0xff] %vm242_vm1, %v2168_v27  ;;  %v9975_v16 = vld [vmem:[#allocation2 + $0x50] sm:$0xff] }
 0x2d6   : >> { %2622 = vrot.lane.b32.xlu0 %v9801_v52, %s8664_s28  ;;  %304 = vst.msk [vmem:[#allocation3 + $0x40] sm:$0xff] %vm242_vm1, %v9975_v16 }
 0x2d7   : >> { %2624 = vrot.lane.b32.xlu1 %v9799_v51, %s8664_s28 }
 0x2d8   : >> { %v2172_v26 = vpop.permute.xlu0 %2171 }
 0x2d9   : >> { %v2174_v39 = vpop.permute.xlu1 %2173  ;;  %v2198_v40 = vsel %vm2187_vm15, %v2170_v22, %v2172_v26 }
 0x2da   : >> { %2245 = vst.msk [vmem:[#allocation3 + $0x988] sm:$0xff] %vm242_vm1, %v2174_v39  ;;  %v2199_v30 = vsel %vm2187_vm15, %v2172_v26, %v2174_v39  ;;  %2626 = vrot.lane.b32.xlu0 %v9811_v19, %s8664_s28  ;;  %v7964_v29 = vpack.c.bf16 %v2198_v40, %v2196_v63  ;;  %v9984_v39 = vld [vmem:[#allocation2 + $0x70] sm:$0xff]  ;;  %v4399_v40 = vld [vmem:[%s9300_s18 + $0x68] sm:$0xff] }
 0x2db   : >> { %2628 = vrot.lane.b32.xlu1 %v9809_v36, %s8664_s28  ;;  %v7962_v23 = vpack.c.bf16 %v2199_v30, %v2197_v28  ;;  %v4400_v26 = vld [vmem:[%s9300_s18 + $0x70] sm:$0xff]  ;;  %307 = vst.msk [vmem:[#allocation3 + $0x58] sm:$0xff] %vm242_vm1, %v9984_v39 }
 0x2dc   : >> { %v2176_v44 = vpop.permute.xlu0 %2175  ;;  %5184 = vmatprep.mubr.f32.mxu1 %v4400_v26  ;;  %v4465_v26 = vld [vmem:[%s9300_s18 + $0x278] sm:$0xff] }
 0x2dd   : >> { %v2178_v37 = vpop.permute.xlu1 %2177  ;;  %7963 = vmatprep.subr.bf16.mxu0 %v7962_v23  ;;  %5185 = vmatmul.mubr.f32.gmra.mrb[2].mxu1 %v4399_v40  ;;  %v4464_v40 = vld [vmem:[%s9300_s18 + $0x270] sm:$0xff] }
 0x2de   : >> { %v2200_v31 = vsel %vm2187_vm15, %v2176_v44, %v2178_v37  ;;  %7965 = vmatpush1.bf16.msra.mxu0 %v7964_v29  ;;  %4248 = vrot.lane.b32.xlu0 %v9799_v51, %s8665_s29 }
 0x2df   : >> { %4250 = vrot.lane.b32.xlu1 %v9811_v19, %s8665_s29  ;;  %5190 = vmatprep.mubr.f32.mxu1 %v4413_v17  ;;  %v10048_v17 = vld [vmem:[#allocation2 + $0xf0] sm:$0xff] }
 0x2e0   : >> { %v2180_v12 = vpop.permute.xlu0 %2179  ;;  %319 = vst.msk [vmem:[#allocation3 + $0xb8] sm:$0xff] %vm242_vm1, %v10048_v17 }
 0x2e1   : >> { %v2182_v6 = vpop.permute.xlu1 %2181  ;;  %v2201_v7 = vsel %vm2187_vm15, %v2178_v37, %v2180_v12  ;;  %2248 = vst.msk [vmem:[#allocation3 + $0x9a0] sm:$0xff] %vm242_vm1, %v2180_v12  ;;  %5191 = vmatmul.mubr.f32.gmra.mrb[4].mxu1 %v4412_v18  ;;  %v10005_v12 = vld [vmem:[#allocation2 + $0x90] sm:$0xff]  ;;  %v4478_v18 = vld [vmem:[%s9300_s18 + $0x2e0] sm:$0xff] }
 0x2e2   : >> { %4256 = vrot.lane.b32.xlu0 %v9822_v59, %s8665_s29  ;;  %310 = vst.msk [vmem:[#allocation3 + $0x70] sm:$0xff] %vm242_vm1, %v10005_v12 }
 0x2e3   : >> { %4258 = vrot.lane.b32.xlu1 %v9820_v57, %s8665_s29 }
 0x2e4   : >> { %v2184_v49 = vpop.permute.xlu0 %2183 }
 0x2e5   : >> { %v2186_v35 = vpop.permute.xlu1 %2185  ;;  %v2202_v13 = vsel %vm2187_vm15, %v2182_v6, %v2184_v49 }
 0x2e6   : >> { %2251 = vst.msk [vmem:[#allocation3 + $0x9b8] sm:$0xff] %vm242_vm1, %v2186_v35  ;;  %v2203_v45 = vsel %vm2187_vm15, %v2184_v49, %v2186_v35  ;;  %4246 = vrot.lane.b32.xlu0 %v9801_v52, %s8665_s29  ;;  %v7968_v43 = vpack.c.bf16 %v2202_v13, %v2200_v31  ;;  %v4426_v49 = vld [vmem:[%s9300_s18 + $0x140] sm:$0xff]  ;;  %v4425_v13 = vld [vmem:[%s9300_s18 + $0x138] sm:$0xff] }
 0x2e7   : >> { %4254 = vrot.lane.b32.xlu1 %v9809_v36, %s8665_s29  ;;  %v7966_v41 = vpack.c.bf16 %v2203_v45, %v2201_v7  ;;  %5196 = vmatprep.mubr.f32.mxu1 %v4426_v49 }
 0x2e8   : >> { %v2301_v48 = vpop.permute.xlu0 %2300  ;;  %5197 = vmatmul.mubr.f32.gmra.mrb[6].mxu1 %v4425_v13 }
 0x2e9   : >> { %v2303_v24 = vpop.permute.xlu1 %2302  ;;  %7967 = vmatprep.subr.bf16.mxu0 %v7966_v41 }
 0x2ea   : >> { %v2349_v15 = vsel %vm2348_vm0, %v2301_v48, %v2303_v24  ;;  %7969 = vmatpush1.bf16.msra.mxu0 %v7968_v43  ;;  %4264 = vrot.lane.b32.xlu0 %v9829_v2, %s8665_s29  ;;  %v4439_v48 = vld [vmem:[%s9300_s18 + $0x1a8] sm:$0xff] }
 0x2eb   : >> { %4266 = vrot.lane.b32.xlu1 %v9841_v8, %s8665_s29  ;;  %5202 = vmatprep.mubr.f32.mxu1 %v4439_v48  ;;  %v4404_v48 = vld [vmem:[%s9300_s18 + $0x90] sm:$0xff] }
 0x2ec   : >> { %v2305_v11 = vpop.permute.xlu0 %2304  ;;  %5410 = vmatprep.mubr.f32.mxu0 %v4404_v48 }
 0x2ed   : >> { %v2307_v21 = vpop.permute.xlu1 %2306  ;;  %v2350_v38 = vsel %vm2348_vm0, %v2303_v24, %v2305_v11  ;;  %2391 = vst.msk [vmem:[#allocation3 + $0x9d0] sm:$0xff] %vm242_vm1, %v2305_v11  ;;  %v10016_v24 = vld [vmem:[#allocation2 + $0xb0] sm:$0xff] }
 0x2ee   : >> { %4272 = vrot.lane.b32.xlu0 %v9852_v20, %s8665_s29  ;;  %313 = vst.msk [vmem:[#allocation3 + $0x88] sm:$0xff] %vm242_vm1, %v10016_v24 }
 0x2ef   : >> { %4274 = vrot.lane.b32.xlu1 %v9850_v60, %s8665_s29 }
 0x2f0   : >> { %v2309_v1 = vpop.permute.xlu0 %2308 }
 0x2f1   : >> { %v2311_v9 = vpop.permute.xlu1 %2310  ;;  %v2351_v14 = vsel %vm2348_vm0, %v2307_v21, %v2309_v1 }
 0x2f2   : >> { %2394 = vst.msk [vmem:[#allocation3 + $0x9e8] sm:$0xff] %vm242_vm1, %v2311_v9  ;;  %v2352_v5 = vsel %vm2348_vm0, %v2309_v1, %v2311_v9  ;;  %4262 = vrot.lane.b32.xlu0 %v9831_v4, %s8665_s29  ;;  %v7972_v63 = vpack.c.bf16 %v2351_v14, %v2349_v15  ;;  %v4438_v15 = vld [vmem:[%s9300_s18 + $0x1a0] sm:$0xff]  ;;  %v4452_v9 = vld [vmem:[%s9300_s18 + $0x210] sm:$0xff]  ;;  %v4451_v1 = vld [vmem:[%s9300_s18 + $0x208] sm:$0xff] }
 0x2f3   : >> { %4270 = vrot.lane.b32.xlu1 %v9839_v53, %s8665_s29  ;;  %v7970_v61 = vpack.c.bf16 %v2352_v5, %v2350_v38  ;;  %5203 = vmatmul.mubr.f32.gmra.mrb[8].mxu1 %v4438_v15 }
 0x2f4   : >> { %v2313_v27 = vpop.permute.xlu0 %2312  ;;  %5208 = vmatprep.mubr.f32.mxu1 %v4452_v9  ;;  %v4417_v9 = vld [vmem:[%s9300_s18 + $0xf8] sm:$0xff] }
 0x2f5   : >> { %v2315_v22 = vpop.permute.xlu1 %2314  ;;  %7971 = vmatprep.subr.bf16.mxu0 %v7970_v61 }
 0x2f6   : >> { %v2353_v28 = vsel %vm2348_vm0, %v2313_v27, %v2315_v22  ;;  %7973 = vmatpush1.bf16.msra.mxu0 %v7972_v63  ;;  %4280 = vrot.lane.b32.xlu0 %v9860_v25, %s8665_s29 }
 0x2f7   : >> { %4282 = vrot.lane.b32.xlu1 %v9872_v33, %s8665_s29  ;;  %5209 = vmatmul.mubr.f32.gmra.mrb[10].mxu1 %v4451_v1 }
 0x2f8   : >> { %v2317_v23 = vpop.permute.xlu0 %2316  ;;  %5214 = vmatprep.mubr.f32.mxu1 %v4465_v26 }
 0x2f9   : >> { %v2319_v30 = vpop.permute.xlu1 %2318  ;;  %v2354_v29 = vsel %vm2348_vm0, %v2315_v22, %v2317_v23  ;;  %2397 = vst.msk [vmem:[#allocation3 + $0xa00] sm:$0xff] %vm242_vm1, %v2317_v23  ;;  %v10037_v22 = vld [vmem:[#allocation2 + $0xd0] sm:$0xff] }
 0x2fa   : >> { %4288 = vrot.lane.b32.xlu0 %v9883_v55, %s8665_s29  ;;  %316 = vst.msk [vmem:[#allocation3 + $0xa0] sm:$0xff] %vm242_vm1, %v10037_v22 }
 0x2fb   : >> { %4290 = vrot.lane.b32.xlu1 %v9881_v47, %s8665_s29  ;;  %5215 = vmatmul.mubr.f32.gmra.mrb[12].mxu1 %v4464_v40 }
 0x2fc   : >> { %v2321_v44 = vpop.permute.xlu0 %2320  ;;  %5220 = vmatprep.mubr.f32.mxu1 %v4478_v18 }
 0x2fd   : >> { %v2323_v37 = vpop.permute.xlu1 %2322  ;;  %v2355_v31 = vsel %vm2348_vm0, %v2319_v30, %v2321_v44 }
 0x2fe   : >> { %2400 = vst.msk [vmem:[#allocation3 + $0xa18] sm:$0xff] %vm242_vm1, %v2323_v37  ;;  %v2356_v6 = vsel %vm2348_vm0, %v2321_v44, %v2323_v37  ;;  %4278 = vrot.lane.b32.xlu0 %v9862_v32, %s8665_s29  ;;  %v7976_v35 = vpack.c.bf16 %v2355_v31, %v2353_v28  ;;  %v4477_v37 = vld [vmem:[%s9300_s18 + $0x2d8] sm:$0xff] }
 0x2ff   : >> { %4286 = vrot.lane.b32.xlu1 %v9870_v42, %s8665_s29  ;;  %v7974_v7 = vpack.c.bf16 %v2356_v6, %v2354_v29  ;;  %5221 = vmatmul.mubr.f32.gmra.mrb[14].mxu1 %v4477_v37 }
 0x300   : >> { %v2325_v41 = vpop.permute.xlu0 %2324 }
 0x301   : >> { %v2327_v45 = vpop.permute.xlu1 %2326  ;;  %7975 = vmatprep.subr.bf16.mxu0 %v7974_v7  ;;  %v8666_v7 = vmov 0.0  }
 0x302   : >> { %v2357_v43 = vsel %vm2348_vm0, %v2325_v41, %v2327_v45  ;;  %7977 = vmatpush1.bf16.msra.mxu0 %v7976_v35  ;;  %4296 = vrot.lane.b32.xlu0 %v9890_v10, %s8665_s29 }
 0x303   : >> { %4298 = vrot.lane.b32.xlu1 %v9902_v62, %s8665_s29  ;;  %5856 = vmatprep.mubr.f32.mxu1 %v8666_v7 }
 0x304   : >> { %v2329_v11 = vpop.permute.xlu0 %2328 }
 0x305   : >> { %v2331_v21 = vpop.permute.xlu1 %2330  ;;  %v2358_v38 = vsel %vm2348_vm0, %v2327_v45, %v2329_v11  ;;  %2403 = vst.msk [vmem:[#allocation3 + $0xa30] sm:$0xff] %vm242_vm1, %v2329_v11  ;;  %v4403_v11 = vld [vmem:[%s9300_s18 + $0x88] sm:$0xff] }
 0x306   : >> { %4304 = vrot.lane.b32.xlu0 %v9913_v56, %s8665_s29  ;;  %5411 = vmatmul.mubr.f32.gmra.mrb[2].mxu0 %v4403_v11  ;;  %v4469_v11 = vld [vmem:[%s9300_s18 + $0x298] sm:$0xff] }
 0x307   : >> { %4306 = vrot.lane.b32.xlu1 %v9911_v54, %s8665_s29  ;;  %5416 = vmatprep.mubr.f32.mxu0 %v4417_v9 }
 0x308   : >> { %v2333_v5 = vpop.permute.xlu0 %2332 }
 0x309   : >> { %v2335_v14 = vpop.permute.xlu1 %2334  ;;  %v2359_v61 = vsel %vm2348_vm0, %v2331_v21, %v2333_v5 }
 0x30a   : >> { %2406 = vst.msk [vmem:[#allocation3 + $0xa48] sm:$0xff] %vm242_vm1, %v2335_v14  ;;  %v2360_v63 = vsel %vm2348_vm0, %v2333_v5, %v2335_v14  ;;  %4294 = vrot.lane.b32.xlu0 %v9892_v50, %s8665_s29  ;;  %v7980_v28 = vpack.c.bf16 %v2359_v61, %v2357_v43  ;;  %v4416_v5 = vld [vmem:[%s9300_s18 + $0xf0] sm:$0xff] }
 0x30b   : >> { %4302 = vrot.lane.b32.xlu1 %v9900_v58, %s8665_s29  ;;  %v7978_v27 = vpack.c.bf16 %v2360_v63, %v2358_v38  ;;  %5417 = vmatmul.mubr.f32.gmra.mrb[4].mxu0 %v4416_v5  ;;  %v4430_v63 = vld [vmem:[%s9300_s18 + $0x160] sm:$0xff] }
 0x30c   : >> { %v2337_v23 = vpop.permute.xlu0 %2336  ;;  %5422 = vmatprep.mubr.f32.mxu0 %v4430_v63  ;;  %v4482_v63 = vld [vmem:[%s9300_s18 + $0x300] sm:$0xff] }
 0x30d   : >> { %v2339_v30 = vpop.permute.xlu1 %2338  ;;  %7979 = vmatprep.subr.bf16.mxu0 %v7978_v27 }
 0x30e   : >> { %v2361_v29 = vsel %vm2348_vm0, %v2337_v23, %v2339_v30  ;;  %7981 = vmatpush1.bf16.msra.mxu0 %v7980_v28  ;;  %2630 = vrot.lane.b32.xlu0 %v9822_v59, %s8664_s28 }
 0x30f   : >> { %2632 = vrot.lane.b32.xlu1 %v9820_v57, %s8664_s28 }
 0x310   : >> { %v2341_v31 = vpop.permute.xlu0 %2340 }
 0x311   : >> { %v2343_v44 = vpop.permute.xlu1 %2342  ;;  %v2362_v6 = vsel %vm2348_vm0, %v2339_v30, %v2341_v31  ;;  %2409 = vst.msk [vmem:[#allocation3 + $0xa60] sm:$0xff] %vm242_vm1, %v2341_v31  ;;  %v4429_v30 = vld [vmem:[%s9300_s18 + $0x158] sm:$0xff]  ;;  %v4443_v31 = vld [vmem:[%s9300_s18 + $0x1c8] sm:$0xff] }
 0x312   : >> { %2634 = vrot.lane.b32.xlu0 %v9831_v4, %s8664_s28  ;;  %5423 = vmatmul.mubr.f32.gmra.mrb[6].mxu0 %v4429_v30  ;;  %v4393_v30 = vld [vmem:[%s9300_s18 + $0x38] sm:$0xff] }
 0x313   : >> { %2636 = vrot.lane.b32.xlu1 %v9829_v2, %s8664_s28  ;;  %5428 = vmatprep.mubr.f32.mxu0 %v4443_v31 }
 0x314   : >> { %v2345_v49 = vpop.permute.xlu0 %2344 }
 0x315   : >> { %v2347_v35 = vpop.permute.xlu1 %2346  ;;  %v2363_v13 = vsel %vm2348_vm0, %v2343_v44, %v2345_v49 }
 0x316   : >> { %2412 = vst.msk [vmem:[#allocation3 + $0xa78] sm:$0xff] %vm242_vm1, %v2347_v35  ;;  %v2364_v45 = vsel %vm2348_vm0, %v2345_v49, %v2347_v35  ;;  %2638 = vrot.lane.b32.xlu0 %v9841_v8, %s8664_s28  ;;  %v7984_v43 = vpack.c.bf16 %v2363_v13, %v2361_v29 }
 0x317   : >> { %2640 = vrot.lane.b32.xlu1 %v9839_v53, %s8664_s28  ;;  %v7982_v41 = vpack.c.bf16 %v2364_v45, %v2362_v6  ;;  %v4442_v6 = vld [vmem:[%s9300_s18 + $0x1c0] sm:$0xff]  ;;  %v4456_v45 = vld [vmem:[%s9300_s18 + $0x230] sm:$0xff] }
 0x318   : >> { %v2462_v21 = vpop.permute.xlu0 %2461  ;;  %5429 = vmatmul.mubr.f32.gmra.mrb[8].mxu0 %v4442_v6 }
 0x319   : >> { %v2464_v15 = vpop.permute.xlu1 %2463  ;;  %7983 = vmatprep.subr.bf16.mxu0 %v7982_v41  ;;  %v4455_v41 = vld [vmem:[%s9300_s18 + $0x228] sm:$0xff]  ;;  %5434 = vmatprep.mubr.f32.mxu0 %v4456_v45 }
 0x31a   : >> { %v2510_v38 = vsel %vm2509_vm2, %v2462_v21, %v2464_v15  ;;  %7985 = vmatpush1.bf16.msra.mxu0 %v7984_v43  ;;  %2642 = vrot.lane.b32.xlu0 %v9852_v20, %s8664_s28 }
 0x31b   : >> { %2644 = vrot.lane.b32.xlu1 %v9850_v60, %s8664_s28 }
 0x31c   : >> { %v2466_v14 = vpop.permute.xlu0 %2465  ;;  %5435 = vmatmul.mubr.f32.gmra.mrb[10].mxu0 %v4455_v41 }
 0x31d   : >> { %v2468_v1 = vpop.permute.xlu1 %2467  ;;  %v2511_v61 = vsel %vm2509_vm2, %v2464_v15, %v2466_v14  ;;  %2552 = vst.msk [vmem:[#allocation3 + $0xa90] sm:$0xff] %vm242_vm1, %v2466_v14  ;;  %5440 = vmatprep.mubr.f32.mxu0 %v4469_v11 }
 0x31e   : >> { %2646 = vrot.lane.b32.xlu0 %v9862_v32, %s8664_s28 }
 0x31f   : >> { %2648 = vrot.lane.b32.xlu1 %v9860_v25, %s8664_s28 }
 0x320   : >> { %v2470_v28 = vpop.permute.xlu0 %2469 }
 0x321   : >> { %v2472_v27 = vpop.permute.xlu1 %2471  ;;  %v2512_v26 = vsel %vm2509_vm2, %v2468_v1, %v2470_v28  ;;  %v4468_v1 = vld [vmem:[%s9300_s18 + $0x290] sm:$0xff] }
 0x322   : >> { %2555 = vst.msk [vmem:[#allocation3 + $0xaa8] sm:$0xff] %vm242_vm1, %v2472_v27  ;;  %v2513_v40 = vsel %vm2509_vm2, %v2470_v28, %v2472_v27  ;;  %2650 = vrot.lane.b32.xlu0 %v9872_v33, %s8664_s28  ;;  %v7988_v29 = vpack.c.bf16 %v2512_v26, %v2510_v38  ;;  %5441 = vmatmul.mubr.f32.gmra.mrb[12].mxu0 %v4468_v1  ;;  %v4481_v27 = vld [vmem:[%s9300_s18 + $0x2f8] sm:$0xff] }
 0x323   : >> { %2652 = vrot.lane.b32.xlu1 %v9870_v42, %s8664_s28  ;;  %v7986_v23 = vpack.c.bf16 %v2513_v40, %v2511_v61  ;;  %5446 = vmatprep.mubr.f32.mxu0 %v4482_v63  ;;  %v10214_v63 = vld [vmem:[#allocation2 + $0x8] sm:$0xff] }
 0x324   : >> { %v2474_v37 = vpop.permute.xlu0 %2473 }
 0x325   : >> { %v2476_v18 = vpop.permute.xlu1 %2475  ;;  %7987 = vmatprep.subr.bf16.mxu0 %v7986_v23 }
 0x326   : >> { %v2514_v44 = vsel %vm2509_vm2, %v2474_v37, %v2476_v18  ;;  %7989 = vmatpush1.bf16.msra.mxu0 %v7988_v29  ;;  %2654 = vrot.lane.b32.xlu0 %v9883_v55, %s8664_s28 }
 0x327   : >> { %2656 = vrot.lane.b32.xlu1 %v9881_v47, %s8664_s28  ;;  %5447 = vmatmul.mubr.f32.gmra.mrb[14].mxu0 %v4481_v27 }
 0x328   : >> { %v2478_v49 = vpop.permute.xlu0 %2477  ;;  %5517 = vmatprep.mubr.f32.mxu0 %v4393_v30 }
 0x329   : >> { %v2480_v35 = vpop.permute.xlu1 %2479  ;;  %v2515_v13 = vsel %vm2509_vm2, %v2476_v18, %v2478_v49  ;;  %2558 = vst.msk [vmem:[#allocation3 + $0xac0] sm:$0xff] %vm242_vm1, %v2478_v49 }
 0x32a   : >> { %2658 = vrot.lane.b32.xlu0 %v9892_v50, %s8664_s28 }
 0x32b   : >> { %2660 = vrot.lane.b32.xlu1 %v9890_v10, %s8664_s28 }
 0x32c   : >> { %v2482_v48 = vpop.permute.xlu0 %2481 }
 0x32d   : >> { %v2484_v43 = vpop.permute.xlu1 %2483  ;;  %v2516_v15 = vsel %vm2509_vm2, %v2480_v35, %v2482_v48 }
 0x32e   : >> { %2561 = vst.msk [vmem:[#allocation3 + $0xad8] sm:$0xff] %vm242_vm1, %v2484_v43  ;;  %v2517_v21 = vsel %vm2509_vm2, %v2482_v48, %v2484_v43  ;;  %2662 = vrot.lane.b32.xlu0 %v9902_v62, %s8664_s28  ;;  %v7992_v9 = vpack.c.bf16 %v2516_v15, %v2514_v44 }
 0x32f   : >> { %2664 = vrot.lane.b32.xlu1 %v9900_v58, %s8664_s28  ;;  %v7990_v38 = vpack.c.bf16 %v2517_v21, %v2515_v13 }
 0x330   : >> { %v2486_v5 = vpop.permute.xlu0 %2485 }
 0x331   : >> { %v2488_v14 = vpop.permute.xlu1 %2487  ;;  %7991 = vmatprep.subr.bf16.mxu0 %v7990_v38 }
 0x332   : >> { %v2518_v61 = vsel %vm2509_vm2, %v2486_v5, %v2488_v14  ;;  %7993 = vmatpush1.bf16.msra.mxu0 %v7992_v9  ;;  %2666 = vrot.lane.b32.xlu0 %v9913_v56, %s8664_s28 }
 0x333   : >> { %2668 = vrot.lane.b32.xlu1 %v9911_v54, %s8664_s28 }
 0x334   : >> { %v2490_v26 = vpop.permute.xlu0 %2489 }
 0x335   : >> { %v2492_v28 = vpop.permute.xlu1 %2491  ;;  %v2519_v40 = vsel %vm2509_vm2, %v2488_v14, %v2490_v26  ;;  %2564 = vst.msk [vmem:[#allocation3 + $0xaf0] sm:$0xff] %vm242_vm1, %v2490_v26  ;;  %v10222_v26 = vld [vmem:[#allocation2 + $0x28] sm:$0xff] }
 0x336   : >> { %2783 = vrot.lane.b32.xlu0 %v9801_v52, %s8667_s5 }
 0x337   : >> { %2785 = vrot.lane.b32.xlu1 %v9799_v51, %s8667_s5 }
 0x338   : >> { %v2494_v29 = vpop.permute.xlu0 %2493 }
 0x339   : >> { %v2496_v23 = vpop.permute.xlu1 %2495  ;;  %v2520_v18 = vsel %vm2509_vm2, %v2492_v28, %v2494_v29 }
 0x33a   : >> { %2567 = vst.msk [vmem:[#allocation3 + $0xb08] sm:$0xff] %vm242_vm1, %v2496_v23  ;;  %v2521_v37 = vsel %vm2509_vm2, %v2494_v29, %v2496_v23  ;;  %2787 = vrot.lane.b32.xlu0 %v9811_v19, %s8667_s5  ;;  %v7996_v51 = vpack.c.bf16 %v2520_v18, %v2518_v61  ;;  %v10232_v23 = vld [vmem:[#allocation2 + $0x20] sm:$0xff] }
 0x33b   : >> { %2789 = vrot.lane.b32.xlu1 %v9809_v36, %s8667_s5  ;;  %v7994_v44 = vpack.c.bf16 %v2521_v37, %v2519_v40  ;;  %v10234_v29 = vld [vmem:[#allocation2] sm:$0xff] }
 0x33c   : >> { %v2498_v6 = vpop.permute.xlu0 %2497 }
 0x33d   : >> { %v2500_v31 = vpop.permute.xlu1 %2499  ;;  %7995 = vmatprep.subr.bf16.mxu0 %v7994_v44 }
 0x33e   : >> { %v2522_v52 = vsel %vm2509_vm2, %v2498_v6, %v2500_v31  ;;  %7997 = vmatpush1.bf16.msra.mxu0 %v7996_v51  ;;  %2791 = vrot.lane.b32.xlu0 %v9822_v59, %s8667_s5 }
 0x33f   : >> { %2793 = vrot.lane.b32.xlu1 %v9820_v57, %s8667_s5 }
 0x340   : >> { %v2502_v49 = vpop.permute.xlu0 %2501 }
 0x341   : >> { %v2504_v35 = vpop.permute.xlu1 %2503  ;;  %v2523_v36 = vsel %vm2509_vm2, %v2500_v31, %v2502_v49  ;;  %2570 = vst.msk [vmem:[#allocation3 + $0xb20] sm:$0xff] %vm242_vm1, %v2502_v49  ;;  %v10244_v31 = vld [vmem:[#allocation2 + $0x48] sm:$0xff] }
 0x342   : >> { %2795 = vrot.lane.b32.xlu0 %v9831_v4, %s8667_s5 }
 0x343   : >> { %2797 = vrot.lane.b32.xlu1 %v9829_v2, %s8667_s5 }
 0x344   : >> { %v2506_v13 = vpop.permute.xlu0 %2505 }
 0x345   : >> { %v2508_v19 = vpop.permute.xlu1 %2507  ;;  %v2524_v57 = vsel %vm2509_vm2, %v2504_v35, %v2506_v13 }
 0x346   : >> { %2573 = vst.msk [vmem:[#allocation3 + $0xb38] sm:$0xff] %vm242_vm1, %v2508_v19  ;;  %v2525_v59 = vsel %vm2509_vm2, %v2506_v13, %v2508_v19  ;;  %2799 = vrot.lane.b32.xlu0 %v9841_v8, %s8667_s5  ;;  %v8000_v2 = vpack.c.bf16 %v2524_v57, %v2522_v52  ;;  %v10252_v19 = vld [vmem:[#allocation2 + $0x68] sm:$0xff] }
 0x347   : >> { %2801 = vrot.lane.b32.xlu1 %v9839_v53, %s8667_s5  ;;  %v7998_v45 = vpack.c.bf16 %v2525_v59, %v2523_v36 }
 0x348   : >> { %v2623_v43 = vpop.permute.xlu0 %2622 }
 0x349   : >> { %v2625_v41 = vpop.permute.xlu1 %2624  ;;  %7999 = vmatprep.subr.bf16.mxu0 %v7998_v45  ;;  %v10262_v45 = vld [vmem:[#allocation2 + $0x60] sm:$0xff] }
 0x34a   : >> { %v10160_v4 = vsel %vm2670_vm3, %v2623_v43, %v2625_v41  ;;  %8001 = vmatpush1.bf16.msra.mxu0 %v8000_v2  ;;  %2803 = vrot.lane.b32.xlu0 %v9852_v20, %s8667_s5  ;;  %v10264_v2 = vld [vmem:[#allocation2 + $0x40] sm:$0xff] }
 0x34b   : >> { %2805 = vrot.lane.b32.xlu1 %v9850_v60, %s8667_s5 }
 0x34c   : >> { %v2627_v48 = vpop.permute.xlu0 %2626 }
 0x34d   : >> { %v10166_v53 = vpop.permute.xlu1 %2628  ;;  %v10169_v8 = vsel %vm2670_vm3, %v2625_v41, %v2627_v48  ;;  %2713 = vst.msk [vmem:[#allocation3 + $0xb50] sm:$0xff] %vm242_vm1, %v2627_v48 }
 0x34e   : >> { %2807 = vrot.lane.b32.xlu0 %v9862_v32, %s8667_s5 }
 0x34f   : >> { %2809 = vrot.lane.b32.xlu1 %v9860_v25, %s8667_s5 }
 0x350   : >> { %v4249_v60 = vpop.permute.xlu0 %4248 }
 0x351   : >> { %v10176_v15 = vpop.permute.xlu1 %4250 }
 0x352   : >> { %v4312_v20 = vsel %vm4310_vm4, %v4249_v60, %v10176_v15  ;;  %2811 = vrot.lane.b32.xlu0 %v9872_v33, %s8667_s5 }
 0x353   : >> { %2815 = vrot.lane.b32.xlu1 %v9883_v55, %s8667_s5 }
 0x354   : >> { %v4257_v11 = vpop.permute.xlu0 %4256 }
 0x355   : >> { %v10184_v21 = vpop.permute.xlu1 %4258 }
 0x356   : >> { %v4315_v25 = vsel %vm4310_vm4, %v4257_v11, %v10184_v21  ;;  %2817 = vrot.lane.b32.xlu0 %v9881_v47, %s8667_s5 }
 0x357   : >> { %2813 = vrot.lane.b32.xlu1 %v9870_v42, %s8667_s5  ;;  %v8146_v32 = vpack.c.bf16 %v4315_v25, %v4312_v20  ;;  %v5091_v20 = vld [vmem:[#allocation3 + $0x12c8] sm:$0xff] }
 0x358   : >> { %v4247_v9 = vpop.permute.xlu0 %4246  ;;  %v10274_v25 = vld [vmem:[#allocation2 + $0x88] sm:$0xff] }
 0x359   : >> { %v4255_v38 = vpop.permute.xlu1 %4254  ;;  %8147 = vmatprep.subr.bf16.mxu1 %v8146_v32  ;;  %v4311_v33 = vsel %vm4310_vm4, %v4247_v9, %v4249_v60 }
 0x35a   : >> { %v4314_v55 = vsel %vm4310_vm4, %v4255_v38, %v4257_v11  ;;  %2821 = vrot.lane.b32.xlu0 %v9890_v10, %s8667_s5  ;;  %v5094_v11 = vld [vmem:[#allocation3 + $0x12e0] sm:$0xff] }
 0x35b   : >> { %2823 = vrot.lane.b32.xlu1 %v9902_v62, %s8667_s5  ;;  %v8148_v1 = vpack.c.bf16 %v4314_v55, %v4311_v33  ;;  %v8162_v33 = vpack.c.bf16 %v5094_v11, %v5091_v20  ;;  %v10303_v20 = vld [vmem:[#allocation2 + $0xc8] sm:$0xff] }
 0x35c   : >> { %v4265_v42 = vpop.permute.xlu0 %4264 }
 0x35d   : >> { %v10198_v14 = vpop.permute.xlu1 %4266  ;;  %8149 = vmatpush1.bf16.msra.mxu1 %v8148_v1  ;;  %v5090_v1 = vld [vmem:[#allocation3 + $0x12c0] sm:$0xff] }
 0x35e   : >> { %v4318_v47 = vsel %vm4310_vm4, %v4265_v42, %v10198_v14  ;;  %2827 = vrot.lane.b32.xlu0 %v9913_v56, %s8667_s5 }
 0x35f   : >> { %2829 = vrot.lane.b32.xlu1 %v9911_v54, %s8667_s5 }
 0x360   : >> { %v4273_v62 = vpop.permute.xlu0 %4272 }
 0x361   : >> { %v10206_v5 = vpop.permute.xlu1 %4274 }
 0x362   : >> { %v4321_v10 = vsel %vm4310_vm4, %v4273_v62, %v10206_v5  ;;  %2819 = vrot.lane.b32.xlu0 %v9892_v50, %s8667_s5 }
 0x363   : >> { %2825 = vrot.lane.b32.xlu1 %v9900_v58, %s8667_s5  ;;  %v8150_v61 = vpack.c.bf16 %v4321_v10, %v4318_v47  ;;  %v5100_v10 = vld [vmem:[#allocation3 + $0x1310] sm:$0xff] }
 0x364   : >> { %v4263_v54 = vpop.permute.xlu0 %4262 }
 0x365   : >> { %v4271_v27 = vpop.permute.xlu1 %4270  ;;  %8151 = vmatprep.subr.bf16.mxu1 %v8150_v61  ;;  %v4317_v28 = vsel %vm4310_vm4, %v4263_v54, %v4265_v42  ;;  %v5093_v42 = vld [vmem:[#allocation3 + $0x12d8] sm:$0xff]  ;;  %v10282_v61 = vld [vmem:[#allocation2 + $0xa8] sm:$0xff] }
 0x366   : >> { %v4320_v56 = vsel %vm4310_vm4, %v4271_v27, %v4273_v62  ;;  %2946 = vrot.lane.b32.xlu0 %v10214_v63, %s8668_s6  ;;  %v5097_v62 = vld [vmem:[#allocation3 + $0x12f8] sm:$0xff] }
 0x367   : >> { %2948 = vrot.lane.b32.xlu1 %v9949_v46, %s8668_s6  ;;  %v8152_v58 = vpack.c.bf16 %v4320_v56, %v4317_v28  ;;  %v8164_v56 = vpack.c.bf16 %v5093_v42, %v5090_v1  ;;  %v5111_v1 = vld [vmem:[#allocation3 + $0x1368] sm:$0xff] }
 0x368   : >> { %v4281_v40 = vpop.permute.xlu0 %4280  ;;  %v10311_v42 = vld [vmem:[#allocation2 + $0xe8] sm:$0xff] }
 0x369   : >> { %v10224_v50 = vpop.permute.xlu1 %4282  ;;  %8153 = vmatpush1.bf16.msra.mxu1 %v8152_v58 }
 0x36a   : >> { %v4324_v30 = vsel %vm4310_vm4, %v4281_v40, %v10224_v50  ;;  %2952 = vrot.lane.b32.xlu0 %v10222_v26, %s8668_s6 }
 0x36b   : >> { %2954 = vrot.lane.b32.xlu1 %v9958_v34, %s8668_s6 }
 0x36c   : >> { %v4289_v37 = vpop.permute.xlu0 %4288 }
 0x36d   : >> { %v10236_v18 = vpop.permute.xlu1 %4290 }
 0x36e   : >> { %v4327_v44 = vsel %vm4310_vm4, %v4289_v37, %v10236_v18  ;;  %2944 = vrot.lane.b32.xlu0 %v10234_v29, %s8668_s6 }
 0x36f   : >> { %2950 = vrot.lane.b32.xlu1 %v10232_v23, %s8668_s6  ;;  %v8154_v51 = vpack.c.bf16 %v4327_v44, %v4324_v30  ;;  %v5096_v30 = vld [vmem:[#allocation3 + $0x12f0] sm:$0xff] }
 0x370   : >> { %v4279_v52 = vpop.permute.xlu0 %4278 }
 0x371   : >> { %v4287_v6 = vpop.permute.xlu1 %4286  ;;  %8155 = vmatprep.subr.bf16.mxu1 %v8154_v51  ;;  %v4323_v49 = vsel %vm4310_vm4, %v4279_v52, %v4281_v40  ;;  %v8166_v40 = vpack.c.bf16 %v5100_v10, %v5097_v62  ;;  %v5106_v52 = vld [vmem:[#allocation3 + $0x1340] sm:$0xff] }
 0x372   : >> { %v4326_v35 = vsel %vm4310_vm4, %v4287_v6, %v4289_v37  ;;  %2958 = vrot.lane.b32.xlu0 %v10244_v31, %s8668_s6  ;;  %v5099_v37 = vld [vmem:[#allocation3 + $0x1308] sm:$0xff] }
 0x373   : >> { %2960 = vrot.lane.b32.xlu1 %v9975_v16, %s8668_s6  ;;  %v8156_v36 = vpack.c.bf16 %v4326_v35, %v4323_v49  ;;  %v5103_v6 = vld [vmem:[#allocation3 + $0x1328] sm:$0xff]  ;;  %v10294_v35 = vld [vmem:[#allocation2 + $0xa0] sm:$0xff] }
 0x374   : >> { %v4297_v57 = vpop.permute.xlu0 %4296 }
 0x375   : >> { %v10254_v13 = vpop.permute.xlu1 %4298  ;;  %8157 = vmatpush1.bf16.msra.mxu1 %v8156_v36 }
 0x376   : >> { %v4330_v59 = vsel %vm4310_vm4, %v4297_v57, %v10254_v13  ;;  %2964 = vrot.lane.b32.xlu0 %v10252_v19, %s8668_s6 }
 0x377   : >> { %2966 = vrot.lane.b32.xlu1 %v9984_v39, %s8668_s6 }
 0x378   : >> { %v4305_v43 = vpop.permute.xlu0 %4304 }
 0x379   : >> { %v10266_v41 = vpop.permute.xlu1 %4306 }
 0x37a   : >> { %v4333_v48 = vsel %vm4310_vm4, %v4305_v43, %v10266_v41  ;;  %2956 = vrot.lane.b32.xlu0 %v10264_v2, %s8668_s6 }
 0x37b   : >> { %2962 = vrot.lane.b32.xlu1 %v10262_v45, %s8668_s6  ;;  %v8158_v60 = vpack.c.bf16 %v4333_v48, %v4330_v59  ;;  %v5102_v48 = vld [vmem:[#allocation3 + $0x1320] sm:$0xff] }
 0x37c   : >> { %v4295_v38 = vpop.permute.xlu0 %4294 }
 0x37d   : >> { %v4303_v32 = vpop.permute.xlu1 %4302  ;;  %8159 = vmatprep.subr.bf16.mxu1 %v8158_v60  ;;  %v4329_v55 = vsel %vm4310_vm4, %v4295_v38, %v4297_v57  ;;  %v8168_v57 = vpack.c.bf16 %v5099_v37, %v5096_v30  ;;  %v5112_v60 = vld [vmem:[#allocation3 + $0x1370] sm:$0xff] }
 0x37e   : >> { %v4332_v9 = vsel %vm4310_vm4, %v4303_v32, %v4305_v43  ;;  %2970 = vrot.lane.b32.xlu0 %v10274_v25, %s8668_s6  ;;  %v8170_v43 = vpack.c.bf16 %v5106_v52, %v5103_v6  ;;  %v4540_v37 = vld [vmem:[#allocation3 + $0x190] sm:$0xff] }
 0x37f   : >> { %2972 = vrot.lane.b32.xlu1 %v10005_v12, %s8668_s6  ;;  %v8160_v47 = vpack.c.bf16 %v4332_v9, %v4329_v55 }
 0x380   : >> { %v2631_v54 = vpop.permute.xlu0 %2630 }
 0x381   : >> { %v2633_v27 = vpop.permute.xlu1 %2632  ;;  %8161 = vmatpush1.bf16.msra.mxu1 %v8160_v47  ;;  %v2673_v28 = vsel %vm2670_vm3, %v10166_v53, %v2631_v54  ;;  %v10296_v53 = vld [vmem:[#allocation2 + $0x80] sm:$0xff] }
 0x382   : >> { %2716 = vst.msk [vmem:[#allocation3 + $0xb68] sm:$0xff] %vm242_vm1, %v2633_v27  ;;  %v2674_v58 = vsel %vm2670_vm3, %v2631_v54, %v2633_v27  ;;  %8163 = vmatprep.subr.bf16.mxu1 %v8162_v33  ;;  %2976 = vrot.lane.b32.xlu0 %v10282_v61, %s8668_s6  ;;  %v8004_v51 = vpack.c.bf16 %v2673_v28, %v10160_v4  ;;  %v5109_v4 = vld [vmem:[#allocation3 + $0x1358] sm:$0xff]  ;;  %v5108_v33 = vld [vmem:[#allocation3 + $0x1350] sm:$0xff]  ;;  %v4543_v27 = vld [vmem:[#allocation3 + $0x1a8] sm:$0xff] }
 0x383   : >> { %2978 = vrot.lane.b32.xlu1 %v10016_v24, %s8668_s6  ;;  %v8002_v44 = vpack.c.bf16 %v2674_v58, %v10169_v8  ;;  %v5105_v8 = vld [vmem:[#allocation3 + $0x1338] sm:$0xff]  ;;  %v8174_v55 = vpack.c.bf16 %v5112_v60, %v5109_v4  ;;  %v8176_v10 = vpack.c.bf16 %v5111_v1, %v5108_v33  ;;  %v4492_v28 = vld [vmem:[#allocation3 + $0x10] sm:$0xff]  ;;  %v4495_v58 = vld [vmem:[#allocation3 + $0x28] sm:$0xff]  ;;  %v8178_v6 = vpack.c.bf16 %v4543_v27, %v4540_v37 }
 0x384   : >> { %v2635_v36 = vpop.permute.xlu0 %2634  ;;  %v8172_v38 = vpack.c.bf16 %v5105_v8, %v5102_v48  ;;  %v4498_v8 = vld [vmem:[#allocation3 + $0x40] sm:$0xff]  ;;  %v4504_v1 = vld [vmem:[#allocation3 + $0x70] sm:$0xff] }
 0x385   : >> { %v2637_v49 = vpop.permute.xlu1 %2636  ;;  %8003 = vmatprep.subr.bf16.mxu0 %v8002_v44  ;;  %8165 = vmatpush1.bf16.msra.mxu1 %v8164_v56  ;;  %v10320_v44 = vld [vmem:[#allocation2 + $0xe0] sm:$0xff] }
 0x386   : >> { %v2675_v59 = vsel %vm2670_vm3, %v2635_v36, %v2637_v49  ;;  %8005 = vmatpush1.bf16.msra.mxu0 %v8004_v51  ;;  %8167 = vmatprep.subr.bf16.mxu1 %v8166_v40  ;;  %v10322_v51 = vld [vmem:[#allocation2 + $0xc0] sm:$0xff] }
 0x387   : >> { %2974 = vrot.lane.b32.xlu1 %v10294_v35, %s8668_s6  ;;  %2968 = vrot.lane.b32.xlu0 %v10296_v53, %s8668_s6  ;;  %v4398_v36 = vld [vmem:[%s9300_s18 + $0x60] sm:$0xff] }
 0x388   : >> { %v2639_v32 = vpop.permute.xlu0 %2638  ;;  %v4546_v4 = vld [vmem:[#allocation3 + $0x1c0] sm:$0xff] }
 0x389   : >> { %v2641_v11 = vpop.permute.xlu1 %2640  ;;  %8169 = vmatpush1.bf16.msra.mxu1 %v8168_v57  ;;  %v2676_v9 = vsel %vm2670_vm3, %v2637_v49, %v2639_v32  ;;  %2719 = vst.msk [vmem:[#allocation3 + $0xb80] sm:$0xff] %vm242_vm1, %v2639_v32  ;;  %v8180_v57 = vpack.c.bf16 %v4495_v58, %v4492_v28  ;;  %v4561_v58 = vld [vmem:[#allocation3 + $0x238] sm:$0xff]  ;;  %v4558_v37 = vld [vmem:[#allocation3 + $0x220] sm:$0xff] }
 0x38a   : >> { %8171 = vmatprep.subr.bf16.mxu1 %v8170_v43  ;;  %v4549_v43 = vld [vmem:[#allocation3 + $0x1d8] sm:$0xff] }
 0x38b   : >> { %2984 = vrot.lane.b32.xlu1 %v10037_v22, %s8668_s6  ;;  %2982 = vrot.lane.b32.xlu0 %v10303_v20, %s8668_s6  ;;  %v8182_v60 = vpack.c.bf16 %v4549_v43, %v4546_v4  ;;  %v4564_v4 = vld [vmem:[#allocation3 + $0x250] sm:$0xff] }
 0x38c   : >> { %v2643_v62 = vpop.permute.xlu0 %2642 }
 0x38d   : >> { %v2645_v47 = vpop.permute.xlu1 %2644  ;;  %8173 = vmatpush1.bf16.msra.mxu1 %v8172_v38  ;;  %v2677_v54 = vsel %vm2670_vm3, %v2641_v11, %v2643_v62  ;;  %v4411_v38 = vld [vmem:[%s9300_s18 + $0xc8] sm:$0xff] }
 0x38e   : >> { %2722 = vst.msk [vmem:[#allocation3 + $0xb98] sm:$0xff] %vm242_vm1, %v2645_v47  ;;  %v2678_v56 = vsel %vm2670_vm3, %v2643_v62, %v2645_v47  ;;  %8175 = vmatprep.subr.bf16.mxu1 %v8174_v55  ;;  %v8008_v30 = vpack.c.bf16 %v2677_v54, %v2675_v59  ;;  %v4501_v59 = vld [vmem:[#allocation3 + $0x58] sm:$0xff]  ;;  %v4555_v55 = vld [vmem:[#allocation3 + $0x208] sm:$0xff]  ;;  %v4552_v62 = vld [vmem:[#allocation3 + $0x1f0] sm:$0xff] }
 0x38f   : >> { %2990 = vrot.lane.b32.xlu1 %v10048_v17, %s8668_s6  ;;  %2988 = vrot.lane.b32.xlu0 %v10311_v42, %s8668_s6  ;;  %v8006_v40 = vpack.c.bf16 %v2678_v56, %v2676_v9  ;;  %v8184_v9 = vpack.c.bf16 %v4501_v59, %v4498_v8  ;;  %v4507_v47 = vld [vmem:[#allocation3 + $0x88] sm:$0xff]  ;;  %v4424_v56 = vld [vmem:[%s9300_s18 + $0x130] sm:$0xff] }
 0x390   : >> { %v2647_v49 = vpop.permute.xlu0 %2646  ;;  %v8188_v28 = vpack.c.bf16 %v4507_v47, %v4504_v1  ;;  %v4570_v1 = vld [vmem:[#allocation3 + $0x280] sm:$0xff]  ;;  %v4525_v47 = vld [vmem:[#allocation3 + $0x118] sm:$0xff] }
 0x391   : >> { %v2649_v52 = vpop.permute.xlu1 %2648  ;;  %8007 = vmatprep.subr.bf16.mxu0 %v8006_v40  ;;  %8177 = vmatpush1.bf16.msra.mxu1 %v8176_v10  ;;  %v8186_v10 = vpack.c.bf16 %v4555_v55, %v4552_v62 }
 0x392   : >> { %v2679_v48 = vsel %vm2670_vm3, %v2647_v49, %v2649_v52  ;;  %8009 = vmatpush1.bf16.msra.mxu0 %v8008_v30  ;;  %8179 = vmatprep.subr.bf16.mxu1 %v8178_v6  ;;  %v4510_v6 = vld [vmem:[#allocation3 + $0xa0] sm:$0xff]  ;;  %v8190_v49 = vpack.c.bf16 %v4561_v58, %v4558_v37  ;;  %v4476_v37 = vld [vmem:[%s9300_s18 + $0x2d0] sm:$0xff] }
 0x393   : >> { %2986 = vrot.lane.b32.xlu1 %v10320_v44, %s8668_s6  ;;  %2980 = vrot.lane.b32.xlu0 %v10322_v51, %s8668_s6 }
 0x394   : >> { %5857 = vmatmul.mubr.f32.vlgmr.msra.gmra.mrb[16].mxu1 %v4398_v36  ;;  %v2651_v32 = vpop.permute.xlu0 %2650 }
 0x395   : >> { %v2653_v11 = vpop.permute.xlu1 %2652  ;;  %8181 = vmatpush3.bf16.msra.mxu1 %v8180_v57  ;;  %5862 = vmatprep.mubr.f32.mxu1 %v8666_v7  ;;  %v2680_v33 = vsel %vm2670_vm3, %v2649_v52, %v2651_v32  ;;  %2725 = vst.msk [vmem:[#allocation3 + $0xbb0] sm:$0xff] %vm242_vm1, %v2651_v32  ;;  %v4513_v52 = vld [vmem:[#allocation3 + $0xb8] sm:$0xff] }
 0x396   : >> { %8183 = vmatprep.subr.bf16.mxu1 %v8182_v60  ;;  %v8192_v8 = vpack.c.bf16 %v4513_v52, %v4510_v6  ;;  %v4519_v60 = vld [vmem:[#allocation3 + $0xe8] sm:$0xff]  ;;  %v4392_v6 = vld [vmem:[%s9300_s18 + $0x30] sm:$0xff] }
 0x397   : >> { %3109 = vrot.lane.b32.xlu1 %v9949_v46, %s8669_s7  ;;  %3107 = vrot.lane.b32.xlu0 %v10214_v63, %s8669_s7  ;;  %v4528_v52 = vld [vmem:[#allocation3 + $0x130] sm:$0xff] }
 0x398   : >> { %5863 = vmatmul.mubr.f32.gmra.mrb[18].mxu1 %v4411_v38  ;;  %v2655_v54 = vpop.permute.xlu0 %2654  ;;  %v4573_v38 = vld [vmem:[#allocation3 + $0x298] sm:$0xff] }
 0x399   : >> { %v2657_v27 = vpop.permute.xlu1 %2656  ;;  %8185 = vmatpush3.bf16.msra.mxu1 %v8184_v9  ;;  %5868 = vmatprep.mubr.f32.mxu1 %v8666_v7  ;;  %v2681_v40 = vsel %vm2670_vm3, %v2653_v11, %v2655_v54 }
 0x39a   : >> { %2728 = vst.msk [vmem:[#allocation3 + $0xbc8] sm:$0xff] %vm242_vm1, %v2657_v27  ;;  %v2682_v46 = vsel %vm2670_vm3, %v2655_v54, %v2657_v27  ;;  %8187 = vmatprep.subr.bf16.mxu1 %v8186_v10  ;;  %v8012_v30 = vpack.c.bf16 %v2681_v40, %v2679_v48  ;;  %v4522_v54 = vld [vmem:[#allocation3 + $0x100] sm:$0xff] }
 0x39b   : >> { %3115 = vrot.lane.b32.xlu1 %v9958_v34, %s8669_s7  ;;  %3113 = vrot.lane.b32.xlu0 %v10222_v26, %s8669_s7  ;;  %v8010_v63 = vpack.c.bf16 %v2682_v46, %v2680_v33  ;;  %v4437_v34 = vld [vmem:[%s9300_s18 + $0x198] sm:$0xff]  ;;  %v4567_v26 = vld [vmem:[#allocation3 + $0x268] sm:$0xff]  ;;  %v8200_v58 = vpack.c.bf16 %v4525_v47, %v4522_v54 }
 0x39c   : >> { %5869 = vmatmul.mubr.f32.gmra.mrb[20].mxu1 %v4424_v56  ;;  %v2659_v57 = vpop.permute.xlu0 %2658  ;;  %v8194_v32 = vpack.c.bf16 %v4567_v26, %v4564_v4  ;;  %v4651_v54 = vld [vmem:[#allocation3 + $0x508] sm:$0xff] }
 0x39d   : >> { %v2661_v36 = vpop.permute.xlu1 %2660  ;;  %8011 = vmatprep.subr.bf16.mxu0 %v8010_v63  ;;  %8189 = vmatpush3.bf16.msra.mxu1 %v8188_v28  ;;  %v4579_v28 = vld [vmem:[#allocation3 + $0x2c8] sm:$0xff]  ;;  %v4576_v63 = vld [vmem:[#allocation3 + $0x2b0] sm:$0xff] }
 0x39e   : >> { %v2683_v43 = vsel %vm2670_vm3, %v2659_v57, %v2661_v36  ;;  %8013 = vmatpush1.bf16.msra.mxu0 %v8012_v30  ;;  %8191 = vmatprep.subr.bf16.mxu1 %v8190_v49  ;;  %v4531_v30 = vld [vmem:[#allocation3 + $0x148] sm:$0xff]  ;;  %v4585_v49 = vld [vmem:[#allocation3 + $0x2f8] sm:$0xff] }
 0x39f   : >> { %3111 = vrot.lane.b32.xlu1 %v10232_v23, %s8669_s7  ;;  %3105 = vrot.lane.b32.xlu0 %v10234_v29, %s8669_s7  ;;  %v4450_v23 = vld [vmem:[%s9300_s18 + $0x200] sm:$0xff]  ;;  %v4516_v29 = vld [vmem:[#allocation3 + $0xd0] sm:$0xff] }
 0x3a0   : >> { %5874 = vmatprep.mubr.f32.mxu1 %v8666_v7  ;;  %v2663_v59 = vpop.permute.xlu0 %2662  ;;  %v8196_v9 = vpack.c.bf16 %v4519_v60, %v4516_v29 }
 0x3a1   : >> { %v2665_v48 = vpop.permute.xlu1 %2664  ;;  %5875 = vmatmul.mubr.f32.gmra.mrb[22].mxu1 %v4437_v34  ;;  %v2684_v11 = vsel %vm2670_vm3, %v2661_v36, %v2663_v59  ;;  %2731 = vst.msk [vmem:[#allocation3 + $0xbe0] sm:$0xff] %vm242_vm1, %v2663_v59  ;;  %v8204_v36 = vpack.c.bf16 %v4531_v30, %v4528_v52  ;;  %v4582_v34 = vld [vmem:[#allocation3 + $0x2e0] sm:$0xff]  ;;  %v4639_v59 = vld [vmem:[#allocation3 + $0x4a8] sm:$0xff] }
 0x3a2   : >> { %8193 = vmatpush3.bf16.msra.mxu1 %v8192_v8  ;;  %5880 = vmatprep.mubr.f32.mxu1 %v8666_v7  ;;  %v4537_v8 = vld [vmem:[#allocation3 + $0x178] sm:$0xff]  ;;  %v4603_v30 = vld [vmem:[#allocation3 + $0x388] sm:$0xff] }
 0x3a3   : >> { %3121 = vrot.lane.b32.xlu1 %v9975_v16, %s8669_s7  ;;  %3119 = vrot.lane.b32.xlu0 %v10244_v31, %s8669_s7  ;;  %v8198_v16 = vpack.c.bf16 %v4573_v38, %v4570_v1  ;;  %v4463_v31 = vld [vmem:[%s9300_s18 + $0x268] sm:$0xff] }
 0x3a4   : >> { %8195 = vmatprep.subr.bf16.mxu1 %v8194_v32  ;;  %v2667_v33 = vpop.permute.xlu0 %2666  ;;  %v4636_v32 = vld [vmem:[#allocation3 + $0x490] sm:$0xff]  ;;  %v8559_v38 = vld [vmem:[%s9300_s18 + $0x8] sm:$0xff] }
 0x3a5   : >> { %v2669_v55 = vpop.permute.xlu1 %2668  ;;  %5881 = vmatmul.mubr.f32.gmra.mrb[24].mxu1 %v4450_v23  ;;  %v2685_v62 = vsel %vm2670_vm3, %v2665_v48, %v2667_v33  ;;  %v4534_v48 = vld [vmem:[#allocation3 + $0x160] sm:$0xff]  ;;  %v4591_v23 = vld [vmem:[#allocation3 + $0x328] sm:$0xff] }
 0x3a6   : >> { %2734 = vst.msk [vmem:[#allocation3 + $0xbf8] sm:$0xff] %vm242_vm1, %v2669_v55  ;;  %v2686_v10 = vsel %vm2670_vm3, %v2667_v33, %v2669_v55  ;;  %8197 = vmatpush3.bf16.msra.mxu1 %v8196_v9  ;;  %5886 = vmatprep.mubr.f32.mxu1 %v8666_v7  ;;  %v8016_v56 = vpack.c.bf16 %v2685_v62, %v2683_v43  ;;  %v4588_v9 = vld [vmem:[#allocation3 + $0x310] sm:$0xff]  ;;  %v4645_v33 = vld [vmem:[#allocation3 + $0x4d8] sm:$0xff] }
 0x3a7   : >> { %3127 = vrot.lane.b32.xlu1 %v9984_v39, %s8669_s7  ;;  %3125 = vrot.lane.b32.xlu0 %v10252_v19, %s8669_s7  ;;  %v8014_v27 = vpack.c.bf16 %v2686_v10, %v2684_v11  ;;  %v8202_v19 = vpack.c.bf16 %v4579_v28, %v4576_v63  ;;  %v8208_v4 = vpack.c.bf16 %v4537_v8, %v4534_v48  ;;  %v8560_v10 = vld [vmem:[%s9300_s18] sm:$0xff]  ;;  %v4648_v63 = vld [vmem:[#allocation3 + $0x4f0] sm:$0xff]  ;;  %v4663_v48 = vld [vmem:[#allocation3 + $0x568] sm:$0xff] }
 0x3a8   : >> { %8199 = vmatprep.subr.bf16.mxu1 %v8198_v16  ;;  %v2784_v46 = vpop.permute.xlu0 %2783  ;;  %v8212_v1 = vpack.c.bf16 %v4591_v23, %v4588_v9  ;;  %v4642_v16 = vld [vmem:[#allocation3 + $0x4c0] sm:$0xff]  ;;  %v4615_v23 = vld [vmem:[#allocation3 + $0x3e8] sm:$0xff] }
 0x3a9   : >> { %v2786_v40 = vpop.permute.xlu1 %2785  ;;  %8015 = vmatprep.subr.bf16.mxu0 %v8014_v27  ;;  %5887 = vmatmul.mubr.f32.gmra.mrb[26].mxu1 %v4463_v31  ;;  %v4597_v31 = vld [vmem:[#allocation3 + $0x358] sm:$0xff]  ;;  %v4594_v27 = vld [vmem:[#allocation3 + $0x340] sm:$0xff] }
 0x3aa   : >> { %v2832_v39 = vsel %vm2831_vm5, %v2784_v46, %v2786_v40  ;;  %8201 = vmatpush3.bf16.msra.mxu1 %v8200_v58  ;;  %8017 = vmatpush1.bf16.msra.mxu0 %v8016_v56  ;;  %v8561_v56 = vld [vmem:[%s9300_s18 + $0x70] sm:$0xff]  ;;  %v8216_v28 = vpack.c.bf16 %v4597_v31, %v4594_v27  ;;  %v8562_v46 = vld [vmem:[%s9300_s18 + $0x68] sm:$0xff]  ;;  %v8565_v8 = vld [vmem:[%s9300_s18 + $0x140] sm:$0xff] }
 0x3ab   : >> { %3123 = vrot.lane.b32.xlu1 %v10262_v45, %s8669_s7  ;;  %3117 = vrot.lane.b32.xlu0 %v10264_v2, %s8669_s7  ;;  %v8206_v45 = vpack.c.bf16 %v4585_v49, %v4582_v34  ;;  %v4489_v2 = vld [vmem:[%s9300_s18 + $0x338] sm:$0xff]  ;;  %v4675_v31 = vld [vmem:[#allocation3 + $0x5c8] sm:$0xff] }
 0x3ac   : >> { %8203 = vmatprep.subr.bf16.mxu1 %v8202_v19  ;;  %5892 = vmatprep.mubr.f32.mxu1 %v8666_v7  ;;  %v2788_v43 = vpop.permute.xlu0 %2787  ;;  %v4600_v19 = vld [vmem:[#allocation3 + $0x370] sm:$0xff] }
 0x3ad   : >> { %v2790_v57 = vpop.permute.xlu1 %2789  ;;  %5893 = vmatmul.mubr.f32.gmra.mrb[28].mxu1 %v4476_v37  ;;  %5518 = vmatmul.mubr.f32.vlgmr.msra.gmra.mrb[0].mxu0 %v4392_v6  ;;  %v2833_v26 = vsel %vm2831_vm5, %v2786_v40, %v2788_v43  ;;  %2874 = vst.msk [vmem:[#allocation3 + $0xc10] sm:$0xff] %vm242_vm1, %v2788_v43  ;;  %v4657_v37 = vld [vmem:[#allocation3 + $0x538] sm:$0xff]  ;;  %v8220_v6 = vpack.c.bf16 %v4603_v30, %v4600_v19 }
 0x3ae   : >> { %8205 = vmatpush3.bf16.msra.mxu1 %v8204_v36  ;;  %5898 = vmatprep.mubr.f32.mxu1 %v8666_v7  ;;  %v8564_v36 = vld [vmem:[%s9300_s18 + $0xd0] sm:$0xff]  ;;  %v4609_v43 = vld [vmem:[#allocation3 + $0x3b8] sm:$0xff] }
 0x3af   : >> { %3133 = vrot.lane.b32.xlu1 %v10005_v12, %s8669_s7  ;;  %3131 = vrot.lane.b32.xlu0 %v10274_v25, %s8669_s7  ;;  %v8210_v12 = vpack.c.bf16 %v4639_v59, %v4636_v32  ;;  %v4660_v32 = vld [vmem:[#allocation3 + $0x550] sm:$0xff] }
 0x3b0   : >> { %8207 = vmatprep.subr.bf16.mxu1 %v8206_v45  ;;  %v2792_v11 = vpop.permute.xlu0 %2791  ;;  %v4606_v45 = vld [vmem:[#allocation3 + $0x3a0] sm:$0xff] }
 0x3b1   : >> { %v2794_v60 = vpop.permute.xlu1 %2793  ;;  %5899 = vmatmul.mubr.f32.gmra.mrb[30].mxu1 %v4489_v2  ;;  %v2834_v7 = vsel %vm2831_vm5, %v2790_v57, %v2792_v11  ;;  %v4654_v57 = vld [vmem:[#allocation3 + $0x520] sm:$0xff]  ;;  %v8224_v59 = vpack.c.bf16 %v4609_v43, %v4606_v45  ;;  %v8572_v43 = vld [vmem:[%s9300_s18 + $0x270] sm:$0xff]  ;;  %v4735_v45 = vld [vmem:[#allocation3 + $0x7a8] sm:$0xff] }
 0x3b2   : >> { %2877 = vst.msk [vmem:[#allocation3 + $0xc28] sm:$0xff] %vm242_vm1, %v2794_v60  ;;  %v2835_v29 = vsel %vm2831_vm5, %v2792_v11, %v2794_v60  ;;  %8209 = vmatpush3.bf16.msra.mxu1 %v8208_v4  ;;  %5969 = vmatprep.mubr.f32.mxu1 %v8559_v38  ;;  %v8020_v55 = vpack.c.bf16 %v2834_v7, %v2832_v39  ;;  %v8566_v11 = vld [vmem:[%s9300_s18 + $0x138] sm:$0xff]  ;;  %v10429_v38 = vld [vmem:[#allocation2 + $0x8] sm:$0xff] }
 0x3b3   : >> { %3139 = vrot.lane.b32.xlu1 %v10016_v24, %s8669_s7  ;;  %3137 = vrot.lane.b32.xlu0 %v10282_v61, %s8669_s7  ;;  %v8018_v25 = vpack.c.bf16 %v2835_v29, %v2833_v26  ;;  %v8214_v61 = vpack.c.bf16 %v4645_v33, %v4642_v16  ;;  %v4669_v29 = vld [vmem:[#allocation3 + $0x598] sm:$0xff]  ;;  %v4618_v16 = vld [vmem:[#allocation3 + $0x400] sm:$0xff] }
 0x3b4   : >> { %8211 = vmatprep.subr.bf16.mxu1 %v8210_v12  ;;  %v2796_v62 = vpop.permute.xlu0 %2795  ;;  %v10427_v12 = vld [vmem:[#allocation2 + $0x10] sm:$0xff] }
 0x3b5   : >> { %v2798_v47 = vpop.permute.xlu1 %2797  ;;  %8019 = vmatprep.subr.bf16.mxu0 %v8018_v25  ;;  %5970 = vmatmul.mubr.f32.vlgmr.msra.gmra.mrb[32].mxu1 %v8560_v10  ;;  %v8567_v25 = vld [vmem:[%s9300_s18 + $0x1a8] sm:$0xff]  ;;  %v8569_v10 = vld [vmem:[%s9300_s18 + $0x210] sm:$0xff] }
 0x3b6   : >> { %v2836_v24 = vsel %vm2831_vm5, %v2796_v62, %v2798_v47  ;;  %8213 = vmatpush3.bf16.msra.mxu1 %v8212_v1  ;;  %8021 = vmatpush1.bf16.msra.mxu0 %v8020_v55  ;;  %v8568_v1 = vld [vmem:[%s9300_s18 + $0x1a0] sm:$0xff] }
 0x3b7   : >> { %3135 = vrot.lane.b32.xlu1 %v10294_v35, %s8669_s7  ;;  %3129 = vrot.lane.b32.xlu0 %v10296_v53, %s8669_s7  ;;  %v8218_v35 = vpack.c.bf16 %v4651_v54, %v4648_v63  ;;  %v8563_v53 = vld [vmem:[%s9300_s18 + $0xd8] sm:$0xff] }
 0x3b8   : >> { %8215 = vmatprep.subr.bf16.mxu1 %v8214_v61  ;;  %5974 = vmatprep.mubr.f32.mxu1 %v8561_v56  ;;  %v2800_v40 = vpop.permute.xlu0 %2799  ;;  %v10442_v61 = vld [vmem:[#allocation2 + $0x28] sm:$0xff] }
 0x3b9   : >> { %v2802_v58 = vpop.permute.xlu1 %2801  ;;  %5975 = vmatmul.mubr.f32.gmra.mrb[34].mxu1 %v8562_v46  ;;  %v2837_v39 = vsel %vm2831_vm5, %v2798_v47, %v2800_v40  ;;  %2880 = vst.msk [vmem:[#allocation3 + $0xc40] sm:$0xff] %vm242_vm1, %v2800_v40  ;;  %v4666_v47 = vld [vmem:[#allocation3 + $0x580] sm:$0xff]  ;;  %v4627_v40 = vld [vmem:[#allocation3 + $0x448] sm:$0xff] }
 0x3ba   : >> { %8217 = vmatpush3.bf16.msra.mxu1 %v8216_v28  ;;  %5979 = vmatprep.mubr.f32.mxu1 %v8563_v53  ;;  %v8570_v28 = vld [vmem:[%s9300_s18 + $0x208] sm:$0xff]  ;;  %v4624_v53 = vld [vmem:[#allocation3 + $0x430] sm:$0xff] }
 0x3bb   : >> { %3145 = vrot.lane.b32.xlu1 %v10037_v22, %s8669_s7  ;;  %3143 = vrot.lane.b32.xlu0 %v10303_v20, %s8669_s7  ;;  %v8222_v20 = vpack.c.bf16 %v4657_v37, %v4654_v57  ;;  %v4681_v37 = vld [vmem:[#allocation3 + $0x5f8] sm:$0xff] }
 0x3bc   : >> { %8219 = vmatprep.subr.bf16.mxu1 %v8218_v35  ;;  %v2804_v49 = vpop.permute.xlu0 %2803 }
 0x3bd   : >> { %v2806_v52 = vpop.permute.xlu1 %2805  ;;  %5980 = vmatmul.mubr.f32.gmra.mrb[36].mxu1 %v8564_v36  ;;  %v2838_v34 = vsel %vm2831_vm5, %v2802_v58, %v2804_v49  ;;  %v4672_v58 = vld [vmem:[#allocation3 + $0x5b0] sm:$0xff] }
 0x3be   : >> { %2883 = vst.msk [vmem:[#allocation3 + $0xc58] sm:$0xff] %vm242_vm1, %v2806_v52  ;;  %v2839_v22 = vsel %vm2831_vm5, %v2804_v49, %v2806_v52  ;;  %8221 = vmatpush3.bf16.msra.mxu1 %v8220_v6  ;;  %5984 = vmatprep.mubr.f32.mxu1 %v8565_v8  ;;  %v8024_v2 = vpack.c.bf16 %v2838_v34, %v2836_v24  ;;  %v10440_v24 = vld [vmem:[#allocation2 + $0x30] sm:$0xff]  ;;  %v10454_v6 = vld [vmem:[#allocation2 + $0x20] sm:$0xff] }
 0x3bf   : >> { %3151 = vrot.lane.b32.xlu1 %v10048_v17, %s8669_s7  ;;  %3149 = vrot.lane.b32.xlu0 %v10311_v42, %s8669_s7  ;;  %v8022_v26 = vpack.c.bf16 %v2839_v22, %v2837_v39  ;;  %v8226_v17 = vpack.c.bf16 %v4663_v48, %v4660_v32  ;;  %v4612_v42 = vld [vmem:[#allocation3 + $0x3d0] sm:$0xff]  ;;  %v8234_v30 = vpack.c.bf16 %v4675_v31, %v4672_v58  ;;  %v8571_v39 = vld [vmem:[%s9300_s18 + $0x278] sm:$0xff]  ;;  %v10456_v52 = vld [vmem:[#allocation2] sm:$0xff] }
 0x3c0   : >> { %8223 = vmatprep.subr.bf16.mxu1 %v8222_v20  ;;  %v2808_v60 = vpop.permute.xlu0 %2807  ;;  %v8228_v9 = vpack.c.bf16 %v4615_v23, %v4612_v42  ;;  %v8236_v49 = vpack.c.bf16 %v4627_v40, %v4624_v53  ;;  %v4678_v34 = vld [vmem:[#allocation3 + $0x5e0] sm:$0xff]  ;;  %v4633_v22 = vld [vmem:[#allocation3 + $0x478] sm:$0xff]  ;;  %v10467_v48 = vld [vmem:[#allocation2 + $0x48] sm:$0xff] }
 0x3c1   : >> { %v2810_v4 = vpop.permute.xlu1 %2809  ;;  %8023 = vmatprep.subr.bf16.mxu0 %v8022_v26  ;;  %5985 = vmatmul.mubr.f32.gmra.mrb[38].mxu1 %v8566_v11  ;;  %v8238_v8 = vpack.c.bf16 %v4681_v37, %v4678_v34  ;;  %v4630_v26 = vld [vmem:[#allocation3 + $0x460] sm:$0xff]  ;;  %v8574_v32 = vld [vmem:[%s9300_s18 + $0x2d8] sm:$0xff]  ;;  %v4732_v23 = vld [vmem:[#allocation3 + $0x790] sm:$0xff] }
 0x3c2   : >> { %v10421_v7 = vsel %vm2831_vm5, %v2808_v60, %v2810_v4  ;;  %8225 = vmatpush3.bf16.msra.mxu1 %v8224_v59  ;;  %8025 = vmatpush1.bf16.msra.mxu0 %v8024_v2  ;;  %v10465_v2 = vld [vmem:[#allocation2 + $0x50] sm:$0xff]  ;;  %v8573_v59 = vld [vmem:[%s9300_s18 + $0x2e0] sm:$0xff]  ;;  %v8242_v42 = vpack.c.bf16 %v4735_v45, %v4732_v23  ;;  %v4747_v40 = vld [vmem:[#allocation3 + $0x808] sm:$0xff] }
 0x3c3   : >> { %3147 = vrot.lane.b32.xlu1 %v10320_v44, %s8669_s7  ;;  %3141 = vrot.lane.b32.xlu0 %v10322_v51, %s8669_s7  ;;  %v4621_v44 = vld [vmem:[#allocation3 + $0x418] sm:$0xff]  ;;  %v8230_v51 = vpack.c.bf16 %v4669_v29, %v4666_v47  ;;  %v4690_v58 = vld [vmem:[#allocation3 + $0x640] sm:$0xff]  ;;  %v4699_v37 = vld [vmem:[#allocation3 + $0x688] sm:$0xff] }
 0x3c4   : >> { %8227 = vmatprep.subr.bf16.mxu1 %v8226_v17  ;;  %5989 = vmatprep.mubr.f32.mxu1 %v8567_v25  ;;  %v2812_v33 = vpop.permute.xlu0 %2811  ;;  %v8232_v27 = vpack.c.bf16 %v4621_v44, %v4618_v16  ;;  %v8575_v29 = vld [vmem:[%s9300_s18 + $0x18] sm:$0xff]  ;;  %v10516_v23 = vld [vmem:[%s9300_s18 + $0x108] sm:$0xff] }
 0x3c5   : >> { %v2816_v55 = vpop.permute.xlu1 %2815  ;;  %5990 = vmatmul.mubr.f32.gmra.mrb[40].mxu1 %v8568_v1  ;;  %v2841_v62 = vsel %vm2831_vm5, %v2810_v4, %v2812_v33  ;;  %2886 = vst.msk [vmem:[#allocation3 + $0xc70] sm:$0xff] %vm242_vm1, %v2812_v33  ;;  %v8240_v4 = vpack.c.bf16 %v4633_v22, %v4630_v26  ;;  %v10478_v33 = vld [vmem:[#allocation2 + $0x70] sm:$0xff]  ;;  %v10480_v1 = vld [vmem:[#allocation2 + $0x68] sm:$0xff]  ;;  %v4693_v16 = vld [vmem:[#allocation3 + $0x658] sm:$0xff] }
 0x3c6   : >> { %8229 = vmatpush3.bf16.msra.mxu1 %v8228_v9  ;;  %5994 = vmatprep.mubr.f32.mxu1 %v8569_v10  ;;  %v4684_v9 = vld [vmem:[#allocation3 + $0x610] sm:$0xff]  ;;  %v4738_v10 = vld [vmem:[#allocation3 + $0x7c0] sm:$0xff]  ;;  %v8578_v53 = vld [vmem:[%s9300_s18 + $0x78] sm:$0xff] }
 0x3c7   : >> { %3270 = vrot.lane.b32.xlu1 %v10427_v12, %s8670_s8  ;;  %3268 = vrot.lane.b32.xlu0 %v10429_v38, %s8670_s8  ;;  %v10502_v34 = vld [vmem:[%s9300_s18 + $0x98] sm:$0xff]  ;;  %v4696_v22 = vld [vmem:[#allocation3 + $0x670] sm:$0xff]  ;;  %v10510_v26 = vld [vmem:[#allocation2 + $0x88] sm:$0xff] }
 0x3c8   : >> { %8231 = vmatprep.subr.bf16.mxu1 %v8230_v51  ;;  %v2818_v56 = vpop.permute.xlu0 %2817  ;;  %v8576_v51 = vld [vmem:[%s9300_s18 + $0x10] sm:$0xff]  ;;  %v8252_v45 = vpack.c.bf16 %v4699_v37, %v4696_v22  ;;  %v4717_v22 = vld [vmem:[#allocation3 + $0x718] sm:$0xff] }
 0x3c9   : >> { %v2814_v54 = vpop.permute.xlu1 %2813  ;;  %5995 = vmatmul.mubr.f32.gmra.mrb[42].mxu1 %v8570_v28  ;;  %v2843_v63 = vsel %vm2831_vm5, %v2816_v55, %v2818_v56  ;;  %2889 = vst.msk [vmem:[#allocation3 + $0xc88] sm:$0xff] %vm242_vm1, %v2818_v56  ;;  %v8577_v56 = vld [vmem:[%s9300_s18 + $0x80] sm:$0xff] }
 0x3ca   : >> { %v2842_v46 = vsel %vm2831_vm5, %v2814_v54, %v2816_v55  ;;  %8233 = vmatpush3.bf16.msra.mxu1 %v8232_v27  ;;  %5999 = vmatprep.mubr.f32.mxu1 %v8571_v39  ;;  %v8026_v35 = vpack.c.bf16 %v2843_v63, %v2841_v62  ;;  %v4741_v55 = vld [vmem:[#allocation3 + $0x7d8] sm:$0xff]  ;;  %v10492_v63 = vld [vmem:[#allocation2 + $0x40] sm:$0xff] }
 0x3cb   : >> { %3276 = vrot.lane.b32.xlu1 %v10440_v24, %s8670_s8  ;;  %3274 = vrot.lane.b32.xlu0 %v10442_v61, %s8670_s8  ;;  %v8028_v19 = vpack.c.bf16 %v2842_v46, %v10421_v7  ;;  %v4687_v7 = vld [vmem:[#allocation3 + $0x628] sm:$0xff]  ;;  %v8246_v54 = vpack.c.bf16 %v4741_v55, %v4738_v10  ;;  %v10490_v46 = vld [vmem:[#allocation2 + $0x60] sm:$0xff]  ;;  %v10525_v55 = vld [vmem:[#allocation2 + $0xb0] sm:$0xff] }
 0x3cc   : >> { %8235 = vmatprep.subr.bf16.mxu1 %v8234_v30  ;;  %v2822_v57 = vpop.permute.xlu0 %2821  ;;  %8027 = vmatprep.subr.bf16.mxu0 %v8026_v35  ;;  %v8244_v47 = vpack.c.bf16 %v4687_v7, %v4684_v9  ;;  %v8248_v30 = vpack.c.bf16 %v4693_v16, %v4690_v58  ;;  %v4759_v9 = vld [vmem:[#allocation3 + $0x868] sm:$0xff]  ;;  %v4756_v16 = vld [vmem:[#allocation3 + $0x850] sm:$0xff]  ;;  %v8583_v58 = vld [vmem:[%s9300_s18 + $0x1b8] sm:$0xff] }
 0x3cd   : >> { %v2824_v36 = vpop.permute.xlu1 %2823  ;;  %6000 = vmatmul.mubr.f32.gmra.mrb[44].mxu1 %v8572_v43  ;;  %8029 = vmatpush1.bf16.msra.mxu0 %v8028_v19  ;;  %v4744_v19 = vld [vmem:[#allocation3 + $0x7f0] sm:$0xff]  ;;  %v8579_v43 = vld [vmem:[%s9300_s18 + $0xe8] sm:$0xff] }
 0x3ce   : >> { %2892 = vst.msk [vmem:[#allocation3 + $0xca0] sm:$0xff] %vm242_vm1, %v2824_v36  ;;  %v2845_v20 = vsel %vm2831_vm5, %v2822_v57, %v2824_v36  ;;  %8237 = vmatpush3.bf16.msra.mxu1 %v8236_v49  ;;  %6004 = vmatprep.mubr.f32.mxu1 %v8573_v59  ;;  %v10496_v49 = vld [vmem:[%s9300_s18 + $0xa0] sm:$0xff]  ;;  %v8582_v10 = vld [vmem:[%s9300_s18 + $0x148] sm:$0xff] }
 0x3cf   : >> { %3272 = vrot.lane.b32.xlu1 %v10454_v6, %s8670_s8  ;;  %3266 = vrot.lane.b32.xlu0 %v10456_v52, %s8670_s8 }
 0x3d0   : >> { %8239 = vmatprep.subr.bf16.mxu1 %v8238_v8  ;;  %v2828_v11 = vpop.permute.xlu0 %2827  ;;  %v10508_v8 = vld [vmem:[#allocation2 + $0x90] sm:$0xff]  ;;  %5523 = vmatprep.mubr.f32.mxu0 %v10496_v49 }
 0x3d1   : >> { %v2830_v60 = vpop.permute.xlu1 %2829  ;;  %6005 = vmatmul.mubr.f32.gmra.mrb[46].mxu1 %v8574_v32  ;;  %v4705_v32 = vld [vmem:[#allocation3 + $0x6b8] sm:$0xff]  ;;  %5524 = vmatmul.mubr.f32.gmra.mrb[2].mxu0 %v10502_v34 }
 0x3d2   : >> { %2895 = vst.msk [vmem:[#allocation3 + $0xcb8] sm:$0xff] %vm242_vm1, %v2830_v60  ;;  %v2847_v17 = vsel %vm2831_vm5, %v2828_v11, %v2830_v60  ;;  %8241 = vmatpush3.bf16.msra.mxu1 %v8240_v4  ;;  %6074 = vmatprep.mubr.f32.mxu1 %v8575_v29  ;;  %v8580_v60 = vld [vmem:[%s9300_s18 + $0xe0] sm:$0xff] }
 0x3d3   : >> { %3282 = vrot.lane.b32.xlu1 %v10465_v2, %s8670_s8  ;;  %3280 = vrot.lane.b32.xlu0 %v10467_v48, %s8670_s8  ;;  %v8030_v25 = vpack.c.bf16 %v2847_v17, %v2845_v20  ;;  %v4753_v20 = vld [vmem:[#allocation3 + $0x838] sm:$0xff] }
 0x3d4   : >> { %8243 = vmatprep.subr.bf16.mxu1 %v8242_v42  ;;  %v2820_v62 = vpop.permute.xlu0 %2819  ;;  %v8581_v42 = vld [vmem:[%s9300_s18 + $0x150] sm:$0xff]  ;;  %5529 = vmatprep.mubr.f32.mxu0 %v10516_v23 }
 0x3d5   : >> { %v2826_v44 = vpop.permute.xlu1 %2825  ;;  %8031 = vmatprep.subr.bf16.mxu0 %v8030_v25  ;;  %6075 = vmatmul.mubr.f32.vlgmr.msra.gmra.mrb[48].mxu1 %v8576_v51  ;;  %v2844_v27 = vsel %vm2831_vm5, %v2820_v62, %v2822_v57  ;;  %v8250_v57 = vpack.c.bf16 %v4747_v40, %v4744_v19  ;;  %v4702_v25 = vld [vmem:[#allocation3 + $0x6a0] sm:$0xff] }
 0x3d6   : >> { %v2846_v31 = vsel %vm2831_vm5, %v2826_v44, %v2828_v11  ;;  %8245 = vmatpush3.bf16.msra.mxu1 %v8244_v47  ;;  %6079 = vmatprep.mubr.f32.mxu1 %v8577_v56  ;;  %v4750_v11 = vld [vmem:[#allocation3 + $0x820] sm:$0xff]  ;;  %v10527_v47 = vld [vmem:[#allocation2 + $0xa8] sm:$0xff]  ;;  %v8256_v44 = vpack.c.bf16 %v4705_v32, %v4702_v25 }
 0x3d7   : >> { %3288 = vrot.lane.b32.xlu1 %v10478_v33, %s8670_s8  ;;  %3286 = vrot.lane.b32.xlu0 %v10480_v1, %s8670_s8  ;;  %v8032_v28 = vpack.c.bf16 %v2846_v31, %v2844_v27  ;;  %v8254_v17 = vpack.c.bf16 %v4753_v20, %v4750_v11  ;;  %v4711_v31 = vld [vmem:[#allocation3 + $0x6e8] sm:$0xff]  ;;  %v10532_v27 = vld [vmem:[%s9300_s18 + $0x100] sm:$0xff]  ;;  %v10548_v20 = vld [vmem:[%s9300_s18 + $0x170] sm:$0xff] }
 0x3d8   : >> { %8247 = vmatprep.subr.bf16.mxu1 %v8246_v54  ;;  %v2947_v35 = vpop.permute.xlu0 %2946  ;;  %v10543_v19 = vld [vmem:[#allocation2 + $0x80] sm:$0xff]  ;;  %5530 = vmatmul.mubr.f32.gmra.mrb[4].mxu0 %v10532_v27  ;;  %v4771_v32 = vld [vmem:[#allocation3 + $0x8c8] sm:$0xff] }
 0x3d9   : >> { %v2949_v39 = vpop.permute.xlu1 %2948  ;;  %8033 = vmatpush1.bf16.msra.mxu0 %v8032_v28  ;;  %6080 = vmatmul.mubr.f32.gmra.mrb[50].mxu1 %v8578_v53  ;;  %v8258_v28 = vpack.c.bf16 %v4759_v9, %v4756_v16  ;;  %v10541_v53 = vld [vmem:[#allocation2 + $0xa0] sm:$0xff]  ;;  %v8586_v9 = vld [vmem:[%s9300_s18 + $0x218] sm:$0xff] }
 0x3da   : >> { %3035 = vst.msk [vmem:[#allocation3 + $0xcd0] sm:$0xff] %vm242_vm1, %v2949_v39  ;;  %v2994_v36 = vsel %vm2992_vm6, %v2947_v35, %v2949_v39  ;;  %8249 = vmatpush3.bf16.msra.mxu1 %v8248_v30  ;;  %6084 = vmatprep.mubr.f32.mxu1 %v8579_v43  ;;  %v4708_v30 = vld [vmem:[#allocation3 + $0x6d0] sm:$0xff]  ;;  %v4765_v39 = vld [vmem:[#allocation3 + $0x898] sm:$0xff]  ;;  %v4762_v43 = vld [vmem:[#allocation3 + $0x880] sm:$0xff] }
 0x3db   : >> { %3284 = vrot.lane.b32.xlu1 %v10490_v46, %s8670_s8  ;;  %3278 = vrot.lane.b32.xlu0 %v10492_v63, %s8670_s8  ;;  %v4714_v11 = vld [vmem:[#allocation3 + $0x700] sm:$0xff] }
 0x3dc   : >> { %8251 = vmatprep.subr.bf16.mxu1 %v8250_v57  ;;  %v2953_v4 = vpop.permute.xlu0 %2952  ;;  %v8584_v57 = vld [vmem:[%s9300_s18 + $0x1b0] sm:$0xff]  ;;  %5535 = vmatprep.mubr.f32.mxu0 %v10548_v20 }
 0x3dd   : >> { %v2955_v59 = vpop.permute.xlu1 %2954  ;;  %6085 = vmatmul.mubr.f32.gmra.mrb[52].mxu1 %v8580_v60  ;;  %v10554_v60 = vld [vmem:[%s9300_s18 + $0x168] sm:$0xff] }
 0x3de   : >> { %3038 = vst.msk [vmem:[#allocation3 + $0xce8] sm:$0xff] %vm242_vm1, %v2955_v59  ;;  %v2996_v7 = vsel %vm2992_vm6, %v2953_v4, %v2955_v59  ;;  %8253 = vmatpush3.bf16.msra.mxu1 %v8252_v45  ;;  %6089 = vmatprep.mubr.f32.mxu1 %v8581_v42  ;;  %v8262_v59 = vpack.c.bf16 %v4765_v39, %v4762_v43  ;;  %v4729_v43 = vld [vmem:[#allocation3 + $0x778] sm:$0xff] }
 0x3df   : >> { %3294 = vrot.lane.b32.xlu1 %v10508_v8, %s8670_s8  ;;  %3292 = vrot.lane.b32.xlu0 %v10510_v26, %s8670_s8  ;;  %v8034_v29 = vpack.c.bf16 %v2996_v7, %v2994_v36  ;;  %v10560_v7 = vld [vmem:[#allocation2 + $0xd0] sm:$0xff]  ;;  %v8264_v42 = vpack.c.bf16 %v4717_v22, %v4714_v11 }
 0x3e0   : >> { %8255 = vmatprep.subr.bf16.mxu1 %v8254_v17  ;;  %v2945_v51 = vpop.permute.xlu0 %2944  ;;  %v10562_v17 = vld [vmem:[#allocation2 + $0xc8] sm:$0xff]  ;;  %5536 = vmatmul.mubr.f32.gmra.mrb[6].mxu0 %v10554_v60  ;;  %v10584_v22 = vld [vmem:[%s9300_s18 + $0x1d0] sm:$0xff] }
 0x3e1   : >> { %v2951_v62 = vpop.permute.xlu1 %2950  ;;  %8035 = vmatprep.subr.bf16.mxu0 %v8034_v29  ;;  %6090 = vmatmul.mubr.f32.gmra.mrb[54].mxu1 %v8582_v10  ;;  %v2993_v56 = vsel %vm2992_vm6, %v2945_v51, %v2947_v35  ;;  %v8260_v35 = vpack.c.bf16 %v4711_v31, %v4708_v30  ;;  %v10568_v51 = vld [vmem:[%s9300_s18 + $0x1d8] sm:$0xff]  ;;  %v8587_v31 = vld [vmem:[%s9300_s18 + $0x288] sm:$0xff]  ;;  %v8589_v11 = vld [vmem:[%s9300_s18 + $0x2f0] sm:$0xff] }
 0x3e2   : >> { %v2995_v54 = vsel %vm2992_vm6, %v2951_v62, %v2953_v4  ;;  %8257 = vmatpush3.bf16.msra.mxu1 %v8256_v44  ;;  %6094 = vmatprep.mubr.f32.mxu1 %v8583_v58  ;;  %v8585_v4 = vld [vmem:[%s9300_s18 + $0x220] sm:$0xff]  ;;  %v4768_v44 = vld [vmem:[#allocation3 + $0x8b0] sm:$0xff]  ;;  %v4723_v62 = vld [vmem:[#allocation3 + $0x748] sm:$0xff] }
 0x3e3   : >> { %3300 = vrot.lane.b32.xlu1 %v10525_v55, %s8670_s8  ;;  %3298 = vrot.lane.b32.xlu0 %v10527_v47, %s8670_s8  ;;  %v8036_v40 = vpack.c.bf16 %v2995_v54, %v2993_v56  ;;  %v8266_v16 = vpack.c.bf16 %v4771_v32, %v4768_v44  ;;  %v4720_v56 = vld [vmem:[#allocation3 + $0x730] sm:$0xff] }
 0x3e4   : >> { %8259 = vmatprep.subr.bf16.mxu1 %v8258_v28  ;;  %v2959_v36 = vpop.permute.xlu0 %2958  ;;  %v4777_v28 = vld [vmem:[#allocation3 + $0x8f8] sm:$0xff]  ;;  %v10577_v58 = vld [vmem:[#allocation2 + $0xf0] sm:$0xff]  ;;  %v8268_v30 = vpack.c.bf16 %v4723_v62, %v4720_v56  ;;  %5541 = vmatprep.mubr.f32.mxu0 %v10568_v51 }
 0x3e5   : >> { %v2961_v37 = vpop.permute.xlu1 %2960  ;;  %8037 = vmatpush1.bf16.msra.mxu0 %v8036_v40  ;;  %6095 = vmatmul.mubr.f32.gmra.mrb[56].mxu1 %v8584_v57  ;;  %v10579_v40 = vld [vmem:[#allocation2 + $0xe8] sm:$0xff]  ;;  %v4774_v57 = vld [vmem:[#allocation3 + $0x8e0] sm:$0xff] }
 0x3e6   : >> { %3041 = vst.msk [vmem:[#allocation3 + $0xd00] sm:$0xff] %vm242_vm1, %v2961_v37  ;;  %v2998_v45 = vsel %vm2992_vm6, %v2959_v36, %v2961_v37  ;;  %8261 = vmatpush3.bf16.msra.mxu1 %v8260_v35  ;;  %6099 = vmatprep.mubr.f32.mxu1 %v8585_v4  ;;  %v8588_v37 = vld [vmem:[%s9300_s18 + $0x280] sm:$0xff]  ;;  %v8270_v4 = vpack.c.bf16 %v4777_v28, %v4774_v57 }
 0x3e7   : >> { %3296 = vrot.lane.b32.xlu1 %v10541_v53, %s8670_s8  ;;  %3290 = vrot.lane.b32.xlu0 %v10543_v19, %s8670_s8 }
 0x3e8   : >> { %8263 = vmatprep.subr.bf16.mxu1 %v8262_v59  ;;  %v2965_v25 = vpop.permute.xlu0 %2964  ;;  %5542 = vmatmul.mubr.f32.gmra.mrb[8].mxu0 %v10584_v22 }
 0x3e9   : >> { %v2967_v29 = vpop.permute.xlu1 %2966  ;;  %6100 = vmatmul.mubr.f32.gmra.mrb[58].mxu1 %v8586_v9  ;;  %v10593_v9 = vld [vmem:[#allocation2 + $0xe0] sm:$0xff] }
 0x3ea   : >> { %3044 = vst.msk [vmem:[#allocation3 + $0xd18] sm:$0xff] %vm242_vm1, %v2967_v29  ;;  %v3000_v10 = vsel %vm2992_vm6, %v2965_v25, %v2967_v29  ;;  %8265 = vmatpush3.bf16.msra.mxu1 %v8264_v42  ;;  %6104 = vmatprep.mubr.f32.mxu1 %v8587_v31  ;;  %v4726_v42 = vld [vmem:[#allocation3 + $0x760] sm:$0xff]  ;;  %v4831_v29 = vld [vmem:[#allocation3 + $0xaa8] sm:$0xff] }
 0x3eb   : >> { %3306 = vrot.lane.b32.xlu1 %v10560_v7, %s8670_s8  ;;  %3304 = vrot.lane.b32.xlu0 %v10562_v17, %s8670_s8  ;;  %v8038_v54 = vpack.c.bf16 %v3000_v10, %v2998_v45  ;;  %v8590_v10 = vld [vmem:[%s9300_s18 + $0x2e8] sm:$0xff] }
 0x3ec   : >> { %8267 = vmatprep.subr.bf16.mxu1 %v8266_v16  ;;  %v2957_v35 = vpop.permute.xlu0 %2956  ;;  %v4828_v16 = vld [vmem:[#allocation3 + $0xa90] sm:$0xff]  ;;  %v4783_v31 = vld [vmem:[#allocation3 + $0x928] sm:$0xff] }
 0x3ed   : >> { %v2963_v39 = vpop.permute.xlu1 %2962  ;;  %8039 = vmatprep.subr.bf16.mxu0 %v8038_v54  ;;  %6105 = vmatmul.mubr.f32.gmra.mrb[60].mxu1 %v8588_v37  ;;  %v2997_v59 = vsel %vm2992_vm6, %v2957_v35, %v2959_v36  ;;  %v8272_v36 = vpack.c.bf16 %v4729_v43, %v4726_v42  ;;  %v10600_v54 = vld [vmem:[%s9300_s18 + $0x240] sm:$0xff]  ;;  %v8274_v28 = vpack.c.bf16 %v4831_v29, %v4828_v16  ;;  %v4780_v35 = vld [vmem:[#allocation3 + $0x910] sm:$0xff]  ;;  %v4837_v37 = vld [vmem:[#allocation3 + $0xad8] sm:$0xff] }
 0x3ee   : >> { %v2999_v45 = vsel %vm2992_vm6, %v2963_v39, %v2965_v25  ;;  %8269 = vmatpush3.bf16.msra.mxu1 %v8268_v30  ;;  %6109 = vmatprep.mubr.f32.mxu1 %v8589_v11  ;;  %v10595_v25 = vld [vmem:[#allocation2 + $0xc0] sm:$0xff]  ;;  %v8591_v30 = vld [vmem:[%s9300_s18 + $0x28] sm:$0xff]  ;;  %v10606_v39 = vld [vmem:[%s9300_s18 + $0x238] sm:$0xff]  ;;  %v8276_v57 = vpack.c.bf16 %v4783_v31, %v4780_v35 }
 0x3ef   : >> { %3312 = vrot.lane.b32.xlu1 %v10577_v58, %s8670_s8  ;;  %3310 = vrot.lane.b32.xlu0 %v10579_v40, %s8670_s8  ;;  %v8040_v32 = vpack.c.bf16 %v2999_v45, %v2997_v59  ;;  %v8592_v59 = vld [vmem:[%s9300_s18 + $0x20] sm:$0xff]  ;;  %v4789_v11 = vld [vmem:[#allocation3 + $0x958] sm:$0xff]  ;;  %v4843_v16 = vld [vmem:[#allocation3 + $0xb08] sm:$0xff] }
 0x3f0   : >> { %8271 = vmatprep.subr.bf16.mxu1 %v8270_v4  ;;  %v2971_v62 = vpop.permute.xlu0 %2970  ;;  %5547 = vmatprep.mubr.f32.mxu0 %v10600_v54  ;;  %v4834_v4 = vld [vmem:[#allocation3 + $0xac0] sm:$0xff]  ;;  %v8594_v35 = vld [vmem:[%s9300_s18 + $0x88] sm:$0xff] }
 0x3f1   : >> { %v2973_v44 = vpop.permute.xlu1 %2972  ;;  %8041 = vmatpush1.bf16.msra.mxu0 %v8040_v32  ;;  %6110 = vmatmul.mubr.f32.gmra.mrb[62].mxu1 %v8590_v10  ;;  %v10616_v32 = vld [vmem:[%s9300_s18 + $0x2a8] sm:$0xff]  ;;  %v8278_v29 = vpack.c.bf16 %v4837_v37, %v4834_v4  ;;  %v4786_v10 = vld [vmem:[#allocation3 + $0x940] sm:$0xff]  ;;  %v4840_v37 = vld [vmem:[#allocation3 + $0xaf0] sm:$0xff] }
 0x3f2   : >> { %3047 = vst.msk [vmem:[#allocation3 + $0xd30] sm:$0xff] %vm242_vm1, %v2973_v44  ;;  %v3002_v56 = vsel %vm2992_vm6, %v2971_v62, %v2973_v44  ;;  %8273 = vmatpush3.bf16.msra.mxu1 %v8272_v36  ;;  %6179 = vmatprep.mubr.f32.mxu1 %v8591_v30  ;;  %v8593_v36 = vld [vmem:[%s9300_s18 + $0x90] sm:$0xff]  ;;  %v8280_v31 = vpack.c.bf16 %v4789_v11, %v4786_v10  ;;  %v4801_v10 = vld [vmem:[#allocation3 + $0x9b8] sm:$0xff] }
 0x3f3   : >> { %3308 = vrot.lane.b32.xlu1 %v10593_v9, %s8670_s8  ;;  %3302 = vrot.lane.b32.xlu0 %v10595_v25, %s8670_s8  ;;  %v4792_v11 = vld [vmem:[#allocation3 + $0x970] sm:$0xff] }
 0x3f4   : >> { %8275 = vmatprep.subr.bf16.mxu1 %v8274_v28  ;;  %v2977_v45 = vpop.permute.xlu0 %2976  ;;  %5548 = vmatmul.mubr.f32.gmra.mrb[10].mxu0 %v10606_v39 }
 0x3f5   : >> { %v2979_v43 = vpop.permute.xlu1 %2978  ;;  %6180 = vmatmul.mubr.f32.vlgmr.msra.gmra.mrb[64].mxu1 %v8592_v59  ;;  %5553 = vmatprep.mubr.f32.mxu0 %v10616_v32  ;;  %v8595_v59 = vld [vmem:[%s9300_s18 + $0xf8] sm:$0xff] }
 0x3f6   : >> { %3050 = vst.msk [vmem:[#allocation3 + $0xd48] sm:$0xff] %vm242_vm1, %v2979_v43  ;;  %v3004_v42 = vsel %vm2992_vm6, %v2977_v45, %v2979_v43  ;;  %8277 = vmatpush3.bf16.msra.mxu1 %v8276_v57  ;;  %6184 = vmatprep.mubr.f32.mxu1 %v8593_v36  ;;  %v4795_v57 = vld [vmem:[#allocation3 + $0x988] sm:$0xff]  ;;  %v10628_v43 = vld [vmem:[%s9300_s18 + $0x2a0] sm:$0xff]  ;;  %v8596_v36 = vld [vmem:[%s9300_s18 + $0xf0] sm:$0xff] }
 0x3f7   : >> { %3446 = vrot.lane.b32.xlu1 %v10427_v12, %s8671_s9  ;;  %3444 = vrot.lane.b32.xlu0 %v10429_v38, %s8671_s9  ;;  %v8042_v44 = vpack.c.bf16 %v3004_v42, %v3002_v56  ;;  %v8282_v56 = vpack.c.bf16 %v4843_v16, %v4840_v37  ;;  %v4849_v42 = vld [vmem:[#allocation3 + $0xb38] sm:$0xff]  ;;  %v10640_v16 = vld [vmem:[%s9300_s18 + $0x310] sm:$0xff]  ;;  %v4798_v37 = vld [vmem:[#allocation3 + $0x9a0] sm:$0xff] }
 0x3f8   : >> { %8279 = vmatprep.subr.bf16.mxu1 %v8278_v29  ;;  %5554 = vmatmul.mubr.f32.gmra.mrb[12].mxu0 %v10628_v43 }
 0x3f9   : >> { %v2975_v28 = vpop.permute.xlu1 %2974  ;;  %v2969_v30 = vpop.permute.xlu0 %2968  ;;  %8043 = vmatprep.subr.bf16.mxu0 %v8042_v44  ;;  %6185 = vmatmul.mubr.f32.gmra.mrb[66].mxu1 %v8594_v35  ;;  %v4846_v44 = vld [vmem:[#allocation3 + $0xb20] sm:$0xff]  ;;  %v10646_v35 = vld [vmem:[%s9300_s18 + $0x308] sm:$0xff] }
 0x3fa   : >> { %v3003_v12 = vsel %vm2992_vm6, %v2975_v28, %v2977_v45  ;;  %v3001_v38 = vsel %vm2992_vm6, %v2969_v30, %v2971_v62  ;;  %8281 = vmatpush3.bf16.msra.mxu1 %v8280_v31  ;;  %6189 = vmatprep.mubr.f32.mxu1 %v8595_v59  ;;  %v8284_v45 = vpack.c.bf16 %v4795_v57, %v4792_v11  ;;  %v8597_v30 = vld [vmem:[%s9300_s18 + $0x160] sm:$0xff]  ;;  %v4855_v57 = vld [vmem:[#allocation3 + $0xb68] sm:$0xff]  ;;  %v8598_v59 = vld [vmem:[%s9300_s18 + $0x158] sm:$0xff] }
 0x3fb   : >> { %3454 = vrot.lane.b32.xlu1 %v10440_v24, %s8671_s9  ;;  %3452 = vrot.lane.b32.xlu0 %v10442_v61, %s8671_s9  ;;  %v8044_v4 = vpack.c.bf16 %v3003_v12, %v3001_v38  ;;  %v8286_v28 = vpack.c.bf16 %v4849_v42, %v4846_v44  ;;  %v8288_v12 = vpack.c.bf16 %v4801_v10, %v4798_v37  ;;  %v4807_v11 = vld [vmem:[#allocation3 + $0x9e8] sm:$0xff]  ;;  %v4804_v10 = vld [vmem:[#allocation3 + $0x9d0] sm:$0xff] }
 0x3fc   : >> { %8283 = vmatprep.subr.bf16.mxu1 %v8282_v56  ;;  %5559 = vmatprep.mubr.f32.mxu0 %v10640_v16  ;;  %v10656_v42 = vld [vmem:[%s9300_s18 + $0x48] sm:$0xff] }
 0x3fd   : >> { %v2985_v62 = vpop.permute.xlu1 %2984  ;;  %v2983_v29 = vpop.permute.xlu0 %2982  ;;  %8045 = vmatpush1.bf16.msra.mxu0 %v8044_v4  ;;  %6190 = vmatmul.mubr.f32.gmra.mrb[68].mxu1 %v8596_v36  ;;  %v4852_v4 = vld [vmem:[#allocation3 + $0xb50] sm:$0xff]  ;;  %v8599_v36 = vld [vmem:[%s9300_s18 + $0x1c8] sm:$0xff] }
 0x3fe   : >> { %3053 = vst.msk [vmem:[#allocation3 + $0xd60] sm:$0xff] %vm242_vm1, %v2985_v62  ;;  %v3006_v31 = vsel %vm2992_vm6, %v2983_v29, %v2985_v62  ;;  %8285 = vmatpush3.bf16.msra.mxu1 %v8284_v45  ;;  %6194 = vmatprep.mubr.f32.mxu1 %v8597_v30  ;;  %v8290_v62 = vpack.c.bf16 %v4855_v57, %v4852_v4  ;;  %v8600_v57 = vld [vmem:[%s9300_s18 + $0x1c0] sm:$0xff] }
 0x3ff   : >> { %3450 = vrot.lane.b32.xlu1 %v10454_v6, %s8671_s9  ;;  %3442 = vrot.lane.b32.xlu0 %v10456_v52, %s8671_s9  ;;  %v8292_v30 = vpack.c.bf16 %v4807_v11, %v4804_v10  ;;  %v4864_v10 = vld [vmem:[#allocation3 + $0xbb0] sm:$0xff] }
 0x400   : >> { %8287 = vmatprep.subr.bf16.mxu1 %v8286_v28  ;;  %5560 = vmatmul.mubr.f32.gmra.mrb[14].mxu0 %v10646_v35  ;;  %v4861_v28 = vld [vmem:[#allocation3 + $0xb98] sm:$0xff] }
 0x401   : >> { %v2991_v38 = vpop.permute.xlu1 %2990  ;;  %v2989_v56 = vpop.permute.xlu0 %2988  ;;  %6195 = vmatmul.mubr.f32.gmra.mrb[70].mxu1 %v8598_v59  ;;  %5630 = vmatprep.mubr.f32.mxu0 %v10656_v42  ;;  %v4813_v59 = vld [vmem:[#allocation3 + $0xa18] sm:$0xff] }
 0x402   : >> { %3056 = vst.msk [vmem:[#allocation3 + $0xd78] sm:$0xff] %vm242_vm1, %v2991_v38  ;;  %v3008_v45 = vsel %vm2992_vm6, %v2989_v56, %v2991_v38  ;;  %8289 = vmatpush3.bf16.msra.mxu1 %v8288_v12  ;;  %6199 = vmatprep.mubr.f32.mxu1 %v8599_v36  ;;  %v4858_v12 = vld [vmem:[#allocation3 + $0xb80] sm:$0xff] }
 0x403   : >> { %3462 = vrot.lane.b32.xlu1 %v10465_v2, %s8671_s9  ;;  %3460 = vrot.lane.b32.xlu0 %v10467_v48, %s8671_s9  ;;  %v8046_v44 = vpack.c.bf16 %v3008_v45, %v3006_v31  ;;  %v8294_v48 = vpack.c.bf16 %v4861_v28, %v4858_v12  ;;  %v8601_v31 = vld [vmem:[%s9300_s18 + $0x230] sm:$0xff]  ;;  %v4810_v45 = vld [vmem:[#allocation3 + $0xa00] sm:$0xff]  ;;  %v4819_v28 = vld [vmem:[#allocation3 + $0xa48] sm:$0xff] }
 0x404   : >> { %8291 = vmatprep.subr.bf16.mxu1 %v8290_v62  ;;  %v4867_v62 = vld [vmem:[#allocation3 + $0xbc8] sm:$0xff] }
 0x405   : >> { %v2987_v37 = vpop.permute.xlu1 %2986  ;;  %v2981_v38 = vpop.permute.xlu0 %2980  ;;  %8047 = vmatprep.subr.bf16.mxu0 %v8046_v44  ;;  %6200 = vmatmul.mubr.f32.gmra.mrb[72].mxu1 %v8600_v57  ;;  %v8602_v44 = vld [vmem:[%s9300_s18 + $0x228] sm:$0xff] }
 0x406   : >> { %v3007_v2 = vsel %vm2992_vm6, %v2987_v37, %v2989_v56  ;;  %v3005_v4 = vsel %vm2992_vm6, %v2981_v38, %v2983_v29  ;;  %8293 = vmatpush3.bf16.msra.mxu1 %v8292_v30  ;;  %6204 = vmatprep.mubr.f32.mxu1 %v8601_v31  ;;  %v8296_v56 = vpack.c.bf16 %v4813_v59, %v4810_v45  ;;  %v8603_v30 = vld [vmem:[%s9300_s18 + $0x298] sm:$0xff]  ;;  %v4816_v37 = vld [vmem:[#allocation3 + $0xa30] sm:$0xff]  ;;  %v4822_v45 = vld [vmem:[#allocation3 + $0xa60] sm:$0xff] }
 0x407   : >> { %3470 = vrot.lane.b32.xlu1 %v10478_v33, %s8671_s9  ;;  %3468 = vrot.lane.b32.xlu0 %v10480_v1, %s8671_s9  ;;  %v8048_v11 = vpack.c.bf16 %v3007_v2, %v3005_v4  ;;  %v8298_v1 = vpack.c.bf16 %v4867_v62, %v4864_v10  ;;  %v4873_v38 = vld [vmem:[#allocation3 + $0xbf8] sm:$0xff]  ;;  %v8300_v57 = vpack.c.bf16 %v4819_v28, %v4816_v37  ;;  %v8604_v2 = vld [vmem:[%s9300_s18 + $0x290] sm:$0xff]  ;;  %v4870_v4 = vld [vmem:[#allocation3 + $0xbe0] sm:$0xff] }
 0x408   : >> { %8295 = vmatprep.subr.bf16.mxu1 %v8294_v48  ;;  %v4825_v48 = vld [vmem:[#allocation3 + $0xa78] sm:$0xff] }
 0x409   : >> { %v3110_v36 = vpop.permute.xlu1 %3109  ;;  %v3108_v29 = vpop.permute.xlu0 %3107  ;;  %8049 = vmatpush1.bf16.msra.mxu0 %v8048_v11  ;;  %6205 = vmatmul.mubr.f32.gmra.mrb[74].mxu1 %v8602_v44  ;;  %v8605_v11 = vld [vmem:[%s9300_s18 + $0x300] sm:$0xff]  ;;  %v8304_v62 = vpack.c.bf16 %v4825_v48, %v4822_v45  ;;  %v8606_v44 = vld [vmem:[%s9300_s18 + $0x2f8] sm:$0xff] }
 0x40a   : >> { %3196 = vst.msk [vmem:[#allocation3 + $0xd90] sm:$0xff] %vm242_vm1, %v3110_v36  ;;  %v3155_v33 = vsel %vm3153_vm7, %v3108_v29, %v3110_v36  ;;  %8297 = vmatpush3.bf16.msra.mxu1 %v8296_v56  ;;  %6209 = vmatprep.mubr.f32.mxu1 %v8603_v30  ;;  %v4882_v45 = vld [vmem:[#allocation3 + $0xc40] sm:$0xff] }
 0x40b   : >> { %3466 = vrot.lane.b32.xlu1 %v10490_v46, %s8671_s9  ;;  %3458 = vrot.lane.b32.xlu0 %v10492_v63, %s8671_s9  ;;  %v8302_v46 = vpack.c.bf16 %v4873_v38, %v4870_v4 }
 0x40c   : >> { %8299 = vmatprep.subr.bf16.mxu1 %v8298_v1  ;;  %v8607_v1 = vld [vmem:[%s9300_s18 + $0x38] sm:$0xff] }
 0x40d   : >> { %v3116_v12 = vpop.permute.xlu1 %3115  ;;  %v3114_v59 = vpop.permute.xlu0 %3113  ;;  %6210 = vmatmul.mubr.f32.gmra.mrb[76].mxu1 %v8604_v2 }
 0x40e   : >> { %3199 = vst.msk [vmem:[#allocation3 + $0xda8] sm:$0xff] %vm242_vm1, %v3116_v12  ;;  %v3157_v31 = vsel %vm3153_vm7, %v3114_v59, %v3116_v12  ;;  %8301 = vmatpush3.bf16.msra.mxu1 %v8300_v57  ;;  %6214 = vmatprep.mubr.f32.mxu1 %v8605_v11  ;;  %v8608_v57 = vld [vmem:[%s9300_s18 + $0x30] sm:$0xff] }
 0x40f   : >> { %3478 = vrot.lane.b32.xlu1 %v10508_v8, %s8671_s9  ;;  %3476 = vrot.lane.b32.xlu0 %v10510_v26, %s8671_s9  ;;  %v8050_v63 = vpack.c.bf16 %v3157_v31, %v3155_v33  ;;  %v4879_v26 = vld [vmem:[#allocation3 + $0xc28] sm:$0xff] }
 0x410   : >> { %8303 = vmatprep.subr.bf16.mxu1 %v8302_v46 }
 0x411   : >> { %v3112_v56 = vpop.permute.xlu1 %3111  ;;  %v3106_v36 = vpop.permute.xlu0 %3105  ;;  %8051 = vmatprep.subr.bf16.mxu0 %v8050_v63  ;;  %6215 = vmatmul.mubr.f32.gmra.mrb[78].mxu1 %v8606_v44  ;;  %v4924_v37 = vld [vmem:[#allocation3 + $0xd90] sm:$0xff] }
 0x412   : >> { %v3156_v10 = vsel %vm3153_vm7, %v3112_v56, %v3114_v59  ;;  %v3154_v28 = vsel %vm3153_vm7, %v3106_v36, %v3108_v29  ;;  %8305 = vmatpush3.bf16.msra.mxu1 %v8304_v62  ;;  %6284 = vmatprep.mubr.f32.mxu1 %v8607_v1  ;;  %v4876_v59 = vld [vmem:[#allocation3 + $0xc10] sm:$0xff] }
 0x413   : >> { %3486 = vrot.lane.b32.xlu1 %v10525_v55, %s8671_s9  ;;  %3484 = vrot.lane.b32.xlu0 %v10527_v47, %s8671_s9  ;;  %v8052_v8 = vpack.c.bf16 %v3156_v10, %v3154_v28  ;;  %v8308_v55 = vpack.c.bf16 %v4879_v26, %v4876_v59  ;;  %v4891_v10 = vld [vmem:[#allocation3 + $0xc88] sm:$0xff] }
 0x415   : >> { %v3122_v33 = vpop.permute.xlu1 %3121  ;;  %v3120_v30 = vpop.permute.xlu0 %3119  ;;  %v4927_v38 = vld [vmem:[#allocation3 + $0xda8] sm:$0xff]  ;;  %8053 = vmatpush1.bf16.msra.mxu0 %v8052_v8  ;;  %6285 = vmatmul.mubr.f32.vlgmr.msra.gmra.mrb[80].mxu1 %v8608_v57 }
 0x416   : >> { %3202 = vst.msk [vmem:[#allocation3 + $0xdc0] sm:$0xff] %vm242_vm1, %v3122_v33  ;;  %v3159_v29 = vsel %vm3153_vm7, %v3120_v30, %v3122_v33  ;;  %v8306_v12 = vpack.c.bf16 %v4927_v38, %v4924_v37  ;;  %6289 = vmatprep.mubr.f32.mxu1 %v10496_v49  ;;  %v4888_v33 = vld [vmem:[#allocation3 + $0xc70] sm:$0xff] }
 0x417   : >> { %3482 = vrot.lane.b32.xlu1 %v10541_v53, %s8671_s9  ;;  %3474 = vrot.lane.b32.xlu0 %v10543_v19, %s8671_s9 }
 0x418   : >> { %8307 = vmatprep.subr.bf16.mxu1 %v8306_v12  ;;  %v4897_v12 = vld [vmem:[#allocation3 + $0xcb8] sm:$0xff] }
 0x419   : >> { %v3128_v47 = vpop.permute.xlu1 %3127  ;;  %v3126_v2 = vpop.permute.xlu0 %3125  ;;  %8309 = vmatpush3.bf16.msra.mxu1 %v8308_v55 }
 0x41a   : >> { %3205 = vst.msk [vmem:[#allocation3 + $0xdd8] sm:$0xff] %vm242_vm1, %v3128_v47  ;;  %v3161_v4 = vsel %vm3153_vm7, %v3126_v2, %v3128_v47  ;;  %6290 = vmatmul.mubr.f32.gmra.mrb[82].mxu1 %v10502_v34 }
 0x41b   : >> { %3494 = vrot.lane.b32.xlu1 %v10560_v7, %s8671_s9  ;;  %3492 = vrot.lane.b32.xlu0 %v10562_v17, %s8671_s9  ;;  %v8054_v49 = vpack.c.bf16 %v3161_v4, %v3159_v29  ;;  %v4885_v7 = vld [vmem:[#allocation3 + $0xc58] sm:$0xff] }
 0x41c   : >> { %6294 = vmatprep.mubr.f32.mxu1 %v10516_v23 }
 0x41d   : >> { %v3124_v53 = vpop.permute.xlu1 %3123  ;;  %v3118_v19 = vpop.permute.xlu0 %3117  ;;  %8055 = vmatprep.subr.bf16.mxu0 %v8054_v49  ;;  %v4930_v46 = vld [vmem:[#allocation3 + $0xdc0] sm:$0xff] }
 0x41e   : >> { %v3160_v48 = vsel %vm3153_vm7, %v3124_v53, %v3126_v2  ;;  %v3158_v31 = vsel %vm3153_vm7, %v3118_v19, %v3120_v30  ;;  %6295 = vmatmul.mubr.f32.gmra.mrb[84].mxu1 %v10532_v27  ;;  %v4894_v49 = vld [vmem:[#allocation3 + $0xca0] sm:$0xff]  ;;  %v10784_v19 = vld [vmem:[#allocation2 + $0x50] sm:$0xff] }
 0x41f   : >> { %3502 = vrot.lane.b32.xlu1 %v10577_v58, %s8671_s9  ;;  %3500 = vrot.lane.b32.xlu0 %v10579_v40, %s8671_s9  ;;  %v8056_v34 = vpack.c.bf16 %v3160_v48, %v3158_v31  ;;  %v10729_v58 = vld [vmem:[#allocation2 + $0x10] sm:$0xff]  ;;  %v10731_v40 = vld [vmem:[#allocation2 + $0x8] sm:$0xff]  ;;  %v8320_v53 = vpack.c.bf16 %v4897_v12, %v4894_v49 }
 0x420   : >> { %6299 = vmatprep.mubr.f32.mxu1 %v10548_v20  ;;  %v8312_v20 = vpack.c.bf16 %v4885_v7, %v4882_v45  ;;  %v10786_v48 = vld [vmem:[#allocation2 + $0x48] sm:$0xff] }
 0x421   : >> { %v3134_v23 = vpop.permute.xlu1 %3133  ;;  %v3132_v17 = vpop.permute.xlu0 %3131  ;;  %v4933_v11 = vld [vmem:[#allocation3 + $0xdd8] sm:$0xff]  ;;  %8057 = vmatpush1.bf16.msra.mxu0 %v8056_v34 }
 0x422   : >> { %3208 = vst.msk [vmem:[#allocation3 + $0xdf0] sm:$0xff] %vm242_vm1, %v3134_v23  ;;  %v3163_v63 = vsel %vm3153_vm7, %v3132_v17, %v3134_v23  ;;  %v8310_v27 = vpack.c.bf16 %v4933_v11, %v4930_v46  ;;  %6300 = vmatmul.mubr.f32.gmra.mrb[86].mxu1 %v10554_v60  ;;  %v10796_v46 = vld [vmem:[#allocation2 + $0x68] sm:$0xff] }
 0x423   : >> { %3498 = vrot.lane.b32.xlu1 %v10593_v9, %s8671_s9  ;;  %3490 = vrot.lane.b32.xlu0 %v10595_v25, %s8671_s9 }
 0x424   : >> { %8311 = vmatprep.subr.bf16.mxu1 %v8310_v27  ;;  %6304 = vmatprep.mubr.f32.mxu1 %v10568_v51 }
 0x425   : >> { %v3140_v62 = vpop.permute.xlu1 %3139  ;;  %v3138_v56 = vpop.permute.xlu0 %3137  ;;  %8313 = vmatpush3.bf16.msra.mxu1 %v8312_v20 }
 0x426   : >> { %3211 = vst.msk [vmem:[#allocation3 + $0xe08] sm:$0xff] %vm242_vm1, %v3140_v62  ;;  %v3165_v60 = vsel %vm3153_vm7, %v3138_v56, %v3140_v62  ;;  %6305 = vmatmul.mubr.f32.gmra.mrb[88].mxu1 %v10584_v22  ;;  %v10804_v62 = vld [vmem:[#allocation2 + $0x60] sm:$0xff] }
 0x427   : >> { %3647 = vrot.lane.b32.xlu1 %v10729_v58, %s8672_s10  ;;  %3645 = vrot.lane.b32.xlu0 %v10731_v40, %s8672_s10  ;;  %v8058_v9 = vpack.c.bf16 %v3165_v60, %v3163_v63  ;;  %v4903_v60 = vld [vmem:[#allocation3 + $0xce8] sm:$0xff] }
 0x428   : >> { %6309 = vmatprep.mubr.f32.mxu1 %v10600_v54 }
 0x429   : >> { %v3136_v51 = vpop.permute.xlu1 %3135  ;;  %v3130_v25 = vpop.permute.xlu0 %3129  ;;  %8059 = vmatprep.subr.bf16.mxu0 %v8058_v9  ;;  %v4936_v1 = vld [vmem:[#allocation3 + $0xdf0] sm:$0xff] }
 0x42a   : >> { %v3164_v36 = vsel %vm3153_vm7, %v3136_v51, %v3138_v56  ;;  %v3162_v44 = vsel %vm3153_vm7, %v3130_v25, %v3132_v17  ;;  %6310 = vmatmul.mubr.f32.gmra.mrb[90].mxu1 %v10606_v39  ;;  %v10794_v17 = vld [vmem:[#allocation2 + $0x70] sm:$0xff]  ;;  %v10806_v56 = vld [vmem:[#allocation2 + $0x40] sm:$0xff] }
 0x42b   : >> { %3655 = vrot.lane.b32.xlu1 %v10440_v24, %s8672_s10  ;;  %3653 = vrot.lane.b32.xlu0 %v10442_v61, %s8672_s10  ;;  %v8060_v22 = vpack.c.bf16 %v3164_v36, %v3162_v44  ;;  %v8316_v24 = vpack.c.bf16 %v4891_v10, %v4888_v33  ;;  %v10757_v61 = vld [vmem:[#allocation2 + $0x18] sm:$0xff]  ;;  %v4900_v10 = vld [vmem:[#allocation3 + $0xcd0] sm:$0xff] }
 0x42c   : >> { %6314 = vmatprep.mubr.f32.mxu1 %v10616_v32  ;;  %v10822_v33 = vld [vmem:[#allocation2 + $0x78] sm:$0xff] }
 0x42d   : >> { %v3146_v54 = vpop.permute.xlu1 %3145  ;;  %v3144_v28 = vpop.permute.xlu0 %3143  ;;  %v4939_v8 = vld [vmem:[#allocation3 + $0xe08] sm:$0xff]  ;;  %8061 = vmatpush1.bf16.msra.mxu0 %v8060_v22 }
 0x42e   : >> { %3214 = vst.msk [vmem:[#allocation3 + $0xe20] sm:$0xff] %vm242_vm1, %v3146_v54  ;;  %v3167_v26 = vsel %vm3153_vm7, %v3144_v28, %v3146_v54  ;;  %v8314_v39 = vpack.c.bf16 %v4939_v8, %v4936_v1  ;;  %6315 = vmatmul.mubr.f32.gmra.mrb[92].mxu1 %v10628_v43  ;;  %v10769_v43 = vld [vmem:[#allocation2 + $0x30] sm:$0xff]  ;;  %v8324_v54 = vpack.c.bf16 %v4903_v60, %v4900_v10  ;;  %v10858_v60 = vld [vmem:[#allocation2 + $0x80] sm:$0xff] }
 0x42f   : >> { %3651 = vrot.lane.b32.xlu1 %v10454_v6, %s8672_s10  ;;  %3643 = vrot.lane.b32.xlu0 %v10456_v52, %s8672_s10  ;;  %v10767_v52 = vld [vmem:[#allocation2 + $0x38] sm:$0xff] }
 0x430   : >> { %8315 = vmatprep.subr.bf16.mxu1 %v8314_v39  ;;  %6319 = vmatprep.mubr.f32.mxu1 %v10640_v16 }
 0x431   : >> { %v3152_v32 = vpop.permute.xlu1 %3151  ;;  %v3150_v30 = vpop.permute.xlu0 %3149  ;;  %8317 = vmatpush3.bf16.msra.mxu1 %v8316_v24 }
 0x432   : >> { %3217 = vst.msk [vmem:[#allocation3 + $0xe38] sm:$0xff] %vm242_vm1, %v3152_v32  ;;  %v3169_v37 = vsel %vm3153_vm7, %v3150_v30, %v3152_v32  ;;  %6320 = vmatmul.mubr.f32.gmra.mrb[94].mxu1 %v10646_v35 }
 0x433   : >> { %3850 = vrot.lane.b32.xlu1 %v10757_v61, %s8673_s11  ;;  %3848 = vrot.lane.b32.xlu0 %v10729_v58, %s8673_s11  ;;  %v8062_v6 = vpack.c.bf16 %v3169_v37, %v3167_v26 }
 0x434   : >> { %6389 = vmatprep.mubr.f32.mxu1 %v10656_v42 }
 0x435   : >> { %v3148_v16 = vpop.permute.xlu1 %3147  ;;  %v3142_v38 = vpop.permute.xlu0 %3141  ;;  %8063 = vmatprep.subr.bf16.mxu0 %v8062_v6  ;;  %v4942_v47 = vld [vmem:[#allocation3 + $0xe20] sm:$0xff] }
 0x436   : >> { %v3168_v57 = vsel %vm3153_vm7, %v3148_v16, %v3150_v30  ;;  %v3166_v35 = vsel %vm3153_vm7, %v3142_v38, %v3144_v28  ;;  %v10814_v28 = vld [vmem:[#allocation2 + $0x58] sm:$0xff] }
 0x437   : >> { %3858 = vrot.lane.b32.xlu1 %v10767_v52, %s8673_s11  ;;  %3856 = vrot.lane.b32.xlu0 %v10769_v43, %s8673_s11  ;;  %v8064_v29 = vpack.c.bf16 %v3168_v57, %v3166_v35  ;;  %v4909_v16 = vld [vmem:[#allocation3 + $0xd18] sm:$0xff] }
 0x439   : >> { %v3271_v59 = vpop.permute.xlu1 %3270  ;;  %v3269_v55 = vpop.permute.xlu0 %3268  ;;  %v4945_v2 = vld [vmem:[#allocation3 + $0xe38] sm:$0xff]  ;;  %8065 = vmatpush1.bf16.msra.mxu0 %v8064_v29 }
 0x43a   : >> { %3356 = vst.msk [vmem:[#allocation3 + $0xe50] sm:$0xff] %vm242_vm1, %v3271_v59  ;;  %v3315_v42 = vsel %vm242_vm1, %v3269_v55, %v3271_v59  ;;  %v8318_v4 = vpack.c.bf16 %v4945_v2, %v4942_v47  ;;  %v10836_v2 = vld [vmem:[#allocation2 + $0x90] sm:$0xff] }
 0x43b   : >> { %3456 = vrot.lane.b32.xlu1 %v10767_v52, %s8671_s9  ;;  %3448 = vrot.lane.b32.xlu0 %v10757_v61, %s8671_s9 }
 0x43c   : >> { %8319 = vmatprep.subr.bf16.mxu1 %v8318_v4 }
 0x43d   : >> { %v3277_v31 = vpop.permute.xlu1 %3276  ;;  %v3275_v34 = vpop.permute.xlu0 %3274  ;;  %8321 = vmatpush3.bf16.msra.mxu1 %v8320_v53 }
 0x43e   : >> { %3359 = vst.msk [vmem:[#allocation3 + $0xe68] sm:$0xff] %vm242_vm1, %v3277_v31  ;;  %v3317_v7 = vsel %vm242_vm1, %v3275_v34, %v3277_v31 }
 0x43f   : >> { %3663 = vrot.lane.b32.xlu1 %v10784_v19, %s8672_s10  ;;  %3661 = vrot.lane.b32.xlu0 %v10786_v48, %s8672_s10  ;;  %v8066_v23 = vpack.c.bf16 %v3317_v7, %v3315_v42  ;;  %v10838_v42 = vld [vmem:[#allocation2 + $0x88] sm:$0xff] }
 0x440   : >> { %v10848_v7 = vld [vmem:[#allocation2 + $0xa8] sm:$0xff] }
 0x441   : >> { %v3273_v11 = vpop.permute.xlu1 %3272  ;;  %v3267_v63 = vpop.permute.xlu0 %3266  ;;  %8067 = vmatprep.subr.bf16.mxu0 %v8066_v23  ;;  %v4948_v25 = vld [vmem:[#allocation3 + $0xe50] sm:$0xff] }
 0x442   : >> { %v3316_v27 = vsel %vm242_vm1, %v3273_v11, %v3275_v34  ;;  %v3314_v45 = vsel %vm242_vm1, %v3267_v63, %v3269_v55  ;;  %v4906_v55 = vld [vmem:[#allocation3 + $0xd00] sm:$0xff]  ;;  %v10846_v34 = vld [vmem:[#allocation2 + $0xb0] sm:$0xff] }
 0x443   : >> { %3671 = vrot.lane.b32.xlu1 %v10794_v17, %s8672_s10  ;;  %3669 = vrot.lane.b32.xlu0 %v10796_v46, %s8672_s10  ;;  %v8068_v20 = vpack.c.bf16 %v3316_v27, %v3314_v45  ;;  %v8328_v47 = vpack.c.bf16 %v4909_v16, %v4906_v55 }
 0x445   : >> { %v3283_v9 = vpop.permute.xlu1 %3282  ;;  %v3281_v51 = vpop.permute.xlu0 %3280  ;;  %v4951_v36 = vld [vmem:[#allocation3 + $0xe68] sm:$0xff]  ;;  %8069 = vmatpush1.bf16.msra.mxu0 %v8068_v20  ;;  %v10856_v20 = vld [vmem:[#allocation2 + $0xa0] sm:$0xff] }
 0x446   : >> { %3362 = vst.msk [vmem:[#allocation3 + $0xe80] sm:$0xff] %vm242_vm1, %v3283_v9  ;;  %v3319_v44 = vsel %vm242_vm1, %v3281_v51, %v3283_v9  ;;  %v8322_v22 = vpack.c.bf16 %v4951_v36, %v4948_v25  ;;  %v4915_v9 = vld [vmem:[#allocation3 + $0xd48] sm:$0xff] }
 0x447   : >> { %3667 = vrot.lane.b32.xlu1 %v10804_v62, %s8672_s10  ;;  %3659 = vrot.lane.b32.xlu0 %v10806_v56, %s8672_s10 }
 0x448   : >> { %8323 = vmatprep.subr.bf16.mxu1 %v8322_v22 }
 0x449   : >> { %v3289_v1 = vpop.permute.xlu1 %3288  ;;  %v3287_v8 = vpop.permute.xlu0 %3286  ;;  %8325 = vmatpush3.bf16.msra.mxu1 %v8324_v54  ;;  %v4912_v54 = vld [vmem:[#allocation3 + $0xd30] sm:$0xff] }
 0x44a   : >> { %3365 = vst.msk [vmem:[#allocation3 + $0xe98] sm:$0xff] %vm242_vm1, %v3289_v1  ;;  %v3321_v26 = vsel %vm242_vm1, %v3287_v8, %v3289_v1  ;;  %v8332_v1 = vpack.c.bf16 %v4915_v9, %v4912_v54  ;;  %v4421_v54 = vld [vmem:[%s9300_s18 + $0x118] sm:$0xff] }
 0x44b   : >> { %3866 = vrot.lane.b32.xlu1 %v10814_v28, %s8673_s11  ;;  %3864 = vrot.lane.b32.xlu0 %v10784_v19, %s8673_s11  ;;  %v8070_v39 = vpack.c.bf16 %v3321_v26, %v3319_v44 }
 0x44d   : >> { %v3285_v24 = vpop.permute.xlu1 %3284  ;;  %v3279_v32 = vpop.permute.xlu0 %3278  ;;  %8071 = vmatprep.subr.bf16.mxu0 %v8070_v39  ;;  %v4954_v35 = vld [vmem:[#allocation3 + $0xe80] sm:$0xff] }
 0x44e   : >> { %v3320_v30 = vsel %vm242_vm1, %v3285_v24, %v3287_v8  ;;  %v3318_v37 = vsel %vm242_vm1, %v3279_v32, %v3281_v51  ;;  %v10866_v8 = vld [vmem:[#allocation2 + $0x98] sm:$0xff] }
 0x44f   : >> { %3874 = vrot.lane.b32.xlu1 %v10822_v33, %s8673_s11  ;;  %3872 = vrot.lane.b32.xlu0 %v10794_v17, %s8673_s11  ;;  %v8072_v6 = vpack.c.bf16 %v3320_v30, %v3318_v37  ;;  %v10874_v30 = vld [vmem:[#allocation2 + $0xb8] sm:$0xff] }
 0x451   : >> { %v3295_v38 = vpop.permute.xlu1 %3294  ;;  %v3293_v57 = vpop.permute.xlu0 %3292  ;;  %v4957_v29 = vld [vmem:[#allocation3 + $0xe98] sm:$0xff]  ;;  %8073 = vmatpush1.bf16.msra.mxu0 %v8072_v6 }
 0x452   : >> { %3368 = vst.msk [vmem:[#allocation3 + $0xeb0] sm:$0xff] %vm242_vm1, %v3295_v38  ;;  %v3323_v12 = vsel %vm242_vm1, %v3293_v57, %v3295_v38  ;;  %v8326_v59 = vpack.c.bf16 %v4957_v29, %v4954_v35  ;;  %v4921_v35 = vld [vmem:[#allocation3 + $0xd78] sm:$0xff] }
 0x453   : >> { %3472 = vrot.lane.b32.xlu1 %v10822_v33, %s8671_s9  ;;  %3464 = vrot.lane.b32.xlu0 %v10814_v28, %s8671_s9 }
 0x454   : >> { %8327 = vmatprep.subr.bf16.mxu1 %v8326_v59 }
 0x455   : >> { %v3301_v4 = vpop.permute.xlu1 %3300  ;;  %v3299_v49 = vpop.permute.xlu0 %3298  ;;  %8329 = vmatpush3.bf16.msra.mxu1 %v8328_v47  ;;  %v4394_v47 = vld [vmem:[%s9300_s18 + $0x40] sm:$0xff] }
 0x456   : >> { %3371 = vst.msk [vmem:[#allocation3 + $0xec8] sm:$0xff] %vm242_vm1, %v3301_v4  ;;  %v3325_v53 = vsel %vm242_vm1, %v3299_v49, %v3301_v4 }
 0x457   : >> { %3679 = vrot.lane.b32.xlu1 %v10836_v2, %s8672_s10  ;;  %3677 = vrot.lane.b32.xlu0 %v10838_v42, %s8672_s10  ;;  %v8074_v31 = vpack.c.bf16 %v3325_v53, %v3323_v12  ;;  %v4918_v53 = vld [vmem:[#allocation3 + $0xd60] sm:$0xff] }
 0x459   : >> { %v3297_v23 = vpop.permute.xlu1 %3296  ;;  %v3291_v11 = vpop.permute.xlu0 %3290  ;;  %8075 = vmatprep.subr.bf16.mxu0 %v8074_v31  ;;  %v4960_v36 = vld [vmem:[#allocation3 + $0xeb0] sm:$0xff]  ;;  %v8336_v31 = vpack.c.bf16 %v4921_v35, %v4918_v53  ;;  %v4433_v35 = vld [vmem:[%s9300_s18 + $0x178] sm:$0xff]  ;;  %v4446_v53 = vld [vmem:[%s9300_s18 + $0x1e0] sm:$0xff] }
 0x45a   : >> { %v3324_v63 = vsel %vm242_vm1, %v3297_v23, %v3299_v49  ;;  %v3322_v27 = vsel %vm242_vm1, %v3291_v11, %v3293_v57  ;;  %v10891_v23 = vld [vmem:[#allocation2 + $0xd0] sm:$0xff]  ;;  %v10893_v11 = vld [vmem:[#allocation2 + $0xc8] sm:$0xff] }
 0x45b   : >> { %3687 = vrot.lane.b32.xlu1 %v10846_v34, %s8672_s10  ;;  %3685 = vrot.lane.b32.xlu0 %v10848_v7, %s8672_s10  ;;  %v8076_v45 = vpack.c.bf16 %v3324_v63, %v3322_v27  ;;  %v4408_v63 = vld [vmem:[%s9300_s18 + $0xb0] sm:$0xff] }
 0x45d   : >> { %v3307_v51 = vpop.permute.xlu1 %3306  ;;  %v3305_v25 = vpop.permute.xlu0 %3304  ;;  %v4963_v44 = vld [vmem:[#allocation3 + $0xec8] sm:$0xff]  ;;  %8077 = vmatpush1.bf16.msra.mxu0 %v8076_v45 }
 0x45e   : >> { %3374 = vst.msk [vmem:[#allocation3 + $0xee0] sm:$0xff] %vm242_vm1, %v3307_v51  ;;  %v3327_v22 = vsel %vm242_vm1, %v3305_v25, %v3307_v51  ;;  %v8330_v10 = vpack.c.bf16 %v4963_v44, %v4960_v36  ;;  %v10905_v36 = vld [vmem:[#allocation2 + $0xf0] sm:$0xff]  ;;  %v10907_v44 = vld [vmem:[#allocation2 + $0xe8] sm:$0xff] }
 0x45f   : >> { %3683 = vrot.lane.b32.xlu1 %v10856_v20, %s8672_s10  ;;  %3675 = vrot.lane.b32.xlu0 %v10858_v60, %s8672_s10 }
 0x460   : >> { %8331 = vmatprep.subr.bf16.mxu1 %v8330_v10 }
 0x461   : >> { %v3313_v26 = vpop.permute.xlu1 %3312  ;;  %v3311_v39 = vpop.permute.xlu0 %3310  ;;  %8333 = vmatpush3.bf16.msra.mxu1 %v8332_v1 }
 0x462   : >> { %3377 = vst.msk [vmem:[#allocation3 + $0xef8] sm:$0xff] %vm242_vm1, %v3313_v26  ;;  %v3329_v24 = vsel %vm242_vm1, %v3311_v39, %v3313_v26 }
 0x463   : >> { %3882 = vrot.lane.b32.xlu1 %v10866_v8, %s8673_s11  ;;  %3880 = vrot.lane.b32.xlu0 %v10836_v2, %s8673_s11  ;;  %v8078_v32 = vpack.c.bf16 %v3329_v24, %v3327_v22  ;;  %v4420_v24 = vld [vmem:[%s9300_s18 + $0x110] sm:$0xff] }
 0x465   : >> { %v3309_v37 = vpop.permute.xlu1 %3308  ;;  %v3303_v6 = vpop.permute.xlu0 %3302  ;;  %8079 = vmatprep.subr.bf16.mxu0 %v8078_v32  ;;  %v4966_v59 = vld [vmem:[#allocation3 + $0xee0] sm:$0xff] }
 0x466   : >> { %v3328_v16 = vsel %vm242_vm1, %v3309_v37, %v3311_v39  ;;  %v3326_v38 = vsel %vm242_vm1, %v3303_v6, %v3305_v25  ;;  %v4407_v25 = vld [vmem:[%s9300_s18 + $0xa8] sm:$0xff]  ;;  %v10917_v32 = vld [vmem:[#allocation2 + $0xe0] sm:$0xff] }
 0x467   : >> { %3890 = vrot.lane.b32.xlu1 %v10874_v30, %s8673_s11  ;;  %3888 = vrot.lane.b32.xlu0 %v10846_v34, %s8673_s11  ;;  %v8080_v57 = vpack.c.bf16 %v3328_v16, %v3326_v38  ;;  %v10919_v37 = vld [vmem:[#allocation2 + $0xc0] sm:$0xff] }
 0x468   : >> { %v4434_v38 = vld [vmem:[%s9300_s18 + $0x180] sm:$0xff] }
 0x469   : >> { %v10882_v29 = vpop.permute.xlu1 %3446  ;;  %v3445_v12 = vpop.permute.xlu0 %3444  ;;  %v4969_v55 = vld [vmem:[#allocation3 + $0xef8] sm:$0xff]  ;;  %8081 = vmatpush1.bf16.msra.mxu0 %v8080_v57 }
 0x46a   : >> { %v3508_v4 = vsel %vm3506_vm8, %v3445_v12, %v10882_v29  ;;  %v8334_v49 = vpack.c.bf16 %v4969_v55, %v4966_v59  ;;  %v4447_v59 = vld [vmem:[%s9300_s18 + $0x1e8] sm:$0xff] }
 0x46b   : >> { %3488 = vrot.lane.b32.xlu1 %v10874_v30, %s8671_s9  ;;  %3480 = vrot.lane.b32.xlu0 %v10866_v8, %s8671_s9 }
 0x46c   : >> { %8335 = vmatprep.subr.bf16.mxu1 %v8334_v49  ;;  %5631 = vmatmul.mubr.f32.vlgmr.msra.gmra.mrb[0].mxu0 %v4394_v47 }
 0x46d   : >> { %v10896_v27 = vpop.permute.xlu1 %3454  ;;  %v3453_v45 = vpop.permute.xlu0 %3452  ;;  %8337 = vmatpush3.bf16.msra.mxu1 %v8336_v31  ;;  %5636 = vmatprep.mubr.f32.mxu0 %v4408_v63  ;;  %v10943_v31 = vld [vmem:[#allocation2 + $0xf8] sm:$0xff] }
 0x46e   : >> { %v3511_v9 = vsel %vm3506_vm8, %v3453_v45, %v10896_v27 }
 0x46f   : >> { %3695 = vrot.lane.b32.xlu1 %v10891_v23, %s8672_s10  ;;  %3693 = vrot.lane.b32.xlu0 %v10893_v11, %s8672_s10  ;;  %v8082_v51 = vpack.c.bf16 %v3511_v9, %v3508_v4  ;;  %v4460_v9 = vld [vmem:[%s9300_s18 + $0x250] sm:$0xff] }
 0x470   : >> { %6390 = vmatmul.mubr.f32.vlgmr.msra.gmra.mrb[96].mxu1 %v4394_v47  ;;  %5637 = vmatmul.mubr.f32.gmra.mrb[2].mxu0 %v4407_v25 }
 0x471   : >> { %v3451_v22 = vpop.permute.xlu1 %3450  ;;  %v3443_v10 = vpop.permute.xlu0 %3442  ;;  %8083 = vmatprep.subr.bf16.mxu0 %v8082_v51  ;;  %6394 = vmatprep.mubr.f32.mxu1 %v4408_v63 }
 0x472   : >> { %v3510_v1 = vsel %vm3506_vm8, %v3451_v22, %v3453_v45  ;;  %v3507_v26 = vsel %vm3506_vm8, %v3443_v10, %v3445_v12  ;;  %5642 = vmatprep.mubr.f32.mxu0 %v4421_v54  ;;  %v10931_v12 = vld [vmem:[#allocation2 + $0xd8] sm:$0xff]  ;;  %v4459_v10 = vld [vmem:[%s9300_s18 + $0x248] sm:$0xff] }
 0x473   : >> { %3703 = vrot.lane.b32.xlu1 %v10905_v36, %s8672_s10  ;;  %3701 = vrot.lane.b32.xlu0 %v10907_v44, %s8672_s10  ;;  %v8084_v39 = vpack.c.bf16 %v3510_v1, %v3507_v26  ;;  %v4473_v26 = vld [vmem:[%s9300_s18 + $0x2b8] sm:$0xff] }
 0x474   : >> { %6395 = vmatmul.mubr.f32.gmra.mrb[98].mxu1 %v4407_v25  ;;  %5643 = vmatmul.mubr.f32.gmra.mrb[4].mxu0 %v4420_v24 }
 0x475   : >> { %v10921_v6 = vpop.permute.xlu1 %3462  ;;  %v3461_v16 = vpop.permute.xlu0 %3460  ;;  %8085 = vmatpush1.bf16.msra.mxu0 %v8084_v39  ;;  %6399 = vmatprep.mubr.f32.mxu1 %v4421_v54 }
 0x476   : >> { %v3514_v57 = vsel %vm3506_vm8, %v3461_v16, %v10921_v6  ;;  %5648 = vmatprep.mubr.f32.mxu0 %v4434_v38 }
 0x477   : >> { %3699 = vrot.lane.b32.xlu1 %v10917_v32, %s8672_s10  ;;  %3691 = vrot.lane.b32.xlu0 %v10919_v37, %s8672_s10 }
 0x478   : >> { %6400 = vmatmul.mubr.f32.gmra.mrb[100].mxu1 %v4420_v24  ;;  %5649 = vmatmul.mubr.f32.gmra.mrb[6].mxu0 %v4433_v35  ;;  %v4472_v24 = vld [vmem:[%s9300_s18 + $0x2b0] sm:$0xff] }
 0x479   : >> { %v10934_v55 = vpop.permute.xlu1 %3470  ;;  %v3469_v47 = vpop.permute.xlu0 %3468  ;;  %6404 = vmatprep.mubr.f32.mxu1 %v4434_v38  ;;  %5654 = vmatprep.mubr.f32.mxu0 %v4447_v59  ;;  %v4486_v38 = vld [vmem:[%s9300_s18 + $0x320] sm:$0xff] }
 0x47a   : >> { %v3517_v4 = vsel %vm3506_vm8, %v3469_v47, %v10934_v55 }
 0x47b   : >> { %3898 = vrot.lane.b32.xlu1 %v10931_v12, %s8673_s11  ;;  %3896 = vrot.lane.b32.xlu0 %v10891_v23, %s8673_s11  ;;  %v8086_v49 = vpack.c.bf16 %v3517_v4, %v3514_v57  ;;  %v4485_v4 = vld [vmem:[%s9300_s18 + $0x318] sm:$0xff] }
 0x47c   : >> { %6405 = vmatmul.mubr.f32.gmra.mrb[102].mxu1 %v4433_v35  ;;  %5655 = vmatmul.mubr.f32.gmra.mrb[8].mxu0 %v4446_v53 }
 0x47d   : >> { %v3467_v63 = vpop.permute.xlu1 %3466  ;;  %v3459_v45 = vpop.permute.xlu0 %3458  ;;  %8087 = vmatprep.subr.bf16.mxu0 %v8086_v49  ;;  %6409 = vmatprep.mubr.f32.mxu1 %v4447_v59  ;;  %v10975_v49 = vld [vmem:[#allocation2 + $0x20] sm:$0xff] }
 0x47e   : >> { %v3516_v51 = vsel %vm3506_vm8, %v3467_v63, %v3469_v47  ;;  %v3513_v25 = vsel %vm3506_vm8, %v3459_v45, %v3461_v16  ;;  %5660 = vmatprep.mubr.f32.mxu0 %v4460_v9  ;;  %v10963_v16 = vld [vmem:[#allocation2 + $0x28] sm:$0xff] }
 0x47f   : >> { %3906 = vrot.lane.b32.xlu1 %v10943_v31, %s8673_s11  ;;  %3904 = vrot.lane.b32.xlu0 %v10905_v36, %s8673_s11  ;;  %v8088_v22 = vpack.c.bf16 %v3516_v51, %v3513_v25 }
 0x480   : >> { %6410 = vmatmul.mubr.f32.gmra.mrb[104].mxu1 %v4446_v53  ;;  %5661 = vmatmul.mubr.f32.gmra.mrb[10].mxu0 %v4459_v10  ;;  %v10977_v53 = vld [vmem:[#allocation2] sm:$0xff] }
 0x481   : >> { %v10953_v54 = vpop.permute.xlu1 %3478  ;;  %v3477_v1 = vpop.permute.xlu0 %3476  ;;  %8089 = vmatpush1.bf16.msra.mxu0 %v8088_v22  ;;  %6414 = vmatprep.mubr.f32.mxu1 %v4460_v9 }
 0x482   : >> { %v3520_v39 = vsel %vm3506_vm8, %v3477_v1, %v10953_v54  ;;  %5666 = vmatprep.mubr.f32.mxu0 %v4473_v26 }
 0x483   : >> { %3504 = vrot.lane.b32.xlu1 %v10943_v31, %s8671_s9  ;;  %3496 = vrot.lane.b32.xlu0 %v10931_v12, %s8671_s9 }
 0x484   : >> { %6415 = vmatmul.mubr.f32.gmra.mrb[106].mxu1 %v4459_v10  ;;  %5667 = vmatmul.mubr.f32.gmra.mrb[12].mxu0 %v4472_v24 }
 0x485   : >> { %v10966_v57 = vpop.permute.xlu1 %3486  ;;  %v3485_v35 = vpop.permute.xlu0 %3484  ;;  %6419 = vmatprep.mubr.f32.mxu1 %v4473_v26  ;;  %5672 = vmatprep.mubr.f32.mxu0 %v4486_v38 }
 0x486   : >> { %v3523_v59 = vsel %vm3506_vm8, %v3485_v35, %v10966_v57 }
 0x487   : >> { %3854 = vrot.lane.b32.xlu1 %v10963_v16, %s8673_s11  ;;  %3846 = vrot.lane.b32.xlu0 %v10731_v40, %s8673_s11  ;;  %v8090_v47 = vpack.c.bf16 %v3523_v59, %v3520_v39 }
 0x488   : >> { %6420 = vmatmul.mubr.f32.gmra.mrb[108].mxu1 %v4472_v24  ;;  %5673 = vmatmul.mubr.f32.gmra.mrb[14].mxu0 %v4485_v4 }
 0x489   : >> { %v3483_v63 = vpop.permute.xlu1 %3482  ;;  %v3475_v45 = vpop.permute.xlu0 %3474  ;;  %8091 = vmatprep.subr.bf16.mxu0 %v8090_v47  ;;  %6424 = vmatprep.mubr.f32.mxu1 %v4486_v38 }
 0x48a   : >> { %v3522_v9 = vsel %vm3506_vm8, %v3483_v63, %v3485_v35  ;;  %v3519_v51 = vsel %vm3506_vm8, %v3475_v45, %v3477_v1 }
 0x48b   : >> { %3852 = vrot.lane.b32.xlu1 %v10975_v49, %s8673_s11  ;;  %3844 = vrot.lane.b32.xlu0 %v10977_v53, %s8673_s11  ;;  %v8092_v40 = vpack.c.bf16 %v3522_v9, %v3519_v51 }
 0x48c   : >> { %6425 = vmatmul.mubr.f32.gmra.mrb[110].mxu1 %v4485_v4 }
 0x48d   : >> { %v10985_v25 = vpop.permute.xlu1 %3494  ;;  %v3493_v22 = vpop.permute.xlu0 %3492  ;;  %8093 = vmatpush1.bf16.msra.mxu0 %v8092_v40 }
 0x48e   : >> { %v3526_v10 = vsel %vm3506_vm8, %v3493_v22, %v10985_v25 }
 0x48f   : >> { %4051 = vrot.lane.b32.xlu1 %v10757_v61, %s8674_s12  ;;  %4049 = vrot.lane.b32.xlu0 %v10729_v58, %s8674_s12 }
 0x491   : >> { %v10993_v1 = vpop.permute.xlu1 %3502  ;;  %v3501_v26 = vpop.permute.xlu0 %3500 }
 0x492   : >> { %v3529_v39 = vsel %vm3506_vm8, %v3501_v26, %v10993_v1 }
 0x493   : >> { %4059 = vrot.lane.b32.xlu1 %v10767_v52, %s8674_s12  ;;  %4057 = vrot.lane.b32.xlu0 %v10769_v43, %s8674_s12  ;;  %v8094_v24 = vpack.c.bf16 %v3529_v39, %v3526_v10 }
 0x495   : >> { %v3499_v38 = vpop.permute.xlu1 %3498  ;;  %v3491_v35 = vpop.permute.xlu0 %3490  ;;  %8095 = vmatprep.subr.bf16.mxu0 %v8094_v24 }
 0x496   : >> { %v3528_v59 = vsel %vm3506_vm8, %v3499_v38, %v3501_v26  ;;  %v3525_v58 = vsel %vm3506_vm8, %v3491_v35, %v3493_v22 }
 0x497   : >> { %3657 = vrot.lane.b32.xlu1 %v10767_v52, %s8672_s10  ;;  %3649 = vrot.lane.b32.xlu0 %v10757_v61, %s8672_s10  ;;  %v8096_v47 = vpack.c.bf16 %v3528_v59, %v3525_v58 }
 0x499   : >> { %v11007_v4 = vpop.permute.xlu1 %3647  ;;  %v3646_v63 = vpop.permute.xlu0 %3645  ;;  %8097 = vmatpush1.bf16.msra.mxu0 %v8096_v47 }
 0x49a   : >> { %v3709_v43 = vsel %vm3707_vm9, %v3646_v63, %v11007_v4 }
 0x49b   : >> { %3870 = vrot.lane.b32.xlu1 %v10796_v46, %s8673_s11  ;;  %3862 = vrot.lane.b32.xlu0 %v10786_v48, %s8673_s11 }
 0x49d   : >> { %v11015_v45 = vpop.permute.xlu1 %3655  ;;  %v3654_v52 = vpop.permute.xlu0 %3653 }
 0x49e   : >> { %v3712_v61 = vsel %vm3707_vm9, %v3654_v52, %v11015_v45 }
 0x49f   : >> { %3868 = vrot.lane.b32.xlu1 %v10804_v62, %s8673_s11  ;;  %3860 = vrot.lane.b32.xlu0 %v10806_v56, %s8673_s11  ;;  %v8098_v9 = vpack.c.bf16 %v3712_v61, %v3709_v43 }
 0x4a1   : >> { %v3652_v51 = vpop.permute.xlu1 %3651  ;;  %v3644_v40 = vpop.permute.xlu0 %3643  ;;  %8099 = vmatprep.subr.bf16.mxu0 %v8098_v9 }
 0x4a2   : >> { %v3711_v46 = vsel %vm3707_vm9, %v3652_v51, %v3654_v52  ;;  %v3708_v48 = vsel %vm3707_vm9, %v3644_v40, %v3646_v63 }
 0x4a3   : >> { %4067 = vrot.lane.b32.xlu1 %v10814_v28, %s8674_s12  ;;  %4065 = vrot.lane.b32.xlu0 %v10784_v19, %s8674_s12  ;;  %v8100_v22 = vpack.c.bf16 %v3711_v46, %v3708_v48 }
 0x4a5   : >> { %v3851_v62 = vpop.permute.xlu1 %3850  ;;  %v11029_v10 = vpop.permute.xlu0 %3848  ;;  %8101 = vmatpush1.bf16.msra.mxu0 %v8100_v22 }
 0x4a6   : >> { %v3911_v56 = vsel %vm3908_vm11, %v11029_v10, %v3851_v62 }
 0x4a7   : >> { %3959 = vst.msk [vmem:[#allocation3 + $0x1090] sm:$0xff] %vm242_vm1, %v3911_v56  ;;  %4075 = vrot.lane.b32.xlu1 %v10822_v33, %s8674_s12  ;;  %4073 = vrot.lane.b32.xlu0 %v10794_v17, %s8674_s12 }
 0x4a9   : >> { %v3859_v26 = vpop.permute.xlu1 %3858  ;;  %v11038_v39 = vpop.permute.xlu0 %3856 }
 0x4aa   : >> { %v3914_v19 = vsel %vm3908_vm11, %v11038_v39, %v3859_v26 }
 0x4ab   : >> { %3962 = vst.msk [vmem:[#allocation3 + $0x10a8] sm:$0xff] %vm242_vm1, %v3914_v19  ;;  %3673 = vrot.lane.b32.xlu1 %v10822_v33, %s8672_s10  ;;  %3665 = vrot.lane.b32.xlu0 %v10814_v28, %s8672_s10 }
 0x4ad   : >> { %v3457_v24 = vpop.permute.xlu1 %3456  ;;  %v3449_v38 = vpop.permute.xlu0 %3448 }
 0x4ae   : >> { %v3512_v35 = vsel %vm3506_vm8, %v10896_v27, %v3457_v24  ;;  %v3509_v17 = vsel %vm3506_vm8, %v10882_v29, %v3449_v38  ;;  %v5020_v27 = vld [vmem:[#allocation3 + $0x1090] sm:$0xff] }
 0x4af   : >> { %3560 = vst.msk [vmem:[#allocation3 + $0xf28] sm:$0xff] %vm242_vm1, %v3512_v35  ;;  %3557 = vst.msk [vmem:[#allocation3 + $0xf10] sm:$0xff] %vm242_vm1, %v3509_v17  ;;  %3886 = vrot.lane.b32.xlu1 %v10848_v7, %s8673_s11  ;;  %3878 = vrot.lane.b32.xlu0 %v10838_v42, %s8673_s11 }
 0x4b1   : >> { %v11057_v33 = vpop.permute.xlu1 %3663  ;;  %v3662_v28 = vpop.permute.xlu0 %3661 }
 0x4b2   : >> { %v3715_v59 = vsel %vm3707_vm9, %v3662_v28, %v11057_v33  ;;  %v5023_v58 = vld [vmem:[#allocation3 + $0x10a8] sm:$0xff] }
 0x4b3   : >> { %3884 = vrot.lane.b32.xlu1 %v10856_v20, %s8673_s11  ;;  %3876 = vrot.lane.b32.xlu0 %v10858_v60, %s8673_s11  ;;  %v8338_v29 = vpack.c.bf16 %v5023_v58, %v5020_v27 }
 0x4b5   : >> { %v11065_v47 = vpop.permute.xlu1 %3671  ;;  %v3670_v63 = vpop.permute.xlu0 %3669  ;;  %8339 = vmatprep.subr.bf16.mxu1 %v8338_v29 }
 0x4b6   : >> { %v3718_v42 = vsel %vm3707_vm9, %v3670_v63, %v11065_v47  ;;  %v4972_v43 = vld [vmem:[#allocation3 + $0xf10] sm:$0xff]  ;;  %v4975_v52 = vld [vmem:[#allocation3 + $0xf28] sm:$0xff] }
 0x4b7   : >> { %4083 = vrot.lane.b32.xlu1 %v10866_v8, %s8674_s12  ;;  %4081 = vrot.lane.b32.xlu0 %v10836_v2, %s8674_s12  ;;  %v8340_v61 = vpack.c.bf16 %v4975_v52, %v4972_v43  ;;  %v8102_v9 = vpack.c.bf16 %v3718_v42, %v3715_v59 }
 0x4b9   : >> { %v3668_v51 = vpop.permute.xlu1 %3667  ;;  %v3660_v40 = vpop.permute.xlu0 %3659  ;;  %8341 = vmatpush3.bf16.msra.mxu1 %v8340_v61  ;;  %8103 = vmatprep.subr.bf16.mxu0 %v8102_v9 }
 0x4ba   : >> { %v3717_v46 = vsel %vm3707_vm9, %v3668_v51, %v3670_v63  ;;  %v3714_v48 = vsel %vm3707_vm9, %v3660_v40, %v3662_v28 }
 0x4bb   : >> { %4091 = vrot.lane.b32.xlu1 %v10874_v30, %s8674_s12  ;;  %4089 = vrot.lane.b32.xlu0 %v10846_v34, %s8674_s12  ;;  %v8104_v22 = vpack.c.bf16 %v3717_v46, %v3714_v48 }
 0x4bd   : >> { %v3867_v62 = vpop.permute.xlu1 %3866  ;;  %v11079_v56 = vpop.permute.xlu0 %3864  ;;  %8105 = vmatpush1.bf16.msra.mxu0 %v8104_v22 }
 0x4be   : >> { %v3917_v2 = vsel %vm3908_vm11, %v11079_v56, %v3867_v62 }
 0x4bf   : >> { %3965 = vst.msk [vmem:[#allocation3 + $0x10c0] sm:$0xff] %vm242_vm1, %v3917_v2  ;;  %3689 = vrot.lane.b32.xlu1 %v10874_v30, %s8672_s10  ;;  %3681 = vrot.lane.b32.xlu0 %v10866_v8, %s8672_s10 }
 0x4c1   : >> { %v3875_v26 = vpop.permute.xlu1 %3874  ;;  %v11088_v19 = vpop.permute.xlu0 %3872 }
 0x4c2   : >> { %v3920_v34 = vsel %vm3908_vm11, %v11088_v19, %v3875_v26  ;;  %v4397_v26 = vld [vmem:[%s9300_s18 + $0x58] sm:$0xff] }
 0x4c3   : >> { %3968 = vst.msk [vmem:[#allocation3 + $0x10d8] sm:$0xff] %vm242_vm1, %v3920_v34  ;;  %3902 = vrot.lane.b32.xlu1 %v10907_v44, %s8673_s11  ;;  %3894 = vrot.lane.b32.xlu0 %v10893_v11, %s8673_s11  ;;  %v3982_v34 = vld [vmem:[#allocation2 + $0x8] sm:$0xff] }
 0x4c4   : >> { %6494 = vmatprep.mubr.f32.mxu1 %v4397_v26  ;;  %5743 = vmatprep.mubr.f32.mxu0 %v4397_v26 }
 0x4c5   : >> { %v3473_v24 = vpop.permute.xlu1 %3472  ;;  %v3465_v38 = vpop.permute.xlu0 %3464 }
 0x4c6   : >> { %v3518_v35 = vsel %vm3506_vm8, %v10934_v55, %v3473_v24  ;;  %v3515_v17 = vsel %vm3506_vm8, %v10921_v6, %v3465_v38  ;;  %v5026_v55 = vld [vmem:[#allocation3 + $0x10c0] sm:$0xff] }
 0x4c7   : >> { %3566 = vst.msk [vmem:[#allocation3 + $0xf58] sm:$0xff] %vm242_vm1, %v3518_v35  ;;  %3563 = vst.msk [vmem:[#allocation3 + $0xf40] sm:$0xff] %vm242_vm1, %v3515_v17  ;;  %3900 = vrot.lane.b32.xlu1 %v10917_v32, %s8673_s11  ;;  %3892 = vrot.lane.b32.xlu0 %v10919_v37, %s8673_s11 }
 0x4c9   : >> { %v11107_v28 = vpop.permute.xlu1 %3679  ;;  %v3678_v59 = vpop.permute.xlu0 %3677 }
 0x4ca   : >> { %v3721_v27 = vsel %vm3707_vm9, %v3678_v59, %v11107_v28  ;;  %v5029_v58 = vld [vmem:[#allocation3 + $0x10d8] sm:$0xff] }
 0x4cb   : >> { %4099 = vrot.lane.b32.xlu1 %v10931_v12, %s8674_s12  ;;  %4097 = vrot.lane.b32.xlu0 %v10891_v23, %s8674_s12  ;;  %v8342_v6 = vpack.c.bf16 %v5029_v58, %v5026_v55  ;;  %v11123_v23 = vpop.f32.mrb[0].mxu1 }
 0x4cc   : >> { %v11125_v51 = vpop.f32.mrb[1].mxu1 }
 0x4cd   : >> { %v11115_v29 = vpop.permute.xlu1 %3687  ;;  %v3686_v63 = vpop.permute.xlu0 %3685  ;;  %8343 = vmatprep.subr.bf16.mxu1 %v8342_v6 }
 0x4ce   : >> { %v3724_v42 = vsel %vm3707_vm9, %v3686_v63, %v11115_v29  ;;  %v4978_v43 = vld [vmem:[#allocation3 + $0xf40] sm:$0xff]  ;;  %v4981_v52 = vld [vmem:[#allocation3 + $0xf58] sm:$0xff]  ;;  %v11129_v62 = vpop.f32.mrb[2].mxu1 }
 0x4cf   : >> { %4107 = vrot.lane.b32.xlu1 %v10943_v31, %s8674_s12  ;;  %4105 = vrot.lane.b32.xlu0 %v10905_v36, %s8674_s12  ;;  %v8344_v61 = vpack.c.bf16 %v4981_v52, %v4978_v43  ;;  %v8106_v9 = vpack.c.bf16 %v3724_v42, %v3721_v27  ;;  %v11135_v2 = vpop.f32.mrb[3].mxu1  ;;  %v4189_v43 = vld [vmem:[#allocation2 + $0x38] sm:$0xff] }
 0x4d0   : >> { %v11138_v24 = vpop.f32.mrb[4].mxu1  ;;  %v4185_v52 = vld [vmem:[#allocation2 + $0x18] sm:$0xff] }
 0x4d1   : >> { %v3684_v40 = vpop.permute.xlu1 %3683  ;;  %v3676_v46 = vpop.permute.xlu0 %3675  ;;  %8345 = vmatpush3.bf16.msra.mxu1 %v8344_v61  ;;  %8107 = vmatprep.subr.bf16.mxu0 %v8106_v9 }
 0x4d2   : >> { %v3723_v48 = vsel %vm3707_vm9, %v3684_v40, %v3686_v63  ;;  %v3720_v22 = vsel %vm3707_vm9, %v3676_v46, %v3678_v59  ;;  %v11144_v59 = vpop.f32.mrb[5].mxu1 }
 0x4d3   : >> { %3705 = vrot.lane.b32.xlu1 %v10943_v31, %s8672_s10  ;;  %3697 = vrot.lane.b32.xlu0 %v10931_v12, %s8672_s10  ;;  %v8108_v36 = vpack.c.bf16 %v3723_v48, %v3720_v22  ;;  %v11150_v27 = vpop.f32.mrb[6].mxu1 }
 0x4d4   : >> { %v11152_v55 = vpop.f32.mrb[7].mxu1 }
 0x4d5   : >> { %v3883_v38 = vpop.permute.xlu1 %3882  ;;  %v11140_v35 = vpop.permute.xlu0 %3880  ;;  %8109 = vmatpush1.bf16.msra.mxu0 %v8108_v36  ;;  %v3990_v36 = vld [vmem:[#allocation2 + $0x48] sm:$0xff] }
 0x4d6   : >> { %v3923_v17 = vsel %vm3908_vm11, %v11140_v35, %v3883_v38  ;;  %v11158_v42 = vpop.f32.mrb[8].mxu1 }
 0x4d7   : >> { %3971 = vst.msk [vmem:[#allocation3 + $0x10f0] sm:$0xff] %vm242_vm1, %v3923_v17  ;;  %4055 = vrot.lane.b32.xlu1 %v10963_v16, %s8674_s12  ;;  %4047 = vrot.lane.b32.xlu0 %v3982_v34, %s8674_s12  ;;  %12293 = vst [vmem:[#allocation7_spill] sm:$0xff] %v11158_v42  ;;  %v11165_v16 = vpop.f32.mrb[9].mxu1 }
 0x4d8   : >> { %12294 = vst [vmem:[#allocation8_spill] sm:$0xff] %v11165_v16  ;;  %v11167_v61 = vpop.f32.mrb[10].mxu1 }
 0x4d9   : >> { %v3891_v58 = vpop.permute.xlu1 %3890  ;;  %v11154_v6 = vpop.permute.xlu0 %3888  ;;  %12295 = vst [vmem:[#allocation9_spill] sm:$0xff] %v11167_v61 }
 0x4da   : >> { %v3926_v63 = vsel %vm3908_vm11, %v11154_v6, %v3891_v58  ;;  %v11173_v22 = vpop.f32.mrb[11].mxu1 }
 0x4db   : >> { %3974 = vst.msk [vmem:[#allocation3 + $0x1108] sm:$0xff] %vm242_vm1, %v3926_v63  ;;  %4053 = vrot.lane.b32.xlu1 %v10975_v49, %s8674_s12  ;;  %4045 = vrot.lane.b32.xlu0 %v10977_v53, %s8674_s12  ;;  %12296 = vst [vmem:[#allocation10_spill] sm:$0xff] %v11173_v22  ;;  %v11179_v49 = vpop.f32.mrb[12].mxu1  ;;  %v3994_v53 = vld [vmem:[#allocation2 + $0x68] sm:$0xff] }
 0x4dc   : >> { %12297 = vst [vmem:[#allocation11_spill] sm:$0xff] %v11179_v49  ;;  %v11181_v26 = vpop.f32.mrb[13].mxu1 }
 0x4dd   : >> { %v3489_v9 = vpop.permute.xlu1 %3488  ;;  %v3481_v40 = vpop.permute.xlu0 %3480  ;;  %12298 = vst [vmem:[#allocation12_spill] sm:$0xff] %v11181_v26 }
 0x4de   : >> { %v3524_v46 = vsel %vm3506_vm8, %v10966_v57, %v3489_v9  ;;  %v3521_v48 = vsel %vm3506_vm8, %v10953_v54, %v3481_v40  ;;  %v5032_v38 = vld [vmem:[#allocation3 + $0x10f0] sm:$0xff]  ;;  %v11187_v58 = vpop.f32.mrb[14].mxu1  ;;  %v3989_v9 = vld [vmem:[#allocation2 + $0x40] sm:$0xff] }
 0x4df   : >> { %3572 = vst.msk [vmem:[#allocation3 + $0xf88] sm:$0xff] %vm242_vm1, %v3524_v46  ;;  %3569 = vst.msk [vmem:[#allocation3 + $0xf70] sm:$0xff] %vm242_vm1, %v3521_v48  ;;  %4260 = vrot.lane.b32.xlu1 %v4189_v43, %s8665_s29  ;;  %4252 = vrot.lane.b32.xlu0 %v4185_v52, %s8665_s29  ;;  %v11191_v43 = vpop.f32.mrb[15].mxu1  ;;  %v3993_v52 = vld [vmem:[#allocation2 + $0x60] sm:$0xff] }
 0x4e0   : >> { %12299 = vst [vmem:[#allocation13_spill] sm:$0xff] %v11187_v58  ;;  %12300 = vst [vmem:[#allocation14_spill] sm:$0xff] %v11191_v43  ;;  %v11193_v40 = vpop.f32.mrb[16].mxu1  ;;  %v4193_v43 = vld [vmem:[#allocation2 + $0x58] sm:$0xff] }
 0x4e1   : >> { %v11183_v57 = vpop.permute.xlu1 %3695  ;;  %v3694_v34 = vpop.permute.xlu0 %3693 }
 0x4e2   : >> { %v3727_v54 = vsel %vm3707_vm9, %v3694_v34, %v11183_v57  ;;  %v5035_v17 = vld [vmem:[#allocation3 + $0x1108] sm:$0xff]  ;;  %v11199_v26 = vpop.f32.mrb[17].mxu1 }
 0x4e3   : >> { %4071 = vrot.lane.b32.xlu1 %v3994_v53, %s8674_s12  ;;  %4063 = vrot.lane.b32.xlu0 %v3990_v36, %s8674_s12  ;;  %v8346_v63 = vpack.c.bf16 %v5035_v17, %v5032_v38  ;;  %v11203_v38 = vpop.f32.mrb[18].mxu1  ;;  %v4197_v17 = vld [vmem:[#allocation2 + $0x78] sm:$0xff] }
 0x4e4   : >> { %v11205_v49 = vpop.f32.mrb[19].mxu1 }
 0x4e5   : >> { %v11195_v46 = vpop.permute.xlu1 %3703  ;;  %v3702_v48 = vpop.permute.xlu0 %3701  ;;  %8347 = vmatprep.subr.bf16.mxu1 %v8346_v63 }
 0x4e6   : >> { %v3730_v0 = vsel %vm3707_vm9, %v3702_v48, %v11195_v46  ;;  %v4984_v3 = vld [vmem:[#allocation3 + $0xf70] sm:$0xff]  ;;  %v4987_v58 = vld [vmem:[#allocation3 + $0xf88] sm:$0xff]  ;;  %v11209_v42 = vpop.f32.mrb[20].mxu1 }
 0x4e7   : >> { %4069 = vrot.lane.b32.xlu1 %v3993_v52, %s8674_s12  ;;  %4061 = vrot.lane.b32.xlu0 %v3989_v9, %s8674_s12  ;;  %v8348_v53 = vpack.c.bf16 %v4987_v58, %v4984_v3  ;;  %v8110_v36 = vpack.c.bf16 %v3730_v0, %v3727_v54  ;;  %v11213_v3 = vpop.f32.mrb[21].mxu1  ;;  %v3998_v54 = vld [vmem:[#allocation2 + $0x88] sm:$0xff] }
 0x4e8   : >> { %v11215_v58 = vpop.f32.mrb[22].mxu1 }
 0x4e9   : >> { %v3700_v63 = vpop.permute.xlu1 %3699  ;;  %v3692_v22 = vpop.permute.xlu0 %3691  ;;  %8349 = vmatpush3.bf16.msra.mxu1 %v8348_v53  ;;  %8111 = vmatprep.subr.bf16.mxu0 %v8110_v36  ;;  %12301 = vst [vmem:[#allocation15_spill] sm:$0xff] %v11215_v58 }
 0x4ea   : >> { %v3729_v61 = vsel %vm3707_vm9, %v3700_v63, %v3702_v48  ;;  %v3726_v16 = vsel %vm3707_vm9, %v3692_v22, %v3694_v34  ;;  %v11221_v22 = vpop.f32.mrb[23].mxu1 }
 0x4eb   : >> { %4276 = vrot.lane.b32.xlu1 %v4197_v17, %s8665_s29  ;;  %4268 = vrot.lane.b32.xlu0 %v4193_v43, %s8665_s29  ;;  %v8112_v0 = vpack.c.bf16 %v3729_v61, %v3726_v16  ;;  %12302 = vst [vmem:[#allocation16_spill] sm:$0xff] %v11221_v22  ;;  %v11227_v16 = vpop.f32.mrb[24].mxu1 }
 0x4ec   : >> { %12303 = vst [vmem:[#allocation17_spill] sm:$0xff] %v11227_v16  ;;  %v11229_v61 = vpop.f32.mrb[25].mxu1 }
 0x4ed   : >> { %v3899_v52 = vpop.permute.xlu1 %3898  ;;  %v11217_v9 = vpop.permute.xlu0 %3896  ;;  %8113 = vmatpush1.bf16.msra.mxu0 %v8112_v0  ;;  %12304 = vst [vmem:[#allocation18_spill] sm:$0xff] %v11229_v61 }
 0x4ee   : >> { %v3929_v48 = vsel %vm3908_vm11, %v11217_v9, %v3899_v52  ;;  %v11235_v36 = vpop.f32.mrb[26].mxu1 }
 0x4ef   : >> { %3977 = vst.msk [vmem:[#allocation3 + $0x1120] sm:$0xff] %vm242_vm1, %v3929_v48  ;;  %4087 = vrot.lane.b32.xlu1 %v10848_v7, %s8674_s12  ;;  %4079 = vrot.lane.b32.xlu0 %v3998_v54, %s8674_s12  ;;  %12305 = vst [vmem:[#allocation19_spill] sm:$0xff] %v11235_v36  ;;  %v11242_v7 = vpop.f32.mrb[27].mxu1 }
 0x4f0   : >> { %12306 = vst [vmem:[#allocation20_spill] sm:$0xff] %v11242_v7  ;;  %v11244_v17 = vpop.f32.mrb[28].mxu1 }
 0x4f1   : >> { %v3907_v34 = vpop.permute.xlu1 %3906  ;;  %v11231_v43 = vpop.permute.xlu0 %3904  ;;  %12307 = vst [vmem:[#allocation21_spill] sm:$0xff] %v11244_v17 }
 0x4f2   : >> { %v3932_v53 = vsel %vm3908_vm11, %v11231_v43, %v3907_v34  ;;  %v11250_v48 = vpop.f32.mrb[29].mxu1 }
 0x4f3   : >> { %3980 = vst.msk [vmem:[#allocation3 + $0x1138] sm:$0xff] %vm242_vm1, %v3932_v53  ;;  %4085 = vrot.lane.b32.xlu1 %v10856_v20, %s8674_s12  ;;  %4077 = vrot.lane.b32.xlu0 %v10858_v60, %s8674_s12  ;;  %12308 = vst [vmem:[#allocation22_spill] sm:$0xff] %v11250_v48  ;;  %v11258_v20 = vpop.f32.mrb[30].mxu1 }
 0x4f4   : >> { %12309 = vst [vmem:[#allocation23_spill] sm:$0xff] %v11258_v20  ;;  %v11260_v60 = vpop.f32.mrb[31].mxu1 }
 0x4f5   : >> { %v3505_v63 = vpop.permute.xlu1 %3504  ;;  %v3497_v0 = vpop.permute.xlu0 %3496  ;;  %12310 = vst [vmem:[#allocation24_spill] sm:$0xff] %v11260_v60 }
 0x4f6   : >> { %v3530_v54 = vsel %vm3506_vm8, %v10993_v1, %v3505_v63  ;;  %v3527_v52 = vsel %vm3506_vm8, %v10985_v25, %v3497_v0  ;;  %v5038_v63 = vld [vmem:[#allocation3 + $0x1120] sm:$0xff] }
 0x4f7   : >> { %3578 = vst.msk [vmem:[#allocation3 + $0xfb8] sm:$0xff] %vm242_vm1, %v3530_v54  ;;  %3575 = vst.msk [vmem:[#allocation3 + $0xfa0] sm:$0xff] %vm242_vm1, %v3527_v52  ;;  %4292 = vrot.lane.b32.xlu1 %v10874_v30, %s8665_s29  ;;  %4284 = vrot.lane.b32.xlu0 %v10866_v8, %s8665_s29  ;;  %v7390_v54 = vpop.f32.mrb[32].mxu1 }
 0x4f8   : >> { %v7391_v52 = vpop.f32.mrb[33].mxu1 }
 0x4f9   : >> { %v3855_v1 = vpop.permute.xlu1 %3854  ;;  %v3847_v34 = vpop.permute.xlu0 %3846  ;;  %v11270_v60 = vadd.f32 %v7391_v52, %v7390_v54 }
 0x4fa   : >> { %v3913_v25 = vsel %vm3908_vm11, %v3855_v1, %v11038_v39  ;;  %v3910_v53 = vsel %vm3908_vm11, %v3847_v34, %v11029_v10  ;;  %v5041_v0 = vld [vmem:[#allocation3 + $0x1138] sm:$0xff]  ;;  %v7393_v20 = vpop.f32.mrb[34].mxu1 }
 0x4fb   : >> { %4103 = vrot.lane.b32.xlu1 %v10907_v44, %s8674_s12  ;;  %4095 = vrot.lane.b32.xlu0 %v10893_v11, %s8674_s12  ;;  %v8350_v8 = vpack.c.bf16 %v5041_v0, %v5038_v63  ;;  %v8114_v30 = vpack.c.bf16 %v3913_v25, %v3910_v53  ;;  %v7394_v44 = vpop.f32.mrb[35].mxu1 }
 0x4fc   : >> { %v11278_v53 = vadd.f32 %v7394_v44, %v7393_v20  ;;  %v7396_v63 = vpop.f32.mrb[36].mxu1 }
 0x4fd   : >> { %v3853_v48 = vpop.permute.xlu1 %3852  ;;  %v3845_v39 = vpop.permute.xlu0 %3844  ;;  %8351 = vmatprep.subr.bf16.mxu1 %v8350_v8  ;;  %8115 = vmatprep.subr.bf16.mxu0 %v8114_v30 }
 0x4fe   : >> { %v3912_v10 = vsel %vm3908_vm11, %v3853_v48, %v3855_v1  ;;  %v3909_v17 = vsel %vm3908_vm11, %v3845_v39, %v3847_v34  ;;  %v4990_v7 = vld [vmem:[#allocation3 + $0xfa0] sm:$0xff]  ;;  %v4993_v36 = vld [vmem:[#allocation3 + $0xfb8] sm:$0xff]  ;;  %v7397_v0 = vpop.f32.mrb[37].mxu1 }
 0x4ff   : >> { %4101 = vrot.lane.b32.xlu1 %v10917_v32, %s8674_s12  ;;  %4093 = vrot.lane.b32.xlu0 %v10919_v37, %s8674_s12  ;;  %v8352_v11 = vpack.c.bf16 %v4993_v36, %v4990_v7  ;;  %v8116_v25 = vpack.c.bf16 %v3912_v10, %v3909_v17  ;;  %v11282_v1 = vadd.f32 %v7397_v0, %v7396_v63  ;;  %v7399_v34 = vpop.f32.mrb[38].mxu1 }
 0x500   : >> { %v7400_v37 = vpop.f32.mrb[39].mxu1 }
 0x501   : >> { %v4052_v54 = vpop.permute.xlu1 %4051  ;;  %v11280_v48 = vpop.permute.xlu0 %4049  ;;  %8353 = vmatpush3.bf16.msra.mxu1 %v8352_v11  ;;  %8117 = vmatpush1.bf16.msra.mxu0 %v8116_v25  ;;  %v11291_v36 = vadd.f32 %v7400_v37, %v7399_v34 }
 0x502   : >> { %v4112_v32 = vsel %vm4109_vm12, %v11280_v48, %v4052_v54  ;;  %v7402_v7 = vpop.f32.mrb[40].mxu1 }
 0x503   : >> { %4160 = vst.msk [vmem:[#allocation3 + $0x1150] sm:$0xff] %vm242_vm1, %v4112_v32  ;;  %4308 = vrot.lane.b32.xlu1 %v10943_v31, %s8665_s29  ;;  %4300 = vrot.lane.b32.xlu0 %v10931_v12, %s8665_s29  ;;  %v7403_v30 = vpop.f32.mrb[41].mxu1 }
 0x504   : >> { %v11298_v52 = vadd.f32 %v7403_v30, %v7402_v7  ;;  %v7405_v39 = vpop.f32.mrb[42].mxu1 }
 0x505   : >> { %v4060_v17 = vpop.permute.xlu1 %4059  ;;  %v11293_v20 = vpop.permute.xlu0 %4057 }
 0x506   : >> { %v4115_v8 = vsel %vm4109_vm12, %v11293_v20, %v4060_v17  ;;  %v7406_v31 = vpop.f32.mrb[43].mxu1 }
 0x507   : >> { %4163 = vst.msk [vmem:[#allocation3 + $0x1168] sm:$0xff] %vm242_vm1, %v4115_v8  ;;  %v11300_v12 = vadd.f32 %v7406_v31, %v7405_v39  ;;  %v7408_v63 = vpop.f32.mrb[44].mxu1 }
 0x508   : >> { %v7409_v0 = vpop.f32.mrb[45].mxu1 }
 0x509   : >> { %v3658_v10 = vpop.permute.xlu1 %3657  ;;  %v3650_v44 = vpop.permute.xlu0 %3649  ;;  %v11308_v54 = vadd.f32 %v7409_v0, %v7408_v63 }
 0x50a   : >> { %v3713_v11 = vsel %vm3707_vm9, %v11015_v45, %v3658_v10  ;;  %v3710_v25 = vsel %vm3707_vm9, %v11007_v4, %v3650_v44  ;;  %v7411_v32 = vpop.f32.mrb[46].mxu1  ;;  %v5044_v17 = vld [vmem:[#allocation3 + $0x1150] sm:$0xff] }
 0x50b   : >> { %3761 = vst.msk [vmem:[#allocation3 + $0xfe8] sm:$0xff] %vm242_vm1, %v3713_v11  ;;  %3758 = vst.msk [vmem:[#allocation3 + $0xfd0] sm:$0xff] %vm242_vm1, %v3710_v25  ;;  %v7412_v4 = vpop.f32.mrb[47].mxu1 }
 0x50c   : >> { %v11314_v31 = vadd.f32 %v7412_v4, %v7411_v32  ;;  %v7446_v10 = vpop.f32.mrb[48].mxu1 }
 0x50d   : >> { %v3871_v34 = vpop.permute.xlu1 %3870  ;;  %v3863_v37 = vpop.permute.xlu0 %3862 }
 0x50e   : >> { %v3919_v7 = vsel %vm3908_vm11, %v3871_v34, %v11088_v19  ;;  %v3916_v45 = vsel %vm3908_vm11, %v3863_v37, %v11079_v56  ;;  %v5047_v8 = vld [vmem:[#allocation3 + $0x1168] sm:$0xff]  ;;  %v7447_v44 = vpop.f32.mrb[49].mxu1 }
 0x50f   : >> { %v8354_v30 = vpack.c.bf16 %v5047_v8, %v5044_v17  ;;  %v8118_v39 = vpack.c.bf16 %v3919_v7, %v3916_v45  ;;  %v7448_v63 = vadd.f32 %v7447_v44, %v7446_v10  ;;  %v7449_v16 = vpop.f32.mrb[50].mxu1 }
 0x510   : >> { %v7450_v32 = vpop.f32.mrb[51].mxu1 }
 0x511   : >> { %v3869_v11 = vpop.permute.xlu1 %3868  ;;  %v3861_v25 = vpop.permute.xlu0 %3860  ;;  %8355 = vmatprep.subr.bf16.mxu1 %v8354_v30  ;;  %8119 = vmatprep.subr.bf16.mxu0 %v8118_v39  ;;  %v11319_v7 = vadd.f32 %v7448_v63, %v11270_v60  ;;  %v7451_v45 = vadd.f32 %v7450_v32, %v7449_v16 }
 0x512   : >> { %v3918_v0 = vsel %vm3908_vm11, %v3869_v11, %v3871_v34  ;;  %v3915_v19 = vsel %vm3908_vm11, %v3861_v25, %v3863_v37  ;;  %v4996_v61 = vld [vmem:[#allocation3 + $0xfd0] sm:$0xff]  ;;  %v4999_v56 = vld [vmem:[#allocation3 + $0xfe8] sm:$0xff]  ;;  %v7452_v17 = vpop.f32.mrb[52].mxu1 }
 0x513   : >> { %v8356_v22 = vpack.c.bf16 %v4999_v56, %v4996_v61  ;;  %v8120_v58 = vpack.c.bf16 %v3918_v0, %v3915_v19  ;;  %v11326_v37 = vadd.f32 %v7451_v45, %v11278_v53  ;;  %v7453_v30 = vpop.f32.mrb[53].mxu1 }
 0x514   : >> { %v7454_v61 = vadd.f32 %v7453_v30, %v7452_v17  ;;  %v7455_v60 = vpop.f32.mrb[54].mxu1 }
 0x515   : >> { %v4068_v8 = vpop.permute.xlu1 %4067  ;;  %v11321_v4 = vpop.permute.xlu0 %4065  ;;  %8357 = vmatpush3.bf16.msra.mxu1 %v8356_v22  ;;  %8121 = vmatpush1.bf16.msra.mxu0 %v8120_v58 }
 0x516   : >> { %v4118_v34 = vsel %vm4109_vm12, %v11321_v4, %v4068_v8  ;;  %v7456_v39 = vpop.f32.mrb[55].mxu1  ;;  %v11332_v44 = vadd.f32 %v7454_v61, %v11282_v1 }
 0x517   : >> { %4166 = vst.msk [vmem:[#allocation3 + $0x1180] sm:$0xff] %vm242_vm1, %v4118_v34  ;;  %v7457_v22 = vadd.f32 %v7456_v39, %v7455_v60  ;;  %v7458_v11 = vpop.f32.mrb[56].mxu1 }
 0x518   : >> { %v7459_v25 = vpop.f32.mrb[57].mxu1 }
 0x519   : >> { %v4076_v10 = vpop.permute.xlu1 %4075  ;;  %v11329_v16 = vpop.permute.xlu0 %4073  ;;  %v11338_v53 = vadd.f32 %v7457_v22, %v11291_v36  ;;  %v7460_v63 = vadd.f32 %v7459_v25, %v7458_v11 }
 0x51a   : >> { %v4121_v58 = vsel %vm4109_vm12, %v11329_v16, %v4076_v10  ;;  %v7461_v0 = vpop.f32.mrb[58].mxu1 }
 0x51b   : >> { %4169 = vst.msk [vmem:[#allocation3 + $0x1198] sm:$0xff] %vm242_vm1, %v4121_v58  ;;  %v11345_v45 = vadd.f32 %v7460_v63, %v11298_v52  ;;  %v7462_v17 = vpop.f32.mrb[59].mxu1 }
 0x51c   : >> { %v7463_v36 = vadd.f32 %v7462_v17, %v7461_v0  ;;  %v7464_v8 = vpop.f32.mrb[60].mxu1 }
 0x51d   : >> { %v3674_v19 = vpop.permute.xlu1 %3673  ;;  %v3666_v56 = vpop.permute.xlu0 %3665 }
 0x51e   : >> { %v3719_v32 = vsel %vm3707_vm9, %v11065_v47, %v3674_v19  ;;  %v3716_v1 = vsel %vm3707_vm9, %v11057_v33, %v3666_v56  ;;  %v7465_v34 = vpop.f32.mrb[61].mxu1  ;;  %v11350_v60 = vadd.f32 %v7463_v36, %v11300_v12  ;;  %v5050_v39 = vld [vmem:[#allocation3 + $0x1180] sm:$0xff] }
 0x51f   : >> { %3767 = vst.msk [vmem:[#allocation3 + $0x1018] sm:$0xff] %vm242_vm1, %v3719_v32  ;;  %3764 = vst.msk [vmem:[#allocation3 + $0x1000] sm:$0xff] %vm242_vm1, %v3716_v1  ;;  %v7466_v47 = vadd.f32 %v7465_v34, %v7464_v8  ;;  %v7467_v22 = vpop.f32.mrb[62].mxu1 }
 0x520   : >> { %v7468_v63 = vpop.f32.mrb[63].mxu1 }
 0x521   : >> { %v3887_v30 = vpop.permute.xlu1 %3886  ;;  %v3879_v61 = vpop.permute.xlu0 %3878  ;;  %v11357_v25 = vadd.f32 %v7466_v47, %v11308_v54  ;;  %v7469_v0 = vadd.f32 %v7468_v63, %v7467_v22 }
 0x522   : >> { %v3925_v33 = vsel %vm3908_vm11, %v3887_v30, %v11154_v6  ;;  %v3922_v52 = vsel %vm3908_vm11, %v3879_v61, %v11140_v35  ;;  %v5053_v10 = vld [vmem:[#allocation3 + $0x1198] sm:$0xff]  ;;  %v7502_v19 = vpop.f32.mrb[64].mxu1 }
 0x523   : >> { %v8358_v58 = vpack.c.bf16 %v5053_v10, %v5050_v39  ;;  %v8122_v11 = vpack.c.bf16 %v3925_v33, %v3922_v52  ;;  %v11362_v17 = vadd.f32 %v7469_v0, %v11314_v31  ;;  %v7503_v36 = vpop.f32.mrb[65].mxu1 }
 0x524   : >> { %v7504_v34 = vadd.f32 %v7503_v36, %v7502_v19  ;;  %v7505_v47 = vpop.f32.mrb[66].mxu1 }
 0x525   : >> { %v3885_v12 = vpop.permute.xlu1 %3884  ;;  %v3877_v56 = vpop.permute.xlu0 %3876  ;;  %8359 = vmatprep.subr.bf16.mxu1 %v8358_v58  ;;  %8123 = vmatprep.subr.bf16.mxu0 %v8122_v11 }
 0x526   : >> { %v3924_v6 = vsel %vm3908_vm11, %v3885_v12, %v3887_v30  ;;  %v3921_v32 = vsel %vm3908_vm11, %v3877_v56, %v3879_v61  ;;  %v5002_v35 = vld [vmem:[#allocation3 + $0x1000] sm:$0xff]  ;;  %v5005_v1 = vld [vmem:[#allocation3 + $0x1018] sm:$0xff]  ;;  %v7506_v33 = vpop.f32.mrb[67].mxu1  ;;  %v11367_v30 = vadd.f32 %v7504_v34, %v11319_v7 }
 0x527   : >> { %v8360_v8 = vpack.c.bf16 %v5005_v1, %v5002_v35  ;;  %v8124_v54 = vpack.c.bf16 %v3924_v6, %v3921_v32  ;;  %v7507_v61 = vadd.f32 %v7506_v33, %v7505_v47  ;;  %v7508_v31 = vpop.f32.mrb[68].mxu1 }
 0x528   : >> { %v7509_v58 = vpop.f32.mrb[69].mxu1 }
 0x529   : >> { %v4084_v52 = vpop.permute.xlu1 %4083  ;;  %v11364_v39 = vpop.permute.xlu0 %4081  ;;  %8361 = vmatpush3.bf16.msra.mxu1 %v8360_v8  ;;  %8125 = vmatpush1.bf16.msra.mxu0 %v8124_v54  ;;  %v11373_v22 = vadd.f32 %v7507_v61, %v11326_v37  ;;  %v7510_v11 = vadd.f32 %v7509_v58, %v7508_v31 }
 0x52a   : >> { %v4124_v10 = vsel %vm4109_vm12, %v11364_v39, %v4084_v52  ;;  %v7511_v63 = vpop.f32.mrb[70].mxu1 }
 0x52b   : >> { %4172 = vst.msk [vmem:[#allocation3 + $0x11b0] sm:$0xff] %vm242_vm1, %v4124_v10  ;;  %v11380_v12 = vadd.f32 %v7510_v11, %v11332_v44  ;;  %v7512_v56 = vpop.f32.mrb[71].mxu1 }
 0x52c   : >> { %v7513_v6 = vadd.f32 %v7512_v56, %v7511_v63  ;;  %v7514_v32 = vpop.f32.mrb[72].mxu1 }
 0x52d   : >> { %v4092_v0 = vpop.permute.xlu1 %4091  ;;  %v11375_v19 = vpop.permute.xlu0 %4089 }
 0x52e   : >> { %v4127_v7 = vsel %vm4109_vm12, %v11375_v19, %v4092_v0  ;;  %v7515_v35 = vpop.f32.mrb[73].mxu1  ;;  %v11384_v36 = vadd.f32 %v7513_v6, %v11338_v53 }
 0x52f   : >> { %4175 = vst.msk [vmem:[#allocation3 + $0x11c8] sm:$0xff] %vm242_vm1, %v4127_v7  ;;  %v7516_v8 = vadd.f32 %v7515_v35, %v7514_v32  ;;  %v7517_v44 = vpop.f32.mrb[74].mxu1 }
 0x530   : >> { %v7518_v33 = vpop.f32.mrb[75].mxu1 }
 0x531   : >> { %v3690_v37 = vpop.permute.xlu1 %3689  ;;  %v3682_v1 = vpop.permute.xlu0 %3681  ;;  %v11393_v47 = vadd.f32 %v7516_v8, %v11345_v45  ;;  %v7519_v52 = vadd.f32 %v7518_v33, %v7517_v44 }
 0x532   : >> { %v3725_v54 = vsel %vm3707_vm9, %v11115_v29, %v3690_v37  ;;  %v3722_v34 = vsel %vm3707_vm9, %v11107_v28, %v3682_v1  ;;  %v7520_v61 = vpop.f32.mrb[76].mxu1  ;;  %v5056_v28 = vld [vmem:[#allocation3 + $0x11b0] sm:$0xff] }
 0x533   : >> { %3773 = vst.msk [vmem:[#allocation3 + $0x1048] sm:$0xff] %vm242_vm1, %v3725_v54  ;;  %3770 = vst.msk [vmem:[#allocation3 + $0x1030] sm:$0xff] %vm242_vm1, %v3722_v34  ;;  %v11400_v11 = vadd.f32 %v7519_v52, %v11350_v60  ;;  %v7521_v63 = vpop.f32.mrb[77].mxu1 }
 0x534   : >> { %v7522_v7 = vadd.f32 %v7521_v63, %v7520_v61  ;;  %v7523_v56 = vpop.f32.mrb[78].mxu1 }
 0x535   : >> { %v3903_v53 = vpop.permute.xlu1 %3902  ;;  %v3895_v10 = vpop.permute.xlu0 %3894 }
 0x536   : >> { %v3931_v31 = vsel %vm3908_vm11, %v3903_v53, %v11231_v43  ;;  %v3928_v29 = vsel %vm3908_vm11, %v3895_v10, %v11217_v9  ;;  %v5059_v58 = vld [vmem:[#allocation3 + $0x11c8] sm:$0xff]  ;;  %v7524_v6 = vpop.f32.mrb[79].mxu1  ;;  %v11403_v43 = vadd.f32 %v7522_v7, %v11357_v25 }
 0x537   : >> { %v8362_v0 = vpack.c.bf16 %v5059_v58, %v5056_v28  ;;  %v8126_v45 = vpack.c.bf16 %v3931_v31, %v3928_v29  ;;  %v7525_v37 = vadd.f32 %v7524_v6, %v7523_v56  ;;  %v7558_v54 = vpop.f32.mrb[80].mxu1 }
 0x538   : >> { %v7559_v52 = vpop.f32.mrb[81].mxu1 }
 0x539   : >> { %v3901_v32 = vpop.permute.xlu1 %3900  ;;  %v3893_v35 = vpop.permute.xlu0 %3892  ;;  %8363 = vmatprep.subr.bf16.mxu1 %v8362_v0  ;;  %8127 = vmatprep.subr.bf16.mxu0 %v8126_v45  ;;  %v11408_v33 = vadd.f32 %v7525_v37, %v11362_v17  ;;  %v7560_v61 = vadd.f32 %v7559_v52, %v7558_v54 }
 0x53a   : >> { %v3930_v9 = vsel %vm3908_vm11, %v3901_v32, %v3903_v53  ;;  %v3927_v1 = vsel %vm3908_vm11, %v3893_v35, %v3895_v10  ;;  %v5008_v60 = vld [vmem:[#allocation3 + $0x1030] sm:$0xff]  ;;  %v5011_v8 = vld [vmem:[#allocation3 + $0x1048] sm:$0xff]  ;;  %v7561_v31 = vpop.f32.mrb[82].mxu1 }
 0x53b   : >> { %v8364_v34 = vpack.c.bf16 %v5011_v8, %v5008_v60  ;;  %v8128_v44 = vpack.c.bf16 %v3930_v9, %v3927_v1  ;;  %v11415_v53 = vadd.f32 %v7560_v61, %v11367_v30  ;;  %v7562_v10 = vpop.f32.mrb[83].mxu1 }
 0x53c   : >> { %v7563_v58 = vadd.f32 %v7562_v10, %v7561_v31  ;;  %v7564_v17 = vpop.f32.mrb[84].mxu1 }
 0x53d   : >> { %v4100_v29 = vpop.permute.xlu1 %4099  ;;  %v11410_v28 = vpop.permute.xlu0 %4097  ;;  %8365 = vmatpush3.bf16.msra.mxu1 %v8364_v34  ;;  %8129 = vmatpush1.bf16.msra.mxu0 %v8128_v44 }
 0x53e   : >> { %v4130_v25 = vsel %vm4109_vm12, %v11410_v28, %v4100_v29  ;;  %v7565_v63 = vpop.f32.mrb[85].mxu1  ;;  %v11421_v7 = vadd.f32 %v7563_v58, %v11373_v22 }
 0x53f   : >> { %4178 = vst.msk [vmem:[#allocation3 + $0x11e0] sm:$0xff] %vm242_vm1, %v4130_v25  ;;  %v7566_v56 = vadd.f32 %v7565_v63, %v7564_v17  ;;  %v7567_v32 = vpop.f32.mrb[86].mxu1 }
 0x540   : >> { %v7568_v35 = vpop.f32.mrb[87].mxu1 }
 0x541   : >> { %v4108_v0 = vpop.permute.xlu1 %4107  ;;  %v11418_v45 = vpop.permute.xlu0 %4105  ;;  %v11427_v30 = vadd.f32 %v7566_v56, %v11380_v12  ;;  %v7569_v37 = vadd.f32 %v7568_v35, %v7567_v32 }
 0x542   : >> { %v4133_v6 = vsel %vm4109_vm12, %v11418_v45, %v4108_v0  ;;  %v7570_v9 = vpop.f32.mrb[88].mxu1 }
 0x543   : >> { %4181 = vst.msk [vmem:[#allocation3 + $0x11f8] sm:$0xff] %vm242_vm1, %v4133_v6  ;;  %v11434_v54 = vadd.f32 %v7569_v37, %v11384_v36  ;;  %v7571_v34 = vpop.f32.mrb[89].mxu1 }
 0x544   : >> { %v7572_v12 = vadd.f32 %v7571_v34, %v7570_v9  ;;  %v7573_v44 = vpop.f32.mrb[90].mxu1 }
 0x545   : >> { %v3706_v1 = vpop.permute.xlu1 %3705  ;;  %v3698_v60 = vpop.permute.xlu0 %3697 }
 0x546   : >> { %v3731_v8 = vsel %vm3707_vm9, %v11195_v46, %v3706_v1  ;;  %v3728_v22 = vsel %vm3707_vm9, %v11183_v57, %v3698_v60  ;;  %v7574_v52 = vpop.f32.mrb[91].mxu1  ;;  %v11439_v29 = vadd.f32 %v7572_v12, %v11393_v47  ;;  %v5062_v25 = vld [vmem:[#allocation3 + $0x11e0] sm:$0xff] }
 0x547   : >> { %3779 = vst.msk [vmem:[#allocation3 + $0x1078] sm:$0xff] %vm242_vm1, %v3731_v8  ;;  %3776 = vst.msk [vmem:[#allocation3 + $0x1060] sm:$0xff] %vm242_vm1, %v3728_v22  ;;  %v7575_v46 = vadd.f32 %v7574_v52, %v7573_v44  ;;  %v7576_v58 = vpop.f32.mrb[92].mxu1 }
 0x548   : >> { %v7577_v56 = vpop.f32.mrb[93].mxu1 }
 0x549   : >> { %v4056_v61 = vpop.permute.xlu1 %4055  ;;  %v4048_v31 = vpop.permute.xlu0 %4047  ;;  %v11446_v0 = vadd.f32 %v7575_v46, %v11400_v11  ;;  %v7578_v6 = vadd.f32 %v7577_v56, %v7576_v58  ;;  %v11454_v46 = vld [vmem:[%s9300_s18 + $0x50] sm:$0xff] }
 0x54a   : >> { %v4114_v57 = vsel %vm4109_vm12, %v4056_v61, %v11293_v20  ;;  %v4111_v36 = vsel %vm4109_vm12, %v4048_v31, %v11280_v48  ;;  %v5065_v10 = vld [vmem:[#allocation3 + $0x11f8] sm:$0xff]  ;;  %v7579_v32 = vpop.f32.mrb[94].mxu1 }
 0x54b   : >> { %v8366_v17 = vpack.c.bf16 %v5065_v10, %v5062_v25  ;;  %v8130_v63 = vpack.c.bf16 %v4114_v57, %v4111_v36  ;;  %v11451_v1 = vadd.f32 %v7578_v6, %v11403_v43  ;;  %v7580_v11 = vpop.f32.mrb[95].mxu1  ;;  %v11464_v36 = vld [vmem:[%s9300_s18 + $0xc0] sm:$0xff] }
 0x54c   : >> { %v7581_v22 = vadd.f32 %v7580_v11, %v7579_v32  ;;  %v7614_v34 = vpop.f32.mrb[96].mxu1 }
 0x54d   : >> { %v4054_v47 = vpop.permute.xlu1 %4053  ;;  %v4046_v35 = vpop.permute.xlu0 %4045  ;;  %8367 = vmatprep.subr.bf16.mxu1 %v8366_v17  ;;  %8131 = vmatprep.subr.bf16.mxu0 %v8130_v63 }
 0x54e   : >> { %v4113_v20 = vsel %vm4109_vm12, %v4054_v47, %v4056_v61  ;;  %v4110_v48 = vsel %vm4109_vm12, %v4046_v35, %v4048_v31  ;;  %v5014_v37 = vld [vmem:[#allocation3 + $0x1060] sm:$0xff]  ;;  %v5017_v9 = vld [vmem:[#allocation3 + $0x1078] sm:$0xff]  ;;  %v7615_v12 = vpop.f32.mrb[97].mxu1  ;;  %v11457_v61 = vadd.f32 %v7581_v22, %v11408_v33 }
 0x54f   : >> { %v8368_v60 = vpack.c.bf16 %v5017_v9, %v5014_v37  ;;  %v8132_v8 = vpack.c.bf16 %v4113_v20, %v4110_v48  ;;  %v7616_v31 = vadd.f32 %v7615_v12, %v7614_v34  ;;  %v7617_v25 = vpop.f32.mrb[98].mxu1  ;;  %v11497_v12 = vld [vmem:[%s9300_s18 + $0x190] sm:$0xff] }
 0x550   : >> { %v7618_v33 = vpop.f32.mrb[99].mxu1 }
 0x551   : >> { %v4261_v44 = vpop.permute.xlu1 %4260  ;;  %v4253_v52 = vpop.permute.xlu0 %4252  ;;  %8369 = vmatpush3.bf16.msra.mxu1 %v8368_v60  ;;  %8133 = vmatpush1.bf16.msra.mxu0 %v8132_v8  ;;  %v11469_v10 = vadd.f32 %v7616_v31, %v11415_v53  ;;  %v7619_v58 = vadd.f32 %v7618_v33, %v7617_v25  ;;  %v11481_v53 = vld [vmem:[%s9300_s18 + $0x128] sm:$0xff] }
 0x552   : >> { %v4316_v43 = vsel %vm4310_vm4, %v10184_v21, %v4261_v44  ;;  %v4313_v57 = vsel %vm4310_vm4, %v10176_v15, %v4253_v52  ;;  %v7620_v17 = vpop.f32.mrb[100].mxu1  ;;  %v11474_v15 = vld [vmem:[%s9300_s18 + $0xb8] sm:$0xff] }
 0x553   : >> { %4364 = vst.msk [vmem:[#allocation3 + $0x1228] sm:$0xff] %vm242_vm1, %v4316_v43  ;;  %4361 = vst.msk [vmem:[#allocation3 + $0x1210] sm:$0xff] %vm242_vm1, %v4313_v57  ;;  %v11484_v32 = vadd.f32 %v7619_v58, %v11421_v7  ;;  %v7621_v47 = vpop.f32.mrb[101].mxu1 }
 0x554   : >> { %6495 = vmatmul.mubr.f32.vlgmr.msra.gmra.mrb[112].mxu1 %v11454_v46  ;;  %v7622_v20 = vadd.f32 %v7621_v47, %v7620_v17  ;;  %v7623_v48 = vpop.f32.mrb[102].mxu1  ;;  %v11505_v17 = vld [vmem:[%s9300_s18 + $0x188] sm:$0xff] }
 0x555   : >> { %v4072_v21 = vpop.permute.xlu1 %4071  ;;  %v4064_v63 = vpop.permute.xlu0 %4063  ;;  %6499 = vmatprep.mubr.f32.mxu1 %v11464_v36 }
 0x556   : >> { %v4120_v56 = vsel %vm4109_vm12, %v4072_v21, %v11329_v16  ;;  %v4117_v6 = vsel %vm4109_vm12, %v4064_v63, %v11321_v4  ;;  %v7624_v37 = vpop.f32.mrb[103].mxu1  ;;  %v11489_v16 = vld [vmem:[%s9300_s18 + $0x120] sm:$0xff]  ;;  %v11492_v4 = vadd.f32 %v7622_v20, %v11427_v30 }
 0x557   : >> { %v8134_v35 = vpack.c.bf16 %v4120_v56, %v4117_v6  ;;  %v7625_v7 = vadd.f32 %v7624_v37, %v7623_v48  ;;  %v7626_v44 = vpop.f32.mrb[104].mxu1  ;;  %v11522_v48 = vld [vmem:[%s9300_s18 + $0x1f0] sm:$0xff] }
 0x558   : >> { %6500 = vmatmul.mubr.f32.gmra.mrb[114].mxu1 %v11474_v15  ;;  %v7627_v57 = vpop.f32.mrb[105].mxu1 }
 0x559   : >> { %v4070_v9 = vpop.permute.xlu1 %4069  ;;  %v4062_v11 = vpop.permute.xlu0 %4061  ;;  %6504 = vmatprep.mubr.f32.mxu1 %v11481_v53  ;;  %8135 = vmatprep.subr.bf16.mxu0 %v8134_v35  ;;  %v11500_v43 = vadd.f32 %v7625_v7, %v11434_v54  ;;  %v7628_v30 = vadd.f32 %v7627_v57, %v7626_v44  ;;  %v11532_v7 = vld [vmem:[%s9300_s18 + $0x260] sm:$0xff] }
 0x55a   : >> { %v4119_v60 = vsel %vm4109_vm12, %v4070_v9, %v4072_v21  ;;  %v4116_v8 = vsel %vm4109_vm12, %v4062_v11, %v4064_v63  ;;  %v5068_v22 = vld [vmem:[#allocation3 + $0x1210] sm:$0xff]  ;;  %v5071_v34 = vld [vmem:[#allocation3 + $0x1228] sm:$0xff]  ;;  %v7629_v25 = vpop.f32.mrb[106].mxu1  ;;  %v11512_v63 = vld [vmem:[%s9300_s18 + $0x1f8] sm:$0xff] }
 0x55b   : >> { %v8370_v52 = vpack.c.bf16 %v5071_v34, %v5068_v22  ;;  %v8136_v31 = vpack.c.bf16 %v4119_v60, %v4116_v8  ;;  %v11515_v56 = vadd.f32 %v7628_v30, %v11439_v29  ;;  %v7630_v6 = vpop.f32.mrb[107].mxu1  ;;  %v11545_v30 = vld [vmem:[%s9300_s18 + $0x2c8] sm:$0xff] }
 0x55c   : >> { %6505 = vmatmul.mubr.f32.gmra.mrb[116].mxu1 %v11489_v16  ;;  %v7631_v47 = vadd.f32 %v7630_v6, %v7629_v25  ;;  %v7632_v35 = vpop.f32.mrb[108].mxu1  ;;  %v11553_v6 = vld [vmem:[%s9300_s18 + $0x2c0] sm:$0xff] }
 0x55d   : >> { %v4277_v33 = vpop.permute.xlu1 %4276  ;;  %v4269_v58 = vpop.permute.xlu0 %4268  ;;  %8371 = vmatprep.subr.bf16.mxu1 %v8370_v52  ;;  %6509 = vmatprep.mubr.f32.mxu1 %v11497_v12 }
 0x55e   : >> { %v4322_v21 = vsel %vm4310_vm4, %v10206_v5, %v4277_v33  ;;  %v4319_v54 = vsel %vm4310_vm4, %v10198_v14, %v4269_v58  ;;  %8373 = vmatpush3.bf16.msra.mxu1 %v8370_v52  ;;  %8137 = vmatpush1.bf16.msra.mxu0 %v8136_v31  ;;  %v7633_v5 = vpop.f32.mrb[109].mxu1  ;;  %v11525_v29 = vadd.f32 %v7631_v47, %v11446_v0 }
 0x55f   : >> { %4370 = vst.msk [vmem:[#allocation3 + $0x1258] sm:$0xff] %vm242_vm1, %v4322_v21  ;;  %4367 = vst.msk [vmem:[#allocation3 + $0x1240] sm:$0xff] %vm242_vm1, %v4319_v54  ;;  %v7634_v37 = vadd.f32 %v7633_v5, %v7632_v35  ;;  %v7635_v60 = vpop.f32.mrb[110].mxu1 }
 0x560   : >> { %6510 = vmatmul.mubr.f32.gmra.mrb[118].mxu1 %v11505_v17  ;;  %v7636_v34 = vpop.f32.mrb[111].mxu1 }
 0x561   : >> { %v4088_v20 = vpop.permute.xlu1 %4087  ;;  %v4080_v14 = vpop.permute.xlu0 %4079  ;;  %6514 = vmatprep.mubr.f32.mxu1 %v11512_v63  ;;  %v11535_v22 = vadd.f32 %v7634_v37, %v11451_v1  ;;  %v7637_v0 = vadd.f32 %v7636_v34, %v7635_v60  ;;  %v8609_v60 = vld [vmem:[%s9300_s18 + $0x60] sm:$0xff] }
 0x562   : >> { %v4126_v9 = vsel %vm4109_vm12, %v4088_v20, %v11375_v19  ;;  %v4123_v11 = vsel %vm4109_vm12, %v4080_v14, %v11364_v39  ;;  %v11540_v19 = vld [vmem:[%s9300_s18 + $0x258] sm:$0xff] }
 0x563   : >> { %v8138_v8 = vpack.c.bf16 %v4126_v9, %v4123_v11  ;;  %v11548_v25 = vadd.f32 %v7637_v0, %v11457_v61  ;;  %v11560_v61 = vld [vmem:[%s9300_s18 + $0x330] sm:$0xff] }
 0x564   : >> { %6515 = vmatmul.mubr.f32.gmra.mrb[120].mxu1 %v11522_v48 }
 0x565   : >> { %v4086_v44 = vpop.permute.xlu1 %4085  ;;  %v4078_v52 = vpop.permute.xlu0 %4077  ;;  %6519 = vmatprep.mubr.f32.mxu1 %v11532_v7  ;;  %8139 = vmatprep.subr.bf16.mxu0 %v8138_v8 }
 0x566   : >> { %v4125_v39 = vsel %vm4109_vm12, %v4086_v44, %v4088_v20  ;;  %v4122_v31 = vsel %vm4109_vm12, %v4078_v52, %v4080_v14  ;;  %v5074_v57 = vld [vmem:[#allocation3 + $0x1240] sm:$0xff]  ;;  %v5077_v1 = vld [vmem:[#allocation3 + $0x1258] sm:$0xff]  ;;  %v11567_v14 = vld [vmem:[%s9300_s18 + $0x328] sm:$0xff] }
 0x567   : >> { %v8374_v33 = vpack.c.bf16 %v5077_v1, %v5074_v57  ;;  %v8140_v58 = vpack.c.bf16 %v4125_v39, %v4122_v31  ;;  %v5092_v1 = vld [vmem:[#allocation3 + $0x12d0] sm:$0xff] }
 0x568   : >> { %6520 = vmatmul.mubr.f32.gmra.mrb[122].mxu1 %v11540_v19 }
 0x569   : >> { %v4293_v21 = vpop.permute.xlu1 %4292  ;;  %v4285_v54 = vpop.permute.xlu0 %4284  ;;  %8375 = vmatprep.subr.bf16.mxu1 %v8374_v33  ;;  %6524 = vmatprep.mubr.f32.mxu1 %v11545_v30 }
 0x56a   : >> { %v4328_v47 = vsel %vm4310_vm4, %v10236_v18, %v4293_v21  ;;  %v4325_v35 = vsel %vm4310_vm4, %v10224_v50, %v4285_v54  ;;  %8377 = vmatpush3.bf16.msra.mxu1 %v8374_v33  ;;  %8141 = vmatpush1.bf16.msra.mxu0 %v8140_v58  ;;  %v5095_v33 = vld [vmem:[#allocation3 + $0x12e8] sm:$0xff] }
 0x56b   : >> { %4376 = vst.msk [vmem:[#allocation3 + $0x1288] sm:$0xff] %vm242_vm1, %v4328_v47  ;;  %4373 = vst.msk [vmem:[#allocation3 + $0x1270] sm:$0xff] %vm242_vm1, %v4325_v35  ;;  %v8386_v54 = vpack.c.bf16 %v5095_v33, %v5092_v1  ;;  %v5101_v47 = vld [vmem:[#allocation3 + $0x1318] sm:$0xff] }
 0x56c   : >> { %6525 = vmatmul.mubr.f32.gmra.mrb[124].mxu1 %v11553_v6  ;;  %v5113_v35 = vld [vmem:[#allocation3 + $0x1378] sm:$0xff] }
 0x56d   : >> { %v4104_v5 = vpop.permute.xlu1 %4103  ;;  %v4096_v20 = vpop.permute.xlu0 %4095  ;;  %6529 = vmatprep.mubr.f32.mxu1 %v11560_v61 }
 0x56e   : >> { %v4132_v50 = vsel %vm4109_vm12, %v4104_v5, %v11418_v45  ;;  %v4129_v18 = vsel %vm4109_vm12, %v4096_v20, %v11410_v28 }
 0x56f   : >> { %v8142_v37 = vpack.c.bf16 %v4132_v50, %v4129_v18 }
 0x570   : >> { %6530 = vmatmul.mubr.f32.gmra.mrb[126].mxu1 %v11567_v14 }
 0x571   : >> { %v4102_v9 = vpop.permute.xlu1 %4101  ;;  %v4094_v11 = vpop.permute.xlu0 %4093  ;;  %8143 = vmatprep.subr.bf16.mxu0 %v8142_v37  ;;  %7750 = vmatprep.mubr.f32.mxu1 %v8609_v60 }
 0x572   : >> { %v4131_v8 = vsel %vm4109_vm12, %v4102_v9, %v4104_v5  ;;  %v4128_v34 = vsel %vm4109_vm12, %v4094_v11, %v4096_v20  ;;  %v5080_v0 = vld [vmem:[#allocation3 + $0x1270] sm:$0xff]  ;;  %v5083_v44 = vld [vmem:[#allocation3 + $0x1288] sm:$0xff]  ;;  %v8616_v5 = vld [vmem:[%s9300_s18 + $0x338] sm:$0xff] }
 0x573   : >> { %v8378_v52 = vpack.c.bf16 %v5083_v44, %v5080_v0  ;;  %v8144_v39 = vpack.c.bf16 %v4131_v8, %v4128_v34 }
 0x575   : >> { %v4309_v45 = vpop.permute.xlu1 %4308  ;;  %v4301_v31 = vpop.permute.xlu0 %4300  ;;  %8379 = vmatprep.subr.bf16.mxu1 %v8378_v52  ;;  %8145 = vmatpush1.bf16.msra.mxu0 %v8144_v39 }
 0x576   : >> { %v4334_v28 = vsel %vm4310_vm4, %v10266_v41, %v4309_v45  ;;  %v4331_v57 = vsel %vm4310_vm4, %v10254_v13, %v4301_v31  ;;  %8381 = vmatpush3.bf16.msra.mxu1 %v8378_v52  ;;  %v5098_v13 = vld [vmem:[#allocation3 + $0x1300] sm:$0xff] }
 0x577   : >> { %4382 = vst.msk [vmem:[#allocation3 + $0x12b8] sm:$0xff] %vm242_vm1, %v4334_v28  ;;  %4379 = vst.msk [vmem:[#allocation3 + $0x12a0] sm:$0xff] %vm242_vm1, %v4331_v57 }
 0x578   : >> { %5744 = vmatmul.mubr.f32.vlgmr.msra.gmra.mrb[0].mxu0 %v11454_v46  ;;  %v8390_v46 = vpack.c.bf16 %v5101_v47, %v5098_v13 }
 0x579   : >> { %5749 = vmatprep.mubr.f32.mxu0 %v11464_v36  ;;  %v5104_v36 = vld [vmem:[#allocation3 + $0x1330] sm:$0xff] }
 0x57c   : >> { %5750 = vmatmul.mubr.f32.gmra.mrb[2].mxu0 %v11474_v15  ;;  %v5107_v15 = vld [vmem:[#allocation3 + $0x1348] sm:$0xff] }
 0x57d   : >> { %5755 = vmatprep.mubr.f32.mxu0 %v11481_v53  ;;  %v8394_v53 = vpack.c.bf16 %v5107_v15, %v5104_v36 }
 0x57e   : >> { %v5086_v58 = vld [vmem:[#allocation3 + $0x12a0] sm:$0xff]  ;;  %v5089_v41 = vld [vmem:[#allocation3 + $0x12b8] sm:$0xff] }
 0x57f   : >> { %v8382_v21 = vpack.c.bf16 %v5089_v41, %v5086_v58 }
 0x580   : >> { %5756 = vmatmul.mubr.f32.gmra.mrb[4].mxu0 %v11489_v16  ;;  %v5110_v16 = vld [vmem:[#allocation3 + $0x1360] sm:$0xff] }
 0x581   : >> { %8383 = vmatprep.subr.bf16.mxu1 %v8382_v21  ;;  %5761 = vmatprep.mubr.f32.mxu0 %v11497_v12  ;;  %v8398_v12 = vpack.c.bf16 %v5113_v35, %v5110_v16 }
 0x582   : >> { %8385 = vmatpush3.bf16.msra.mxu1 %v8382_v21 }
 0x583   : >> { %8387 = vmatprep.subr.bf16.mxu1 %v8386_v54 }
 0x584   : >> { %5762 = vmatmul.mubr.f32.gmra.mrb[6].mxu0 %v11505_v17  ;;  %v8610_v17 = vld [vmem:[%s9300_s18 + $0xc8] sm:$0xff] }
 0x585   : >> { %5767 = vmatprep.mubr.f32.mxu0 %v11512_v63  ;;  %v8611_v63 = vld [vmem:[%s9300_s18 + $0x130] sm:$0xff] }
 0x586   : >> { %8389 = vmatpush3.bf16.msra.mxu1 %v8386_v54 }
 0x587   : >> { %8391 = vmatprep.subr.bf16.mxu1 %v8390_v46 }
 0x588   : >> { %5768 = vmatmul.mubr.f32.gmra.mrb[8].mxu0 %v11522_v48  ;;  %v8612_v48 = vld [vmem:[%s9300_s18 + $0x198] sm:$0xff] }
 0x589   : >> { %5773 = vmatprep.mubr.f32.mxu0 %v11532_v7  ;;  %v8613_v7 = vld [vmem:[%s9300_s18 + $0x200] sm:$0xff] }
 0x58a   : >> { %8393 = vmatpush3.bf16.msra.mxu1 %v8390_v46 }
 0x58b   : >> { %8395 = vmatprep.subr.bf16.mxu1 %v8394_v53 }
 0x58c   : >> { %5774 = vmatmul.mubr.f32.gmra.mrb[10].mxu0 %v11540_v19  ;;  %v8614_v19 = vld [vmem:[%s9300_s18 + $0x268] sm:$0xff] }
 0x58d   : >> { %5779 = vmatprep.mubr.f32.mxu0 %v11545_v30  ;;  %v8615_v30 = vld [vmem:[%s9300_s18 + $0x2d0] sm:$0xff]  ;;  %s8675_s18 = smov (!%p7351_p8), 42  }
 0x58e   : >> { %8397 = vmatpush3.bf16.msra.mxu1 %v8394_v53 }
 0x58f   : >> { %8399 = vmatprep.subr.bf16.mxu1 %v8398_v12 }
 0x590   : >> { %5780 = vmatmul.mubr.f32.gmra.mrb[12].mxu0 %v11553_v6 }
 0x591   : >> { %5785 = vmatprep.mubr.f32.mxu0 %v11560_v61 }
 0x592   : >> { %8401 = vmatpush3.bf16.msra.mxu1 %v8398_v12 }
 0x594   : >> { %5786 = vmatmul.mubr.f32.gmra.mrb[14].mxu0 %v11567_v14 }
 0x595   : >> { %7751 = vmatmul.mubr.f32.vlgmr.msra.gmra.mrb[128].mxu1 %v8610_v17 }
 0x596   : >> { %7753 = vmatprep.mubr.f32.mxu1 %v8611_v63 }
 0x599   : >> { %7754 = vmatmul.mubr.f32.gmra.mrb[130].mxu1 %v8612_v48  ;;  %v12311_v48 = vld [vmem:[#allocation15_spill] sm:$0xff] }
 0x59a   : >> { %7756 = vmatprep.mubr.f32.mxu1 %v8613_v7 }
 0x59d   : >> { %7757 = vmatmul.mubr.f32.gmra.mrb[132].mxu1 %v8614_v19  ;;  %v12313_v19 = vld [vmem:[#allocation7_spill] sm:$0xff] }
 0x59e   : >> { %7759 = vmatprep.mubr.f32.mxu1 %v8615_v30 }
 0x5a1   : >> { %7760 = vmatmul.mubr.f32.gmra.mrb[134].mxu1 %v8616_v5 }
 0x627   : >> { %v7670_v6 = vpop.f32.mrb[112].mxu1 }
 0x628   : >> { %v7671_v20 = vpop.f32.mrb[113].mxu1 }
 0x629   : >> { %v7672_v61 = vadd.f32 %v7671_v20, %v7670_v6  ;;  %v12315_v20 = vld [vmem:[#allocation17_spill] sm:$0xff] }
 0x62b   : >> { %v7673_v50 = vpop.f32.mrb[114].mxu1  ;;  %v11606_v14 = vadd.f32 %v7672_v61, %v11469_v10  ;;  %v12316_v61 = vld [vmem:[#allocation18_spill] sm:$0xff] }
 0x62c   : >> { %v7674_v18 = vpop.f32.mrb[115].mxu1 }
 0x62d   : >> { %v7675_v37 = vadd.f32 %v7674_v18, %v7673_v50 }
 0x62f   : >> { %v7676_v9 = vpop.f32.mrb[116].mxu1  ;;  %v11609_v11 = vadd.f32 %v7675_v37, %v11484_v32  ;;  %v12317_v37 = vld [vmem:[#allocation9_spill] sm:$0xff] }
 0x630   : >> { %v7677_v60 = vpop.f32.mrb[117].mxu1 }
 0x631   : >> { %v7678_v8 = vadd.f32 %v7677_v60, %v7676_v9 }
 0x633   : >> { %v7679_v34 = vpop.f32.mrb[118].mxu1  ;;  %v11612_v0 = vadd.f32 %v7678_v8, %v11492_v4  ;;  %v12318_v8 = vld [vmem:[#allocation10_spill] sm:$0xff] }
 0x634   : >> { %v7680_v44 = vpop.f32.mrb[119].mxu1 }
 0x635   : >> { %v7681_v52 = vadd.f32 %v7680_v44, %v7679_v34  ;;  %v12319_v44 = vld [vmem:[#allocation19_spill] sm:$0xff] }
 0x637   : >> { %v7682_v39 = vpop.f32.mrb[120].mxu1  ;;  %v11615_v45 = vadd.f32 %v7681_v52, %v11500_v43 }
 0x638   : >> { %v7683_v10 = vpop.f32.mrb[121].mxu1 }
 0x639   : >> { %v7684_v31 = vadd.f32 %v7683_v10, %v7682_v39  ;;  %v12320_v39 = vld [vmem:[#allocation20_spill] sm:$0xff] }
 0x63b   : >> { %v7685_v28 = vpop.f32.mrb[122].mxu1  ;;  %v11618_v57 = vadd.f32 %v7684_v31, %v11515_v56 }
 0x63c   : >> { %v7686_v32 = vpop.f32.mrb[123].mxu1 }
 0x63d   : >> { %v7687_v1 = vadd.f32 %v7686_v32, %v7685_v28  ;;  %v12321_v28 = vld [vmem:[#allocation11_spill] sm:$0xff] }
 0x63f   : >> { %v7688_v33 = vpop.f32.mrb[124].mxu1  ;;  %v11621_v4 = vadd.f32 %v7687_v1, %v11525_v29 }
 0x640   : >> { %v7689_v58 = vpop.f32.mrb[125].mxu1 }
 0x641   : >> { %v7690_v41 = vadd.f32 %v7689_v58, %v7688_v33  ;;  %v12322_v33 = vld [vmem:[#allocation12_spill] sm:$0xff] }
 0x643   : >> { %v7691_v21 = vpop.f32.mrb[126].mxu1  ;;  %v11624_v43 = vadd.f32 %v7690_v41, %v11535_v22  ;;  %v12323_v41 = vld [vmem:[#allocation21_spill] sm:$0xff] }
 0x644   : >> { %v7692_v54 = vpop.f32.mrb[127].mxu1 }
 0x645   : >> { %v7693_v13 = vadd.f32 %v7692_v54, %v7691_v21  ;;  %v12324_v54 = vld [vmem:[#allocation22_spill] sm:$0xff] }
 0x647   : >> { %v11627_v47 = vadd.f32 %v7693_v13, %v11548_v25 }
 0x64b   : >> { %v5745_v56 = vpop.f32.mrb[0].mxu0 }
 0x64c   : >> { %v8402_v46 = vadd.f32 %v5745_v56, %v11123_v23  ;;  %v5747_v36 = vpop.f32.mrb[1].mxu0 }
 0x64d   : >> { %v8404_v29 = vadd.f32 %v5747_v36, %v11125_v51  ;;  %v12325_v36 = vld [vmem:[#allocation13_spill] sm:$0xff] }
 0x64e   : >> { %v11636_v22 = vadd.f32 %v8402_v46, %v11193_v40 }
 0x64f   : >> { %v11639_v15 = vadd.f32 %v8404_v29, %v11199_v26  ;;  %v5751_v25 = vpop.f32.mrb[2].mxu0 }
 0x650   : >> { %6643 = vst [vmem:[%s11632_s17] sm:$0xff] %v11636_v22  ;;  %v8406_v23 = vadd.f32 %v5751_v25, %v11129_v62  ;;  %v5753_v53 = vpop.f32.mrb[3].mxu0 }
 0x651   : >> { %6644 = vst [vmem:[%s11632_s17 + $0x8] sm:$0xff] %v11639_v15  ;;  %v8408_v16 = vadd.f32 %v5753_v53, %v11135_v2 }
 0x652   : >> { %v11648_v51 = vadd.f32 %v8406_v23, %v11203_v38 }
 0x653   : >> { %v11651_v40 = vadd.f32 %v8408_v16, %v11205_v49  ;;  %v5757_v26 = vpop.f32.mrb[4].mxu0  ;;  %v12326_v16 = vld [vmem:[#allocation14_spill] sm:$0xff] }
 0x654   : >> { %6646 = vst [vmem:[%s11632_s17 + $0x18] sm:$0xff] %v11648_v51  ;;  %v8410_v35 = vadd.f32 %v5757_v26, %v11138_v24  ;;  %v5759_v12 = vpop.f32.mrb[5].mxu0 }
 0x655   : >> { %6647 = vst [vmem:[%s11632_s17 + $0x20] sm:$0xff] %v11651_v40  ;;  %v8412_v62 = vadd.f32 %v5759_v12, %v11144_v59  ;;  %v12327_v12 = vld [vmem:[#allocation23_spill] sm:$0xff] }
 0x656   : >> { %v11660_v2 = vadd.f32 %v8410_v35, %v11209_v42  ;;  %v12312_v42 = vld [vmem:[#allocation16_spill] sm:$0xff] }
 0x657   : >> { %v11663_v38 = vadd.f32 %v8412_v62, %v11213_v3  ;;  %v5763_v49 = vpop.f32.mrb[6].mxu0 }
 0x658   : >> { %6649 = vst [vmem:[%s11632_s17 + $0x30] sm:$0xff] %v11660_v2  ;;  %v8414_v17 = vadd.f32 %v5763_v49, %v11150_v27  ;;  %v5765_v63 = vpop.f32.mrb[7].mxu0  ;;  %v12314_v27 = vld [vmem:[#allocation8_spill] sm:$0xff] }
 0x659   : >> { %6650 = vst [vmem:[%s11632_s17 + $0x38] sm:$0xff] %v11663_v38  ;;  %v8416_v24 = vadd.f32 %v5765_v63, %v11152_v55  ;;  %v12328_v49 = vld [vmem:[#allocation24_spill] sm:$0xff] }
 0x65a   : >> { %v11672_v59 = vadd.f32 %v8414_v17, %v12311_v48 }
 0x65b   : >> { %v11675_v7 = vadd.f32 %v8416_v24, %v12312_v42  ;;  %v5769_v3 = vpop.f32.mrb[8].mxu0 }
 0x65c   : >> { %6652 = vst [vmem:[%s11632_s17 + $0x48] sm:$0xff] %v11672_v59  ;;  %v8418_v30 = vadd.f32 %v5769_v3, %v12313_v19  ;;  %v5771_v5 = vpop.f32.mrb[9].mxu0 }
 0x65d   : >> { %6653 = vst [vmem:[%s11632_s17 + $0x50] sm:$0xff] %v11675_v7  ;;  %v8420_v6 = vadd.f32 %v5771_v5, %v12314_v27 }
 0x65e   : >> { %v11684_v55 = vadd.f32 %v8418_v30, %v12315_v20 }
 0x65f   : >> { %v11687_v50 = vadd.f32 %v8420_v6, %v12316_v61  ;;  %v5775_v18 = vpop.f32.mrb[10].mxu0  ;;  %v6671_v6 = vmax.f32 (!%p7351_p8), %v11636_v22, 0.0 }
 0x660   : >> { %6655 = vst [vmem:[%s11632_s17 + $0x60] sm:$0xff] %v11684_v55  ;;  %v8422_v9 = vadd.f32 %v5775_v18, %v12317_v37  ;;  %v5777_v60 = vpop.f32.mrb[11].mxu0  ;;  %v6674_v37 = vmax.f32 (!%p7351_p8), %v11648_v51, 0.0  ;;  %v6675_v51 = vmax.f32 (!%p7351_p8), %v11651_v40, 0.0 }
 0x661   : >> { %6656 = vst [vmem:[%s11632_s17 + $0x68] sm:$0xff] %v11687_v50  ;;  %v8424_v34 = vadd.f32 %v5777_v60, %v12318_v8 }
 0x662   : >> { %v11696_v52 = vadd.f32 %v8422_v9, %v12319_v44  ;;  %v6672_v9 = vmax.f32 (!%p7351_p8), %v11639_v15, 0.0 }
 0x663   : >> { %v11699_v10 = vadd.f32 %v8424_v34, %v12320_v39  ;;  %v5781_v31 = vpop.f32.mrb[12].mxu0 }
 0x664   : >> { %6658 = vst [vmem:[%s11632_s17 + $0x78] sm:$0xff] %v11696_v52  ;;  %v8426_v32 = vadd.f32 %v5781_v31, %v12321_v28  ;;  %v5783_v1 = vpop.f32.mrb[13].mxu0  ;;  %v6678_v28 = vmax.f32 (!%p7351_p8), %v11663_v38, 0.0 }
 0x665   : >> { %6659 = vst [vmem:[%s11632_s17 + $0x80] sm:$0xff] %v11699_v10  ;;  %v8428_v58 = vadd.f32 %v5783_v1, %v12322_v33  ;;  %v6680_v33 = vmax.f32 (!%p7351_p8), %v11672_v59, 0.0 }
 0x666   : >> { %v11708_v21 = vadd.f32 %v8426_v32, %v12323_v41  ;;  %v6677_v32 = vmax.f32 (!%p7351_p8), %v11660_v2, 0.0 }
 0x667   : >> { %v11711_v13 = vadd.f32 %v8428_v58, %v12324_v54  ;;  %v5787_v56 = vpop.f32.mrb[14].mxu0  ;;  %v6681_v54 = vmax.f32 (!%p7351_p8), %v11675_v7, 0.0 }
 0x668   : >> { %v7752_v46 = vpop.f32.mrb[128].mxu1  ;;  %6661 = vst [vmem:[%s11632_s17 + $0x90] sm:$0xff] %v11708_v21  ;;  %v8430_v29 = vadd.f32 %v5787_v56, %v12325_v36  ;;  %v5789_v25 = vpop.f32.mrb[15].mxu0  ;;  %v6683_v36 = vmax.f32 (!%p7351_p8), %v11684_v55, 0.0 }
 0x669   : >> { %v6607_v23 = vadd.f32 %v7752_v46, %v11609_v11  ;;  %v6601_v53 = vpop.f32.mrb[129].mxu1  ;;  %6662 = vst [vmem:[%s11632_s17 + $0x98] sm:$0xff] %v11711_v13  ;;  %v8432_v26 = vadd.f32 %v5789_v25, %v12326_v16  ;;  %v6684_v46 = vmax.f32 (!%p7351_p8), %v11687_v50, 0.0  ;;  %v6686_v25 = vmax.f32 (!%p7351_p8), %v11696_v52, 0.0 }
 0x66a   : >> { %v6602_v35 = vadd.f32 %v6601_v53, %v11606_v14  ;;  %v11722_v62 = vadd.f32 %v8430_v29, %v12327_v12  ;;  %v6687_v16 = vmax.f32 (!%p7351_p8), %v11699_v10, 0.0  ;;  %v6689_v12 = vmax.f32 (!%p7351_p8), %v11708_v21, 0.0 }
 0x66b   : >> { %6648 = vst.msk [vmem:[%s11632_s17 + $0x28] sm:$0xff] %vm242_vm1, %v6607_v23  ;;  %v11727_v17 = vadd.f32 %v8432_v26, %v12328_v49  ;;  %v6676_v39 = vmax.f32 (!%p7351_p8), %v6607_v23, 0.0 }
 0x66c   : >> { %6645 = vst.msk [vmem:[%s11632_s17 + $0x10] sm:$0xff] %vm242_vm1, %v6602_v35  ;;  %v7755_v11 = vpop.f32.mrb[130].mxu1  ;;  %6664 = vst [vmem:[%s11632_s17 + $0xa8] sm:$0xff] %v11722_v62 }
 0x66d   : >> { %v6617_v63 = vadd.f32 %v7755_v11, %v11615_v45  ;;  %v6611_v24 = vpop.f32.mrb[131].mxu1  ;;  %6665 = vst [vmem:[%s11632_s17 + $0xb0] sm:$0xff] %v11727_v17  ;;  %v6692_v11 = vmax.f32 (!%p7351_p8), %v11722_v62, 0.0 }
 0x66e   : >> { %v6612_v14 = vadd.f32 %v6611_v24, %v11612_v0 }
 0x66f   : >> { %6654 = vst.msk [vmem:[%s11632_s17 + $0x58] sm:$0xff] %vm242_vm1, %v6617_v63  ;;  %v6682_v2 = vmax.f32 (!%p7351_p8), %v6617_v63, 0.0 }
 0x670   : >> { %6651 = vst.msk [vmem:[%s11632_s17 + $0x40] sm:$0xff] %vm242_vm1, %v6612_v14  ;;  %v7758_v48 = vpop.f32.mrb[132].mxu1  ;;  %v6679_v58 = vmax.f32 (!%p7351_p8), %v6612_v14, 0.0  ;;  %v6693_v14 = vmax.f32 (!%p7351_p8), %v11727_v17, 0.0 }
 0x671   : >> { %v11742_v42 = vadd.f32 %v7758_v48, %v11621_v4  ;;  %v6621_v3 = vpop.f32.mrb[133].mxu1  ;;  %v12329_v4 = vld [vmem:[#allocation6_spill] sm:$0xff] (!%p7351_p8) }
 0x672   : >> { %v11745_v19 = vadd.f32 %v6621_v3, %v11618_v57  ;;  %6670 = sbr.rel (%p7351_p8) target bundleno = 1820 (0x71c), region = 43  ;;  %v6673_v57 = vmax.f32 (!%p7351_p8), %v6602_v35, 0.0  ;;  %v6706_v27 = vsub.s32 (!%p7351_p8), 2, %v12329_v4  ;;  %v6702_v20 = vsub.s32 (!%p7351_p8), 1, %v12329_v4 }
 0x673   : >> { %6660 = vst.msk [vmem:[%s11632_s17 + $0x88] sm:$0xff] %vm242_vm1, %v11742_v42  ;;  %v6688_v53 = vmax.f32 (!%p7351_p8), %v11742_v42, 0.0  ;;  %v6690_v35 = vmax.f32 (!%p7351_p8), %v11711_v13, 0.0 }
 0x674   : >> { %6657 = vst.msk [vmem:[%s11632_s17 + $0x70] sm:$0xff] %vm242_vm1, %v11745_v19  ;;  %v7761_v45 = vpop.f32.mrb[134].mxu1  ;;  %v6685_v23 = vmax.f32 (!%p7351_p8), %v11745_v19, 0.0 }
 0x675   : >> { %v11754_v0 = vadd.f32 %v7761_v45, %v11627_v47  ;;  %v6631_v30 = vpop.f32.mrb[135].mxu1  ;;  %v6698_v47 = vsub.s32 (!%p7351_p8), 0, %v12329_v4 }
 0x676   : >> { %v11757_v5 = vadd.f32 %v6631_v30, %v11624_v43  ;;  %v12330_v43 = vld [vmem:[#allocation5_spill] sm:$0xff] (!%p7351_p8) }
 0x677   : >> { %6666 = vst.msk [vmem:[%s11632_s17 + $0xb8] sm:$0xff] %vm242_vm1, %v11754_v0  ;;  %v11771_v61 = vrot.slane (!%p7351_p8), %v12330_v43, %v6706_v27  ;;  %v11774_v18 = vrot.slane (!%p7351_p8), %v12330_v43, %v6698_v47  ;;  %v11779_v60 = vrot.slane (!%p7351_p8), %v12330_v43, %v6702_v20  ;;  %v6694_v24 = vmax.f32 (!%p7351_p8), %v11754_v0, 0.0 }
 0x678   : >> { %6663 = vst.msk [vmem:[%s11632_s17 + $0xa0] sm:$0xff] %vm242_vm1, %v11757_v5  ;;  %v6691_v63 = vmax.f32 (!%p7351_p8), %v11757_v5, 0.0 }
 0x679   : >> { %v6713_v8 = vmul.f32 %v11771_v61, %v6673_v57  ;;  %v6711_v22 = vmul.f32 %v11774_v18, %v6671_v6  ;;  %v6714_v34 = vmul.f32 %v11774_v18, %v6674_v37  ;;  %v6712_v44 = vmul.f32 %v11779_v60, %v6672_v9 }
 0x67a   : >> { %v6716_v15 = vmul.f32 %v11771_v61, %v6676_v39  ;;  %v6715_v31 = vmul.f32 %v11779_v60, %v6675_v51  ;;  %v6718_v1 = vmul.f32 %v11779_v60, %v6678_v28  ;;  %v6717_v40 = vmul.f32 %v11774_v18, %v6677_v32 }
 0x67b   : >> { %6763 = vrot.lane.b32.xlu1 %v6713_v8, %s8675_s18  ;;  %6759 = vrot.lane.b32.xlu0 %v6711_v22, %s8675_s18  ;;  %v6720_v41 = vmul.f32 %v11774_v18, %v6680_v33  ;;  %v6719_v38 = vmul.f32 %v11771_v61, %v6679_v58  ;;  %v6722_v56 = vmul.f32 %v11771_v61, %v6682_v2 }
 0x67c   : >> { %v6721_v59 = vmul.f32 %v11779_v60, %v6681_v54  ;;  %v6724_v29 = vmul.f32 %v11779_v60, %v6684_v46  ;;  %v6723_v7 = vmul.f32 %v11774_v18, %v6683_v36  ;;  %v6726_v50 = vmul.f32 %v11774_v18, %v6686_v25 }
 0x67d   : >> { %v6725_v55 = vmul.f32 %v11771_v61, %v6685_v23  ;;  %v6728_v52 = vmul.f32 %v11771_v61, %v6688_v53  ;;  %v6727_v26 = vmul.f32 %v11779_v60, %v6687_v16  ;;  %v6730_v49 = vmul.f32 %v11779_v60, %v6690_v35 }
 0x67e   : >> { %v6729_v10 = vmul.f32 %v11774_v18, %v6689_v12  ;;  %v6732_v13 = vmul.f32 %v11774_v18, %v6692_v11  ;;  %v6731_v21 = vmul.f32 %v11771_v61, %v6691_v63  ;;  %v6734_v62 = vmul.f32 %v11771_v61, %v6694_v24 }
 0x67f   : >> { %6765 = vrot.lane.b32.xlu1 %v6714_v34, %s8675_s18  ;;  %6761 = vrot.lane.b32.xlu0 %v6712_v44, %s8675_s18  ;;  %v6733_v48 = vmul.f32 %v11779_v60, %v6693_v14 }
 0x683   : >> { %6769 = vrot.lane.b32.xlu1 %v6716_v15, %s8675_s18  ;;  %6767 = vrot.lane.b32.xlu0 %v6715_v31, %s8675_s18 }
 0x687   : >> { %6773 = vrot.lane.b32.xlu1 %v6718_v1, %s8675_s18  ;;  %6771 = vrot.lane.b32.xlu0 %v6717_v40, %s8675_s18 }
 0x68b   : >> { %6777 = vrot.lane.b32.xlu1 %v6720_v41, %s8675_s18  ;;  %6775 = vrot.lane.b32.xlu0 %v6719_v38, %s8675_s18 }
 0x68f   : >> { %6781 = vrot.lane.b32.xlu1 %v6722_v56, %s8675_s18  ;;  %6779 = vrot.lane.b32.xlu0 %v6721_v59, %s8675_s18 }
 0x693   : >> { %6785 = vrot.lane.b32.xlu1 %v6724_v29, %s8675_s18  ;;  %6783 = vrot.lane.b32.xlu0 %v6723_v7, %s8675_s18 }
 0x697   : >> { %6789 = vrot.lane.b32.xlu1 %v6726_v50, %s8675_s18  ;;  %6787 = vrot.lane.b32.xlu0 %v6725_v55, %s8675_s18 }
 0x69b   : >> { %6793 = vrot.lane.b32.xlu1 %v6728_v52, %s8675_s18  ;;  %6791 = vrot.lane.b32.xlu0 %v6727_v26, %s8675_s18 }
 0x69f   : >> { %6797 = vrot.lane.b32.xlu1 %v6730_v49, %s8675_s18  ;;  %6795 = vrot.lane.b32.xlu0 %v6729_v10, %s8675_s18 }
 0x6a3   : >> { %6801 = vrot.lane.b32.xlu1 %v6732_v13, %s8675_s18  ;;  %6799 = vrot.lane.b32.xlu0 %v6731_v21, %s8675_s18 }
 0x6a7   : >> { %6805 = vrot.lane.b32.xlu1 %v6734_v62, %s8675_s18  ;;  %6803 = vrot.lane.b32.xlu0 %v6733_v48, %s8675_s18 }
 0x6ed   : >> { %v6764_v42 = vpop.permute.xlu1 %6763  ;;  %v6760_v3 = vpop.permute.xlu0 %6759 }
 0x6ee   : >> { %6849 = vst.msk [vmem:[#allocation2] sm:$0xff] %vm6848_vm13, %v6760_v3 }
 0x6f1   : >> { %v6766_v19 = vpop.permute.xlu1 %6765  ;;  %v6762_v17 = vpop.permute.xlu0 %6761 }
 0x6f2   : >> { %6852 = vst.msk [vmem:[#allocation2 + $0x20] sm:$0xff] %vm6848_vm13, %v6766_v19  ;;  %v6808_v45 = vsel %vm6807_vm14, %v6760_v3, %v6762_v17  ;;  %v6809_v0 = vsel %vm6807_vm14, %v6762_v17, %v6764_v42 }
 0x6f3   : >> { %6850 = vst [vmem:[#allocation2 + $0x8] sm:$0xff] %v6808_v45  ;;  %6851 = vst.msk [vmem:[#allocation2 + $0x10] sm:$0xff] %vm1382_vm10, %v6809_v0 }
 0x6f5   : >> { %v6770_v30 = vpop.permute.xlu1 %6769  ;;  %v6768_v5 = vpop.permute.xlu0 %6767 }
 0x6f6   : >> { %v6810_v57 = vsel %vm6807_vm14, %v6766_v19, %v6768_v5  ;;  %v6811_v27 = vsel %vm6807_vm14, %v6768_v5, %v6770_v30 }
 0x6f7   : >> { %6853 = vst [vmem:[#allocation2 + $0x28] sm:$0xff] %v6810_v57  ;;  %6854 = vst.msk [vmem:[#allocation2 + $0x30] sm:$0xff] %vm1382_vm10, %v6811_v27 }
 0x6f9   : >> { %v6774_v6 = vpop.permute.xlu1 %6773  ;;  %v6772_v47 = vpop.permute.xlu0 %6771 }
 0x6fa   : >> { %v6812_v20 = vsel %vm6807_vm14, %v6772_v47, %v6774_v6  ;;  %6855 = vst.msk [vmem:[#allocation2 + $0x40] sm:$0xff] %vm6848_vm13, %v6772_v47 }
 0x6fb   : >> { %6856 = vst [vmem:[#allocation2 + $0x48] sm:$0xff] %v6812_v20 }
 0x6fd   : >> { %v6778_v61 = vpop.permute.xlu1 %6777  ;;  %v6776_v18 = vpop.permute.xlu0 %6775 }
 0x6fe   : >> { %6858 = vst.msk [vmem:[#allocation2 + $0x60] sm:$0xff] %vm6848_vm13, %v6778_v61  ;;  %v6813_v37 = vsel %vm6807_vm14, %v6774_v6, %v6776_v18 }
 0x6ff   : >> { %6857 = vst.msk [vmem:[#allocation2 + $0x50] sm:$0xff] %vm1382_vm10, %v6813_v37 }
 0x701   : >> { %v6782_v9 = vpop.permute.xlu1 %6781  ;;  %v6780_v60 = vpop.permute.xlu0 %6779 }
 0x702   : >> { %v6814_v8 = vsel %vm6807_vm14, %v6778_v61, %v6780_v60  ;;  %v6815_v22 = vsel %vm6807_vm14, %v6780_v60, %v6782_v9 }
 0x703   : >> { %6859 = vst [vmem:[#allocation2 + $0x68] sm:$0xff] %v6814_v8  ;;  %6860 = vst.msk [vmem:[#allocation2 + $0x70] sm:$0xff] %vm1382_vm10, %v6815_v22 }
 0x705   : >> { %v6786_v34 = vpop.permute.xlu1 %6785  ;;  %v6784_v44 = vpop.permute.xlu0 %6783 }
 0x706   : >> { %v6816_v39 = vsel %vm6807_vm14, %v6784_v44, %v6786_v34  ;;  %6861 = vst.msk [vmem:[#allocation2 + $0x80] sm:$0xff] %vm6848_vm13, %v6784_v44 }
 0x707   : >> { %6862 = vst [vmem:[#allocation2 + $0x88] sm:$0xff] %v6816_v39 }
 0x709   : >> { %v6790_v51 = vpop.permute.xlu1 %6789  ;;  %v6788_v15 = vpop.permute.xlu0 %6787 }
 0x70a   : >> { %6864 = vst.msk [vmem:[#allocation2 + $0xa0] sm:$0xff] %vm6848_vm13, %v6790_v51  ;;  %v6817_v31 = vsel %vm6807_vm14, %v6786_v34, %v6788_v15 }
 0x70b   : >> { %6863 = vst.msk [vmem:[#allocation2 + $0x90] sm:$0xff] %vm1382_vm10, %v6817_v31 }
 0x70d   : >> { %v6794_v28 = vpop.permute.xlu1 %6793  ;;  %v6792_v32 = vpop.permute.xlu0 %6791 }
 0x70e   : >> { %v6818_v1 = vsel %vm6807_vm14, %v6790_v51, %v6792_v32  ;;  %v6819_v40 = vsel %vm6807_vm14, %v6792_v32, %v6794_v28 }
 0x70f   : >> { %6865 = vst [vmem:[#allocation2 + $0xa8] sm:$0xff] %v6818_v1  ;;  %6866 = vst.msk [vmem:[#allocation2 + $0xb0] sm:$0xff] %vm1382_vm10, %v6819_v40 }
 0x711   : >> { %v6798_v33 = vpop.permute.xlu1 %6797  ;;  %v6796_v58 = vpop.permute.xlu0 %6795 }
 0x712   : >> { %v6820_v41 = vsel %vm6807_vm14, %v6796_v58, %v6798_v33  ;;  %6867 = vst.msk [vmem:[#allocation2 + $0xc0] sm:$0xff] %vm6848_vm13, %v6796_v58 }
 0x713   : >> { %6868 = vst [vmem:[#allocation2 + $0xc8] sm:$0xff] %v6820_v41 }
 0x715   : >> { %v6802_v38 = vpop.permute.xlu1 %6801  ;;  %v6800_v2 = vpop.permute.xlu0 %6799 }
 0x716   : >> { %6870 = vst.msk [vmem:[#allocation2 + $0xe0] sm:$0xff] %vm6848_vm13, %v6802_v38  ;;  %v6821_v54 = vsel %vm6807_vm14, %v6798_v33, %v6800_v2 }
 0x717   : >> { %6869 = vst.msk [vmem:[#allocation2 + $0xd0] sm:$0xff] %vm1382_vm10, %v6821_v54 }
 0x719   : >> { %v6806_v56 = vpop.permute.xlu1 %6805  ;;  %v6804_v59 = vpop.permute.xlu0 %6803 }
 0x71a   : >> { %v6822_v46 = vsel %vm6807_vm14, %v6802_v38, %v6804_v59  ;;  %v6823_v36 = vsel %vm6807_vm14, %v6804_v59, %v6806_v56 }
 0x71b   : >> { %6871 = vst [vmem:[#allocation2 + $0xe8] sm:$0xff] %v6822_v46  ;;  %6872 = vst.msk [vmem:[#allocation2 + $0xf0] sm:$0xff] %vm1382_vm10, %v6823_v36 }
 0x71c PF: >> { %s271_s4 = sadd.s32 1, %s8647_s4  }
 0x71d   : >> { %p268_p9 = scmp.ge.s32.totalorder %s271_s4, 8  }
 0x71f   : > { %270 = sbr.rel (!%p268_p9) target bundleno = 49 (0x31), region = 98 }
 0x726   : > { %6879 = sbr.rel (!%p8718_p4) target bundleno = 1930 (0x78a), region = 47  ;;  %v6895_v29 = vld [vmem:[%s8756_s30] sm:$0xff] (%p8718_p4)  ;;  %v6897_v7 = vld [vmem:[%s8756_s30 + $0x8] sm:$0xff] (%p8718_p4)  ;;  %v6899_v25 = vld [vmem:[%s8756_s30 + $0x10] sm:$0xff] (%p8718_p4) }
 0x727   : > { %s8499_s21 = smul.u32 (%p8718_p4), 192, %s8707_s15  ;;  %v6901_v23 = vld [vmem:[%s8756_s30 + $0x18] sm:$0xff] (%p8718_p4)  ;;  %v6903_v50 = vld [vmem:[%s8756_s30 + $0x20] sm:$0xff] (%p8718_p4)  ;;  %v6905_v4 = vld [vmem:[%s8756_s30 + $0x28] sm:$0xff] (%p8718_p4) }
 0x728   : > { %v6907_v43 = vld [vmem:[%s8756_s30 + $0x30] sm:$0xff] (%p8718_p4)  ;;  %v6909_v55 = vld [vmem:[%s8756_s30 + $0x38] sm:$0xff] (%p8718_p4)  ;;  %v6911_v53 = vld [vmem:[%s8756_s30 + $0x40] sm:$0xff] (%p8718_p4) }
 0x729   : > { %s11893_s22 = scalar_lea.vmem (%p8718_p4), %s12286_s3, %s8499_s21  ;;  %v6913_v16 = vld [vmem:[%s8756_s30 + $0x48] sm:$0xff] (%p8718_p4)  ;;  %v6915_v52 = vld [vmem:[%s8756_s30 + $0x50] sm:$0xff] (%p8718_p4)  ;;  %v6917_v26 = vld [vmem:[%s8756_s30 + $0x58] sm:$0xff] (%p8718_p4) }
 0x72a   : > { %6896 = vst [vmem:[%s11893_s22] sm:$0xff] (%p8718_p4), %v6895_v29  ;;  %6898 = vst [vmem:[%s11893_s22 + $0x8] sm:$0xff] (%p8718_p4), %v6897_v7  ;;  %v6919_v35 = vld [vmem:[%s8756_s30 + $0x60] sm:$0xff] (%p8718_p4)  ;;  %v6921_v12 = vld [vmem:[%s8756_s30 + $0x68] sm:$0xff] (%p8718_p4) }
 0x72b   : > { %6900 = vst [vmem:[%s11893_s22 + $0x10] sm:$0xff] (%p8718_p4), %v6899_v25  ;;  %6902 = vst [vmem:[%s11893_s22 + $0x18] sm:$0xff] (%p8718_p4), %v6901_v23  ;;  %v6923_v49 = vld [vmem:[%s8756_s30 + $0x70] sm:$0xff] (%p8718_p4)  ;;  %v6925_v10 = vld [vmem:[%s8756_s30 + $0x78] sm:$0xff] (%p8718_p4) }
 0x72c   : > { %6904 = vst [vmem:[%s11893_s22 + $0x20] sm:$0xff] (%p8718_p4), %v6903_v50  ;;  %6906 = vst [vmem:[%s11893_s22 + $0x28] sm:$0xff] (%p8718_p4), %v6905_v4  ;;  %v6927_v11 = vld [vmem:[%s8756_s30 + $0x80] sm:$0xff] (%p8718_p4)  ;;  %v6929_v63 = vld [vmem:[%s8756_s30 + $0x88] sm:$0xff] (%p8718_p4) }
 0x72d   : > { %6908 = vst [vmem:[%s11893_s22 + $0x30] sm:$0xff] %v6907_v43  ;;  %6910 = vst [vmem:[%s11893_s22 + $0x38] sm:$0xff] %v6909_v55  ;;  %v6931_v13 = vld [vmem:[%s8756_s30 + $0x90] sm:$0xff]  ;;  %v6933_v21 = vld [vmem:[%s8756_s30 + $0x98] sm:$0xff] }
 0x72e   : > { %6912 = vst [vmem:[%s11893_s22 + $0x40] sm:$0xff] %v6911_v53  ;;  %6914 = vst [vmem:[%s11893_s22 + $0x48] sm:$0xff] %v6913_v16  ;;  %v6935_v24 = vld [vmem:[%s8756_s30 + $0xa0] sm:$0xff]  ;;  %v6937_v14 = vld [vmem:[%s8756_s30 + $0xa8] sm:$0xff] }
 0x72f   : > { %6916 = vst [vmem:[%s11893_s22 + $0x50] sm:$0xff] %v6915_v52  ;;  %6918 = vst [vmem:[%s11893_s22 + $0x58] sm:$0xff] %v6917_v26  ;;  %v6939_v62 = vld [vmem:[%s8756_s30 + $0xb0] sm:$0xff]  ;;  %v6941_v48 = vld [vmem:[%s8756_s30 + $0xb8] sm:$0xff] }
 0x730   : > { %6920 = vst [vmem:[%s11893_s22 + $0x60] sm:$0xff] %v6919_v35  ;;  %6922 = vst [vmem:[%s11893_s22 + $0x68] sm:$0xff] %v6921_v12  ;;  %v6943_v42 = vld [vmem:[%s8756_s30 + $0xc0] sm:$0xff]  ;;  %v6945_v3 = vld [vmem:[%s8756_s30 + $0xc8] sm:$0xff] }
 0x731   : > { %6924 = vst [vmem:[%s11893_s22 + $0x70] sm:$0xff] %v6923_v49  ;;  %6926 = vst [vmem:[%s11893_s22 + $0x78] sm:$0xff] %v6925_v10  ;;  %v6947_v19 = vld [vmem:[%s8756_s30 + $0xd0] sm:$0xff]  ;;  %v6949_v17 = vld [vmem:[%s8756_s30 + $0xd8] sm:$0xff] }
 0x732   : > { %6928 = vst [vmem:[%s11893_s22 + $0x80] sm:$0xff] %v6927_v11  ;;  %6930 = vst [vmem:[%s11893_s22 + $0x88] sm:$0xff] %v6929_v63  ;;  %v6951_v45 = vld [vmem:[%s8756_s30 + $0xe0] sm:$0xff]  ;;  %v6953_v0 = vld [vmem:[%s8756_s30 + $0xe8] sm:$0xff] }
 0x733   : > { %6932 = vst [vmem:[%s11893_s22 + $0x90] sm:$0xff] %v6931_v13  ;;  %6934 = vst [vmem:[%s11893_s22 + $0x98] sm:$0xff] %v6933_v21  ;;  %v6955_v30 = vld [vmem:[%s8756_s30 + $0xf0] sm:$0xff]  ;;  %v6957_v5 = vld [vmem:[%s8756_s30 + $0xf8] sm:$0xff] }
 0x734   : > { %6936 = vst [vmem:[%s11893_s22 + $0xa0] sm:$0xff] %v6935_v24  ;;  %6938 = vst [vmem:[%s11893_s22 + $0xa8] sm:$0xff] %v6937_v14  ;;  %v6959_v57 = vld [vmem:[%s8756_s30 + $0x100] sm:$0xff]  ;;  %v6961_v27 = vld [vmem:[%s8756_s30 + $0x108] sm:$0xff] }
 0x735   : > { %6940 = vst [vmem:[%s11893_s22 + $0xb0] sm:$0xff] %v6939_v62  ;;  %6942 = vst [vmem:[%s11893_s22 + $0xb8] sm:$0xff] %v6941_v48  ;;  %v6963_v6 = vld [vmem:[%s8756_s30 + $0x110] sm:$0xff]  ;;  %v6965_v47 = vld [vmem:[%s8756_s30 + $0x118] sm:$0xff] }
 0x736   : > { %6944 = vst [vmem:[%s11893_s22 + $0x180] sm:$0xff] %v6943_v42  ;;  %6946 = vst [vmem:[%s11893_s22 + $0x188] sm:$0xff] %v6945_v3  ;;  %v6967_v20 = vld [vmem:[%s8756_s30 + $0x120] sm:$0xff]  ;;  %v6969_v61 = vld [vmem:[%s8756_s30 + $0x128] sm:$0xff] }
 0x737   : > { %6948 = vst [vmem:[%s11893_s22 + $0x190] sm:$0xff] %v6947_v19  ;;  %6950 = vst [vmem:[%s11893_s22 + $0x198] sm:$0xff] %v6949_v17  ;;  %v6971_v18 = vld [vmem:[%s8756_s30 + $0x130] sm:$0xff]  ;;  %v6973_v37 = vld [vmem:[%s8756_s30 + $0x138] sm:$0xff] }
 0x738   : > { %6952 = vst [vmem:[%s11893_s22 + $0x1a0] sm:$0xff] %v6951_v45  ;;  %6954 = vst [vmem:[%s11893_s22 + $0x1a8] sm:$0xff] %v6953_v0  ;;  %v6975_v9 = vld [vmem:[%s8756_s30 + $0x140] sm:$0xff]  ;;  %v6977_v60 = vld [vmem:[%s8756_s30 + $0x148] sm:$0xff] }
 0x739   : > { %6956 = vst [vmem:[%s11893_s22 + $0x1b0] sm:$0xff] %v6955_v30  ;;  %6958 = vst [vmem:[%s11893_s22 + $0x1b8] sm:$0xff] %v6957_v5  ;;  %v6979_v8 = vld [vmem:[%s8756_s30 + $0x150] sm:$0xff]  ;;  %v6981_v22 = vld [vmem:[%s8756_s30 + $0x158] sm:$0xff] }
 0x73a   : > { %6960 = vst [vmem:[%s11893_s22 + $0x1c0] sm:$0xff] %v6959_v57  ;;  %6962 = vst [vmem:[%s11893_s22 + $0x1c8] sm:$0xff] %v6961_v27  ;;  %v6983_v34 = vld [vmem:[%s8756_s30 + $0x160] sm:$0xff]  ;;  %v6985_v44 = vld [vmem:[%s8756_s30 + $0x168] sm:$0xff] }
 0x73b   : > { %6964 = vst [vmem:[%s11893_s22 + $0x1d0] sm:$0xff] %v6963_v6  ;;  %6966 = vst [vmem:[%s11893_s22 + $0x1d8] sm:$0xff] %v6965_v47  ;;  %v6987_v39 = vld [vmem:[%s8756_s30 + $0x170] sm:$0xff]  ;;  %v6989_v51 = vld [vmem:[%s8756_s30 + $0x178] sm:$0xff] }
 0x73c   : > { %6968 = vst [vmem:[%s11893_s22 + $0x1e0] sm:$0xff] %v6967_v20  ;;  %6970 = vst [vmem:[%s11893_s22 + $0x1e8] sm:$0xff] %v6969_v61  ;;  %v6991_v15 = vld [vmem:[%s8756_s30 + $0x180] sm:$0xff]  ;;  %v6993_v31 = vld [vmem:[%s8756_s30 + $0x188] sm:$0xff] }
 0x73d   : > { %6972 = vst [vmem:[%s11893_s22 + $0x1f0] sm:$0xff] %v6971_v18  ;;  %6974 = vst [vmem:[%s11893_s22 + $0x1f8] sm:$0xff] %v6973_v37  ;;  %v6995_v28 = vld [vmem:[%s8756_s30 + $0x190] sm:$0xff]  ;;  %v6997_v32 = vld [vmem:[%s8756_s30 + $0x198] sm:$0xff] }
 0x73e   : > { %6976 = vst [vmem:[%s11893_s22 + $0x200] sm:$0xff] %v6975_v9  ;;  %6978 = vst [vmem:[%s11893_s22 + $0x208] sm:$0xff] %v6977_v60  ;;  %v6999_v1 = vld [vmem:[%s8756_s30 + $0x1a0] sm:$0xff]  ;;  %v7001_v40 = vld [vmem:[%s8756_s30 + $0x1a8] sm:$0xff] }
 0x73f   : > { %6980 = vst [vmem:[%s11893_s22 + $0x210] sm:$0xff] %v6979_v8  ;;  %6982 = vst [vmem:[%s11893_s22 + $0x218] sm:$0xff] %v6981_v22  ;;  %v7003_v33 = vld [vmem:[%s8756_s30 + $0x1b0] sm:$0xff]  ;;  %v7005_v58 = vld [vmem:[%s8756_s30 + $0x1b8] sm:$0xff] }
 0x740   : > { %6984 = vst [vmem:[%s11893_s22 + $0x220] sm:$0xff] %v6983_v34  ;;  %6986 = vst [vmem:[%s11893_s22 + $0x228] sm:$0xff] %v6985_v44  ;;  %v7007_v41 = vld [vmem:[%s8756_s30 + $0x1c0] sm:$0xff]  ;;  %v7009_v38 = vld [vmem:[%s8756_s30 + $0x1c8] sm:$0xff] }
 0x741   : > { %6988 = vst [vmem:[%s11893_s22 + $0x230] sm:$0xff] %v6987_v39  ;;  %6990 = vst [vmem:[%s11893_s22 + $0x238] sm:$0xff] %v6989_v51  ;;  %v7011_v2 = vld [vmem:[%s8756_s30 + $0x1d0] sm:$0xff]  ;;  %v7013_v54 = vld [vmem:[%s8756_s30 + $0x1d8] sm:$0xff] }
 0x742   : > { %6992 = vst [vmem:[%s11893_s22 + $0x300] sm:$0xff] %v6991_v15  ;;  %6994 = vst [vmem:[%s11893_s22 + $0x308] sm:$0xff] %v6993_v31  ;;  %v7015_v56 = vld [vmem:[%s8756_s30 + $0x1e0] sm:$0xff]  ;;  %v7017_v59 = vld [vmem:[%s8756_s30 + $0x1e8] sm:$0xff] }
 0x743   : > { %6996 = vst [vmem:[%s11893_s22 + $0x310] sm:$0xff] %v6995_v28  ;;  %6998 = vst [vmem:[%s11893_s22 + $0x318] sm:$0xff] %v6997_v32  ;;  %v7019_v46 = vld [vmem:[%s8756_s30 + $0x1f0] sm:$0xff]  ;;  %v7021_v36 = vld [vmem:[%s8756_s30 + $0x1f8] sm:$0xff] }
 0x744   : > { %7000 = vst [vmem:[%s11893_s22 + $0x320] sm:$0xff] %v6999_v1  ;;  %7002 = vst [vmem:[%s11893_s22 + $0x328] sm:$0xff] %v7001_v40  ;;  %v7023_v29 = vld [vmem:[%s8756_s30 + $0x200] sm:$0xff]  ;;  %v7025_v7 = vld [vmem:[%s8756_s30 + $0x208] sm:$0xff] }
 0x745   : > { %7004 = vst [vmem:[%s11893_s22 + $0x330] sm:$0xff] %v7003_v33  ;;  %7006 = vst [vmem:[%s11893_s22 + $0x338] sm:$0xff] %v7005_v58  ;;  %v7027_v25 = vld [vmem:[%s8756_s30 + $0x210] sm:$0xff]  ;;  %v7029_v23 = vld [vmem:[%s8756_s30 + $0x218] sm:$0xff] }
 0x746   : > { %7008 = vst [vmem:[%s11893_s22 + $0x340] sm:$0xff] %v7007_v41  ;;  %7010 = vst [vmem:[%s11893_s22 + $0x348] sm:$0xff] %v7009_v38  ;;  %v7031_v50 = vld [vmem:[%s8756_s30 + $0x220] sm:$0xff]  ;;  %v7033_v4 = vld [vmem:[%s8756_s30 + $0x228] sm:$0xff] }
 0x747   : > { %7012 = vst [vmem:[%s11893_s22 + $0x350] sm:$0xff] %v7011_v2  ;;  %7014 = vst [vmem:[%s11893_s22 + $0x358] sm:$0xff] %v7013_v54  ;;  %v7035_v43 = vld [vmem:[%s8756_s30 + $0x230] sm:$0xff]  ;;  %v7037_v55 = vld [vmem:[%s8756_s30 + $0x238] sm:$0xff] }
 0x748   : > { %7016 = vst [vmem:[%s11893_s22 + $0x360] sm:$0xff] %v7015_v56  ;;  %7018 = vst [vmem:[%s11893_s22 + $0x368] sm:$0xff] %v7017_v59  ;;  %v7039_v53 = vld [vmem:[%s8756_s30 + $0x240] sm:$0xff]  ;;  %v7041_v16 = vld [vmem:[%s8756_s30 + $0x248] sm:$0xff] }
 0x749   : > { %7020 = vst [vmem:[%s11893_s22 + $0x370] sm:$0xff] %v7019_v46  ;;  %7022 = vst [vmem:[%s11893_s22 + $0x378] sm:$0xff] %v7021_v36  ;;  %v7043_v52 = vld [vmem:[%s8756_s30 + $0x250] sm:$0xff]  ;;  %v7045_v26 = vld [vmem:[%s8756_s30 + $0x258] sm:$0xff] }
 0x74a   : > { %7024 = vst [vmem:[%s11893_s22 + $0x380] sm:$0xff] %v7023_v29  ;;  %7026 = vst [vmem:[%s11893_s22 + $0x388] sm:$0xff] %v7025_v7  ;;  %v7047_v35 = vld [vmem:[%s8756_s30 + $0x260] sm:$0xff]  ;;  %v7049_v12 = vld [vmem:[%s8756_s30 + $0x268] sm:$0xff] }
 0x74b   : > { %7028 = vst [vmem:[%s11893_s22 + $0x390] sm:$0xff] %v7027_v25  ;;  %7030 = vst [vmem:[%s11893_s22 + $0x398] sm:$0xff] %v7029_v23  ;;  %v7051_v49 = vld [vmem:[%s8756_s30 + $0x270] sm:$0xff]  ;;  %v7053_v10 = vld [vmem:[%s8756_s30 + $0x278] sm:$0xff] }
 0x74c   : > { %7032 = vst [vmem:[%s11893_s22 + $0x3a0] sm:$0xff] %v7031_v50  ;;  %7034 = vst [vmem:[%s11893_s22 + $0x3a8] sm:$0xff] %v7033_v4  ;;  %v7055_v11 = vld [vmem:[%s8756_s30 + $0x280] sm:$0xff]  ;;  %v7057_v63 = vld [vmem:[%s8756_s30 + $0x288] sm:$0xff] }
 0x74d   : > { %7036 = vst [vmem:[%s11893_s22 + $0x3b0] sm:$0xff] %v7035_v43  ;;  %7038 = vst [vmem:[%s11893_s22 + $0x3b8] sm:$0xff] %v7037_v55  ;;  %v7059_v13 = vld [vmem:[%s8756_s30 + $0x290] sm:$0xff]  ;;  %v7061_v21 = vld [vmem:[%s8756_s30 + $0x298] sm:$0xff] }
 0x74e   : > { %7040 = vst [vmem:[%s11893_s22 + $0x480] sm:$0xff] %v7039_v53  ;;  %7042 = vst [vmem:[%s11893_s22 + $0x488] sm:$0xff] %v7041_v16  ;;  %v7063_v24 = vld [vmem:[%s8756_s30 + $0x2a0] sm:$0xff]  ;;  %v7065_v14 = vld [vmem:[%s8756_s30 + $0x2a8] sm:$0xff] }
 0x74f   : > { %7044 = vst [vmem:[%s11893_s22 + $0x490] sm:$0xff] %v7043_v52  ;;  %7046 = vst [vmem:[%s11893_s22 + $0x498] sm:$0xff] %v7045_v26  ;;  %v7067_v62 = vld [vmem:[%s8756_s30 + $0x2b0] sm:$0xff]  ;;  %v7069_v48 = vld [vmem:[%s8756_s30 + $0x2b8] sm:$0xff] }
 0x750   : > { %7048 = vst [vmem:[%s11893_s22 + $0x4a0] sm:$0xff] %v7047_v35  ;;  %7050 = vst [vmem:[%s11893_s22 + $0x4a8] sm:$0xff] %v7049_v12  ;;  %v7071_v42 = vld [vmem:[%s8756_s30 + $0x2c0] sm:$0xff]  ;;  %v7073_v3 = vld [vmem:[%s8756_s30 + $0x2c8] sm:$0xff] }
 0x751   : > { %7052 = vst [vmem:[%s11893_s22 + $0x4b0] sm:$0xff] %v7051_v49  ;;  %7054 = vst [vmem:[%s11893_s22 + $0x4b8] sm:$0xff] %v7053_v10  ;;  %v7075_v19 = vld [vmem:[%s8756_s30 + $0x2d0] sm:$0xff]  ;;  %v7077_v17 = vld [vmem:[%s8756_s30 + $0x2d8] sm:$0xff] }
 0x752   : > { %7056 = vst [vmem:[%s11893_s22 + $0x4c0] sm:$0xff] %v7055_v11  ;;  %7058 = vst [vmem:[%s11893_s22 + $0x4c8] sm:$0xff] %v7057_v63  ;;  %v7079_v45 = vld [vmem:[%s8756_s30 + $0x2e0] sm:$0xff]  ;;  %v7081_v0 = vld [vmem:[%s8756_s30 + $0x2e8] sm:$0xff] }
 0x753   : > { %7060 = vst [vmem:[%s11893_s22 + $0x4d0] sm:$0xff] %v7059_v13  ;;  %7062 = vst [vmem:[%s11893_s22 + $0x4d8] sm:$0xff] %v7061_v21  ;;  %v7083_v30 = vld [vmem:[%s8756_s30 + $0x2f0] sm:$0xff]  ;;  %v7085_v5 = vld [vmem:[%s8756_s30 + $0x2f8] sm:$0xff] }
 0x754   : > { %7064 = vst [vmem:[%s11893_s22 + $0x4e0] sm:$0xff] %v7063_v24  ;;  %7066 = vst [vmem:[%s11893_s22 + $0x4e8] sm:$0xff] %v7065_v14  ;;  %v7087_v57 = vld [vmem:[%s8756_s30 + $0x300] sm:$0xff]  ;;  %v7089_v27 = vld [vmem:[%s8756_s30 + $0x308] sm:$0xff] }
 0x755   : > { %7068 = vst [vmem:[%s11893_s22 + $0x4f0] sm:$0xff] %v7067_v62  ;;  %7070 = vst [vmem:[%s11893_s22 + $0x4f8] sm:$0xff] %v7069_v48  ;;  %v7091_v6 = vld [vmem:[%s8756_s30 + $0x310] sm:$0xff]  ;;  %v7093_v47 = vld [vmem:[%s8756_s30 + $0x318] sm:$0xff] }
 0x756   : > { %7072 = vst [vmem:[%s11893_s22 + $0x500] sm:$0xff] %v7071_v42  ;;  %7074 = vst [vmem:[%s11893_s22 + $0x508] sm:$0xff] %v7073_v3  ;;  %v7095_v20 = vld [vmem:[%s8756_s30 + $0x320] sm:$0xff]  ;;  %v7097_v61 = vld [vmem:[%s8756_s30 + $0x328] sm:$0xff] }
 0x757   : > { %7076 = vst [vmem:[%s11893_s22 + $0x510] sm:$0xff] %v7075_v19  ;;  %7078 = vst [vmem:[%s11893_s22 + $0x518] sm:$0xff] %v7077_v17  ;;  %v7099_v18 = vld [vmem:[%s8756_s30 + $0x330] sm:$0xff]  ;;  %v7101_v37 = vld [vmem:[%s8756_s30 + $0x338] sm:$0xff] }
 0x758   : > { %7080 = vst [vmem:[%s11893_s22 + $0x520] sm:$0xff] %v7079_v45  ;;  %7082 = vst [vmem:[%s11893_s22 + $0x528] sm:$0xff] %v7081_v0  ;;  %v7103_v9 = vld [vmem:[%s8756_s30 + $0x340] sm:$0xff]  ;;  %v7105_v60 = vld [vmem:[%s8756_s30 + $0x348] sm:$0xff] }
 0x759   : > { %7084 = vst [vmem:[%s11893_s22 + $0x530] sm:$0xff] %v7083_v30  ;;  %7086 = vst [vmem:[%s11893_s22 + $0x538] sm:$0xff] %v7085_v5  ;;  %v7107_v8 = vld [vmem:[%s8756_s30 + $0x350] sm:$0xff]  ;;  %v7109_v22 = vld [vmem:[%s8756_s30 + $0x358] sm:$0xff] }
 0x75a   : > { %7088 = vst [vmem:[%s11893_s22 + $0x600] sm:$0xff] %v7087_v57  ;;  %7090 = vst [vmem:[%s11893_s22 + $0x608] sm:$0xff] %v7089_v27  ;;  %v7111_v34 = vld [vmem:[%s8756_s30 + $0x360] sm:$0xff]  ;;  %v7113_v44 = vld [vmem:[%s8756_s30 + $0x368] sm:$0xff] }
 0x75b   : > { %7092 = vst [vmem:[%s11893_s22 + $0x610] sm:$0xff] %v7091_v6  ;;  %7094 = vst [vmem:[%s11893_s22 + $0x618] sm:$0xff] %v7093_v47  ;;  %v7115_v39 = vld [vmem:[%s8756_s30 + $0x370] sm:$0xff]  ;;  %v7117_v51 = vld [vmem:[%s8756_s30 + $0x378] sm:$0xff] }
 0x75c   : > { %7096 = vst [vmem:[%s11893_s22 + $0x620] sm:$0xff] %v7095_v20  ;;  %7098 = vst [vmem:[%s11893_s22 + $0x628] sm:$0xff] %v7097_v61  ;;  %v7119_v15 = vld [vmem:[%s8756_s30 + $0x380] sm:$0xff]  ;;  %v7121_v31 = vld [vmem:[%s8756_s30 + $0x388] sm:$0xff] }
 0x75d   : > { %7100 = vst [vmem:[%s11893_s22 + $0x630] sm:$0xff] %v7099_v18  ;;  %7102 = vst [vmem:[%s11893_s22 + $0x638] sm:$0xff] %v7101_v37  ;;  %v7123_v28 = vld [vmem:[%s8756_s30 + $0x390] sm:$0xff]  ;;  %v7125_v32 = vld [vmem:[%s8756_s30 + $0x398] sm:$0xff] }
 0x75e   : > { %7104 = vst [vmem:[%s11893_s22 + $0x640] sm:$0xff] %v7103_v9  ;;  %7106 = vst [vmem:[%s11893_s22 + $0x648] sm:$0xff] %v7105_v60  ;;  %v7127_v1 = vld [vmem:[%s8756_s30 + $0x3a0] sm:$0xff]  ;;  %v7129_v40 = vld [vmem:[%s8756_s30 + $0x3a8] sm:$0xff] }
 0x75f   : > { %7108 = vst [vmem:[%s11893_s22 + $0x650] sm:$0xff] %v7107_v8  ;;  %7110 = vst [vmem:[%s11893_s22 + $0x658] sm:$0xff] %v7109_v22  ;;  %v7131_v33 = vld [vmem:[%s8756_s30 + $0x3b0] sm:$0xff]  ;;  %v7133_v58 = vld [vmem:[%s8756_s30 + $0x3b8] sm:$0xff] }
 0x760   : > { %7112 = vst [vmem:[%s11893_s22 + $0x660] sm:$0xff] %v7111_v34  ;;  %7114 = vst [vmem:[%s11893_s22 + $0x668] sm:$0xff] %v7113_v44  ;;  %v7135_v41 = vld [vmem:[%s8756_s30 + $0x3c0] sm:$0xff]  ;;  %v7137_v38 = vld [vmem:[%s8756_s30 + $0x3c8] sm:$0xff] }
 0x761   : > { %7116 = vst [vmem:[%s11893_s22 + $0x670] sm:$0xff] %v7115_v39  ;;  %7118 = vst [vmem:[%s11893_s22 + $0x678] sm:$0xff] %v7117_v51  ;;  %v7139_v2 = vld [vmem:[%s8756_s30 + $0x3d0] sm:$0xff]  ;;  %v7141_v54 = vld [vmem:[%s8756_s30 + $0x3d8] sm:$0xff] }
 0x762   : > { %7120 = vst [vmem:[%s11893_s22 + $0x680] sm:$0xff] %v7119_v15  ;;  %7122 = vst [vmem:[%s11893_s22 + $0x688] sm:$0xff] %v7121_v31  ;;  %v7143_v56 = vld [vmem:[%s8756_s30 + $0x3e0] sm:$0xff]  ;;  %v7145_v59 = vld [vmem:[%s8756_s30 + $0x3e8] sm:$0xff] }
 0x763   : > { %7124 = vst [vmem:[%s11893_s22 + $0x690] sm:$0xff] %v7123_v28  ;;  %7126 = vst [vmem:[%s11893_s22 + $0x698] sm:$0xff] %v7125_v32  ;;  %v7147_v46 = vld [vmem:[%s8756_s30 + $0x3f0] sm:$0xff]  ;;  %v7149_v36 = vld [vmem:[%s8756_s30 + $0x3f8] sm:$0xff] }
 0x764   : > { %7128 = vst [vmem:[%s11893_s22 + $0x6a0] sm:$0xff] %v7127_v1  ;;  %7130 = vst [vmem:[%s11893_s22 + $0x6a8] sm:$0xff] %v7129_v40  ;;  %v7151_v29 = vld [vmem:[%s8756_s30 + $0x400] sm:$0xff]  ;;  %v7153_v7 = vld [vmem:[%s8756_s30 + $0x408] sm:$0xff] }
 0x765   : > { %7132 = vst [vmem:[%s11893_s22 + $0x6b0] sm:$0xff] %v7131_v33  ;;  %7134 = vst [vmem:[%s11893_s22 + $0x6b8] sm:$0xff] %v7133_v58  ;;  %v7155_v25 = vld [vmem:[%s8756_s30 + $0x410] sm:$0xff]  ;;  %v7157_v23 = vld [vmem:[%s8756_s30 + $0x418] sm:$0xff] }
 0x766   : > { %7136 = vst [vmem:[%s11893_s22 + $0x780] sm:$0xff] %v7135_v41  ;;  %7138 = vst [vmem:[%s11893_s22 + $0x788] sm:$0xff] %v7137_v38  ;;  %v7159_v50 = vld [vmem:[%s8756_s30 + $0x420] sm:$0xff]  ;;  %v7161_v4 = vld [vmem:[%s8756_s30 + $0x428] sm:$0xff] }
 0x767   : > { %7140 = vst [vmem:[%s11893_s22 + $0x790] sm:$0xff] %v7139_v2  ;;  %7142 = vst [vmem:[%s11893_s22 + $0x798] sm:$0xff] %v7141_v54  ;;  %v7163_v43 = vld [vmem:[%s8756_s30 + $0x430] sm:$0xff]  ;;  %v7165_v55 = vld [vmem:[%s8756_s30 + $0x438] sm:$0xff] }
 0x768   : > { %7144 = vst [vmem:[%s11893_s22 + $0x7a0] sm:$0xff] %v7143_v56  ;;  %7146 = vst [vmem:[%s11893_s22 + $0x7a8] sm:$0xff] %v7145_v59  ;;  %v7167_v53 = vld [vmem:[%s8756_s30 + $0x440] sm:$0xff]  ;;  %v7169_v16 = vld [vmem:[%s8756_s30 + $0x448] sm:$0xff] }
 0x769   : > { %7148 = vst [vmem:[%s11893_s22 + $0x7b0] sm:$0xff] %v7147_v46  ;;  %7150 = vst [vmem:[%s11893_s22 + $0x7b8] sm:$0xff] %v7149_v36  ;;  %v7171_v52 = vld [vmem:[%s8756_s30 + $0x450] sm:$0xff]  ;;  %v7173_v26 = vld [vmem:[%s8756_s30 + $0x458] sm:$0xff] }
 0x76a   : > { %7152 = vst [vmem:[%s11893_s22 + $0x7c0] sm:$0xff] %v7151_v29  ;;  %7154 = vst [vmem:[%s11893_s22 + $0x7c8] sm:$0xff] %v7153_v7  ;;  %v7175_v35 = vld [vmem:[%s8756_s30 + $0x460] sm:$0xff]  ;;  %v7177_v12 = vld [vmem:[%s8756_s30 + $0x468] sm:$0xff] }
 0x76b   : > { %7156 = vst [vmem:[%s11893_s22 + $0x7d0] sm:$0xff] %v7155_v25  ;;  %7158 = vst [vmem:[%s11893_s22 + $0x7d8] sm:$0xff] %v7157_v23  ;;  %v7179_v49 = vld [vmem:[%s8756_s30 + $0x470] sm:$0xff]  ;;  %v7181_v10 = vld [vmem:[%s8756_s30 + $0x478] sm:$0xff] }
 0x76c   : > { %7160 = vst [vmem:[%s11893_s22 + $0x7e0] sm:$0xff] %v7159_v50  ;;  %7162 = vst [vmem:[%s11893_s22 + $0x7e8] sm:$0xff] %v7161_v4  ;;  %v7183_v11 = vld [vmem:[%s8756_s30 + $0x480] sm:$0xff]  ;;  %v7185_v63 = vld [vmem:[%s8756_s30 + $0x488] sm:$0xff] }
 0x76d   : > { %7164 = vst [vmem:[%s11893_s22 + $0x7f0] sm:$0xff] %v7163_v43  ;;  %7166 = vst [vmem:[%s11893_s22 + $0x7f8] sm:$0xff] %v7165_v55  ;;  %v7187_v13 = vld [vmem:[%s8756_s30 + $0x490] sm:$0xff]  ;;  %v7189_v21 = vld [vmem:[%s8756_s30 + $0x498] sm:$0xff] }
 0x76e   : > { %7168 = vst [vmem:[%s11893_s22 + $0x800] sm:$0xff] %v7167_v53  ;;  %7170 = vst [vmem:[%s11893_s22 + $0x808] sm:$0xff] %v7169_v16  ;;  %v7191_v24 = vld [vmem:[%s8756_s30 + $0x4a0] sm:$0xff]  ;;  %v7193_v14 = vld [vmem:[%s8756_s30 + $0x4a8] sm:$0xff] }
 0x76f   : > { %7172 = vst [vmem:[%s11893_s22 + $0x810] sm:$0xff] %v7171_v52  ;;  %7174 = vst [vmem:[%s11893_s22 + $0x818] sm:$0xff] %v7173_v26  ;;  %v7195_v62 = vld [vmem:[%s8756_s30 + $0x4b0] sm:$0xff]  ;;  %v7197_v48 = vld [vmem:[%s8756_s30 + $0x4b8] sm:$0xff] }
 0x770   : > { %7176 = vst [vmem:[%s11893_s22 + $0x820] sm:$0xff] %v7175_v35  ;;  %7178 = vst [vmem:[%s11893_s22 + $0x828] sm:$0xff] %v7177_v12  ;;  %v7199_v42 = vld [vmem:[%s8756_s30 + $0x4c0] sm:$0xff]  ;;  %v7201_v3 = vld [vmem:[%s8756_s30 + $0x4c8] sm:$0xff] }
 0x771   : > { %7180 = vst [vmem:[%s11893_s22 + $0x830] sm:$0xff] %v7179_v49  ;;  %7182 = vst [vmem:[%s11893_s22 + $0x838] sm:$0xff] %v7181_v10  ;;  %v7203_v19 = vld [vmem:[%s8756_s30 + $0x4d0] sm:$0xff]  ;;  %v7205_v17 = vld [vmem:[%s8756_s30 + $0x4d8] sm:$0xff] }
 0x772   : > { %7184 = vst [vmem:[%s11893_s22 + $0x900] sm:$0xff] %v7183_v11  ;;  %7186 = vst [vmem:[%s11893_s22 + $0x908] sm:$0xff] %v7185_v63  ;;  %v7207_v45 = vld [vmem:[%s8756_s30 + $0x4e0] sm:$0xff]  ;;  %v7209_v0 = vld [vmem:[%s8756_s30 + $0x4e8] sm:$0xff] }
 0x773   : > { %7188 = vst [vmem:[%s11893_s22 + $0x910] sm:$0xff] %v7187_v13  ;;  %7190 = vst [vmem:[%s11893_s22 + $0x918] sm:$0xff] %v7189_v21  ;;  %v7211_v30 = vld [vmem:[%s8756_s30 + $0x4f0] sm:$0xff]  ;;  %v7213_v5 = vld [vmem:[%s8756_s30 + $0x4f8] sm:$0xff] }
 0x774   : > { %7192 = vst [vmem:[%s11893_s22 + $0x920] sm:$0xff] %v7191_v24  ;;  %7194 = vst [vmem:[%s11893_s22 + $0x928] sm:$0xff] %v7193_v14  ;;  %v7215_v57 = vld [vmem:[%s8756_s30 + $0x500] sm:$0xff]  ;;  %v7217_v27 = vld [vmem:[%s8756_s30 + $0x508] sm:$0xff] }
 0x775   : > { %7196 = vst [vmem:[%s11893_s22 + $0x930] sm:$0xff] %v7195_v62  ;;  %7198 = vst [vmem:[%s11893_s22 + $0x938] sm:$0xff] %v7197_v48  ;;  %v7219_v6 = vld [vmem:[%s8756_s30 + $0x510] sm:$0xff]  ;;  %v7221_v47 = vld [vmem:[%s8756_s30 + $0x518] sm:$0xff] }
 0x776   : > { %7200 = vst [vmem:[%s11893_s22 + $0x940] sm:$0xff] %v7199_v42  ;;  %7202 = vst [vmem:[%s11893_s22 + $0x948] sm:$0xff] %v7201_v3  ;;  %v7223_v20 = vld [vmem:[%s8756_s30 + $0x520] sm:$0xff]  ;;  %v7225_v61 = vld [vmem:[%s8756_s30 + $0x528] sm:$0xff] }
 0x777   : > { %7204 = vst [vmem:[%s11893_s22 + $0x950] sm:$0xff] %v7203_v19  ;;  %7206 = vst [vmem:[%s11893_s22 + $0x958] sm:$0xff] %v7205_v17  ;;  %v7227_v18 = vld [vmem:[%s8756_s30 + $0x530] sm:$0xff]  ;;  %v7229_v37 = vld [vmem:[%s8756_s30 + $0x538] sm:$0xff] }
 0x778   : > { %7208 = vst [vmem:[%s11893_s22 + $0x960] sm:$0xff] %v7207_v45  ;;  %7210 = vst [vmem:[%s11893_s22 + $0x968] sm:$0xff] %v7209_v0  ;;  %v7231_v9 = vld [vmem:[%s8756_s30 + $0x540] sm:$0xff]  ;;  %v7233_v60 = vld [vmem:[%s8756_s30 + $0x548] sm:$0xff] }
 0x779   : > { %7212 = vst [vmem:[%s11893_s22 + $0x970] sm:$0xff] %v7211_v30  ;;  %7214 = vst [vmem:[%s11893_s22 + $0x978] sm:$0xff] %v7213_v5  ;;  %v7235_v8 = vld [vmem:[%s8756_s30 + $0x550] sm:$0xff]  ;;  %v7237_v22 = vld [vmem:[%s8756_s30 + $0x558] sm:$0xff] }
 0x77a   : > { %7216 = vst [vmem:[%s11893_s22 + $0x980] sm:$0xff] %v7215_v57  ;;  %7218 = vst [vmem:[%s11893_s22 + $0x988] sm:$0xff] %v7217_v27  ;;  %v7239_v34 = vld [vmem:[%s8756_s30 + $0x560] sm:$0xff]  ;;  %v7241_v44 = vld [vmem:[%s8756_s30 + $0x568] sm:$0xff] }
 0x77b   : > { %7220 = vst [vmem:[%s11893_s22 + $0x990] sm:$0xff] %v7219_v6  ;;  %7222 = vst [vmem:[%s11893_s22 + $0x998] sm:$0xff] %v7221_v47  ;;  %v7243_v39 = vld [vmem:[%s8756_s30 + $0x570] sm:$0xff]  ;;  %v7245_v51 = vld [vmem:[%s8756_s30 + $0x578] sm:$0xff] }
 0x77c   : > { %7224 = vst [vmem:[%s11893_s22 + $0x9a0] sm:$0xff] %v7223_v20  ;;  %7226 = vst [vmem:[%s11893_s22 + $0x9a8] sm:$0xff] %v7225_v61  ;;  %v7247_v15 = vld [vmem:[%s8756_s30 + $0x580] sm:$0xff]  ;;  %v7249_v31 = vld [vmem:[%s8756_s30 + $0x588] sm:$0xff] }
 0x77d   : > { %7228 = vst [vmem:[%s11893_s22 + $0x9b0] sm:$0xff] %v7227_v18  ;;  %7230 = vst [vmem:[%s11893_s22 + $0x9b8] sm:$0xff] %v7229_v37  ;;  %v7251_v28 = vld [vmem:[%s8756_s30 + $0x590] sm:$0xff]  ;;  %v7253_v32 = vld [vmem:[%s8756_s30 + $0x598] sm:$0xff] }
 0x77e   : > { %7232 = vst [vmem:[%s11893_s22 + $0xa80] sm:$0xff] %v7231_v9  ;;  %7234 = vst [vmem:[%s11893_s22 + $0xa88] sm:$0xff] %v7233_v60  ;;  %v7255_v1 = vld [vmem:[%s8756_s30 + $0x5a0] sm:$0xff]  ;;  %v7257_v40 = vld [vmem:[%s8756_s30 + $0x5a8] sm:$0xff] }
 0x77f   : > { %7236 = vst [vmem:[%s11893_s22 + $0xa90] sm:$0xff] %v7235_v8  ;;  %7238 = vst [vmem:[%s11893_s22 + $0xa98] sm:$0xff] %v7237_v22  ;;  %v7259_v33 = vld [vmem:[%s8756_s30 + $0x5b0] sm:$0xff]  ;;  %v7261_v58 = vld [vmem:[%s8756_s30 + $0x5b8] sm:$0xff] }
 0x780   : > { %7240 = vst [vmem:[%s11893_s22 + $0xaa0] sm:$0xff] %v7239_v34  ;;  %7242 = vst [vmem:[%s11893_s22 + $0xaa8] sm:$0xff] %v7241_v44  ;;  %v7263_v41 = vld [vmem:[%s8756_s30 + $0x5c0] sm:$0xff]  ;;  %v7265_v38 = vld [vmem:[%s8756_s30 + $0x5c8] sm:$0xff] }
 0x781   : > { %7244 = vst [vmem:[%s11893_s22 + $0xab0] sm:$0xff] %v7243_v39  ;;  %7246 = vst [vmem:[%s11893_s22 + $0xab8] sm:$0xff] %v7245_v51  ;;  %v7267_v2 = vld [vmem:[%s8756_s30 + $0x5d0] sm:$0xff]  ;;  %v7269_v54 = vld [vmem:[%s8756_s30 + $0x5d8] sm:$0xff] }
 0x782   : > { %7248 = vst [vmem:[%s11893_s22 + $0xac0] sm:$0xff] %v7247_v15  ;;  %7250 = vst [vmem:[%s11893_s22 + $0xac8] sm:$0xff] %v7249_v31  ;;  %v7271_v56 = vld [vmem:[%s8756_s30 + $0x5e0] sm:$0xff]  ;;  %v7273_v59 = vld [vmem:[%s8756_s30 + $0x5e8] sm:$0xff] }
 0x783   : > { %7252 = vst [vmem:[%s11893_s22 + $0xad0] sm:$0xff] %v7251_v28  ;;  %7254 = vst [vmem:[%s11893_s22 + $0xad8] sm:$0xff] %v7253_v32  ;;  %v7275_v46 = vld [vmem:[%s8756_s30 + $0x5f0] sm:$0xff]  ;;  %v7277_v36 = vld [vmem:[%s8756_s30 + $0x5f8] sm:$0xff] }
 0x784   : > { %7256 = vst [vmem:[%s11893_s22 + $0xae0] sm:$0xff] %v7255_v1  ;;  %7258 = vst [vmem:[%s11893_s22 + $0xae8] sm:$0xff] %v7257_v40 }
 0x785   : > { %7260 = vst [vmem:[%s11893_s22 + $0xaf0] sm:$0xff] %v7259_v33  ;;  %7262 = vst [vmem:[%s11893_s22 + $0xaf8] sm:$0xff] %v7261_v58 }
 0x786   : > { %7264 = vst [vmem:[%s11893_s22 + $0xb00] sm:$0xff] %v7263_v41  ;;  %7266 = vst [vmem:[%s11893_s22 + $0xb08] sm:$0xff] %v7265_v38 }
 0x787   : > { %7268 = vst [vmem:[%s11893_s22 + $0xb10] sm:$0xff] %v7267_v2  ;;  %7270 = vst [vmem:[%s11893_s22 + $0xb18] sm:$0xff] %v7269_v54 }
 0x788   : > { %7272 = vst [vmem:[%s11893_s22 + $0xb20] sm:$0xff] %v7271_v56  ;;  %7274 = vst [vmem:[%s11893_s22 + $0xb28] sm:$0xff] %v7273_v59 }
 0x789   : > { %7276 = vst [vmem:[%s11893_s22 + $0xb30] sm:$0xff] %v7275_v46  ;;  %7278 = vst [vmem:[%s11893_s22 + $0xb38] sm:$0xff] %v7277_v36 }
 0x78a PF: > { %p10_p10 = scmp.ge.s32.totalorder %s8709_s16, 4   ;;  %s12331_s12 = smov %s8639_s13 }
 0x78b   : > { %s12332_s13 = smov %s8716_s19  ;;  %s12333_s14 = smov %s8709_s16 }
 0x78c   :  { %12 = sbr.rel (!%p10_p10) target bundleno = 2 (0x2), region = 109 }

</bundles_post_ra>
